<compile_context>
chip_gen: v7x
topology: tpu7x:2x2x1
jax: 0.10.0
libtpu: 0.0.40
codegen_flags: <defaults>
</compile_context>

<pallas_src>
import functools

import jax
import jax.numpy as jnp
from jax.experimental import pallas as pl
from jax.experimental.pallas import tpu as pltpu

IMAGE_CHANNELS = 1        # 28 -> conv(4,2,1) -> 14 -> conv(4,2,1) -> 7 -> conv(7,1,0) -> 1
LRELU_SLOPE = 0.2
BN_EPS = 1e-5


# ------------------------------- small helpers -------------------------------
def _round_up(x, m):
    return (x + m - 1) // m * m


def _choose_tiling(m, max_tm=512):
    """Pick an M tile (multiple of 16 for bf16 sublane packing) and padded M."""
    tm = min(max_tm, _round_up(m, 16))
    return tm, _round_up(m, tm)


def _vmem_limit_bytes():
    """Per-generation scoped-VMEM limit with headroom (v7x: 64 MiB phys)."""
    try:
        cap = getattr(pltpu.get_tpu_info(), "vmem_capacity_bytes", 64 << 20)
    except Exception:
        cap = 64 << 20            # safe fallback for any generation
    return int(min(cap * 3 // 4, 96 << 20))


_VMEM_LIMIT = _vmem_limit_bytes()


# ----------------------------- JAX glue: im2col -----------------------------
def _im2col_nhwc(x, kh, kw, stride, padding):
    """x: (N, H, W, C) -> (patches (N*Ho*Wo, kh*kw*C), Ho, Wo).

    K ordering is (ki, kj, c); channel stays the minor (lane) axis throughout.
    """
    if padding:
        x = jnp.pad(x, ((0, 0), (padding, padding), (padding, padding), (0, 0)))
    N, H, W, C = x.shape
    Ho = (H - kh) // stride + 1
    Wo = (W - kw) // stride + 1
    cols = []
    for i in range(kh):
        for j in range(kw):
            cols.append(x[:, i:i + stride * (Ho - 1) + 1:stride,
                             j:j + stride * (Wo - 1) + 1:stride, :])
    p = jnp.stack(cols, axis=3)                     # (N, Ho, Wo, kh*kw, C)
    return p.reshape(N * Ho * Wo, kh * kw * C), Ho, Wo


# ------------------------------ Pallas kernels -------------------------------
def _matmul_bias_stats_kernel(p_ref, w_ref, b_ref, y_ref, stats_ref, *, true_m, tm):
    """Tiled (tm, K) @ (K, Cout) + bias; accumulate per-channel sum / sumsq."""
    i = pl.program_id(0)

    @pl.when(i == 0)
    def _():
        stats_ref[...] = jnp.zeros_like(stats_ref)

    y = jnp.dot(p_ref[...], w_ref[...], preferred_element_type=jnp.float32)
    y = y + b_ref[...]
    y_ref[...] = y

    # Padded rows (beyond the true row count) must not bias the batch stats.
    row = i * tm + jax.lax.broadcasted_iota(jnp.int32, y.shape, 0)
    ym = jnp.where(row < true_m, y, 0.0)
    s = jnp.sum(ym, axis=0, keepdims=True)
    ss = jnp.sum(ym * ym, axis=0, keepdims=True)
    stats_ref[...] += jnp.concatenate([s, ss], axis=0)


def _bn_lrelu_kernel(y_ref, stats_ref, g_ref, beta_ref, o_ref, *, true_m):
    """Apply train-mode BatchNorm (biased var, eps=1e-5) + LeakyReLU(0.2)."""
    inv_m = 1.0 / true_m
    mean = stats_ref[0:1, :] * inv_m
    var = stats_ref[1:2, :] * inv_m - mean * mean
    scale = g_ref[...] * jax.lax.rsqrt(var + BN_EPS)
    shift = beta_ref[...] - mean * scale
    z = y_ref[...] * scale + shift
    o_ref[...] = jnp.where(z >= 0, z, LRELU_SLOPE * z).astype(o_ref.dtype)


def _matmul_bias_sigmoid_kernel(p_ref, w_ref, b_ref, o_ref):
    y = jnp.dot(p_ref[...], w_ref[...], preferred_element_type=jnp.float32)
    o_ref[...] = jax.nn.sigmoid(y + b_ref[...])


# ------------------------------ kernel wrappers -------------------------------
def conv_bn_lrelu(patches, w_bf16, b, gamma, beta, *, max_tm=512):
    """patches: (M, K) bf16 (K order (ki,kj,c)); w: (K, Cout) bf16;
    b/gamma/beta: (1, Cout) f32.  Returns (M, Cout) bf16."""
    M, K = patches.shape
    Cout = w_bf16.shape[1]
    tm, m_pad = _choose_tiling(M, max_tm)
    if m_pad != M:
        patches = jnp.pad(patches, ((0, m_pad - M), (0, 0)))
    grid = (m_pad // tm,)

    # Pass A: matmul + bias, accumulate batch statistics (reduction over M).
    y, stats = pl.pallas_call(
        functools.partial(_matmul_bias_stats_kernel, true_m=M, tm=tm),
        out_shape=(jax.ShapeDtypeStruct((m_pad, Cout), jnp.float32),
                   jax.ShapeDtypeStruct((2, Cout), jnp.float32)),
        grid=grid,
        in_specs=[pl.BlockSpec((tm, K), lambda i: (i, 0)),
                  pl.BlockSpec((K, Cout), lambda i: (0, 0)),
                  pl.BlockSpec((1, Cout), lambda i: (0, 0))],
        out_specs=(pl.BlockSpec((tm, Cout), lambda i: (i, 0)),
                   pl.BlockSpec((2, Cout), lambda i: (0, 0))),
        compiler_params=pltpu.CompilerParams(
            dimension_semantics=("arbitrary",),
            vmem_limit_bytes=_VMEM_LIMIT),
    )(patches, w_bf16, b)

    # Pass B: normalize + LeakyReLU (fully parallel over M tiles).
    out = pl.pallas_call(
        functools.partial(_bn_lrelu_kernel, true_m=M),
        out_shape=jax.ShapeDtypeStruct((m_pad, Cout), jnp.bfloat16),
        grid=grid,
        in_specs=[pl.BlockSpec((tm, Cout), lambda i: (i, 0)),
                  pl.BlockSpec((2, Cout), lambda i: (0, 0)),
                  pl.BlockSpec((1, Cout), lambda i: (0, 0)),
                  pl.BlockSpec((1, Cout), lambda i: (0, 0))],
        out_specs=pl.BlockSpec((tm, Cout), lambda i: (i, 0)),
        compiler_params=pltpu.CompilerParams(
            dimension_semantics=("parallel",),
            vmem_limit_bytes=_VMEM_LIMIT),
    )(y, stats, gamma, beta)

    return out[:M]


def conv_sigmoid(patches, w_bf16, b, *, max_tm=512):
    """patches: (M, K) bf16; w: (K, 1) bf16 (unpadded); b: (1, 1) f32."""
    M, K = patches.shape
    Cout = w_bf16.shape[1]
    tm, m_pad = _choose_tiling(M, max_tm)
    if m_pad != M:
        patches = jnp.pad(patches, ((0, m_pad - M), (0, 0)))
    grid = (m_pad // tm,)

    out = pl.pallas_call(
        _matmul_bias_sigmoid_kernel,
        out_shape=jax.ShapeDtypeStruct((m_pad, Cout), jnp.float32),
        grid=grid,
        in_specs=[pl.BlockSpec((tm, K), lambda i: (i, 0)),
                  pl.BlockSpec((K, Cout), lambda i: (0, 0)),
                  pl.BlockSpec((1, Cout), lambda i: (0, 0))],
        out_specs=pl.BlockSpec((tm, Cout), lambda i: (i, 0)),
        compiler_params=pltpu.CompilerParams(
            dimension_semantics=("parallel",),
            vmem_limit_bytes=_VMEM_LIMIT),
    )(patches, w_bf16, b)

    return out[:M]


# --------------------------- parameters (synthetic) ---------------------------
def init_params(key):
    ks = jax.random.split(key, 6)

    def conv_w(k, cout, cin, kh, kw):
        fan_in = cin * kh * kw
        return jax.random.normal(k, (cout, cin, kh, kw), jnp.float32) / jnp.sqrt(fan_in)

    w1 = conv_w(ks[0], 128, IMAGE_CHANNELS, 4, 4)
    b1 = 0.05 * jax.random.normal(ks[1], (128,), jnp.float32)
    g1, be1 = jnp.ones((128,), jnp.float32), jnp.zeros((128,), jnp.float32)

    w2 = conv_w(ks[2], 256, 128, 4, 4)
    b2 = 0.05 * jax.random.normal(ks[3], (256,), jnp.float32)
    g2, be2 = jnp.ones((256,), jnp.float32), jnp.zeros((256,), jnp.float32)

    w3 = conv_w(ks[4], 1, 256, 7, 7)
    b3 = 0.05 * jax.random.normal(ks[5], (1,), jnp.float32)

    return (w1, b1, g1, be1), (w2, b2, g2, be2), (w3, b3)


def prepare_params(params):
    """One-time host-side permute of PyTorch (Cout,Cin,kh,kw) weights to
    (kh*kw*Cin, Cout) bf16 matrices matching the (ki,kj,c) im2col K order."""
    (w1, b1, g1, be1), (w2, b2, g2, be2), (w3, b3) = params

    def to_mat(w):
        cout = w.shape[0]
        return jnp.transpose(w, (2, 3, 1, 0)).reshape(-1, cout).astype(jnp.bfloat16)

    return ((to_mat(w1), b1.reshape(1, -1), g1.reshape(1, -1), be1.reshape(1, -1)),
            (to_mat(w2), b2.reshape(1, -1), g2.reshape(1, -1), be2.reshape(1, -1)),
            (to_mat(w3), b3.reshape(1, -1)))


# ------------------------------- forward pass --------------------------------
def discriminator_forward(x_nchw, prepared):
    (w1, b1, g1, be1), (w2, b2, g2, be2), (w3, b3) = prepared
    N = x_nchw.shape[0]

    # NHWC end-to-end; bf16 activations halve im2col / DMA bytes.
    x = jnp.transpose(x_nchw, (0, 2, 3, 1)).astype(jnp.bfloat16)

    # disc_block 1: Conv(IMAGE_CHANNELS->128, k=4, s=2, p=1) + BN + LeakyReLU
    p1, H1, W1 = _im2col_nhwc(x, 4, 4, 2, 1)
    y1 = conv_bn_lrelu(p1, w1, b1, g1, be1)             # (N*H1*W1, 128) bf16
    x1 = y1.reshape(N, H1, W1, 128)

    # disc_block 2: Conv(128->256, k=4, s=2, p=1) + BN + LeakyReLU
    # (At training-scale batches this im2col could be replaced by in-kernel
    #  accumulation over the 16 (ki,kj) offsets; not needed at these sizes.)
    p2, H2, W2 = _im2col_nhwc(x1, 4, 4, 2, 1)
    y2 = conv_bn_lrelu(p2, w2, b2, g2, be2)             # (N*H2*W2, 256) bf16
    x2 = y2.reshape(N, H2, W2, 256)

    # final: Conv(256->1, k=7, s=1, p=0) + Sigmoid.  Full 7x7 contraction ->
    # plain reshape (NHWC flatten == (ki,kj,c) K order), unpadded (K, 1) weight.
    assert H2 == 7 and W2 == 7
    p3 = x2.reshape(N, H2 * W2 * 256)
    y3 = conv_sigmoid(p3, w3, b3)                       # (N, 1) f32

    return y3                                           # == x.view(-1, 1)


if __name__ == "__main__":
    key = jax.random.PRNGKey(0)
    kx, kp = jax.random.split(key)
    # 28x28 input is required by the 7x7 valid conv at the end (MNIST-style).
    x = jax.random.normal(kx, (2, IMAGE_CHANNELS, 28, 28), jnp.float32)
    params = prepare_params(init_params(kp))

    fwd = jax.jit(discriminator_forward)
    out = jax.block_until_ready(fwd(x, params))

    assert out.shape == (2, 1), out.shape
    assert bool(jnp.all(jnp.isfinite(out)))
    assert bool(jnp.all((out >= 0.0) & (out <= 1.0)))
    print("KERNEL_OK")
</pallas_src>

<mosaic_0001>
module attributes {stable_mosaic.version = 11 : i64} {
  func.func @_bn_lrelu_kernel(%arg0: i32, %arg1: memref<400x128xf32, #tpu.memory_space<vmem>>, %arg2: memref<2x128xf32, #tpu.memory_space<vmem>>, %arg3: memref<1x128xf32, #tpu.memory_space<vmem>>, %arg4: memref<1x128xf32, #tpu.memory_space<vmem>>, %arg5: memref<400x128xbf16, #tpu.memory_space<vmem>>) attributes {dimension_semantics = [#tpu.dimension_semantics<parallel>], iteration_bounds = array<i64: 1>, scalar_prefetch = 0 : i64, scratch_operands = 0 : i64, tpu.core_type = #tpu.core_type<tc>, window_params = [{transform_indices = @transform_0, window_bounds = array<i64: 400, 128>}, {pipeline_mode = #tpu.pipeline_mode<synchronous>, transform_indices = @transform_1, window_bounds = array<i64: 2, 128>}, {pipeline_mode = #tpu.pipeline_mode<synchronous>, transform_indices = @transform_2, window_bounds = array<i64: 1, 128>}, {pipeline_mode = #tpu.pipeline_mode<synchronous>, transform_indices = @transform_3, window_bounds = array<i64: 1, 128>}, {transform_indices = @transform_4, window_bounds = array<i64: 400, 128>}]} {
    %c0 = arith.constant 0 : index
    %c0_0 = arith.constant 0 : index
    %0 = vector.load %arg2[%c0, %c0_0] : memref<2x128xf32, #tpu.memory_space<vmem>>, vector<1x128xf32>
    %cst = arith.constant 0.00255102036 : f32
    %1 = vector.broadcast %cst : f32 to vector<1x128xf32>
    %2 = arith.mulf %0, %1 : vector<1x128xf32>
    %c1 = arith.constant 1 : index
    %c0_1 = arith.constant 0 : index
    %3 = vector.load %arg2[%c1, %c0_1] : memref<2x128xf32, #tpu.memory_space<vmem>>, vector<1x128xf32>
    %cst_2 = arith.constant 0.00255102036 : f32
    %4 = vector.broadcast %cst_2 : f32 to vector<1x128xf32>
    %5 = arith.mulf %3, %4 : vector<1x128xf32>
    %6 = arith.mulf %2, %2 : vector<1x128xf32>
    %7 = arith.subf %5, %6 : vector<1x128xf32>
    %c0_3 = arith.constant 0 : index
    %c0_4 = arith.constant 0 : index
    %8 = vector.load %arg3[%c0_3, %c0_4] : memref<1x128xf32, #tpu.memory_space<vmem>>, vector<1x128xf32>
    %cst_5 = arith.constant 9.99999974E-6 : f32
    %9 = vector.broadcast %cst_5 : f32 to vector<1x128xf32>
    %10 = arith.addf %7, %9 : vector<1x128xf32>
    %11 = math.rsqrt %10 : vector<1x128xf32>
    %12 = arith.mulf %8, %11 : vector<1x128xf32>
    %c0_6 = arith.constant 0 : index
    %c0_7 = arith.constant 0 : index
    %13 = vector.load %arg4[%c0_6, %c0_7] : memref<1x128xf32, #tpu.memory_space<vmem>>, vector<1x128xf32>
    %14 = arith.mulf %2, %12 : vector<1x128xf32>
    %15 = arith.subf %13, %14 : vector<1x128xf32>
    %c0_8 = arith.constant 0 : index
    %c0_9 = arith.constant 0 : index
    %16 = vector.load %arg1[%c0_8, %c0_9] : memref<400x128xf32, #tpu.memory_space<vmem>>, vector<400x128xf32>
    %17 = vector.broadcast %12 : vector<1x128xf32> to vector<400x128xf32>
    %18 = arith.mulf %16, %17 : vector<400x128xf32>
    %19 = vector.broadcast %15 : vector<1x128xf32> to vector<400x128xf32>
    %20 = arith.addf %18, %19 : vector<400x128xf32>
    %cst_10 = arith.constant 0.000000e+00 : f32
    %21 = vector.broadcast %cst_10 : f32 to vector<400x128xf32>
    %22 = arith.cmpf oge, %20, %21 : vector<400x128xf32>
    %cst_11 = arith.constant 2.000000e-01 : f32
    %23 = vector.broadcast %cst_11 : f32 to vector<400x128xf32>
    %24 = arith.mulf %23, %20 : vector<400x128xf32>
    %25 = arith.select %22, %20, %24 : vector<400x128xi1>, vector<400x128xf32>
    %26 = arith.truncf %25 : vector<400x128xf32> to vector<400x128xbf16>
    %c0_12 = arith.constant 0 : index
    %c0_13 = arith.constant 0 : index
    %27 = vector.load %arg5[%c0_12, %c0_13] : memref<400x128xbf16, #tpu.memory_space<vmem>>, vector<400x128xbf16>
    tpu.vector_store %arg5[%c0_12, %c0_13], %26 {strides = array<i32>} : memref<400x128xbf16, #tpu.memory_space<vmem>>, vector<400x128xbf16>,
    return
  }
  func.func @transform_0(%arg0: i32) -> (i32, i32) {
    %c0_i32 = arith.constant 0 : i32
    %c0_i32_0 = arith.constant 0 : i32
    return %arg0, %c0_i32 : i32, i32
  }
  func.func @transform_1(%arg0: i32) -> (i32, i32) {
    %c0_i32 = arith.constant 0 : i32
    %c0_i32_0 = arith.constant 0 : i32
    %c0_i32_1 = arith.constant 0 : i32
    return %c0_i32, %c0_i32_0 : i32, i32
  }
  func.func @transform_2(%arg0: i32) -> (i32, i32) {
    %c0_i32 = arith.constant 0 : i32
    %c0_i32_0 = arith.constant 0 : i32
    %c0_i32_1 = arith.constant 0 : i32
    return %c0_i32, %c0_i32_0 : i32, i32
  }
  func.func @transform_3(%arg0: i32) -> (i32, i32) {
    %c0_i32 = arith.constant 0 : i32
    %c0_i32_0 = arith.constant 0 : i32
    %c0_i32_1 = arith.constant 0 : i32
    return %c0_i32, %c0_i32_0 : i32, i32
  }
  func.func @transform_4(%arg0: i32) -> (i32, i32) {
    %c0_i32 = arith.constant 0 : i32
    %c0_i32_0 = arith.constant 0 : i32
    return %arg0, %c0_i32 : i32, i32
  }
}

module attributes {stable_mosaic.version = 11 : i64} {
  func.func @_matmul_bias_stats_kernel(%arg0: i32, %arg1: memref<400x16xbf16, #tpu.memory_space<vmem>>, %arg2: memref<16x128xbf16, #tpu.memory_space<vmem>>, %arg3: memref<1x128xf32, #tpu.memory_space<vmem>>, %arg4: memref<400x128xf32, #tpu.memory_space<vmem>>, %arg5: memref<2x128xf32, #tpu.memory_space<vmem>>) attributes {dimension_semantics = [#tpu.dimension_semantics<arbitrary>], iteration_bounds = array<i64: 1>, scalar_prefetch = 0 : i64, scratch_operands = 0 : i64, tpu.core_type = #tpu.core_type<tc>, window_params = [{transform_indices = @transform_0, window_bounds = array<i64: 400, 16>}, {pipeline_mode = #tpu.pipeline_mode<synchronous>, transform_indices = @transform_1, window_bounds = array<i64: 16, 128>}, {pipeline_mode = #tpu.pipeline_mode<synchronous>, transform_indices = @transform_2, window_bounds = array<i64: 1, 128>}, {transform_indices = @transform_3, window_bounds = array<i64: 400, 128>}, {pipeline_mode = #tpu.pipeline_mode<synchronous>, transform_indices = @transform_4, window_bounds = array<i64: 2, 128>}]} {
    %c0_i32 = arith.constant 0 : i32
    %0 = arith.cmpi eq, %arg0, %c0_i32 : i32
    %1 = arith.extui %0 : i1 to i32
    %c0_i32_0 = arith.constant 0 : i32
    %2 = arith.cmpi ne, %1, %c0_i32_0 : i32
    scf.if %2 {
      %cst_15 = arith.constant 0.000000e+00 : f32
      %27 = vector.broadcast %cst_15 : f32 to vector<2x128xf32>
      %c0_16 = arith.constant 0 : index
      %c0_17 = arith.constant 0 : index
      %28 = vector.load %arg5[%c0_16, %c0_17] : memref<2x128xf32, #tpu.memory_space<vmem>>, vector<2x128xf32>
      tpu.vector_store %arg5[%c0_16, %c0_17], %27 {strides = array<i32>} : memref<2x128xf32, #tpu.memory_space<vmem>>, vector<2x128xf32>,
    } else {
    }
    %c0 = arith.constant 0 : index
    %c0_1 = arith.constant 0 : index
    %3 = vector.load %arg1[%c0, %c0_1] : memref<400x16xbf16, #tpu.memory_space<vmem>>, vector<400x16xbf16>
    %c0_2 = arith.constant 0 : index
    %c0_3 = arith.constant 0 : index
    %4 = vector.load %arg2[%c0_2, %c0_3] : memref<16x128xbf16, #tpu.memory_space<vmem>>, vector<16x128xbf16>
    %cst = arith.constant dense<0.000000e+00> : vector<400x128xf32>
    %5 = tpu.matmul %3, %4, %cst {dimension_numbers = #tpu.dot_dimension_numbers<[1], [0], [0], [1], [0, 0, 1, 1], [], []>} : vector<400x16xbf16>, vector<16x128xbf16>, vector<400x128xf32> -> vector<400x128xf32>
    %c0_4 = arith.constant 0 : index
    %c0_5 = arith.constant 0 : index
    %6 = vector.load %arg3[%c0_4, %c0_5] : memref<1x128xf32, #tpu.memory_space<vmem>>, vector<1x128xf32>
    %7 = vector.broadcast %6 : vector<1x128xf32> to vector<400x128xf32>
    %8 = arith.addf %5, %7 : vector<400x128xf32>
    %c0_6 = arith.constant 0 : index
    %c0_7 = arith.constant 0 : index
    %9 = vector.load %arg4[%c0_6, %c0_7] : memref<400x128xf32, #tpu.memory_space<vmem>>, vector<400x128xf32>
    tpu.vector_store %arg4[%c0_6, %c0_7], %8 {strides = array<i32>} : memref<400x128xf32, #tpu.memory_space<vmem>>, vector<400x128xf32>,
    %c400_i32 = arith.constant 400 : i32
    %10 = arith.muli %arg0, %c400_i32 : i32
    %11 = tpu.iota {dimensions = array<i32: 0>} : vector<400x128xi32>
    %12 = vector.broadcast %10 : i32 to vector<400x128xi32>
    %13 = arith.addi %12, %11 : vector<400x128xi32>
    %c392_i32 = arith.constant 392 : i32
    %14 = vector.broadcast %c392_i32 : i32 to vector<400x128xi32>
    %15 = arith.cmpi slt, %13, %14 : vector<400x128xi32>
    %cst_8 = arith.constant 0.000000e+00 : f32
    %16 = vector.broadcast %cst_8 : f32 to vector<400x128xf32>
    %17 = arith.select %15, %8, %16 : vector<400x128xi1>, vector<400x128xf32>
    %cst_9 = arith.constant dense<0.000000e+00> : vector<128xf32>
    %18 = vector.multi_reduction <add>, %17, %cst_9 [0] : vector<400x128xf32> to vector<128xf32>
    %19 = vector.shape_cast %18 : vector<128xf32> to vector<1x128xf32>
    %20 = arith.mulf %17, %17 : vector<400x128xf32>
    %cst_10 = arith.constant dense<0.000000e+00> : vector<128xf32>
    %21 = vector.multi_reduction <add>, %20, %cst_10 [0] : vector<400x128xf32> to vector<128xf32>
    %22 = vector.shape_cast %21 : vector<128xf32> to vector<1x128xf32>
    %c0_11 = arith.constant 0 : index
    %c0_12 = arith.constant 0 : index
    %23 = vector.load %arg5[%c0_11, %c0_12] : memref<2x128xf32, #tpu.memory_space<vmem>>, vector<2x128xf32>
    %24 = tpu.concatenate %19, %22 in 0 : vector<1x128xf32>, vector<1x128xf32> -> vector<2x128xf32>
    %25 = arith.addf %23, %24 : vector<2x128xf32>
    %c0_13 = arith.constant 0 : index
    %c0_14 = arith.constant 0 : index
    %26 = vector.load %arg5[%c0_13, %c0_14] : memref<2x128xf32, #tpu.memory_space<vmem>>, vector<2x128xf32>
    tpu.vector_store %arg5[%c0_13, %c0_14], %25 {strides = array<i32>} : memref<2x128xf32, #tpu.memory_space<vmem>>, vector<2x128xf32>,
    return
  }
  func.func @transform_0(%arg0: i32) -> (i32, i32) {
    %c0_i32 = arith.constant 0 : i32
    %c0_i32_0 = arith.constant 0 : i32
    return %arg0, %c0_i32 : i32, i32
  }
  func.func @transform_1(%arg0: i32) -> (i32, i32) {
    %c0_i32 = arith.constant 0 : i32
    %c0_i32_0 = arith.constant 0 : i32
    %c0_i32_1 = arith.constant 0 : i32
    return %c0_i32, %c0_i32_0 : i32, i32
  }
  func.func @transform_2(%arg0: i32) -> (i32, i32) {
    %c0_i32 = arith.constant 0 : i32
    %c0_i32_0 = arith.constant 0 : i32
    %c0_i32_1 = arith.constant 0 : i32
    return %c0_i32, %c0_i32_0 : i32, i32
  }
  func.func @transform_3(%arg0: i32) -> (i32, i32) {
    %c0_i32 = arith.constant 0 : i32
    %c0_i32_0 = arith.constant 0 : i32
    return %arg0, %c0_i32 : i32, i32
  }
  func.func @transform_4(%arg0: i32) -> (i32, i32) {
    %c0_i32 = arith.constant 0 : i32
    %c0_i32_0 = arith.constant 0 : i32
    %c0_i32_1 = arith.constant 0 : i32
    return %c0_i32, %c0_i32_0 : i32, i32
  }
}

module attributes {stable_mosaic.version = 11 : i64} {
  func.func @_matmul_bias_stats_kernel(%arg0: i32, %arg1: memref<112x2048xbf16, #tpu.memory_space<vmem>>, %arg2: memref<2048x256xbf16, #tpu.memory_space<vmem>>, %arg3: memref<1x256xf32, #tpu.memory_space<vmem>>, %arg4: memref<112x256xf32, #tpu.memory_space<vmem>>, %arg5: memref<2x256xf32, #tpu.memory_space<vmem>>) attributes {dimension_semantics = [#tpu.dimension_semantics<arbitrary>], iteration_bounds = array<i64: 1>, scalar_prefetch = 0 : i64, scratch_operands = 0 : i64, tpu.core_type = #tpu.core_type<tc>, window_params = [{transform_indices = @transform_0, window_bounds = array<i64: 112, 2048>}, {pipeline_mode = #tpu.pipeline_mode<synchronous>, transform_indices = @transform_1, window_bounds = array<i64: 2048, 256>}, {pipeline_mode = #tpu.pipeline_mode<synchronous>, transform_indices = @transform_2, window_bounds = array<i64: 1, 256>}, {transform_indices = @transform_3, window_bounds = array<i64: 112, 256>}, {pipeline_mode = #tpu.pipeline_mode<synchronous>, transform_indices = @transform_4, window_bounds = array<i64: 2, 256>}]} {
    %c0_i32 = arith.constant 0 : i32
    %0 = arith.cmpi eq, %arg0, %c0_i32 : i32
    %1 = arith.extui %0 : i1 to i32
    %c0_i32_0 = arith.constant 0 : i32
    %2 = arith.cmpi ne, %1, %c0_i32_0 : i32
    scf.if %2 {
      %cst_15 = arith.constant 0.000000e+00 : f32
      %27 = vector.broadcast %cst_15 : f32 to vector<2x256xf32>
      %c0_16 = arith.constant 0 : index
      %c0_17 = arith.constant 0 : index
      %28 = vector.load %arg5[%c0_16, %c0_17] : memref<2x256xf32, #tpu.memory_space<vmem>>, vector<2x256xf32>
      tpu.vector_store %arg5[%c0_16, %c0_17], %27 {strides = array<i32>} : memref<2x256xf32, #tpu.memory_space<vmem>>, vector<2x256xf32>,
    } else {
    }
    %c0 = arith.constant 0 : index
    %c0_1 = arith.constant 0 : index
    %3 = vector.load %arg1[%c0, %c0_1] : memref<112x2048xbf16, #tpu.memory_space<vmem>>, vector<112x2048xbf16>
    %c0_2 = arith.constant 0 : index
    %c0_3 = arith.constant 0 : index
    %4 = vector.load %arg2[%c0_2, %c0_3] : memref<2048x256xbf16, #tpu.memory_space<vmem>>, vector<2048x256xbf16>
    %cst = arith.constant dense<0.000000e+00> : vector<112x256xf32>
    %5 = tpu.matmul %3, %4, %cst {dimension_numbers = #tpu.dot_dimension_numbers<[1], [0], [0], [1], [0, 0, 1, 1], [], []>} : vector<112x2048xbf16>, vector<2048x256xbf16>, vector<112x256xf32> -> vector<112x256xf32>
    %c0_4 = arith.constant 0 : index
    %c0_5 = arith.constant 0 : index
    %6 = vector.load %arg3[%c0_4, %c0_5] : memref<1x256xf32, #tpu.memory_space<vmem>>, vector<1x256xf32>
    %7 = vector.broadcast %6 : vector<1x256xf32> to vector<112x256xf32>
    %8 = arith.addf %5, %7 : vector<112x256xf32>
    %c0_6 = arith.constant 0 : index
    %c0_7 = arith.constant 0 : index
    %9 = vector.load %arg4[%c0_6, %c0_7] : memref<112x256xf32, #tpu.memory_space<vmem>>, vector<112x256xf32>
    tpu.vector_store %arg4[%c0_6, %c0_7], %8 {strides = array<i32>} : memref<112x256xf32, #tpu.memory_space<vmem>>, vector<112x256xf32>,
    %c112_i32 = arith.constant 112 : i32
    %10 = arith.muli %arg0, %c112_i32 : i32
    %11 = tpu.iota {dimensions = array<i32: 0>} : vector<112x256xi32>
    %12 = vector.broadcast %10 : i32 to vector<112x256xi32>
    %13 = arith.addi %12, %11 : vector<112x256xi32>
    %c98_i32 = arith.constant 98 : i32
    %14 = vector.broadcast %c98_i32 : i32 to vector<112x256xi32>
    %15 = arith.cmpi slt, %13, %14 : vector<112x256xi32>
    %cst_8 = arith.constant 0.000000e+00 : f32
    %16 = vector.broadcast %cst_8 : f32 to vector<112x256xf32>
    %17 = arith.select %15, %8, %16 : vector<112x256xi1>, vector<112x256xf32>
    %cst_9 = arith.constant dense<0.000000e+00> : vector<256xf32>
    %18 = vector.multi_reduction <add>, %17, %cst_9 [0] : vector<112x256xf32> to vector<256xf32>
    %19 = vector.shape_cast %18 : vector<256xf32> to vector<1x256xf32>
    %20 = arith.mulf %17, %17 : vector<112x256xf32>
    %cst_10 = arith.constant dense<0.000000e+00> : vector<256xf32>
    %21 = vector.multi_reduction <add>, %20, %cst_10 [0] : vector<112x256xf32> to vector<256xf32>
    %22 = vector.shape_cast %21 : vector<256xf32> to vector<1x256xf32>
    %c0_11 = arith.constant 0 : index
    %c0_12 = arith.constant 0 : index
    %23 = vector.load %arg5[%c0_11, %c0_12] : memref<2x256xf32, #tpu.memory_space<vmem>>, vector<2x256xf32>
    %24 = tpu.concatenate %19, %22 in 0 : vector<1x256xf32>, vector<1x256xf32> -> vector<2x256xf32>
    %25 = arith.addf %23, %24 : vector<2x256xf32>
    %c0_13 = arith.constant 0 : index
    %c0_14 = arith.constant 0 : index
    %26 = vector.load %arg5[%c0_13, %c0_14] : memref<2x256xf32, #tpu.memory_space<vmem>>, vector<2x256xf32>
    tpu.vector_store %arg5[%c0_13, %c0_14], %25 {strides = array<i32>} : memref<2x256xf32, #tpu.memory_space<vmem>>, vector<2x256xf32>,
    return
  }
  func.func @transform_0(%arg0: i32) -> (i32, i32) {
    %c0_i32 = arith.constant 0 : i32
    %c0_i32_0 = arith.constant 0 : i32
    return %arg0, %c0_i32 : i32, i32
  }
  func.func @transform_1(%arg0: i32) -> (i32, i32) {
    %c0_i32 = arith.constant 0 : i32
    %c0_i32_0 = arith.constant 0 : i32
    %c0_i32_1 = arith.constant 0 : i32
    return %c0_i32, %c0_i32_0 : i32, i32
  }
  func.func @transform_2(%arg0: i32) -> (i32, i32) {
    %c0_i32 = arith.constant 0 : i32
    %c0_i32_0 = arith.constant 0 : i32
    %c0_i32_1 = arith.constant 0 : i32
    return %c0_i32, %c0_i32_0 : i32, i32
  }
  func.func @transform_3(%arg0: i32) -> (i32, i32) {
    %c0_i32 = arith.constant 0 : i32
    %c0_i32_0 = arith.constant 0 : i32
    return %arg0, %c0_i32 : i32, i32
  }
  func.func @transform_4(%arg0: i32) -> (i32, i32) {
    %c0_i32 = arith.constant 0 : i32
    %c0_i32_0 = arith.constant 0 : i32
    %c0_i32_1 = arith.constant 0 : i32
    return %c0_i32, %c0_i32_0 : i32, i32
  }
}

module attributes {stable_mosaic.version = 11 : i64} {
  func.func @_bn_lrelu_kernel(%arg0: i32, %arg1: memref<112x256xf32, #tpu.memory_space<vmem>>, %arg2: memref<2x256xf32, #tpu.memory_space<vmem>>, %arg3: memref<1x256xf32, #tpu.memory_space<vmem>>, %arg4: memref<1x256xf32, #tpu.memory_space<vmem>>, %arg5: memref<112x256xbf16, #tpu.memory_space<vmem>>) attributes {dimension_semantics = [#tpu.dimension_semantics<parallel>], iteration_bounds = array<i64: 1>, scalar_prefetch = 0 : i64, scratch_operands = 0 : i64, tpu.core_type = #tpu.core_type<tc>, window_params = [{transform_indices = @transform_0, window_bounds = array<i64: 112, 256>}, {pipeline_mode = #tpu.pipeline_mode<synchronous>, transform_indices = @transform_1, window_bounds = array<i64: 2, 256>}, {pipeline_mode = #tpu.pipeline_mode<synchronous>, transform_indices = @transform_2, window_bounds = array<i64: 1, 256>}, {pipeline_mode = #tpu.pipeline_mode<synchronous>, transform_indices = @transform_3, window_bounds = array<i64: 1, 256>}, {transform_indices = @transform_4, window_bounds = array<i64: 112, 256>}]} {
    %c0 = arith.constant 0 : index
    %c0_0 = arith.constant 0 : index
    %0 = vector.load %arg2[%c0, %c0_0] : memref<2x256xf32, #tpu.memory_space<vmem>>, vector<1x256xf32>
    %cst = arith.constant 0.0102040814 : f32
    %1 = vector.broadcast %cst : f32 to vector<1x256xf32>
    %2 = arith.mulf %0, %1 : vector<1x256xf32>
    %c1 = arith.constant 1 : index
    %c0_1 = arith.constant 0 : index
    %3 = vector.load %arg2[%c1, %c0_1] : memref<2x256xf32, #tpu.memory_space<vmem>>, vector<1x256xf32>
    %cst_2 = arith.constant 0.0102040814 : f32
    %4 = vector.broadcast %cst_2 : f32 to vector<1x256xf32>
    %5 = arith.mulf %3, %4 : vector<1x256xf32>
    %6 = arith.mulf %2, %2 : vector<1x256xf32>
    %7 = arith.subf %5, %6 : vector<1x256xf32>
    %c0_3 = arith.constant 0 : index
    %c0_4 = arith.constant 0 : index
    %8 = vector.load %arg3[%c0_3, %c0_4] : memref<1x256xf32, #tpu.memory_space<vmem>>, vector<1x256xf32>
    %cst_5 = arith.constant 9.99999974E-6 : f32
    %9 = vector.broadcast %cst_5 : f32 to vector<1x256xf32>
    %10 = arith.addf %7, %9 : vector<1x256xf32>
    %11 = math.rsqrt %10 : vector<1x256xf32>
    %12 = arith.mulf %8, %11 : vector<1x256xf32>
    %c0_6 = arith.constant 0 : index
    %c0_7 = arith.constant 0 : index
    %13 = vector.load %arg4[%c0_6, %c0_7] : memref<1x256xf32, #tpu.memory_space<vmem>>, vector<1x256xf32>
    %14 = arith.mulf %2, %12 : vector<1x256xf32>
    %15 = arith.subf %13, %14 : vector<1x256xf32>
    %c0_8 = arith.constant 0 : index
    %c0_9 = arith.constant 0 : index
    %16 = vector.load %arg1[%c0_8, %c0_9] : memref<112x256xf32, #tpu.memory_space<vmem>>, vector<112x256xf32>
    %17 = vector.broadcast %12 : vector<1x256xf32> to vector<112x256xf32>
    %18 = arith.mulf %16, %17 : vector<112x256xf32>
    %19 = vector.broadcast %15 : vector<1x256xf32> to vector<112x256xf32>
    %20 = arith.addf %18, %19 : vector<112x256xf32>
    %cst_10 = arith.constant 0.000000e+00 : f32
    %21 = vector.broadcast %cst_10 : f32 to vector<112x256xf32>
    %22 = arith.cmpf oge, %20, %21 : vector<112x256xf32>
    %cst_11 = arith.constant 2.000000e-01 : f32
    %23 = vector.broadcast %cst_11 : f32 to vector<112x256xf32>
    %24 = arith.mulf %23, %20 : vector<112x256xf32>
    %25 = arith.select %22, %20, %24 : vector<112x256xi1>, vector<112x256xf32>
    %26 = arith.truncf %25 : vector<112x256xf32> to vector<112x256xbf16>
    %c0_12 = arith.constant 0 : index
    %c0_13 = arith.constant 0 : index
    %27 = vector.load %arg5[%c0_12, %c0_13] : memref<112x256xbf16, #tpu.memory_space<vmem>>, vector<112x256xbf16>
    tpu.vector_store %arg5[%c0_12, %c0_13], %26 {strides = array<i32>} : memref<112x256xbf16, #tpu.memory_space<vmem>>, vector<112x256xbf16>,
    return
  }
  func.func @transform_0(%arg0: i32) -> (i32, i32) {
    %c0_i32 = arith.constant 0 : i32
    %c0_i32_0 = arith.constant 0 : i32
    return %arg0, %c0_i32 : i32, i32
  }
  func.func @transform_1(%arg0: i32) -> (i32, i32) {
    %c0_i32 = arith.constant 0 : i32
    %c0_i32_0 = arith.constant 0 : i32
    %c0_i32_1 = arith.constant 0 : i32
    return %c0_i32, %c0_i32_0 : i32, i32
  }
  func.func @transform_2(%arg0: i32) -> (i32, i32) {
    %c0_i32 = arith.constant 0 : i32
    %c0_i32_0 = arith.constant 0 : i32
    %c0_i32_1 = arith.constant 0 : i32
    return %c0_i32, %c0_i32_0 : i32, i32
  }
  func.func @transform_3(%arg0: i32) -> (i32, i32) {
    %c0_i32 = arith.constant 0 : i32
    %c0_i32_0 = arith.constant 0 : i32
    %c0_i32_1 = arith.constant 0 : i32
    return %c0_i32, %c0_i32_0 : i32, i32
  }
  func.func @transform_4(%arg0: i32) -> (i32, i32) {
    %c0_i32 = arith.constant 0 : i32
    %c0_i32_0 = arith.constant 0 : i32
    return %arg0, %c0_i32 : i32, i32
  }
}

module attributes {stable_mosaic.version = 11 : i64} {
  func.func @_matmul_bias_sigmoid_kernel(%arg0: i32, %arg1: memref<16x12544xbf16, #tpu.memory_space<vmem>>, %arg2: memref<12544x1xbf16, #tpu.memory_space<vmem>>, %arg3: memref<1x1xf32, #tpu.memory_space<vmem>>, %arg4: memref<16x1xf32, #tpu.memory_space<vmem>>) attributes {dimension_semantics = [#tpu.dimension_semantics<parallel>], iteration_bounds = array<i64: 1>, scalar_prefetch = 0 : i64, scratch_operands = 0 : i64, tpu.core_type = #tpu.core_type<tc>, window_params = [{transform_indices = @transform_0, window_bounds = array<i64: 16, 12544>}, {pipeline_mode = #tpu.pipeline_mode<synchronous>, transform_indices = @transform_1, window_bounds = array<i64: 12544, 1>}, {pipeline_mode = #tpu.pipeline_mode<synchronous>, transform_indices = @transform_2, window_bounds = array<i64: 1, 1>}, {transform_indices = @transform_3, window_bounds = array<i64: 16, 1>}]} {
    %c0 = arith.constant 0 : index
    %c0_0 = arith.constant 0 : index
    %0 = vector.load %arg1[%c0, %c0_0] : memref<16x12544xbf16, #tpu.memory_space<vmem>>, vector<16x12544xbf16>
    %c0_1 = arith.constant 0 : index
    %c0_2 = arith.constant 0 : index
    %1 = vector.load %arg2[%c0_1, %c0_2] : memref<12544x1xbf16, #tpu.memory_space<vmem>>, vector<12544x1xbf16>
    %cst = arith.constant dense<0.000000e+00> : vector<16x1xf32>
    %2 = tpu.matmul %0, %1, %cst {dimension_numbers = #tpu.dot_dimension_numbers<[1], [0], [0], [1], [0, 0, 1, 1], [], []>} : vector<16x12544xbf16>, vector<12544x1xbf16>, vector<16x1xf32> -> vector<16x1xf32>
    %c0_3 = arith.constant 0 : index
    %c0_4 = arith.constant 0 : index
    %3 = vector.load %arg3[%c0_3, %c0_4] : memref<1x1xf32, #tpu.memory_space<vmem>>, vector<1x1xf32>
    %4 = vector.broadcast %3 : vector<1x1xf32> to vector<16x1xf32>
    %5 = arith.addf %2, %4 : vector<16x1xf32>
    %6 = arith.negf %5 : vector<16x1xf32>
    %7 = math.exp %6 : vector<16x1xf32>
    %cst_5 = arith.constant 1.000000e+00 : f32
    %8 = vector.broadcast %cst_5 : f32 to vector<16x1xf32>
    %9 = arith.addf %8, %7 : vector<16x1xf32>
    %10 = arith.divf %8, %9 : vector<16x1xf32>
    %c0_6 = arith.constant 0 : index
    %c0_7 = arith.constant 0 : index
    %11 = vector.load %arg4[%c0_6, %c0_7] : memref<16x1xf32, #tpu.memory_space<vmem>>, vector<16x1xf32>
    tpu.vector_store %arg4[%c0_6, %c0_7], %10 {strides = array<i32>} : memref<16x1xf32, #tpu.memory_space<vmem>>, vector<16x1xf32>,
    return
  }
  func.func @transform_0(%arg0: i32) -> (i32, i32) {
    %c0_i32 = arith.constant 0 : i32
    %c0_i32_0 = arith.constant 0 : i32
    return %arg0, %c0_i32 : i32, i32
  }
  func.func @transform_1(%arg0: i32) -> (i32, i32) {
    %c0_i32 = arith.constant 0 : i32
    %c0_i32_0 = arith.constant 0 : i32
    %c0_i32_1 = arith.constant 0 : i32
    return %c0_i32, %c0_i32_0 : i32, i32
  }
  func.func @transform_2(%arg0: i32) -> (i32, i32) {
    %c0_i32 = arith.constant 0 : i32
    %c0_i32_0 = arith.constant 0 : i32
    %c0_i32_1 = arith.constant 0 : i32
    return %c0_i32, %c0_i32_0 : i32, i32
  }
  func.func @transform_3(%arg0: i32) -> (i32, i32) {
    %c0_i32 = arith.constant 0 : i32
    %c0_i32_0 = arith.constant 0 : i32
    return %arg0, %c0_i32 : i32, i32
  }
}

</mosaic_0001>

<bundles_post_ra>
// kernel: discriminator_forward.6
= control target key start
LH: loop header
LB: loop body
LE: loop exit
PB: predicated region body
PF: predicated region fallthrough
CT: control target
= control target key end

     0   :  { %9 = vsyncpa [#allocation3], 0  ;;  %s1309_s0 = inlined_call_operand.vmem [shape: f32[400,128], index: 0, kind: input, shape index: {}]   ;;  %s1310_s1 = inlined_call_operand.vmem [shape: f32[2,128], index: 1, kind: input, shape index: {}]   ;;  %s1311_s2 = inlined_call_operand.hbm [shape: f32[1,128], index: 2, kind: input, shape index: {}]   ;;  %s1312_s3 = inlined_call_operand.hbm [shape: f32[1,128], index: 3, kind: input, shape index: {}]   ;;  %s1313_s4 = inlined_call_operand.vmem [shape: bf16[400,128], index: 4, kind: output, shape index: {}]  }
   0x1   :  { %10 = vsyncpa [#allocation5], 0  ;;  %s923_s15 = smov [#allocation2]   ;;  %s924_s17 = smov [#allocation4]  }
   0x2   :  { %s21_s16 = sshll.u32 %s923_s15, 4  ;;  %s31_s18 = sshll.u32 %s924_s17, 4  ;;  %s22_s16 = int_to_ptr.vmem [resolvable:$true] %s21_s16  ;;  %s32_s18 = int_to_ptr.vmem [resolvable:$true] %s31_s18 }
   0x3   :  { %s875_s21 = scalar_lea.hbm %s1311_s2, 16 }
   0x4   :  { %p876_p0 = scmp.ne.s32.totalorder %s1311_s2, %s875_s21  ;;  %p879_p1 = scmp.lt.u32.totalorder %s875_s21, %s1311_s2 }
   0x6   :  { %p881_p2 = pnand %p879_p1, %p876_p0 }
   0x8   :  { %884 = shalt.err (!%p881_p2)
}
   0x9   :  { %s885_s26 = scalar_lea.vmem %s22_s16, 16  ;;  %s889_s27 = scalar_lea.vmem %s22_s16, 32 }
   0xa   :  { %p886_p3 = scmp.ne.s32.totalorder %s22_s16, %s885_s26  ;;  %p890_p4 = scmp.lt.s32.totalorder %s22_s16, %s22_s16 }
   0xb   :  { %p891_p5 = scmp.lt.s32.totalorder %s889_s27, %s885_s26 }
   0xd   :  { %p892_p6 = por %p891_p5, %p890_p4 }
   0xf   :  { %p893_p7 = pnand %p892_p6, %p886_p3 }
  0x11   :  { %896 = shalt.err (!%p893_p7)
}
  0x12   :  { %24 = dma.hbm_to_vmem [thread:$0]  %s1311_s2, 16, %s22_s16, [#allocation3]  }
  0x13   :  { %s897_s6 = scalar_lea.hbm %s1312_s3, 16 }
  0x14   :  { %p898_p8 = scmp.ne.s32.totalorder %s1312_s3, %s897_s6  ;;  %p901_p9 = scmp.lt.u32.totalorder %s897_s6, %s1312_s3 }
  0x16   :  { %p903_p10 = pnand %p901_p9, %p898_p8 }
  0x18   :  { %906 = shalt.err (!%p903_p10)
}
  0x19   :  { %s907_s11 = scalar_lea.vmem %s32_s18, 16  ;;  %s911_s12 = scalar_lea.vmem %s32_s18, 32 }
  0x1a   :  { %p908_p11 = scmp.ne.s32.totalorder %s32_s18, %s907_s11  ;;  %p912_p12 = scmp.lt.s32.totalorder %s32_s18, %s32_s18 }
  0x1b   :  { %p913_p13 = scmp.lt.s32.totalorder %s911_s12, %s907_s11 }
  0x1d   :  { %p914_p0 = por %p913_p13, %p912_p12 }
  0x1f   :  { %p915_p1 = pnand %p914_p0, %p908_p11 }
  0x21   :  { %918 = shalt.err (!%p915_p1)
}
  0x22   :  { %34 = dma.hbm_to_vmem [thread:$0]  %s1312_s3, 16, %s32_s18, [#allocation5]  }
  0x23   :  { %919 = dma.done.wait [#allocation3], 16  }
  0x24   :  { %920 = vsyncadd [#allocation3], 4294967280 }
  0x25   :  { %921 = dma.done.wait [#allocation5], 16  }
  0x26   :  { %922 = vsyncadd [#allocation5], 4294967280  ;;  %v41_v0 = vld [vmem:[%s1310_s1] sm:$0x1]  ;;  %v43_v1 = vld [vmem:[%s1310_s1 + $0x1] sm:$0x1]  ;;  %v105_v7 = vlaneseq }
  0x27   :  { %v42_v2 = vmul.f32 0.0025510204, %v41_v0  ;;  %v44_v3 = vmul.f32 0.0025510204, %v43_v1  ;;  %v47_v9 = vld [vmem:[#allocation2] sm:$0x1] }
  0x28   :  { %v106_v8 = vshrl.u32 %v105_v7, 7  ;;  %v51_v13 = vld [vmem:[#allocation4] sm:$0x1]  ;;  %v55_v15 = vld [vmem:[%s1309_s0 + $0x8] sm:$0xff]  ;;  %v56_v16 = vld [vmem:[%s1309_s0 + $0x10] sm:$0xff] }
  0x29   :  { %v45_v4 = vmul.f32 %v42_v2, %v42_v2  ;;  %v54_v14 = vld [vmem:[%s1309_s0] sm:$0xff]  ;;  %v57_v17 = vld [vmem:[%s1309_s0 + $0x18] sm:$0xff]  ;;  %v59_v21 = vld [vmem:[%s1309_s0 + $0x28] sm:$0xff] }
  0x2a   :  { %v107_v10 = vsub.s32 0, %v106_v8  ;;  %v58_v18 = vld [vmem:[%s1309_s0 + $0x20] sm:$0xff]  ;;  %v60_v22 = vld [vmem:[%s1309_s0 + $0x30] sm:$0xff]  ;;  %v61_v23 = vld [vmem:[%s1309_s0 + $0x38] sm:$0xff] }
  0x2b   :  { %v46_v5 = vsub.f32 %v44_v3, %v45_v4  ;;  %v62_v24 = vld [vmem:[%s1309_s0 + $0x40] sm:$0xff]  ;;  %v63_v25 = vld [vmem:[%s1309_s0 + $0x48] sm:$0xff]  ;;  %v64_v26 = vld [vmem:[%s1309_s0 + $0x50] sm:$0xff] }
  0x2c   :  { %v65_v31 = vld [vmem:[%s1309_s0 + $0x58] sm:$0xff]  ;;  %v66_v32 = vld [vmem:[%s1309_s0 + $0x60] sm:$0xff]  ;;  %v67_v33 = vld [vmem:[%s1309_s0 + $0x68] sm:$0xff] }
  0x2d   :  { %v48_v6 = vadd.f32 1e-05, %v46_v5 }
  0x2f   :  { %873 = vrsqrt.f32 %v48_v6 }
  0x39   :  { %v874_v11 = vpop.eup %873 }
  0x3a   :  { %v50_v12 = vmul.f32 %v874_v11, %v47_v9 }
  0x3c   :  { %v52_v19 = vmul.f32 %v50_v12, %v42_v2  ;;  %v995_v20 = vrot.slane %v50_v12, %v107_v10 }
  0x3e   :  { %v53_v27 = vsub.f32 %v51_v13, %v52_v19  ;;  %v110_v28 = vmul.f32 %v995_v20, %v54_v14  ;;  %v111_v29 = vmul.f32 %v995_v20, %v55_v15  ;;  %v112_v30 = vmul.f32 %v995_v20, %v56_v16  ;;  %v68_v16 = vld [vmem:[%s1309_s0 + $0x70] sm:$0xff] }
  0x3f   :  { %v113_v34 = vmul.f32 %v995_v20, %v57_v17  ;;  %v114_v35 = vmul.f32 %v995_v20, %v58_v18  ;;  %v115_v36 = vmul.f32 %v995_v20, %v59_v21  ;;  %v116_v37 = vmul.f32 %v995_v20, %v60_v22 }
  0x40   :  { %v1031_v38 = vrot.slane %v53_v27, %v107_v10  ;;  %v117_v39 = vmul.f32 %v995_v20, %v61_v23  ;;  %v118_v40 = vmul.f32 %v995_v20, %v62_v24  ;;  %v119_v41 = vmul.f32 %v995_v20, %v63_v25  ;;  %v69_v24 = vld [vmem:[%s1309_s0 + $0x78] sm:$0xff]  ;;  %v70_v25 = vld [vmem:[%s1309_s0 + $0x80] sm:$0xff] }
  0x41   :  { %v120_v42 = vmul.f32 %v995_v20, %v64_v26  ;;  %v121_v43 = vmul.f32 %v995_v20, %v65_v31  ;;  %v122_v44 = vmul.f32 %v995_v20, %v66_v32  ;;  %v123_v45 = vmul.f32 %v995_v20, %v67_v33  ;;  %v72_v31 = vld [vmem:[%s1309_s0 + $0x90] sm:$0xff]  ;;  %v73_v32 = vld [vmem:[%s1309_s0 + $0x98] sm:$0xff] }
  0x42   :  { %v166_v46 = vadd.f32 %v1031_v38, %v110_v28  ;;  %v167_v47 = vadd.f32 %v1031_v38, %v111_v29  ;;  %v168_v48 = vadd.f32 %v1031_v38, %v112_v30  ;;  %v169_v49 = vadd.f32 %v1031_v38, %v113_v34  ;;  %v71_v30 = vld [vmem:[%s1309_s0 + $0x88] sm:$0xff] }
  0x43   :  { %v170_v50 = vadd.f32 %v1031_v38, %v114_v35  ;;  %v171_v51 = vadd.f32 %v1031_v38, %v115_v36  ;;  %v172_v52 = vadd.f32 %v1031_v38, %v116_v37  ;;  %v173_v53 = vadd.f32 %v1031_v38, %v117_v39 }
  0x44   :  { %vm216_vm0 = vcmp.ge.f32.partialorder %v166_v46, 0.0  ;;  %vm217_vm1 = vcmp.ge.f32.partialorder %v167_v47, 0.0  ;;  %v266_v54 = vmul.f32 0.2, %v166_v46  ;;  %v267_v55 = vmul.f32 0.2, %v167_v47 }
  0x45   :  { %vm218_vm2 = vcmp.ge.f32.partialorder %v168_v48, 0.0  ;;  %vm219_vm3 = vcmp.ge.f32.partialorder %v169_v49, 0.0  ;;  %v268_v56 = vmul.f32 0.2, %v168_v48  ;;  %v269_v57 = vmul.f32 0.2, %v169_v49 }
  0x46   :  { %v316_v58 = vsel %vm216_vm0, %v166_v46, %v266_v54  ;;  %v317_v59 = vsel %vm217_vm1, %v167_v47, %v267_v55  ;;  %vm220_vm4 = vcmp.ge.f32.partialorder %v170_v50, 0.0  ;;  %vm221_vm5 = vcmp.ge.f32.partialorder %v171_v51, 0.0  ;;  %v74_v54 = vld [vmem:[%s1309_s0 + $0xa0] sm:$0xff]  ;;  %v75_v55 = vld [vmem:[%s1309_s0 + $0xa8] sm:$0xff] }
  0x47   :  { %v725_v60 = vpack.c.bf16 %v317_v59, %v316_v58  ;;  %v318_v61 = vsel %vm218_vm2, %v168_v48, %v268_v56  ;;  %v319_v62 = vsel %vm219_vm3, %v169_v49, %v269_v57  ;;  %v270_v63 = vmul.f32 0.2, %v170_v50  ;;  %v76_v56 = vld [vmem:[%s1309_s0 + $0xb0] sm:$0xff] }
  0x48   :  { %v730_v0 = vpack.c.bf16 %v319_v62, %v318_v61  ;;  %v271_v1 = vmul.f32 0.2, %v171_v51  ;;  %vm222_vm6 = vcmp.ge.f32.partialorder %v172_v52, 0.0  ;;  %vm223_vm7 = vcmp.ge.f32.partialorder %v173_v53, 0.0  ;;  %v77_v61 = vld [vmem:[%s1309_s0 + $0xb8] sm:$0xff]  ;;  %v78_v62 = vld [vmem:[%s1309_s0 + $0xc0] sm:$0xff] }
  0x49   :  { %726 = vst [vmem:[%s1313_s4] sm:$0xff] %v725_v60   ;;  %v320_v2 = vsel %vm220_vm4, %v170_v50, %v270_v63  ;;  %v272_v3 = vmul.f32 0.2, %v172_v52  ;;  %v273_v4 = vmul.f32 0.2, %v173_v53  ;;  %v174_v5 = vadd.f32 %v1031_v38, %v118_v40 }
  0x4a   :  { %847 = vst [vmem:[%s1313_s4 + $0x8] sm:$0xff] %v730_v0   ;;  %v321_v6 = vsel %vm221_vm5, %v171_v51, %v271_v1  ;;  %v175_v7 = vadd.f32 %v1031_v38, %v119_v41  ;;  %v176_v8 = vadd.f32 %v1031_v38, %v120_v42  ;;  %v177_v9 = vadd.f32 %v1031_v38, %v121_v43 }
  0x4b   :  { %v735_v10 = vpack.c.bf16 %v321_v6, %v320_v2  ;;  %v322_v11 = vsel %vm222_vm6, %v172_v52, %v272_v3  ;;  %v323_v12 = vsel %vm223_vm7, %v173_v53, %v273_v4  ;;  %vm224_vm8 = vcmp.ge.f32.partialorder %v174_v5, 0.0  ;;  %v79_v3 = vld [vmem:[%s1309_s0 + $0xc8] sm:$0xff] }
  0x4c   :  { %v740_v13 = vpack.c.bf16 %v323_v12, %v322_v11  ;;  %vm225_vm9 = vcmp.ge.f32.partialorder %v175_v7, 0.0  ;;  %v274_v14 = vmul.f32 0.2, %v174_v5  ;;  %v275_v15 = vmul.f32 0.2, %v175_v7 }
  0x4d   :  { %848 = vst [vmem:[%s1313_s4 + $0x10] sm:$0xff] %v735_v10   ;;  %vm226_vm10 = vcmp.ge.f32.partialorder %v176_v8, 0.0  ;;  %vm227_vm11 = vcmp.ge.f32.partialorder %v177_v9, 0.0  ;;  %v276_v17 = vmul.f32 0.2, %v176_v8  ;;  %v178_v22 = vadd.f32 %v1031_v38, %v122_v44 }
  0x4e   :  { %v277_v18 = vmul.f32 0.2, %v177_v9  ;;  %849 = vst [vmem:[%s1313_s4 + $0x18] sm:$0xff] %v740_v13   ;;  %v324_v19 = vsel %vm224_vm8, %v174_v5, %v274_v14  ;;  %v325_v21 = vsel %vm225_vm9, %v175_v7, %v275_v15  ;;  %v179_v23 = vadd.f32 %v1031_v38, %v123_v45 }
  0x4f   :  { %v745_v26 = vpack.c.bf16 %v325_v21, %v324_v19  ;;  %v326_v27 = vsel %vm226_vm10, %v176_v8, %v276_v17  ;;  %v124_v29 = vmul.f32 %v995_v20, %v68_v16  ;;  %vm228_vm12 = vcmp.ge.f32.partialorder %v178_v22, 0.0  ;;  %v80_v8 = vld [vmem:[%s1309_s0 + $0xd0] sm:$0xff]  ;;  %v81_v21 = vld [vmem:[%s1309_s0 + $0xd8] sm:$0xff] }
  0x50   :  { %v327_v28 = vsel %vm227_vm11, %v177_v9, %v277_v18  ;;  %vm229_vm13 = vcmp.ge.f32.partialorder %v179_v23, 0.0  ;;  %v278_v34 = vmul.f32 0.2, %v178_v22  ;;  %v279_v35 = vmul.f32 0.2, %v179_v23 }
  0x51   :  { %v750_v33 = vpack.c.bf16 %v327_v28, %v326_v27  ;;  %850 = vst [vmem:[%s1313_s4 + $0x20] sm:$0xff] %v745_v26   ;;  %v125_v36 = vmul.f32 %v995_v20, %v69_v24  ;;  %v180_v37 = vadd.f32 %v1031_v38, %v124_v29  ;;  %v126_v39 = vmul.f32 %v995_v20, %v70_v25 }
  0x52   :  { %v328_v40 = vsel %vm228_vm12, %v178_v22, %v278_v34  ;;  %v127_v41 = vmul.f32 %v995_v20, %v71_v30  ;;  %v128_v42 = vmul.f32 %v995_v20, %v72_v31  ;;  %v129_v43 = vmul.f32 %v995_v20, %v73_v32  ;;  %v82_v30 = vld [vmem:[%s1309_s0 + $0xe0] sm:$0xff]  ;;  %v83_v31 = vld [vmem:[%s1309_s0 + $0xe8] sm:$0xff] }
  0x53   :  { %851 = vst [vmem:[%s1313_s4 + $0x28] sm:$0xff] %v750_v33   ;;  %v329_v44 = vsel %vm229_vm13, %v179_v23, %v279_v35  ;;  %v181_v45 = vadd.f32 %v1031_v38, %v125_v36  ;;  %vm230_vm14 = vcmp.ge.f32.partialorder %v180_v37, 0.0  ;;  %v280_v46 = vmul.f32 0.2, %v180_v37  ;;  %v84_v36 = vld [vmem:[%s1309_s0 + $0xf0] sm:$0xff] }
  0x54   :  { %v755_v47 = vpack.c.bf16 %v329_v44, %v328_v40  ;;  %v182_v48 = vadd.f32 %v1031_v38, %v126_v39  ;;  %v183_v49 = vadd.f32 %v1031_v38, %v127_v41  ;;  %v184_v50 = vadd.f32 %v1031_v38, %v128_v42 }
  0x55   :  { %vm231_vm15 = vcmp.ge.f32.partialorder %v181_v45, 0.0  ;;  %v281_v51 = vmul.f32 0.2, %v181_v45  ;;  %v330_v52 = vsel %vm230_vm14, %v180_v37, %v280_v46  ;;  %v185_v53 = vadd.f32 %v1031_v38, %v129_v43  ;;  %v85_v37 = vld [vmem:[%s1309_s0 + $0xf8] sm:$0xff] }
  0x56   :  { %852 = vst [vmem:[%s1313_s4 + $0x30] sm:$0xff] %v755_v47   ;;  %vm232_vm0 = vcmp.ge.f32.partialorder %v182_v48, 0.0  ;;  %vm233_vm1 = vcmp.ge.f32.partialorder %v183_v49, 0.0  ;;  %v282_v57 = vmul.f32 0.2, %v182_v48  ;;  %vm234_vm2 = vcmp.ge.f32.partialorder %v184_v50, 0.0 }
  0x57   :  { %v283_v58 = vmul.f32 0.2, %v183_v49  ;;  %v331_v59 = vsel %vm231_vm15, %v181_v45, %v281_v51  ;;  %vm235_vm3 = vcmp.ge.f32.partialorder %v185_v53, 0.0  ;;  %v284_v60 = vmul.f32 0.2, %v184_v50 }
  0x58   :  { %v760_v63 = vpack.c.bf16 %v331_v59, %v330_v52  ;;  %v332_v0 = vsel %vm232_vm0, %v182_v48, %v282_v57  ;;  %v285_v2 = vmul.f32 0.2, %v185_v53  ;;  %v130_v6 = vmul.f32 %v995_v20, %v74_v54  ;;  %v86_v59 = vld [vmem:[%s1309_s0 + $0x100] sm:$0xff] }
  0x59   :  { %v333_v1 = vsel %vm233_vm1, %v183_v49, %v283_v58  ;;  %v334_v5 = vsel %vm234_vm2, %v184_v50, %v284_v60  ;;  %v131_v7 = vmul.f32 %v995_v20, %v75_v55  ;;  %v132_v10 = vmul.f32 %v995_v20, %v76_v56  ;;  %v87_v60 = vld [vmem:[%s1309_s0 + $0x108] sm:$0xff] }
  0x5a   :  { %v765_v4 = vpack.c.bf16 %v333_v1, %v332_v0  ;;  %853 = vst [vmem:[%s1313_s4 + $0x38] sm:$0xff] %v760_v63   ;;  %v335_v9 = vsel %vm235_vm3, %v185_v53, %v285_v2  ;;  %v133_v11 = vmul.f32 %v995_v20, %v77_v61  ;;  %v134_v12 = vmul.f32 %v995_v20, %v78_v62  ;;  %v88_v63 = vld [vmem:[%s1309_s0 + $0x110] sm:$0xff]  ;;  %v89_v0 = vld [vmem:[%s1309_s0 + $0x118] sm:$0xff] }
  0x5b   :  { %v770_v13 = vpack.c.bf16 %v335_v9, %v334_v5  ;;  %v186_v14 = vadd.f32 %v1031_v38, %v130_v6  ;;  %v187_v15 = vadd.f32 %v1031_v38, %v131_v7  ;;  %v135_v16 = vmul.f32 %v995_v20, %v79_v3  ;;  %v91_v9 = vld [vmem:[%s1309_s0 + $0x128] sm:$0xff] }
  0x5c   :  { %854 = vst [vmem:[%s1313_s4 + $0x40] sm:$0xff] %v765_v4   ;;  %v188_v17 = vadd.f32 %v1031_v38, %v132_v10  ;;  %v189_v18 = vadd.f32 %v1031_v38, %v133_v11  ;;  %v190_v19 = vadd.f32 %v1031_v38, %v134_v12  ;;  %v136_v22 = vmul.f32 %v995_v20, %v80_v8  ;;  %v90_v4 = vld [vmem:[%s1309_s0 + $0x120] sm:$0xff] }
  0x5d   :  { %855 = vst [vmem:[%s1313_s4 + $0x48] sm:$0xff] %v770_v13   ;;  %vm236_vm4 = vcmp.ge.f32.partialorder %v186_v14, 0.0  ;;  %vm237_vm5 = vcmp.ge.f32.partialorder %v187_v15, 0.0  ;;  %v286_v23 = vmul.f32 0.2, %v186_v14  ;;  %v191_v29 = vadd.f32 %v1031_v38, %v135_v16 }
  0x5e   :  { %v287_v24 = vmul.f32 0.2, %v187_v15  ;;  %vm238_vm6 = vcmp.ge.f32.partialorder %v188_v17, 0.0  ;;  %vm239_vm7 = vcmp.ge.f32.partialorder %v189_v18, 0.0  ;;  %v288_v25 = vmul.f32 0.2, %v188_v17 }
  0x5f   :  { %v289_v26 = vmul.f32 0.2, %v189_v18  ;;  %v336_v27 = vsel %vm236_vm4, %v186_v14, %v286_v23  ;;  %vm240_vm8 = vcmp.ge.f32.partialorder %v190_v19, 0.0  ;;  %v290_v35 = vmul.f32 0.2, %v190_v19  ;;  %v92_v23 = vld [vmem:[%s1309_s0 + $0x130] sm:$0xff] }
  0x60   :  { %v337_v28 = vsel %vm237_vm5, %v187_v15, %v287_v24  ;;  %v338_v33 = vsel %vm238_vm6, %v188_v17, %v288_v25  ;;  %vm241_vm9 = vcmp.ge.f32.partialorder %v191_v29, 0.0  ;;  %v291_v40 = vmul.f32 0.2, %v191_v29 }
  0x61   :  { %v775_v32 = vpack.c.bf16 %v337_v28, %v336_v27  ;;  %v339_v34 = vsel %vm239_vm7, %v189_v18, %v289_v26  ;;  %v137_v41 = vmul.f32 %v995_v20, %v81_v21  ;;  %v340_v42 = vsel %vm240_vm8, %v190_v19, %v290_v35 }
  0x62   :  { %v780_v39 = vpack.c.bf16 %v339_v34, %v338_v33  ;;  %v192_v43 = vadd.f32 %v1031_v38, %v136_v22  ;;  %v138_v44 = vmul.f32 %v995_v20, %v82_v30  ;;  %v139_v45 = vmul.f32 %v995_v20, %v83_v31  ;;  %v94_v33 = vld [vmem:[%s1309_s0 + $0x140] sm:$0xff] }
  0x63   :  { %856 = vst [vmem:[%s1313_s4 + $0x50] sm:$0xff] %v775_v32   ;;  %v341_v46 = vsel %vm241_vm9, %v191_v29, %v291_v40  ;;  %v193_v47 = vadd.f32 %v1031_v38, %v137_v41  ;;  %v140_v48 = vmul.f32 %v995_v20, %v84_v36  ;;  %v141_v49 = vmul.f32 %v995_v20, %v85_v37  ;;  %v93_v32 = vld [vmem:[%s1309_s0 + $0x138] sm:$0xff]  ;;  %v96_v40 = vld [vmem:[%s1309_s0 + $0x150] sm:$0xff] }
  0x64   :  { %857 = vst [vmem:[%s1313_s4 + $0x58] sm:$0xff] %v780_v39   ;;  %v785_v50 = vpack.c.bf16 %v341_v46, %v340_v42  ;;  %vm242_vm10 = vcmp.ge.f32.partialorder %v192_v43, 0.0  ;;  %v292_v51 = vmul.f32 0.2, %v192_v43  ;;  %v194_v52 = vadd.f32 %v1031_v38, %v138_v44  ;;  %v95_v39 = vld [vmem:[%s1309_s0 + $0x148] sm:$0xff]  ;;  %v97_v41 = vld [vmem:[%s1309_s0 + $0x158] sm:$0xff] }
  0x65   :  { %vm243_vm11 = vcmp.ge.f32.partialorder %v193_v47, 0.0  ;;  %v293_v53 = vmul.f32 0.2, %v193_v47  ;;  %v195_v54 = vadd.f32 %v1031_v38, %v139_v45  ;;  %v196_v55 = vadd.f32 %v1031_v38, %v140_v48 }
  0x66   :  { %858 = vst [vmem:[%s1313_s4 + $0x60] sm:$0xff] %v785_v50   ;;  %v342_v56 = vsel %vm242_vm10, %v192_v43, %v292_v51  ;;  %vm244_vm12 = vcmp.ge.f32.partialorder %v194_v52, 0.0  ;;  %v294_v57 = vmul.f32 0.2, %v194_v52  ;;  %v197_v58 = vadd.f32 %v1031_v38, %v141_v49 }
  0x67   :  { %v343_v61 = vsel %vm243_vm11, %v193_v47, %v293_v53  ;;  %vm245_vm13 = vcmp.ge.f32.partialorder %v195_v54, 0.0  ;;  %v295_v62 = vmul.f32 0.2, %v195_v54  ;;  %vm246_vm14 = vcmp.ge.f32.partialorder %v196_v55, 0.0 }
  0x68   :  { %v790_v1 = vpack.c.bf16 %v343_v61, %v342_v56  ;;  %v344_v2 = vsel %vm244_vm12, %v194_v52, %v294_v57  ;;  %vm247_vm15 = vcmp.ge.f32.partialorder %v197_v58, 0.0  ;;  %v296_v3 = vmul.f32 0.2, %v196_v55 }
  0x69   :  { %v345_v5 = vsel %vm245_vm13, %v195_v54, %v295_v62  ;;  %v297_v6 = vmul.f32 0.2, %v197_v58  ;;  %v142_v7 = vmul.f32 %v995_v20, %v86_v59  ;;  %v143_v8 = vmul.f32 %v995_v20, %v87_v60  ;;  %v98_v62 = vld [vmem:[%s1309_s0 + $0x160] sm:$0xff] }
  0x6a   :  { %859 = vst [vmem:[%s1313_s4 + $0x68] sm:$0xff] %v790_v1   ;;  %v795_v10 = vpack.c.bf16 %v345_v5, %v344_v2  ;;  %v346_v11 = vsel %vm246_vm14, %v196_v55, %v296_v3  ;;  %v144_v12 = vmul.f32 %v995_v20, %v88_v63  ;;  %v145_v13 = vmul.f32 %v995_v20, %v89_v0  ;;  %v99_v63 = vld [vmem:[%s1309_s0 + $0x168] sm:$0xff]  ;;  %v100_v0 = vld [vmem:[%s1309_s0 + $0x170] sm:$0xff]  ;;  %v101_v5 = vld [vmem:[%s1309_s0 + $0x178] sm:$0xff] }
  0x6b   :  { %v347_v14 = vsel %vm247_vm15, %v197_v58, %v297_v6  ;;  %v198_v15 = vadd.f32 %v1031_v38, %v142_v7  ;;  %v199_v16 = vadd.f32 %v1031_v38, %v143_v8  ;;  %v146_v17 = vmul.f32 %v995_v20, %v90_v4  ;;  %v102_v6 = vld [vmem:[%s1309_s0 + $0x180] sm:$0xff] }
  0x6c   :  { %860 = vst [vmem:[%s1313_s4 + $0x70] sm:$0xff] %v795_v10   ;;  %v800_v18 = vpack.c.bf16 %v347_v14, %v346_v11  ;;  %v200_v19 = vadd.f32 %v1031_v38, %v144_v12  ;;  %v201_v21 = vadd.f32 %v1031_v38, %v145_v13  ;;  %v147_v22 = vmul.f32 %v995_v20, %v91_v9  ;;  %v103_v11 = vld [vmem:[%s1309_s0 + $0x188] sm:$0xff] }
  0x6d   :  { %vm248_vm0 = vcmp.ge.f32.partialorder %v198_v15, 0.0  ;;  %vm249_vm1 = vcmp.ge.f32.partialorder %v199_v16, 0.0  ;;  %v298_v24 = vmul.f32 0.2, %v198_v15  ;;  %v299_v25 = vmul.f32 0.2, %v199_v16 }
  0x6e   :  { %861 = vst [vmem:[%s1313_s4 + $0x78] sm:$0xff] %v800_v18   ;;  %vm250_vm2 = vcmp.ge.f32.partialorder %v200_v19, 0.0  ;;  %vm251_vm3 = vcmp.ge.f32.partialorder %v201_v21, 0.0  ;;  %v300_v26 = vmul.f32 0.2, %v200_v19  ;;  %v202_v30 = vadd.f32 %v1031_v38, %v146_v17 }
  0x6f   :  { %v301_v27 = vmul.f32 0.2, %v201_v21  ;;  %v348_v28 = vsel %vm248_vm0, %v198_v15, %v298_v24  ;;  %v349_v29 = vsel %vm249_vm1, %v199_v16, %v299_v25  ;;  %v203_v31 = vadd.f32 %v1031_v38, %v147_v22 }
  0x70   :  { %v805_v34 = vpack.c.bf16 %v349_v29, %v348_v28  ;;  %v350_v35 = vsel %vm250_vm2, %v200_v19, %v300_v26  ;;  %v148_v37 = vmul.f32 %v995_v20, %v92_v23  ;;  %vm252_vm4 = vcmp.ge.f32.partialorder %v202_v30, 0.0 }
  0x71   :  { %v351_v36 = vsel %vm251_vm3, %v201_v21, %v301_v27  ;;  %vm253_vm5 = vcmp.ge.f32.partialorder %v203_v31, 0.0  ;;  %v302_v43 = vmul.f32 0.2, %v202_v30  ;;  %v303_v44 = vmul.f32 0.2, %v203_v31 }
  0x72   :  { %v810_v42 = vpack.c.bf16 %v351_v36, %v350_v35  ;;  %862 = vst [vmem:[%s1313_s4 + $0x80] sm:$0xff] %v805_v34   ;;  %v149_v45 = vmul.f32 %v995_v20, %v93_v32  ;;  %v204_v46 = vadd.f32 %v1031_v38, %v148_v37  ;;  %v150_v47 = vmul.f32 %v995_v20, %v94_v33 }
  0x73   :  { %v352_v48 = vsel %vm252_vm4, %v202_v30, %v302_v43  ;;  %v151_v49 = vmul.f32 %v995_v20, %v95_v39  ;;  %v152_v50 = vmul.f32 %v995_v20, %v96_v40  ;;  %v153_v51 = vmul.f32 %v995_v20, %v97_v41 }
  0x74   :  { %863 = vst [vmem:[%s1313_s4 + $0x88] sm:$0xff] %v810_v42   ;;  %v353_v52 = vsel %vm253_vm5, %v203_v31, %v303_v44  ;;  %v205_v53 = vadd.f32 %v1031_v38, %v149_v45  ;;  %vm254_vm6 = vcmp.ge.f32.partialorder %v204_v46, 0.0  ;;  %v304_v54 = vmul.f32 0.2, %v204_v46 }
  0x75   :  { %v815_v55 = vpack.c.bf16 %v353_v52, %v352_v48  ;;  %v206_v56 = vadd.f32 %v1031_v38, %v150_v47  ;;  %v207_v57 = vadd.f32 %v1031_v38, %v151_v49  ;;  %v208_v58 = vadd.f32 %v1031_v38, %v152_v50 }
  0x76   :  { %vm255_vm7 = vcmp.ge.f32.partialorder %v205_v53, 0.0  ;;  %v305_v59 = vmul.f32 0.2, %v205_v53  ;;  %v354_v60 = vsel %vm254_vm6, %v204_v46, %v304_v54  ;;  %v209_v61 = vadd.f32 %v1031_v38, %v153_v51 }
  0x77   :  { %864 = vst [vmem:[%s1313_s4 + $0x90] sm:$0xff] %v815_v55   ;;  %vm256_vm8 = vcmp.ge.f32.partialorder %v206_v56, 0.0  ;;  %vm257_vm9 = vcmp.ge.f32.partialorder %v207_v57, 0.0  ;;  %v306_v1 = vmul.f32 0.2, %v206_v56  ;;  %vm258_vm10 = vcmp.ge.f32.partialorder %v208_v58, 0.0 }
  0x78   :  { %v307_v2 = vmul.f32 0.2, %v207_v57  ;;  %v355_v3 = vsel %vm255_vm7, %v205_v53, %v305_v59  ;;  %vm259_vm11 = vcmp.ge.f32.partialorder %v209_v61, 0.0  ;;  %v308_v4 = vmul.f32 0.2, %v208_v58 }
  0x79   :  { %v820_v7 = vpack.c.bf16 %v355_v3, %v354_v60  ;;  %v356_v8 = vsel %vm256_vm8, %v206_v56, %v306_v1  ;;  %v309_v10 = vmul.f32 0.2, %v209_v61  ;;  %v154_v14 = vmul.f32 %v995_v20, %v98_v62 }
  0x7a   :  { %v357_v9 = vsel %vm257_vm9, %v207_v57, %v307_v2  ;;  %v358_v13 = vsel %vm258_vm10, %v208_v58, %v308_v4  ;;  %v155_v15 = vmul.f32 %v995_v20, %v99_v63  ;;  %v156_v17 = vmul.f32 %v995_v20, %v100_v0 }
  0x7b   :  { %v825_v12 = vpack.c.bf16 %v357_v9, %v356_v8  ;;  %865 = vst [vmem:[%s1313_s4 + $0x98] sm:$0xff] %v820_v7   ;;  %v359_v16 = vsel %vm259_vm11, %v209_v61, %v309_v10  ;;  %v157_v18 = vmul.f32 %v995_v20, %v101_v5  ;;  %v158_v19 = vmul.f32 %v995_v20, %v102_v6 }
  0x7c   :  { %v830_v21 = vpack.c.bf16 %v359_v16, %v358_v13  ;;  %v210_v22 = vadd.f32 %v1031_v38, %v154_v14  ;;  %v211_v23 = vadd.f32 %v1031_v38, %v155_v15  ;;  %v159_v24 = vmul.f32 %v995_v20, %v103_v11 }
  0x7d   :  { %866 = vst [vmem:[%s1313_s4 + $0xa0] sm:$0xff] %v825_v12   ;;  %v212_v25 = vadd.f32 %v1031_v38, %v156_v17  ;;  %v213_v26 = vadd.f32 %v1031_v38, %v157_v18  ;;  %v214_v27 = vadd.f32 %v1031_v38, %v158_v19 }
  0x7e   :  { %867 = vst [vmem:[%s1313_s4 + $0xa8] sm:$0xff] %v830_v21   ;;  %vm260_vm12 = vcmp.ge.f32.partialorder %v210_v22, 0.0  ;;  %vm261_vm13 = vcmp.ge.f32.partialorder %v211_v23, 0.0  ;;  %v310_v28 = vmul.f32 0.2, %v210_v22  ;;  %v215_v33 = vadd.f32 %v1031_v38, %v159_v24 }
  0x7f   :  { %v311_v29 = vmul.f32 0.2, %v211_v23  ;;  %vm262_vm14 = vcmp.ge.f32.partialorder %v212_v25, 0.0  ;;  %vm263_vm15 = vcmp.ge.f32.partialorder %v213_v26, 0.0  ;;  %v312_v30 = vmul.f32 0.2, %v212_v25 }
  0x80   :  { %v313_v31 = vmul.f32 0.2, %v213_v26  ;;  %v360_v32 = vsel %vm260_vm12, %v210_v22, %v310_v28  ;;  %vm264_vm0 = vcmp.ge.f32.partialorder %v214_v27, 0.0  ;;  %v314_v37 = vmul.f32 0.2, %v214_v27 }
  0x81   :  { %v361_v20 = vsel %vm261_vm13, %v211_v23, %v311_v29  ;;  %v362_v35 = vsel %vm262_vm14, %v212_v25, %v312_v30  ;;  %vm265_vm1 = vcmp.ge.f32.partialorder %v215_v33, 0.0  ;;  %v315_v40 = vmul.f32 0.2, %v215_v33 }
  0x82   :  { %v835_v34 = vpack.c.bf16 %v361_v20, %v360_v32  ;;  %v363_v36 = vsel %vm263_vm15, %v213_v26, %v313_v31  ;;  %v364_v41 = vsel %vm264_vm0, %v214_v27, %v314_v37 }
  0x83   :  { %v840_v39 = vpack.c.bf16 %v363_v36, %v362_v35  ;;  %v365_v42 = vsel %vm265_vm1, %v215_v33, %v315_v40 }
  0x84   :  { %868 = vst [vmem:[%s1313_s4 + $0xb0] sm:$0xff] %v835_v34   ;;  %v845_v43 = vpack.c.bf16 %v365_v42, %v364_v41 }
  0x85   :  { %869 = vst [vmem:[%s1313_s4 + $0xb8] sm:$0xff] %v840_v39  }
  0x86   :  { %870 = vst [vmem:[%s1313_s4 + $0xc0] sm:$0xff] %v845_v43  }
  0x87   :  { %620 = vsyncpa [#allocation3], 1 }
  0x88   :  { %621 = vsyncpa [#allocation5], 1 }

// kernel: discriminator_forward.5
= control target key start
LH: loop header
LB: loop body
LE: loop exit
PB: predicated region body
PF: predicated region fallthrough
CT: control target
= control target key end

     0   :  { %10 = vsyncpa [#allocation3], 0  ;;  %s1794_s0 = inlined_call_operand.vmem [shape: bf16[400,16], index: 0, kind: input, shape index: {}]   ;;  %s1795_s1 = inlined_call_operand.hbm [shape: bf16[16,128], index: 1, kind: input, shape index: {}]   ;;  %s1796_s2 = inlined_call_operand.hbm [shape: f32[1,128], index: 2, kind: input, shape index: {}]   ;;  %s1797_s3 = inlined_call_operand.vmem [shape: f32[400,128], index: 3, kind: output, shape index: {0}]   ;;  %s1798_s4 = inlined_call_operand.vmem [shape: f32[2,128], index: 4, kind: output, shape index: {1}]  }
   0x1   :  { %11 = vsyncpa [#allocation5], 0  ;;  %s1237_s15 = smov [#allocation2]   ;;  %s1189_s19 = scalar_lea.hbm %s1795_s1, 128 }
   0x2   :  { %s19_s16 = sshll.u32 %s1237_s15, 4  ;;  %p1190_p0 = scmp.ne.s32.totalorder %s1795_s1, %s1189_s19  ;;  %s20_s16 = int_to_ptr.vmem [resolvable:$true] %s19_s16 }
   0x3   :  { %p1193_p1 = scmp.lt.u32.totalorder %s1189_s19, %s1795_s1 }
   0x5   :  { %p1195_p2 = pnand %p1193_p1, %p1190_p0 }
   0x7   :  { %1198 = shalt.err (!%p1195_p2)
}
   0x8   :  { %s1199_s24 = scalar_lea.vmem %s20_s16, 128  ;;  %p1204_p4 = scmp.lt.s32.totalorder %s20_s16, %s20_s16 }
   0x9   :  { %p1200_p3 = scmp.ne.s32.totalorder %s20_s16, %s1199_s24  ;;  %p1205_p5 = scmp.lt.s32.totalorder %s1199_s24, %s1199_s24 }
   0xb   :  { %p1206_p6 = por %p1205_p5, %p1204_p4 }
   0xd   :  { %p1207_p7 = pnand %p1206_p6, %p1200_p3 }
   0xf   :  { %1210 = shalt.err (!%p1207_p7)
}
  0x10   :  { %s1238_s25 = smov 64   ;;  %s1239_s26 = smov 4  }
  0x11   :  { %25 = dma.hbm_to_vmem [thread:$0]  %s1795_s1, 128, %s20_s16, [#allocation3], %s1238_s25, %s1238_s25, %s1239_s26  }
  0x12   :  { %s1240_s29 = smov [#allocation4]   ;;  %s1211_s7 = scalar_lea.hbm %s1796_s2, 16 }
  0x13   :  { %s32_s30 = sshll.u32 %s1240_s29, 4  ;;  %p1212_p8 = scmp.ne.s32.totalorder %s1796_s2, %s1211_s7  ;;  %s33_s30 = int_to_ptr.vmem [resolvable:$true] %s32_s30 }
  0x14   :  { %p1215_p9 = scmp.lt.u32.totalorder %s1211_s7, %s1796_s2 }
  0x16   :  { %p1217_p10 = pnand %p1215_p9, %p1212_p8 }
  0x18   :  { %1220 = shalt.err (!%p1217_p10)
}
  0x19   :  { %s1221_s12 = scalar_lea.vmem %s33_s30, 16  ;;  %s1225_s1 = scalar_lea.vmem %s33_s30, 32 }
  0x1a   :  { %p1222_p11 = scmp.ne.s32.totalorder %s33_s30, %s1221_s12  ;;  %p1226_p12 = scmp.lt.s32.totalorder %s33_s30, %s33_s30 }
  0x1b   :  { %p1227_p13 = scmp.lt.s32.totalorder %s1225_s1, %s1221_s12 }
  0x1d   :  { %p1228_p0 = por %p1227_p13, %p1226_p12 }
  0x1f   :  { %p1229_p1 = pnand %p1228_p0, %p1222_p11 }
  0x21   :  { %1232 = shalt.err (!%p1229_p1)
}
  0x22   :  { %35 = dma.hbm_to_vmem [thread:$0]  %s1796_s2, 16, %s33_s30, [#allocation5]  }
  0x23   :  { %1233 = dma.done.wait [#allocation3], 128  }
  0x24   :  { %1234 = vsyncadd [#allocation3], 4294967168 }
  0x25   :  { %1235 = dma.done.wait [#allocation5], 16  }
  0x26   :  { %1236 = vsyncadd [#allocation5], 4294967280  ;;  %v1241_v0 = vmov 0.0   ;;  %vm1242_vm0 = vmmov 0   ;;  %v1163_v1 = vld [vmem:[#allocation2] sm:$0xff]   ;;  %vm238_vm1 = vcmask 130048  }
  0x27   :  { %1053 = vmatprep.subr.bf16.mxu0 %v1241_v0  ;;  %47 = vst [vmem:[%s1798_s4] sm:$0x3] %v1241_v0  ;;  %1055 = vmatprep.mubr.msk.bf16.mxu0 %vm1242_vm0, %v1241_v0  ;;  %v1164_v2 = vld [vmem:[%s1794_s0] sm:$0xff]   ;;  %v1171_v3 = vld [vmem:[%s1794_s0 + $0x68] sm:$0xff]   ;;  %v1173_v5 = vld [vmem:[%s1794_s0 + $0x70] sm:$0xff]   ;;  %vm961_vm2 = vcmask 1040384  }
  0x28   :  { %1155 = vmatprep.subr.bf16.mxu1 %v1241_v0  ;;  %1107 = vmatprep.mubr.msk.bf16.mxu1 %vm1242_vm0, %v1241_v0  ;;  %v1165_v4 = vld [vmem:[%s1794_s0 + $0x8] sm:$0xff]   ;;  %v1166_v6 = vld [vmem:[%s1794_s0 + $0x10] sm:$0xff]   ;;  %v1175_v7 = vld [vmem:[%s1794_s0 + $0x78] sm:$0xff]  }
  0x29   :  { %1054 = vmatpush3.bf16.msra.mxu0 %v1163_v1  ;;  %1156 = vmatpush3.bf16.msra.mxu1 %v1163_v1  ;;  %v1167_v8 = vld [vmem:[%s1794_s0 + $0x18] sm:$0xff]   ;;  %v1177_v9 = vld [vmem:[%s1794_s0 + $0x80] sm:$0xff]   ;;  %v1179_v11 = vld [vmem:[%s1794_s0 + $0x88] sm:$0xff]  }
  0x2a   :  { %v1168_v10 = vld [vmem:[%s1794_s0 + $0x20] sm:$0xff]   ;;  %v1169_v12 = vld [vmem:[%s1794_s0 + $0x28] sm:$0xff]   ;;  %v1181_v13 = vld [vmem:[%s1794_s0 + $0x90] sm:$0xff]  }
  0x2b   :  { %v1170_v14 = vld [vmem:[%s1794_s0 + $0x30] sm:$0xff]   ;;  %v1183_v15 = vld [vmem:[%s1794_s0 + $0x98] sm:$0xff]   ;;  %v1184_v17 = vld [vmem:[%s1794_s0 + $0xa0] sm:$0xff]  }
  0x2c   :  { %1056 = vmatmul.mubr.msk.bf16.vlgmr.msra.gmra.mrb[0].mxu0 %vm238_vm1, %v1164_v2  ;;  %1108 = vmatmul.mubr.msk.bf16.vlgmr.msra.gmra.mrb[0].mxu1 %vm238_vm1, %v1171_v3  ;;  %v1172_v16 = vld [vmem:[%s1794_s0 + $0x38] sm:$0xff]   ;;  %v1174_v18 = vld [vmem:[%s1794_s0 + $0x40] sm:$0xff]   ;;  %v1185_v19 = vld [vmem:[%s1794_s0 + $0xa8] sm:$0xff]  }
  0x2d   :  { %1059 = vmatprep.mubr.msk.bf16.mxu0 %vm1242_vm0, %v1241_v0  ;;  %1111 = vmatprep.mubr.msk.bf16.mxu1 %vm1242_vm0, %v1241_v0  ;;  %v1176_v20 = vld [vmem:[%s1794_s0 + $0x48] sm:$0xff]   ;;  %v1186_v21 = vld [vmem:[%s1794_s0 + $0xb0] sm:$0xff]   ;;  %v1187_v23 = vld [vmem:[%s1794_s0 + $0xb8] sm:$0xff]  }
  0x2e   :  { %v1178_v22 = vld [vmem:[%s1794_s0 + $0x50] sm:$0xff]   ;;  %v1180_v24 = vld [vmem:[%s1794_s0 + $0x58] sm:$0xff]   ;;  %v1188_v25 = vld [vmem:[%s1794_s0 + $0xc0] sm:$0xff]  }
  0x2f   :  { %v1182_v26 = vld [vmem:[%s1794_s0 + $0x60] sm:$0xff]   ;;  %v1448_v27 = vld [vmem:[#allocation4] ss:$0 sm:$0xff] }
  0x34   :  { %1060 = vmatmul.mubr.msk.bf16.gmra.mrb[4].mxu0 %vm238_vm1, %v1165_v4  ;;  %1112 = vmatmul.mubr.msk.bf16.gmra.mrb[4].mxu1 %vm238_vm1, %v1173_v5 }
  0x35   :  { %1063 = vmatprep.mubr.msk.bf16.mxu0 %vm1242_vm0, %v1241_v0  ;;  %1115 = vmatprep.mubr.msk.bf16.mxu1 %vm1242_vm0, %v1241_v0 }
  0x3c   :  { %1064 = vmatmul.mubr.msk.bf16.gmra.mrb[8].mxu0 %vm238_vm1, %v1166_v6  ;;  %1116 = vmatmul.mubr.msk.bf16.gmra.mrb[8].mxu1 %vm238_vm1, %v1175_v7 }
  0x3d   :  { %1067 = vmatprep.mubr.msk.bf16.mxu0 %vm1242_vm0, %v1241_v0  ;;  %1119 = vmatprep.mubr.msk.bf16.mxu1 %vm1242_vm0, %v1241_v0 }
  0x44   :  { %1068 = vmatmul.mubr.msk.bf16.gmra.mrb[12].mxu0 %vm238_vm1, %v1167_v8  ;;  %1120 = vmatmul.mubr.msk.bf16.gmra.mrb[12].mxu1 %vm238_vm1, %v1177_v9 }
  0x45   :  { %1071 = vmatprep.mubr.msk.bf16.mxu0 %vm1242_vm0, %v1241_v0  ;;  %1123 = vmatprep.mubr.msk.bf16.mxu1 %vm1242_vm0, %v1241_v0 }
  0x4c   :  { %1072 = vmatmul.mubr.msk.bf16.gmra.mrb[16].mxu0 %vm238_vm1, %v1168_v10  ;;  %1124 = vmatmul.mubr.msk.bf16.gmra.mrb[16].mxu1 %vm238_vm1, %v1179_v11 }
  0x4d   :  { %1075 = vmatprep.mubr.msk.bf16.mxu0 %vm1242_vm0, %v1241_v0  ;;  %1127 = vmatprep.mubr.msk.bf16.mxu1 %vm1242_vm0, %v1241_v0 }
  0x54   :  { %1076 = vmatmul.mubr.msk.bf16.gmra.mrb[20].mxu0 %vm238_vm1, %v1169_v12  ;;  %1128 = vmatmul.mubr.msk.bf16.gmra.mrb[20].mxu1 %vm238_vm1, %v1181_v13 }
  0x55   :  { %1079 = vmatprep.mubr.msk.bf16.mxu0 %vm1242_vm0, %v1241_v0  ;;  %1131 = vmatprep.mubr.msk.bf16.mxu1 %vm1242_vm0, %v1241_v0 }
  0x5c   :  { %1080 = vmatmul.mubr.msk.bf16.gmra.mrb[24].mxu0 %vm238_vm1, %v1170_v14  ;;  %1132 = vmatmul.mubr.msk.bf16.gmra.mrb[24].mxu1 %vm238_vm1, %v1183_v15 }
  0x5d   :  { %1083 = vmatprep.mubr.msk.bf16.mxu0 %vm1242_vm0, %v1241_v0  ;;  %1135 = vmatprep.mubr.msk.bf16.mxu1 %vm1242_vm0, %v1241_v0 }
  0x64   :  { %1084 = vmatmul.mubr.msk.bf16.gmra.mrb[28].mxu0 %vm238_vm1, %v1172_v16  ;;  %1136 = vmatmul.mubr.msk.bf16.gmra.mrb[28].mxu1 %vm238_vm1, %v1184_v17 }
  0x65   :  { %1087 = vmatprep.mubr.msk.bf16.mxu0 %vm1242_vm0, %v1241_v0  ;;  %1139 = vmatprep.mubr.msk.bf16.mxu1 %vm1242_vm0, %v1241_v0 }
  0x6c   :  { %1088 = vmatmul.mubr.msk.bf16.gmra.mrb[32].mxu0 %vm238_vm1, %v1174_v18  ;;  %1140 = vmatmul.mubr.msk.bf16.gmra.mrb[32].mxu1 %vm238_vm1, %v1185_v19 }
  0x6d   :  { %1091 = vmatprep.mubr.msk.bf16.mxu0 %vm1242_vm0, %v1241_v0  ;;  %1143 = vmatprep.mubr.msk.bf16.mxu1 %vm1242_vm0, %v1241_v0 }
  0x74   :  { %1092 = vmatmul.mubr.msk.bf16.gmra.mrb[36].mxu0 %vm238_vm1, %v1176_v20  ;;  %1144 = vmatmul.mubr.msk.bf16.gmra.mrb[36].mxu1 %vm238_vm1, %v1186_v21 }
  0x75   :  { %1095 = vmatprep.mubr.msk.bf16.mxu0 %vm1242_vm0, %v1241_v0  ;;  %1147 = vmatprep.mubr.msk.bf16.mxu1 %vm1242_vm0, %v1241_v0 }
  0x7c   :  { %1096 = vmatmul.mubr.msk.bf16.gmra.mrb[40].mxu0 %vm238_vm1, %v1178_v22  ;;  %1148 = vmatmul.mubr.msk.bf16.gmra.mrb[40].mxu1 %vm238_vm1, %v1187_v23 }
  0x7d   :  { %1099 = vmatprep.mubr.msk.bf16.mxu0 %vm1242_vm0, %v1241_v0  ;;  %1151 = vmatprep.mubr.msk.bf16.mxu1 %vm1242_vm0, %v1241_v0 }
  0x84   :  { %1100 = vmatmul.mubr.msk.bf16.gmra.mrb[44].mxu0 %vm238_vm1, %v1180_v24  ;;  %1152 = vmatmul.mubr.msk.bf16.gmra.mrb[44].mxu1 %vm238_vm1, %v1188_v25 }
  0x85   :  { %1103 = vmatprep.mubr.msk.bf16.mxu0 %vm1242_vm0, %v1241_v0 }
  0x8c   :  { %1104 = vmatmul.mubr.msk.bf16.gmra.mrb[48].mxu0 %vm238_vm1, %v1182_v26 }
  0xff   :  { %v348_v28 = vpop.f32.mrb[0].mxu0  ;;  %v452_v37 = vpop.f32.mrb[0].mxu1 }
 0x100   :  { %v349_v29 = vadd.f32 %v1448_v27, %v348_v28  ;;  %v1057_v30 = vpop.f32.mrb[1].mxu0  ;;  %v1459_v38 = vadd.f32 %v1448_v27, %v452_v37  ;;  %v1109_v39 = vpop.f32.mrb[1].mxu1 }
 0x101   :  { %v351_v31 = vpop.f32.mrb[2].mxu0  ;;  %v455_v41 = vpop.f32.mrb[2].mxu1 }
 0x102   :  { %547 = vst [vmem:[%s1797_s3] sm:$0xff] %v349_v29  ;;  %v352_v32 = vadd.f32 %v1448_v27, %v351_v31  ;;  %v1058_v33 = vpop.f32.mrb[3].mxu0  ;;  %v855_v34 = vmul.f32 %v349_v29, %v349_v29  ;;  %573 = vst [vmem:[%s1797_s3 + $0xd0] sm:$0xff] %v1459_v38  ;;  %v1466_v43 = vadd.f32 %v1448_v27, %v455_v41  ;;  %v1110_v44 = vpop.f32.mrb[3].mxu1 }
 0x104   :  { %548 = vst [vmem:[%s1797_s3 + $0x8] sm:$0xff] %v352_v32  ;;  %v800_v35 = vadd.f32 %v352_v32, %v349_v29  ;;  %v856_v36 = vmul.f32 %v352_v32, %v352_v32  ;;  %574 = vst [vmem:[%s1797_s3 + $0xd8] sm:$0xff] %v1466_v43 }
 0x106   :  { %v905_v40 = vadd.f32 %v856_v36, %v855_v34 }
 0x107   :  { %v356_v42 = vpop.f32.mrb[4].mxu0  ;;  %v460_v55 = vpop.f32.mrb[4].mxu1 }
 0x108   :  { %v357_v45 = vadd.f32 %v1448_v27, %v356_v42  ;;  %v1061_v46 = vpop.f32.mrb[5].mxu0  ;;  %v1481_v56 = vadd.f32 %v1448_v27, %v460_v55  ;;  %v1113_v57 = vpop.f32.mrb[5].mxu1 }
 0x109   :  { %v359_v47 = vpop.f32.mrb[6].mxu0  ;;  %v463_v59 = vpop.f32.mrb[6].mxu1 }
 0x10a   :  { %549 = vst [vmem:[%s1797_s3 + $0x10] sm:$0xff] %v357_v45  ;;  %v801_v48 = vadd.f32 %v800_v35, %v357_v45  ;;  %v857_v49 = vmul.f32 %v357_v45, %v357_v45  ;;  %v360_v50 = vadd.f32 %v1448_v27, %v359_v47  ;;  %v1062_v51 = vpop.f32.mrb[7].mxu0  ;;  %575 = vst [vmem:[%s1797_s3 + $0xe0] sm:$0xff] %v1481_v56  ;;  %v1114_v62 = vpop.f32.mrb[7].mxu1 }
 0x10b   :  { %v1488_v61 = vadd.f32 %v1448_v27, %v463_v59 }
 0x10c   :  { %v906_v52 = vadd.f32 %v905_v40, %v857_v49  ;;  %550 = vst [vmem:[%s1797_s3 + $0x18] sm:$0xff] %v360_v50  ;;  %v802_v53 = vadd.f32 %v801_v48, %v360_v50  ;;  %v858_v54 = vmul.f32 %v360_v50, %v360_v50 }
 0x10d   :  { %576 = vst [vmem:[%s1797_s3 + $0xe8] sm:$0xff] %v1488_v61 }
 0x10e   :  { %v907_v58 = vadd.f32 %v906_v52, %v858_v54 }
 0x10f   :  { %v364_v60 = vpop.f32.mrb[8].mxu0  ;;  %v468_v9 = vpop.f32.mrb[8].mxu1 }
 0x110   :  { %v365_v63 = vadd.f32 %v1448_v27, %v364_v60  ;;  %v1065_v0 = vpop.f32.mrb[9].mxu0  ;;  %v1503_v10 = vadd.f32 %v1448_v27, %v468_v9  ;;  %v1117_v11 = vpop.f32.mrb[9].mxu1 }
 0x111   :  { %v367_v1 = vpop.f32.mrb[10].mxu0  ;;  %v471_v13 = vpop.f32.mrb[10].mxu1 }
 0x112   :  { %551 = vst [vmem:[%s1797_s3 + $0x20] sm:$0xff] %v365_v63  ;;  %v803_v2 = vadd.f32 %v802_v53, %v365_v63  ;;  %v859_v3 = vmul.f32 %v365_v63, %v365_v63  ;;  %v368_v4 = vadd.f32 %v1448_v27, %v367_v1  ;;  %v1066_v5 = vpop.f32.mrb[11].mxu0  ;;  %577 = vst [vmem:[%s1797_s3 + $0xf0] sm:$0xff] %v1503_v10  ;;  %v1118_v16 = vpop.f32.mrb[11].mxu1 }
 0x113   :  { %v1510_v15 = vadd.f32 %v1448_v27, %v471_v13 }
 0x114   :  { %v908_v6 = vadd.f32 %v907_v58, %v859_v3  ;;  %552 = vst [vmem:[%s1797_s3 + $0x28] sm:$0xff] %v368_v4  ;;  %v804_v7 = vadd.f32 %v803_v2, %v368_v4  ;;  %v860_v8 = vmul.f32 %v368_v4, %v368_v4 }
 0x115   :  { %578 = vst [vmem:[%s1797_s3 + $0xf8] sm:$0xff] %v1510_v15 }
 0x116   :  { %v909_v12 = vadd.f32 %v908_v6, %v860_v8 }
 0x117   :  { %v372_v14 = vpop.f32.mrb[12].mxu0  ;;  %v476_v28 = vpop.f32.mrb[12].mxu1 }
 0x118   :  { %v373_v17 = vadd.f32 %v1448_v27, %v372_v14  ;;  %v1069_v18 = vpop.f32.mrb[13].mxu0  ;;  %v1525_v29 = vadd.f32 %v1448_v27, %v476_v28  ;;  %v1121_v30 = vpop.f32.mrb[13].mxu1 }
 0x119   :  { %v375_v19 = vpop.f32.mrb[14].mxu0  ;;  %v479_v32 = vpop.f32.mrb[14].mxu1 }
 0x11a   :  { %553 = vst [vmem:[%s1797_s3 + $0x30] sm:$0xff] %v373_v17  ;;  %v805_v20 = vadd.f32 %v804_v7, %v373_v17  ;;  %v861_v21 = vmul.f32 %v373_v17, %v373_v17  ;;  %v376_v22 = vadd.f32 %v1448_v27, %v375_v19  ;;  %v1070_v23 = vpop.f32.mrb[15].mxu0  ;;  %579 = vst [vmem:[%s1797_s3 + $0x100] sm:$0xff] %v1525_v29  ;;  %v1122_v35 = vpop.f32.mrb[15].mxu1 }
 0x11b   :  { %v1532_v34 = vadd.f32 %v1448_v27, %v479_v32 }
 0x11c   :  { %v910_v24 = vadd.f32 %v909_v12, %v861_v21  ;;  %554 = vst [vmem:[%s1797_s3 + $0x38] sm:$0xff] %v376_v22  ;;  %v806_v25 = vadd.f32 %v805_v20, %v376_v22  ;;  %v862_v26 = vmul.f32 %v376_v22, %v376_v22 }
 0x11d   :  { %580 = vst [vmem:[%s1797_s3 + $0x108] sm:$0xff] %v1532_v34 }
 0x11e   :  { %v911_v31 = vadd.f32 %v910_v24, %v862_v26 }
 0x11f   :  { %v380_v33 = vpop.f32.mrb[16].mxu0  ;;  %v484_v48 = vpop.f32.mrb[16].mxu1 }
 0x120   :  { %v381_v36 = vadd.f32 %v1448_v27, %v380_v33  ;;  %v1073_v37 = vpop.f32.mrb[17].mxu0  ;;  %v1547_v49 = vadd.f32 %v1448_v27, %v484_v48  ;;  %v1125_v50 = vpop.f32.mrb[17].mxu1 }
 0x121   :  { %v383_v39 = vpop.f32.mrb[18].mxu0  ;;  %v487_v52 = vpop.f32.mrb[18].mxu1 }
 0x122   :  { %555 = vst [vmem:[%s1797_s3 + $0x40] sm:$0xff] %v381_v36  ;;  %v807_v40 = vadd.f32 %v806_v25, %v381_v36  ;;  %v863_v41 = vmul.f32 %v381_v36, %v381_v36  ;;  %v384_v42 = vadd.f32 %v1448_v27, %v383_v39  ;;  %v1074_v44 = vpop.f32.mrb[19].mxu0  ;;  %581 = vst [vmem:[%s1797_s3 + $0x110] sm:$0xff] %v1547_v49  ;;  %v1126_v55 = vpop.f32.mrb[19].mxu1 }
 0x123   :  { %v1554_v54 = vadd.f32 %v1448_v27, %v487_v52 }
 0x124   :  { %v912_v45 = vadd.f32 %v911_v31, %v863_v41  ;;  %556 = vst [vmem:[%s1797_s3 + $0x48] sm:$0xff] %v384_v42  ;;  %v808_v46 = vadd.f32 %v807_v40, %v384_v42  ;;  %v864_v47 = vmul.f32 %v384_v42, %v384_v42 }
 0x125   :  { %582 = vst [vmem:[%s1797_s3 + $0x118] sm:$0xff] %v1554_v54 }
 0x126   :  { %v913_v51 = vadd.f32 %v912_v45, %v864_v47 }
 0x127   :  { %v388_v53 = vpop.f32.mrb[20].mxu0  ;;  %v492_v4 = vpop.f32.mrb[20].mxu1 }
 0x128   :  { %v389_v57 = vadd.f32 %v1448_v27, %v388_v53  ;;  %v1077_v58 = vpop.f32.mrb[21].mxu0  ;;  %v1569_v5 = vadd.f32 %v1448_v27, %v492_v4  ;;  %v1129_v6 = vpop.f32.mrb[21].mxu1 }
 0x129   :  { %v391_v59 = vpop.f32.mrb[22].mxu0  ;;  %v495_v8 = vpop.f32.mrb[22].mxu1 }
 0x12a   :  { %557 = vst [vmem:[%s1797_s3 + $0x50] sm:$0xff] %v389_v57  ;;  %v809_v60 = vadd.f32 %v808_v46, %v389_v57  ;;  %v865_v62 = vmul.f32 %v389_v57, %v389_v57  ;;  %v392_v63 = vadd.f32 %v1448_v27, %v391_v59  ;;  %v1078_v0 = vpop.f32.mrb[23].mxu0  ;;  %583 = vst [vmem:[%s1797_s3 + $0x120] sm:$0xff] %v1569_v5  ;;  %v1130_v12 = vpop.f32.mrb[23].mxu1 }
 0x12b   :  { %v1576_v11 = vadd.f32 %v1448_v27, %v495_v8 }
 0x12c   :  { %v914_v1 = vadd.f32 %v913_v51, %v865_v62  ;;  %558 = vst [vmem:[%s1797_s3 + $0x58] sm:$0xff] %v392_v63  ;;  %v810_v2 = vadd.f32 %v809_v60, %v392_v63  ;;  %v866_v3 = vmul.f32 %v392_v63, %v392_v63 }
 0x12d   :  { %584 = vst [vmem:[%s1797_s3 + $0x128] sm:$0xff] %v1576_v11 }
 0x12e   :  { %v915_v7 = vadd.f32 %v914_v1, %v866_v3 }
 0x12f   :  { %v396_v9 = vpop.f32.mrb[24].mxu0  ;;  %v500_v24 = vpop.f32.mrb[24].mxu1 }
 0x130   :  { %v397_v13 = vadd.f32 %v1448_v27, %v396_v9  ;;  %v1081_v14 = vpop.f32.mrb[25].mxu0  ;;  %v1591_v25 = vadd.f32 %v1448_v27, %v500_v24  ;;  %v1133_v26 = vpop.f32.mrb[25].mxu1 }
 0x131   :  { %v399_v16 = vpop.f32.mrb[26].mxu0  ;;  %v503_v30 = vpop.f32.mrb[26].mxu1 }
 0x132   :  { %559 = vst [vmem:[%s1797_s3 + $0x60] sm:$0xff] %v397_v13  ;;  %v811_v17 = vadd.f32 %v810_v2, %v397_v13  ;;  %v867_v18 = vmul.f32 %v397_v13, %v397_v13  ;;  %v400_v19 = vadd.f32 %v1448_v27, %v399_v16  ;;  %v1082_v20 = vpop.f32.mrb[27].mxu0  ;;  %585 = vst [vmem:[%s1797_s3 + $0x130] sm:$0xff] %v1591_v25  ;;  %v1134_v33 = vpop.f32.mrb[27].mxu1 }
 0x133   :  { %v1598_v32 = vadd.f32 %v1448_v27, %v503_v30 }
 0x134   :  { %v916_v21 = vadd.f32 %v915_v7, %v867_v18  ;;  %560 = vst [vmem:[%s1797_s3 + $0x68] sm:$0xff] %v400_v19  ;;  %v812_v22 = vadd.f32 %v811_v17, %v400_v19  ;;  %v868_v23 = vmul.f32 %v400_v19, %v400_v19 }
 0x135   :  { %586 = vst [vmem:[%s1797_s3 + $0x138] sm:$0xff] %v1598_v32 }
 0x136   :  { %v917_v28 = vadd.f32 %v916_v21, %v868_v23 }
 0x137   :  { %v404_v31 = vpop.f32.mrb[28].mxu0  ;;  %v508_v47 = vpop.f32.mrb[28].mxu1 }
 0x138   :  { %v405_v35 = vadd.f32 %v1448_v27, %v404_v31  ;;  %v1085_v36 = vpop.f32.mrb[29].mxu0  ;;  %v1613_v48 = vadd.f32 %v1448_v27, %v508_v47  ;;  %v1137_v50 = vpop.f32.mrb[29].mxu1 }
 0x139   :  { %v407_v37 = vpop.f32.mrb[30].mxu0  ;;  %v511_v52 = vpop.f32.mrb[30].mxu1 }
 0x13a   :  { %561 = vst [vmem:[%s1797_s3 + $0x70] sm:$0xff] %v405_v35  ;;  %v813_v39 = vadd.f32 %v812_v22, %v405_v35  ;;  %v869_v40 = vmul.f32 %v405_v35, %v405_v35  ;;  %v408_v41 = vadd.f32 %v1448_v27, %v407_v37  ;;  %v1086_v42 = vpop.f32.mrb[31].mxu0  ;;  %587 = vst [vmem:[%s1797_s3 + $0x140] sm:$0xff] %v1613_v48  ;;  %v1138_v57 = vpop.f32.mrb[31].mxu1 }
 0x13b   :  { %v1620_v55 = vadd.f32 %v1448_v27, %v511_v52 }
 0x13c   :  { %v918_v44 = vadd.f32 %v917_v28, %v869_v40  ;;  %562 = vst [vmem:[%s1797_s3 + $0x78] sm:$0xff] %v408_v41  ;;  %v814_v45 = vadd.f32 %v813_v39, %v408_v41  ;;  %v870_v46 = vmul.f32 %v408_v41, %v408_v41 }
 0x13d   :  { %588 = vst [vmem:[%s1797_s3 + $0x148] sm:$0xff] %v1620_v55 }
 0x13e   :  { %v919_v51 = vadd.f32 %v918_v44, %v870_v46 }
 0x13f   :  { %v412_v53 = vpop.f32.mrb[32].mxu0  ;;  %v516_v6 = vpop.f32.mrb[32].mxu1 }
 0x140   :  { %v413_v58 = vadd.f32 %v1448_v27, %v412_v53  ;;  %v1089_v59 = vpop.f32.mrb[33].mxu0  ;;  %v1635_v7 = vadd.f32 %v1448_v27, %v516_v6  ;;  %v1141_v8 = vpop.f32.mrb[33].mxu1 }
 0x141   :  { %v415_v60 = vpop.f32.mrb[34].mxu0  ;;  %v519_v12 = vpop.f32.mrb[34].mxu1 }
 0x142   :  { %563 = vst [vmem:[%s1797_s3 + $0x80] sm:$0xff] %v413_v58  ;;  %v815_v62 = vadd.f32 %v814_v45, %v413_v58  ;;  %v871_v63 = vmul.f32 %v413_v58, %v413_v58  ;;  %v416_v0 = vadd.f32 %v1448_v27, %v415_v60  ;;  %v1090_v1 = vpop.f32.mrb[35].mxu0  ;;  %589 = vst [vmem:[%s1797_s3 + $0x150] sm:$0xff] %v1635_v7  ;;  %v1142_v16 = vpop.f32.mrb[35].mxu1 }
 0x143   :  { %v1642_v14 = vadd.f32 %v1448_v27, %v519_v12 }
 0x144   :  { %v920_v2 = vadd.f32 %v919_v51, %v871_v63  ;;  %564 = vst [vmem:[%s1797_s3 + $0x88] sm:$0xff] %v416_v0  ;;  %v816_v3 = vadd.f32 %v815_v62, %v416_v0  ;;  %v872_v4 = vmul.f32 %v416_v0, %v416_v0 }
 0x145   :  { %590 = vst [vmem:[%s1797_s3 + $0x158] sm:$0xff] %v1642_v14 }
 0x146   :  { %v921_v9 = vadd.f32 %v920_v2, %v872_v4 }
 0x147   :  { %v420_v13 = vpop.f32.mrb[36].mxu0  ;;  %v524_v30 = vpop.f32.mrb[36].mxu1 }
 0x148   :  { %v421_v17 = vadd.f32 %v1448_v27, %v420_v13  ;;  %v1093_v18 = vpop.f32.mrb[37].mxu0  ;;  %v1657_v31 = vadd.f32 %v1448_v27, %v524_v30  ;;  %v1145_v33 = vpop.f32.mrb[37].mxu1 }
 0x149   :  { %v423_v19 = vpop.f32.mrb[38].mxu0  ;;  %v527_v36 = vpop.f32.mrb[38].mxu1 }
 0x14a   :  { %565 = vst [vmem:[%s1797_s3 + $0x90] sm:$0xff] %v421_v17  ;;  %v817_v20 = vadd.f32 %v816_v3, %v421_v17  ;;  %v873_v21 = vmul.f32 %v421_v17, %v421_v17  ;;  %v424_v22 = vadd.f32 %v1448_v27, %v423_v19  ;;  %v1094_v23 = vpop.f32.mrb[39].mxu0  ;;  %591 = vst [vmem:[%s1797_s3 + $0x160] sm:$0xff] %v1657_v31  ;;  %v1146_v40 = vpop.f32.mrb[39].mxu1 }
 0x14b   :  { %v1664_v39 = vadd.f32 %v1448_v27, %v527_v36 }
 0x14c   :  { %v922_v24 = vadd.f32 %v921_v9, %v873_v21  ;;  %566 = vst [vmem:[%s1797_s3 + $0x98] sm:$0xff] %v424_v22  ;;  %v818_v26 = vadd.f32 %v817_v20, %v424_v22  ;;  %v874_v28 = vmul.f32 %v424_v22, %v424_v22 }
 0x14d   :  { %592 = vst [vmem:[%s1797_s3 + $0x168] sm:$0xff] %v1664_v39 }
 0x14e   :  { %v923_v35 = vadd.f32 %v922_v24, %v874_v28 }
 0x14f   :  { %v428_v37 = vpop.f32.mrb[40].mxu0  ;;  %v532_v57 = vpop.f32.mrb[40].mxu1 }
 0x150   :  { %v429_v41 = vadd.f32 %v1448_v27, %v428_v37  ;;  %v1097_v42 = vpop.f32.mrb[41].mxu0  ;;  %v1679_v58 = vadd.f32 %v1448_v27, %v532_v57  ;;  %v1149_v59 = vpop.f32.mrb[41].mxu1 }
 0x151   :  { %v431_v44 = vpop.f32.mrb[42].mxu0  ;;  %v535_v62 = vpop.f32.mrb[42].mxu1  ;;  %v884_v59 = vmul.f32 %v1488_v61, %v1488_v61 }
 0x152   :  { %567 = vst [vmem:[%s1797_s3 + $0xa0] sm:$0xff] %v429_v41  ;;  %v819_v45 = vadd.f32 %v818_v26, %v429_v41  ;;  %v875_v46 = vmul.f32 %v429_v41, %v429_v41  ;;  %v432_v47 = vadd.f32 %v1448_v27, %v431_v44  ;;  %v1098_v50 = vpop.f32.mrb[43].mxu0  ;;  %593 = vst [vmem:[%s1797_s3 + $0x170] sm:$0xff] %v1679_v58  ;;  %v1150_v1 = vpop.f32.mrb[43].mxu1 }
 0x153   :  { %v1686_v0 = vadd.f32 %v1448_v27, %v535_v62  ;;  %v882_v50 = vmul.f32 %v1466_v43, %v1466_v43 }
 0x154   :  { %v924_v51 = vadd.f32 %v923_v35, %v875_v46  ;;  %568 = vst [vmem:[%s1797_s3 + $0xa8] sm:$0xff] %v432_v47  ;;  %v820_v52 = vadd.f32 %v819_v45, %v432_v47  ;;  %v876_v53 = vmul.f32 %v432_v47, %v432_v47  ;;  %v881_v45 = vmul.f32 %v1459_v38, %v1459_v38 }
 0x155   :  { %594 = vst [vmem:[%s1797_s3 + $0x178] sm:$0xff] %v1686_v0 }
 0x156   :  { %v925_v60 = vadd.f32 %v924_v51, %v876_v53 }
 0x157   :  { %v436_v63 = vpop.f32.mrb[44].mxu0  ;;  %v540_v18 = vpop.f32.mrb[44].mxu1 }
 0x158   :  { %v437_v2 = vadd.f32 %v1448_v27, %v436_v63  ;;  %v1101_v3 = vpop.f32.mrb[45].mxu0  ;;  %v1701_v19 = vadd.f32 %v1448_v27, %v540_v18  ;;  %v1153_v20 = vpop.f32.mrb[45].mxu1 }
 0x159   :  { %v439_v4 = vpop.f32.mrb[46].mxu0  ;;  %v543_v22 = vpop.f32.mrb[46].mxu1 }
 0x15a   :  { %569 = vst [vmem:[%s1797_s3 + $0xb0] sm:$0xff] %v437_v2  ;;  %v821_v6 = vadd.f32 %v820_v52, %v437_v2  ;;  %v877_v8 = vmul.f32 %v437_v2, %v437_v2  ;;  %v440_v9 = vadd.f32 %v1448_v27, %v439_v4  ;;  %v1102_v12 = vpop.f32.mrb[47].mxu0  ;;  %595 = vst [vmem:[%s1797_s3 + $0x180] sm:$0xff] %v1701_v19  ;;  %v1154_v26 = vpop.f32.mrb[47].mxu1 }
 0x15b   :  { %v544_v24 = vadd.f32 %v1448_v27, %v543_v22  ;;  %v883_v52 = vmul.f32 %v1481_v56, %v1481_v56 }
 0x15c   :  { %v926_v13 = vadd.f32 %v925_v60, %v877_v8  ;;  %570 = vst [vmem:[%s1797_s3 + $0xb8] sm:$0xff] %v440_v9  ;;  %v822_v16 = vadd.f32 %v821_v6, %v440_v9  ;;  %v878_v17 = vmul.f32 %v440_v9, %v440_v9 }
 0x15d   :  { %596 = vst [vmem:[%s1797_s3 + $0x188] sm:$0xff] %v544_v24 }
 0x15e   :  { %v927_v21 = vadd.f32 %v926_v13, %v878_v17 }
 0x15f   :  { %v444_v23 = vpop.f32.mrb[48].mxu0 }
 0x160   :  { %v445_v28 = vadd.f32 %v1448_v27, %v444_v23  ;;  %v1105_v30 = vpop.f32.mrb[49].mxu0  ;;  %v893_v23 = vmul.f32 %v1591_v25, %v1591_v25 }
 0x161   :  { %v447_v33 = vpop.f32.mrb[50].mxu0 }
 0x162   :  { %571 = vst [vmem:[%s1797_s3 + $0xc0] sm:$0xff] %v445_v28  ;;  %v823_v35 = vadd.f32 %v822_v16, %v445_v28  ;;  %v879_v36 = vmul.f32 %v445_v28, %v445_v28  ;;  %v448_v37 = vadd.f32 %v1448_v27, %v447_v33  ;;  %v1106_v40 = vpop.f32.mrb[51].mxu0  ;;  %v894_v28 = vmul.f32 %v1598_v32, %v1598_v32 }
 0x163   :  { %v895_v33 = vmul.f32 %v1613_v48, %v1613_v48  ;;  %v897_v40 = vmul.f32 %v1635_v7, %v1635_v7 }
 0x164   :  { %v928_v41 = vadd.f32 %v927_v21, %v879_v36  ;;  %572 = vst [vmem:[%s1797_s3 + $0xc8] sm:$0xff] %v448_v37  ;;  %v824_v42 = vadd.f32 %v823_v35, %v448_v37  ;;  %v880_v44 = vmul.f32 %v448_v37, %v448_v37  ;;  %v896_v36 = vmul.f32 %v1620_v55, %v1620_v55 }
 0x166   :  { %v825_v46 = vadd.f32 %v824_v42, %v1459_v38  ;;  %v929_v47 = vadd.f32 %v928_v41, %v880_v44  ;;  %v885_v38 = vmul.f32 %v1503_v10, %v1503_v10  ;;  %v898_v42 = vmul.f32 %v1642_v14, %v1642_v14 }
 0x168   :  { %v826_v51 = vadd.f32 %v825_v46, %v1466_v43  ;;  %v930_v27 = vadd.f32 %v929_v47, %v881_v45  ;;  %v886_v43 = vmul.f32 %v1510_v15, %v1510_v15  ;;  %v899_v45 = vmul.f32 %v1657_v31, %v1657_v31 }
 0x169   :  { %v900_v47 = vmul.f32 %v1664_v39, %v1664_v39 }
 0x16a   :  { %v827_v53 = vadd.f32 %v826_v51, %v1481_v56  ;;  %v931_v57 = vadd.f32 %v930_v27, %v882_v50  ;;  %v887_v56 = vmul.f32 %v1525_v29, %v1525_v29  ;;  %v901_v51 = vmul.f32 %v1679_v58, %v1679_v58 }
 0x16c   :  { %v828_v60 = vadd.f32 %v827_v53, %v1488_v61  ;;  %v932_v62 = vadd.f32 %v931_v57, %v883_v52  ;;  %v888_v61 = vmul.f32 %v1532_v34, %v1532_v34  ;;  %v902_v52 = vmul.f32 %v1686_v0, %v1686_v0 }
 0x16e   :  { %v829_v63 = vadd.f32 %v828_v60, %v1503_v10  ;;  %v933_v1 = vadd.f32 %v932_v62, %v884_v59  ;;  %v889_v10 = vmul.f32 %v1547_v49, %v1547_v49 }
 0x170   :  { %v830_v2 = vadd.f32 %v829_v63, %v1510_v15  ;;  %v934_v3 = vadd.f32 %v933_v1, %v885_v38  ;;  %v890_v15 = vmul.f32 %v1554_v54, %v1554_v54 }
 0x172   :  { %v935_v4 = vadd.f32 %v934_v3, %v886_v43  ;;  %v831_v6 = vadd.f32 %v830_v2, %v1525_v29  ;;  %v891_v29 = vmul.f32 %v1569_v5, %v1569_v5 }
 0x174   :  { %v832_v8 = vadd.f32 %v831_v6, %v1532_v34  ;;  %v936_v9 = vadd.f32 %v935_v4, %v887_v56  ;;  %v892_v34 = vmul.f32 %v1576_v11, %v1576_v11  ;;  %v960_v4 = vld [vmem:[%s1798_s4] sm:$0x3] }
 0x176   :  { %v833_v12 = vadd.f32 %v832_v8, %v1547_v49  ;;  %v937_v13 = vadd.f32 %v936_v9, %v888_v61 }
 0x178   :  { %v834_v16 = vadd.f32 %v833_v12, %v1554_v54  ;;  %v938_v17 = vadd.f32 %v937_v13, %v889_v10 }
 0x17a   :  { %v835_v18 = vadd.f32 %v834_v16, %v1569_v5  ;;  %v939_v20 = vadd.f32 %v938_v17, %v890_v15 }
 0x17c   :  { %v836_v21 = vadd.f32 %v835_v18, %v1576_v11  ;;  %v940_v22 = vadd.f32 %v939_v20, %v891_v29 }
 0x17e   :  { %v837_v49 = vadd.f32 %v836_v21, %v1591_v25  ;;  %v941_v24 = vadd.f32 %v940_v22, %v892_v34 }
 0x180   :  { %v942_v54 = vadd.f32 %v941_v24, %v893_v23  ;;  %v838_v26 = vadd.f32 %v837_v49, %v1598_v32 }
 0x182   :  { %v943_v5 = vadd.f32 %v942_v54, %v894_v28  ;;  %v839_v30 = vadd.f32 %v838_v26, %v1613_v48 }
 0x184   :  { %v944_v11 = vadd.f32 %v943_v5, %v895_v33  ;;  %v840_v35 = vadd.f32 %v839_v30, %v1620_v55 }
 0x186   :  { %v945_v25 = vadd.f32 %v944_v11, %v896_v36  ;;  %v841_v37 = vadd.f32 %v840_v35, %v1635_v7 }
 0x188   :  { %v946_v41 = vadd.f32 %v945_v25, %v897_v40  ;;  %v842_v32 = vadd.f32 %v841_v37, %v1642_v14 }
 0x18a   :  { %v947_v44 = vadd.f32 %v946_v41, %v898_v42  ;;  %v843_v48 = vadd.f32 %v842_v32, %v1657_v31  ;;  %v903_v31 = vmul.f32 %v1701_v19, %v1701_v19 }
 0x18c   :  { %v948_v46 = vadd.f32 %v947_v44, %v899_v45  ;;  %v844_v55 = vadd.f32 %v843_v48, %v1664_v39 }
 0x18e   :  { %v949_v50 = vadd.f32 %v948_v46, %v900_v47  ;;  %v845_v7 = vadd.f32 %v844_v55, %v1679_v58 }
 0x190   :  { %v950_v27 = vadd.f32 %v949_v50, %v901_v51  ;;  %v846_v14 = vadd.f32 %v845_v7, %v1686_v0 }
 0x192   :  { %v951_v53 = vadd.f32 %v950_v27, %v902_v52  ;;  %v847_v57 = vadd.f32 %v846_v14, %v1701_v19 }
 0x194   :  { %v849_v59 = vrot.slane %v847_v57, 4  ;;  %v952_v39 = vadd.f32 %v951_v53, %v903_v31 }
 0x196   :  { %v850_v60 = vadd.f32 %v849_v59, %v847_v57  ;;  %v954_v62 = vrot.slane %v952_v39, 4 }
 0x198   :  { %v851_v38 = vrot.slane %v850_v60, 2  ;;  %v955_v63 = vadd.f32 %v954_v62, %v952_v39 }
 0x19a   :  { %v852_v1 = vadd.f32 %v851_v38, %v850_v60  ;;  %v956_v58 = vrot.slane %v955_v63, 2 }
 0x19c   :  { %v853_v43 = vrot.slane %v852_v1, 1  ;;  %v957_v2 = vadd.f32 %v956_v58, %v955_v63 }
 0x19e   :  { %v958_v3 = vrot.slane %v957_v2, 1  ;;  %v854_v56 = vadd.f32 %v853_v43, %v852_v1 }
 0x1a0   :  { %v959_v0 = vadd.f32 %v958_v3, %v957_v2 }
 0x1a2   :  { %v962_v6 = vsel %vm961_vm2, %v854_v56, %v959_v0 }
 0x1a3   :  { %v963_v19 = vadd.f32 %v962_v6, %v960_v4 }
 0x1a5   :  { %964 = vst [vmem:[%s1798_s4] sm:$0x3] %v963_v19 }
 0x1a6   :  { %973 = vsyncpa [#allocation3], 1 }
 0x1a7   :  { %974 = vsyncpa [#allocation5], 1 }

// kernel: discriminator_forward.8
= control target key start
LH: loop header
LB: loop body
LE: loop exit
PB: predicated region body
PF: predicated region fallthrough
CT: control target
= control target key end

     0   :  { %v60_v7 = vlaneseq  ;;  %s581_s1 = inlined_call_operand.vmem [shape: f32[2,256], index: 1, kind: input, shape index: {}]   ;;  %s582_s2 = inlined_call_operand.vmem [shape: f32[1,256], index: 2, kind: input, shape index: {}]   ;;  %s583_s0 = inlined_call_operand.vmem [shape: f32[112,256], index: 0, kind: input, shape index: {}]   ;;  %s584_s3 = inlined_call_operand.vmem [shape: f32[1,256], index: 3, kind: input, shape index: {}]   ;;  %s585_s4 = inlined_call_operand.vmem [shape: bf16[112,256], index: 4, kind: output, shape index: {}]  }
   0x1   :  { %v17_v0 = vld [vmem:[%s581_s1] ss:$2 sm:$0x3]  ;;  %v323_v1 = vld [vmem:[%s581_s1 + $0x1] ss:$2 sm:$0x3] }
   0x2   :  { %v18_v2 = vmul.f32 0.010204081, %v17_v0  ;;  %v21_v3 = vmul.f32 0.010204081, %v323_v1  ;;  %v61_v8 = vshrl.u32 %v60_v7, 7  ;;  %v31_v15 = vld [vmem:[%s583_s0] sm:$0xff] }
   0x3   :  { %v24_v9 = vld [vmem:[%s582_s2] sm:$0x3]  ;;  %v32_v16 = vld [vmem:[%s583_s0 + $0x8] sm:$0xff]  ;;  %v33_v17 = vld [vmem:[%s583_s0 + $0x10] sm:$0xff] }
   0x4   :  { %v22_v4 = vmul.f32 %v18_v2, %v18_v2  ;;  %v62_v10 = vsub.s32 0, %v61_v8  ;;  %v66_v11 = vsub.s32 1, %v61_v8  ;;  %v28_v14 = vld [vmem:[%s584_s3] sm:$0x3]  ;;  %v34_v18 = vld [vmem:[%s583_s0 + $0x18] sm:$0xff]  ;;  %v36_v23 = vld [vmem:[%s583_s0 + $0x28] sm:$0xff] }
   0x5   :  { %v35_v22 = vld [vmem:[%s583_s0 + $0x20] sm:$0xff]  ;;  %v37_v24 = vld [vmem:[%s583_s0 + $0x30] sm:$0xff]  ;;  %v38_v25 = vld [vmem:[%s583_s0 + $0x38] sm:$0xff] }
   0x6   :  { %v23_v5 = vsub.f32 %v21_v3, %v22_v4  ;;  %v39_v26 = vld [vmem:[%s583_s0 + $0x40] sm:$0xff]  ;;  %v40_v27 = vld [vmem:[%s583_s0 + $0x48] sm:$0xff]  ;;  %v41_v32 = vld [vmem:[%s583_s0 + $0x50] sm:$0xff] }
   0x7   :  { %v42_v33 = vld [vmem:[%s583_s0 + $0x58] sm:$0xff]  ;;  %v43_v34 = vld [vmem:[%s583_s0 + $0x60] sm:$0xff] }
   0x8   :  { %v25_v6 = vadd.f32 1e-05, %v23_v5 }
   0xa   :  { %352 = vrsqrt.f32 %v25_v6 }
  0x14   :  { %v353_v12 = vpop.eup %352 }
  0x15   :  { %v27_v13 = vmul.f32 %v353_v12, %v24_v9 }
  0x17   :  { %v29_v19 = vmul.f32 %v27_v13, %v18_v2  ;;  %v403_v20 = vrot.slane %v27_v13, %v62_v10  ;;  %v405_v21 = vrot.slane %v27_v13, %v66_v11 }
  0x19   :  { %v30_v28 = vsub.f32 %v28_v14, %v29_v19  ;;  %v70_v29 = vmul.f32 %v403_v20, %v31_v15  ;;  %v71_v30 = vmul.f32 %v405_v21, %v32_v16  ;;  %v72_v31 = vmul.f32 %v403_v20, %v33_v17  ;;  %v44_v14 = vld [vmem:[%s583_s0 + $0x68] sm:$0xff] }
  0x1a   :  { %v73_v35 = vmul.f32 %v405_v21, %v34_v18  ;;  %v74_v36 = vmul.f32 %v403_v20, %v35_v22  ;;  %v75_v37 = vmul.f32 %v405_v21, %v36_v23  ;;  %v76_v38 = vmul.f32 %v403_v20, %v37_v24  ;;  %v45_v18 = vld [vmem:[%s583_s0 + $0x70] sm:$0xff] }
  0x1b   :  { %v441_v39 = vrot.slane %v30_v28, %v62_v10  ;;  %v443_v40 = vrot.slane %v30_v28, %v66_v11  ;;  %v77_v41 = vmul.f32 %v405_v21, %v38_v25  ;;  %v78_v42 = vmul.f32 %v403_v20, %v39_v26  ;;  %v47_v28 = vld [vmem:[%s583_s0 + $0x80] sm:$0xff] }
  0x1c   :  { %v79_v43 = vmul.f32 %v405_v21, %v40_v27  ;;  %v80_v44 = vmul.f32 %v403_v20, %v41_v32  ;;  %v81_v45 = vmul.f32 %v405_v21, %v42_v33  ;;  %v82_v46 = vmul.f32 %v403_v20, %v43_v34  ;;  %v46_v27 = vld [vmem:[%s583_s0 + $0x78] sm:$0xff]  ;;  %v49_v34 = vld [vmem:[%s583_s0 + $0x90] sm:$0xff] }
  0x1d   :  { %v109_v47 = vadd.f32 %v441_v39, %v70_v29  ;;  %v110_v48 = vadd.f32 %v443_v40, %v71_v30  ;;  %v111_v49 = vadd.f32 %v441_v39, %v72_v31  ;;  %v112_v50 = vadd.f32 %v443_v40, %v73_v35  ;;  %v48_v29 = vld [vmem:[%s583_s0 + $0x88] sm:$0xff] }
  0x1e   :  { %v113_v51 = vadd.f32 %v441_v39, %v74_v36  ;;  %v114_v52 = vadd.f32 %v443_v40, %v75_v37  ;;  %v115_v53 = vadd.f32 %v441_v39, %v76_v38  ;;  %v116_v54 = vadd.f32 %v443_v40, %v77_v41 }
  0x1f   :  { %vm137_vm0 = vcmp.ge.f32.partialorder %v109_v47, 0.0  ;;  %vm138_vm1 = vcmp.ge.f32.partialorder %v110_v48, 0.0  ;;  %v165_v55 = vmul.f32 0.2, %v109_v47  ;;  %v166_v56 = vmul.f32 0.2, %v110_v48 }
  0x20   :  { %vm139_vm2 = vcmp.ge.f32.partialorder %v111_v49, 0.0  ;;  %vm140_vm3 = vcmp.ge.f32.partialorder %v112_v50, 0.0  ;;  %v167_v57 = vmul.f32 0.2, %v111_v49  ;;  %v168_v58 = vmul.f32 0.2, %v112_v50 }
  0x21   :  { %v193_v59 = vsel %vm137_vm0, %v109_v47, %v165_v55  ;;  %v194_v60 = vsel %vm138_vm1, %v110_v48, %v166_v56  ;;  %vm141_vm4 = vcmp.ge.f32.partialorder %v113_v51, 0.0  ;;  %vm142_vm5 = vcmp.ge.f32.partialorder %v114_v52, 0.0 }
  0x22   :  { %v338_v61 = vpack.c.bf16 %v194_v60, %v193_v59  ;;  %v195_v62 = vsel %vm139_vm2, %v111_v49, %v167_v57  ;;  %v196_v63 = vsel %vm140_vm3, %v112_v50, %v168_v58  ;;  %v169_v0 = vmul.f32 0.2, %v113_v51  ;;  %v51_v58 = vld [vmem:[%s583_s0 + $0xa0] sm:$0xff] }
  0x23   :  { %v339_v1 = vpack.c.bf16 %v196_v63, %v195_v62  ;;  %v170_v2 = vmul.f32 0.2, %v114_v52  ;;  %vm143_vm6 = vcmp.ge.f32.partialorder %v115_v53, 0.0  ;;  %vm144_vm7 = vcmp.ge.f32.partialorder %v116_v54, 0.0 }
  0x24   :  { %305 = vst [vmem:[%s585_s4] sm:$0xff] %v338_v61  ;;  %v197_v3 = vsel %vm141_vm4, %v113_v51, %v169_v0  ;;  %v171_v4 = vmul.f32 0.2, %v115_v53  ;;  %v172_v5 = vmul.f32 0.2, %v116_v54  ;;  %v117_v6 = vadd.f32 %v441_v39, %v78_v42  ;;  %v52_v0 = vld [vmem:[%s583_s0 + $0xa8] sm:$0xff] }
  0x25   :  { %306 = vst [vmem:[%s585_s4 + $0x8] sm:$0xff] %v339_v1  ;;  %v198_v7 = vsel %vm142_vm5, %v114_v52, %v170_v2  ;;  %v118_v8 = vadd.f32 %v443_v40, %v79_v43  ;;  %v119_v9 = vadd.f32 %v441_v39, %v80_v44  ;;  %v120_v10 = vadd.f32 %v443_v40, %v81_v45  ;;  %v50_v44 = vld [vmem:[%s583_s0 + $0x98] sm:$0xff]  ;;  %v53_v1 = vld [vmem:[%s583_s0 + $0xb0] sm:$0xff] }
  0x26   :  { %v340_v11 = vpack.c.bf16 %v198_v7, %v197_v3  ;;  %v199_v12 = vsel %vm143_vm6, %v115_v53, %v171_v4  ;;  %v200_v13 = vsel %vm144_vm7, %v116_v54, %v172_v5  ;;  %vm145_vm8 = vcmp.ge.f32.partialorder %v117_v6, 0.0  ;;  %v54_v2 = vld [vmem:[%s583_s0 + $0xb8] sm:$0xff]  ;;  %v55_v7 = vld [vmem:[%s583_s0 + $0xc0] sm:$0xff] }
  0x27   :  { %v341_v15 = vpack.c.bf16 %v200_v13, %v199_v12  ;;  %vm146_vm9 = vcmp.ge.f32.partialorder %v118_v8, 0.0  ;;  %v173_v16 = vmul.f32 0.2, %v117_v6  ;;  %v174_v17 = vmul.f32 0.2, %v118_v8 }
  0x28   :  { %307 = vst [vmem:[%s585_s4 + $0x10] sm:$0xff] %v340_v11  ;;  %vm147_vm10 = vcmp.ge.f32.partialorder %v119_v9, 0.0  ;;  %vm148_vm11 = vcmp.ge.f32.partialorder %v120_v10, 0.0  ;;  %v175_v19 = vmul.f32 0.2, %v119_v9  ;;  %v83_v25 = vmul.f32 %v405_v21, %v44_v14 }
  0x29   :  { %v176_v22 = vmul.f32 0.2, %v120_v10  ;;  %308 = vst [vmem:[%s585_s4 + $0x18] sm:$0xff] %v341_v15  ;;  %v201_v23 = vsel %vm145_vm8, %v117_v6, %v173_v16  ;;  %v202_v24 = vsel %vm146_vm9, %v118_v8, %v174_v17  ;;  %v121_v26 = vadd.f32 %v441_v39, %v82_v46  ;;  %v56_v8 = vld [vmem:[%s583_s0 + $0xc8] sm:$0xff] }
  0x2a   :  { %v342_v30 = vpack.c.bf16 %v202_v24, %v201_v23  ;;  %v203_v31 = vsel %vm147_vm10, %v119_v9, %v175_v19  ;;  %v84_v33 = vmul.f32 %v403_v20, %v45_v18  ;;  %v122_v36 = vadd.f32 %v443_v40, %v83_v25  ;;  %v57_v9 = vld [vmem:[%s583_s0 + $0xd0] sm:$0xff] }
  0x2b   :  { %v204_v32 = vsel %vm148_vm11, %v120_v10, %v176_v22  ;;  %vm149_vm12 = vcmp.ge.f32.partialorder %v121_v26, 0.0  ;;  %v177_v37 = vmul.f32 0.2, %v121_v26  ;;  %v85_v38 = vmul.f32 %v405_v21, %v46_v27  ;;  %v58_v22 = vld [vmem:[%s583_s0 + $0xd8] sm:$0xff] }
  0x2c   :  { %v343_v35 = vpack.c.bf16 %v204_v32, %v203_v31  ;;  %309 = vst [vmem:[%s585_s4 + $0x20] sm:$0xff] %v342_v30  ;;  %v123_v41 = vadd.f32 %v441_v39, %v84_v33  ;;  %v86_v42 = vmul.f32 %v403_v20, %v47_v28  ;;  %v87_v43 = vmul.f32 %v405_v21, %v48_v29 }
  0x2d   :  { %vm150_vm13 = vcmp.ge.f32.partialorder %v122_v36, 0.0  ;;  %v178_v45 = vmul.f32 0.2, %v122_v36  ;;  %v205_v46 = vsel %vm149_vm12, %v121_v26, %v177_v37  ;;  %v88_v47 = vmul.f32 %v403_v20, %v49_v34 }
  0x2e   :  { %310 = vst [vmem:[%s585_s4 + $0x28] sm:$0xff] %v343_v35  ;;  %v124_v48 = vadd.f32 %v443_v40, %v85_v38  ;;  %vm151_vm14 = vcmp.ge.f32.partialorder %v123_v41, 0.0  ;;  %v179_v49 = vmul.f32 0.2, %v123_v41  ;;  %v125_v50 = vadd.f32 %v441_v39, %v86_v42 }
  0x2f   :  { %v206_v51 = vsel %vm150_vm13, %v122_v36, %v178_v45  ;;  %v126_v52 = vadd.f32 %v443_v40, %v87_v43  ;;  %v89_v53 = vmul.f32 %v405_v21, %v50_v44  ;;  %v127_v54 = vadd.f32 %v441_v39, %v88_v47 }
  0x30   :  { %v344_v55 = vpack.c.bf16 %v206_v51, %v205_v46  ;;  %vm152_vm15 = vcmp.ge.f32.partialorder %v124_v48, 0.0  ;;  %v180_v56 = vmul.f32 0.2, %v124_v48  ;;  %v207_v57 = vsel %vm151_vm14, %v123_v41, %v179_v49 }
  0x31   :  { %vm153_vm0 = vcmp.ge.f32.partialorder %v125_v50, 0.0  ;;  %vm154_vm1 = vcmp.ge.f32.partialorder %v126_v52, 0.0  ;;  %v181_v59 = vmul.f32 0.2, %v125_v50  ;;  %v182_v60 = vmul.f32 0.2, %v126_v52 }
  0x32   :  { %311 = vst [vmem:[%s585_s4 + $0x30] sm:$0xff] %v344_v55  ;;  %v208_v61 = vsel %vm152_vm15, %v124_v48, %v180_v56  ;;  %v128_v62 = vadd.f32 %v443_v40, %v89_v53  ;;  %vm155_vm2 = vcmp.ge.f32.partialorder %v127_v54, 0.0  ;;  %v183_v63 = vmul.f32 0.2, %v127_v54 }
  0x33   :  { %v345_v3 = vpack.c.bf16 %v208_v61, %v207_v57  ;;  %v209_v4 = vsel %vm153_vm0, %v125_v50, %v181_v59  ;;  %v210_v5 = vsel %vm154_vm1, %v126_v52, %v182_v60  ;;  %v90_v6 = vmul.f32 %v403_v20, %v51_v58 }
  0x34   :  { %v346_v10 = vpack.c.bf16 %v210_v5, %v209_v4  ;;  %vm156_vm3 = vcmp.ge.f32.partialorder %v128_v62, 0.0  ;;  %v184_v11 = vmul.f32 0.2, %v128_v62  ;;  %v211_v12 = vsel %vm155_vm2, %v127_v54, %v183_v63 }
  0x35   :  { %312 = vst [vmem:[%s585_s4 + $0x38] sm:$0xff] %v345_v3  ;;  %v91_v13 = vmul.f32 %v405_v21, %v52_v0  ;;  %v129_v14 = vadd.f32 %v441_v39, %v90_v6  ;;  %v92_v15 = vmul.f32 %v403_v20, %v53_v1  ;;  %v93_v16 = vmul.f32 %v405_v21, %v54_v2 }
  0x36   :  { %313 = vst [vmem:[%s585_s4 + $0x40] sm:$0xff] %v346_v10  ;;  %v212_v17 = vsel %vm156_vm3, %v128_v62, %v184_v11  ;;  %v94_v18 = vmul.f32 %v403_v20, %v55_v7  ;;  %v95_v19 = vmul.f32 %v405_v21, %v56_v8  ;;  %v96_v23 = vmul.f32 %v403_v20, %v57_v9 }
  0x37   :  { %v347_v24 = vpack.c.bf16 %v212_v17, %v211_v12  ;;  %v130_v25 = vadd.f32 %v443_v40, %v91_v13  ;;  %vm157_vm4 = vcmp.ge.f32.partialorder %v129_v14, 0.0  ;;  %v185_v26 = vmul.f32 0.2, %v129_v14 }
  0x38   :  { %v131_v27 = vadd.f32 %v441_v39, %v92_v15  ;;  %v132_v28 = vadd.f32 %v443_v40, %v93_v16  ;;  %v133_v29 = vadd.f32 %v441_v39, %v94_v18  ;;  %v134_v30 = vadd.f32 %v443_v40, %v95_v19 }
  0x39   :  { %314 = vst [vmem:[%s585_s4 + $0x48] sm:$0xff] %v347_v24  ;;  %vm158_vm5 = vcmp.ge.f32.partialorder %v130_v25, 0.0  ;;  %v186_v31 = vmul.f32 0.2, %v130_v25  ;;  %v213_v20 = vsel %vm157_vm4, %v129_v14, %v185_v26  ;;  %v97_v32 = vmul.f32 %v405_v21, %v58_v22 }
  0x3a   :  { %vm159_vm6 = vcmp.ge.f32.partialorder %v131_v27, 0.0  ;;  %vm160_vm7 = vcmp.ge.f32.partialorder %v132_v28, 0.0  ;;  %v187_v33 = vmul.f32 0.2, %v131_v27  ;;  %v188_v34 = vmul.f32 0.2, %v132_v28 }
  0x3b   :  { %v214_v35 = vsel %vm158_vm5, %v130_v25, %v186_v31  ;;  %vm161_vm8 = vcmp.ge.f32.partialorder %v133_v29, 0.0  ;;  %vm162_vm9 = vcmp.ge.f32.partialorder %v134_v30, 0.0  ;;  %v189_v36 = vmul.f32 0.2, %v133_v29 }
  0x3c   :  { %v348_v37 = vpack.c.bf16 %v214_v35, %v213_v20  ;;  %v215_v38 = vsel %vm159_vm6, %v131_v27, %v187_v33  ;;  %v216_v41 = vsel %vm160_vm7, %v132_v28, %v188_v34  ;;  %v190_v42 = vmul.f32 0.2, %v134_v30 }
  0x3d   :  { %v349_v43 = vpack.c.bf16 %v216_v41, %v215_v38  ;;  %v217_v44 = vsel %vm161_vm8, %v133_v29, %v189_v36  ;;  %v135_v45 = vadd.f32 %v441_v39, %v96_v23  ;;  %v136_v46 = vadd.f32 %v443_v40, %v97_v32 }
  0x3e   :  { %315 = vst [vmem:[%s585_s4 + $0x50] sm:$0xff] %v348_v37  ;;  %v218_v21 = vsel %vm162_vm9, %v134_v30, %v190_v42 }
  0x3f   :  { %316 = vst [vmem:[%s585_s4 + $0x58] sm:$0xff] %v349_v43  ;;  %v350_v47 = vpack.c.bf16 %v218_v21, %v217_v44  ;;  %vm163_vm10 = vcmp.ge.f32.partialorder %v135_v45, 0.0  ;;  %vm164_vm11 = vcmp.ge.f32.partialorder %v136_v46, 0.0  ;;  %v191_v48 = vmul.f32 0.2, %v135_v45 }
  0x40   :  { %v192_v49 = vmul.f32 0.2, %v136_v46 }
  0x41   :  { %317 = vst [vmem:[%s585_s4 + $0x60] sm:$0xff] %v350_v47  ;;  %v219_v39 = vsel %vm163_vm10, %v135_v45, %v191_v48 }
  0x42   :  { %v220_v40 = vsel %vm164_vm11, %v136_v46, %v192_v49 }
  0x43   :  { %v351_v50 = vpack.c.bf16 %v220_v40, %v219_v39 }
  0x45   :  { %318 = vst [vmem:[%s585_s4 + $0x68] sm:$0xff] %v351_v50 }

// kernel: discriminator_forward.7
= control target key start
LH: loop header
LB: loop body
LE: loop exit
PB: predicated region body
PF: predicated region fallthrough
CT: control target
= control target key end

     0   :  { %vm3271_vm1 = vcmask 1040384   ;;  %s5540_s1 = inlined_call_operand.vmem [shape: bf16[2048,256], index: 1, kind: input, shape index: {}]   ;;  %s5541_s0 = inlined_call_operand.vmem [shape: bf16[112,2048], index: 0, kind: input, shape index: {}]   ;;  %s5542_s4 = inlined_call_operand.vmem [shape: f32[2,256], index: 4, kind: output, shape index: {1}]   ;;  %s5543_s2 = inlined_call_operand.vmem [shape: f32[1,256], index: 2, kind: input, shape index: {}]   ;;  %s5544_s3 = inlined_call_operand.vmem [shape: f32[112,256], index: 3, kind: output, shape index: {0}]  }
   0x1   :  { %v3889_v0 = vld [vmem:[%s5540_s1 + $0x4] ss:$8 sps:$4 sm:$0xff]   ;;  %v3893_v2 = vld [vmem:[%s5540_s1] ss:$8 sps:$4 sm:$0xff]   ;;  %v3895_v4 = vld [vmem:[%s5540_s1 + $0x14] ss:$8 sps:$4 sm:$0xff]  }
   0x2   :  { %v3891_v1 = vld [vmem:[%s5540_s1 + $0x404] ss:$8 sps:$4 sm:$0xff]   ;;  %2241 = vmatprep.subr.bf16.mxu1 %v3889_v0  ;;  %v3894_v3 = vld [vmem:[%s5540_s1 + $0x400] ss:$8 sps:$4 sm:$0xff]   ;;  %v3897_v5 = vld [vmem:[%s5540_s1 + $0x414] ss:$8 sps:$4 sm:$0xff]  }
   0x3   :  { %2653 = vmatprep.subr.bf16.mxu0 %v3891_v1  ;;  %2242 = vmatpush1.bf16.msra.mxu1 %v3893_v2  ;;  %v3899_v6 = vld [vmem:[%s5540_s1 + $0x10] ss:$8 sps:$4 sm:$0xff]   ;;  %v3901_v8 = vld [vmem:[%s5540_s1 + $0x24] ss:$8 sps:$4 sm:$0xff]   ;;  %v3905_v10 = vld [vmem:[%s5540_s1 + $0x20] ss:$8 sps:$4 sm:$0xff]  }
   0x4   :  { %2654 = vmatpush1.bf16.msra.mxu0 %v3894_v3  ;;  %2243 = vmatprep.subr.bf16.mxu1 %v3895_v4  ;;  %v3900_v7 = vld [vmem:[%s5540_s1 + $0x410] ss:$8 sps:$4 sm:$0xff]   ;;  %v3903_v9 = vld [vmem:[%s5540_s1 + $0x424] ss:$8 sps:$4 sm:$0xff]   ;;  %v3906_v11 = vld [vmem:[%s5540_s1 + $0x420] ss:$8 sps:$4 sm:$0xff]  }
   0x5   :  { %2655 = vmatprep.subr.bf16.mxu0 %v3897_v5  ;;  %v3907_v12 = vld [vmem:[%s5540_s1 + $0x34] ss:$8 sps:$4 sm:$0xff]   ;;  %v3911_v14 = vld [vmem:[%s5540_s1 + $0x30] ss:$8 sps:$4 sm:$0xff]   ;;  %v3913_v16 = vld [vmem:[%s5540_s1 + $0x44] ss:$8 sps:$4 sm:$0xff]  }
   0x6   :  { %v3909_v13 = vld [vmem:[%s5540_s1 + $0x434] ss:$8 sps:$4 sm:$0xff]   ;;  %v3912_v15 = vld [vmem:[%s5540_s1 + $0x430] ss:$8 sps:$4 sm:$0xff]   ;;  %v3915_v17 = vld [vmem:[%s5540_s1 + $0x444] ss:$8 sps:$4 sm:$0xff]  }
   0x7   :  { %2244 = vmatpush1.bf16.msra.mxu1 %v3899_v6  ;;  %v3917_v18 = vld [vmem:[%s5540_s1 + $0x40] ss:$8 sps:$4 sm:$0xff]   ;;  %v3919_v20 = vld [vmem:[%s5540_s1 + $0x54] ss:$8 sps:$4 sm:$0xff]   ;;  %v3923_v22 = vld [vmem:[%s5540_s1 + $0x50] ss:$8 sps:$4 sm:$0xff]  }
   0x8   :  { %2656 = vmatpush1.bf16.msra.mxu0 %v3900_v7  ;;  %2245 = vmatprep.subr.bf16.mxu1 %v3901_v8  ;;  %v3918_v19 = vld [vmem:[%s5540_s1 + $0x440] ss:$8 sps:$4 sm:$0xff]   ;;  %v3921_v21 = vld [vmem:[%s5540_s1 + $0x454] ss:$8 sps:$4 sm:$0xff]   ;;  %v3924_v23 = vld [vmem:[%s5540_s1 + $0x450] ss:$8 sps:$4 sm:$0xff]  }
   0x9   :  { %2657 = vmatprep.subr.bf16.mxu0 %v3903_v9  ;;  %v3925_v24 = vld [vmem:[%s5540_s1 + $0x64] ss:$8 sps:$4 sm:$0xff]   ;;  %v3929_v26 = vld [vmem:[%s5540_s1 + $0x60] ss:$8 sps:$4 sm:$0xff]   ;;  %v3931_v28 = vld [vmem:[%s5540_s1 + $0x74] ss:$8 sps:$4 sm:$0xff]  }
   0xa   :  { %v3927_v25 = vld [vmem:[%s5540_s1 + $0x464] ss:$8 sps:$4 sm:$0xff]   ;;  %v3930_v27 = vld [vmem:[%s5540_s1 + $0x460] ss:$8 sps:$4 sm:$0xff]   ;;  %v3933_v29 = vld [vmem:[%s5540_s1 + $0x474] ss:$8 sps:$4 sm:$0xff]  }
   0xb   :  { %2246 = vmatpush1.bf16.msra.mxu1 %v3905_v10  ;;  %v3935_v30 = vld [vmem:[%s5540_s1 + $0x70] ss:$8 sps:$4 sm:$0xff]   ;;  %v3937_v32 = vld [vmem:[%s5540_s1 + $0x84] ss:$8 sps:$4 sm:$0xff]   ;;  %v3941_v34 = vld [vmem:[%s5540_s1 + $0x80] ss:$8 sps:$4 sm:$0xff]  }
   0xc   :  { %2658 = vmatpush1.bf16.msra.mxu0 %v3906_v11  ;;  %2247 = vmatprep.subr.bf16.mxu1 %v3907_v12  ;;  %v3936_v31 = vld [vmem:[%s5540_s1 + $0x470] ss:$8 sps:$4 sm:$0xff]   ;;  %v3939_v33 = vld [vmem:[%s5540_s1 + $0x484] ss:$8 sps:$4 sm:$0xff]   ;;  %v3942_v35 = vld [vmem:[%s5540_s1 + $0x480] ss:$8 sps:$4 sm:$0xff]  }
   0xd   :  { %2659 = vmatprep.subr.bf16.mxu0 %v3909_v13  ;;  %v3943_v36 = vld [vmem:[%s5540_s1 + $0x94] ss:$8 sps:$4 sm:$0xff]   ;;  %v3947_v38 = vld [vmem:[%s5540_s1 + $0x90] ss:$8 sps:$4 sm:$0xff]   ;;  %v3949_v40 = vld [vmem:[%s5540_s1 + $0xa4] ss:$8 sps:$4 sm:$0xff]  }
   0xe   :  { %v3945_v37 = vld [vmem:[%s5540_s1 + $0x494] ss:$8 sps:$4 sm:$0xff]   ;;  %v3948_v39 = vld [vmem:[%s5540_s1 + $0x490] ss:$8 sps:$4 sm:$0xff]   ;;  %v3951_v41 = vld [vmem:[%s5540_s1 + $0x4a4] ss:$8 sps:$4 sm:$0xff]  }
   0xf   :  { %2248 = vmatpush1.bf16.msra.mxu1 %v3911_v14  ;;  %v3953_v42 = vld [vmem:[%s5540_s1 + $0xa0] ss:$8 sps:$4 sm:$0xff]   ;;  %v3955_v44 = vld [vmem:[%s5540_s1 + $0xb4] ss:$8 sps:$4 sm:$0xff]   ;;  %v3959_v46 = vld [vmem:[%s5540_s1 + $0xb0] ss:$8 sps:$4 sm:$0xff]  }
  0x10   :  { %2660 = vmatpush1.bf16.msra.mxu0 %v3912_v15  ;;  %2249 = vmatprep.subr.bf16.mxu1 %v3913_v16  ;;  %v3954_v43 = vld [vmem:[%s5540_s1 + $0x4a0] ss:$8 sps:$4 sm:$0xff]   ;;  %v3957_v45 = vld [vmem:[%s5540_s1 + $0x4b4] ss:$8 sps:$4 sm:$0xff]   ;;  %v3960_v47 = vld [vmem:[%s5540_s1 + $0x4b0] ss:$8 sps:$4 sm:$0xff]  }
  0x11   :  { %2661 = vmatprep.subr.bf16.mxu0 %v3915_v17  ;;  %v21_v48 = vld [vmem:[%s5541_s0] sm:$0xff]  ;;  %v3967_v58 = vld [vmem:[%s5540_s1 + $0xd4] ss:$8 sps:$4 sm:$0xff]   ;;  %v3971_v60 = vld [vmem:[%s5540_s1 + $0xd0] ss:$8 sps:$4 sm:$0xff]  }
  0x12   :  { %v29_v49 = vld [vmem:[%s5541_s0 + $0x40] sm:$0xff]  ;;  %v3969_v59 = vld [vmem:[%s5540_s1 + $0x4d4] ss:$8 sps:$4 sm:$0xff]   ;;  %v3972_v61 = vld [vmem:[%s5540_s1 + $0x4d0] ss:$8 sps:$4 sm:$0xff]  }
  0x13   :  { %2250 = vmatpush1.bf16.msra.mxu1 %v3917_v18  ;;  %v3961_v50 = vld [vmem:[%s5540_s1 + $0xc4] ss:$8 sps:$4 sm:$0xff]   ;;  %v3296_v52 = vcombine.high %v21_v48, %v29_v49  ;;  %v3965_v56 = vld [vmem:[%s5540_s1 + $0xc0] ss:$8 sps:$4 sm:$0xff]   ;;  %v3979_v2 = vld [vmem:[%s5540_s1 + $0xf4] ss:$8 sps:$4 sm:$0xff]   ;;  %v3295_v11 = vcombine.low %v21_v48, %v29_v49 }
  0x14   :  { %2662 = vmatpush1.bf16.msra.mxu0 %v3918_v19  ;;  %2251 = vmatprep.subr.bf16.mxu1 %v3919_v20  ;;  %v3963_v51 = vld [vmem:[%s5540_s1 + $0x4c4] ss:$8 sps:$4 sm:$0xff]   ;;  %v3966_v57 = vld [vmem:[%s5540_s1 + $0x4c0] ss:$8 sps:$4 sm:$0xff]   ;;  %v3981_v3 = vld [vmem:[%s5540_s1 + $0x4f4] ss:$8 sps:$4 sm:$0xff]  }
  0x15   :  { %2663 = vmatprep.subr.bf16.mxu0 %v3921_v21  ;;  %v25_v53 = vld [vmem:[%s5541_s0 + $0x20] sm:$0xff]  ;;  %2273 = vmatprep.mubr.bf16.mxu1 %v3296_v52  ;;  %v3983_v4 = vld [vmem:[%s5540_s1 + $0xf0] ss:$8 sps:$4 sm:$0xff]   ;;  %v3993_v16 = vld [vmem:[%s5540_s1 + $0x114] ss:$8 sps:$4 sm:$0xff]  }
  0x16   :  { %v33_v54 = vld [vmem:[%s5541_s0 + $0x60] sm:$0xff]  ;;  %v3984_v5 = vld [vmem:[%s5540_s1 + $0x4f0] ss:$8 sps:$4 sm:$0xff]   ;;  %v3996_v17 = vld [vmem:[%s5540_s1 + $0x514] ss:$8 sps:$4 sm:$0xff]  }
  0x17   :  { %2252 = vmatpush1.bf16.msra.mxu1 %v3923_v22  ;;  %v3304_v55 = vcombine.high %v25_v53, %v33_v54  ;;  %v3973_v62 = vld [vmem:[%s5540_s1 + $0xe4] ss:$8 sps:$4 sm:$0xff]   ;;  %v3977_v0 = vld [vmem:[%s5540_s1 + $0xe0] ss:$8 sps:$4 sm:$0xff]   ;;  %v3303_v12 = vcombine.low %v25_v53, %v33_v54  ;;  %v3991_v20 = vld [vmem:[%s5540_s1 + $0x110] ss:$8 sps:$4 sm:$0xff]  }
  0x18   :  { %2664 = vmatpush1.bf16.msra.mxu0 %v3924_v23  ;;  %2253 = vmatprep.subr.bf16.mxu1 %v3925_v24  ;;  %v3975_v63 = vld [vmem:[%s5540_s1 + $0x4e4] ss:$8 sps:$4 sm:$0xff]   ;;  %v3978_v1 = vld [vmem:[%s5540_s1 + $0x4e0] ss:$8 sps:$4 sm:$0xff]   ;;  %v3994_v21 = vld [vmem:[%s5540_s1 + $0x510] ss:$8 sps:$4 sm:$0xff]  }
  0x19   :  { %2665 = vmatprep.subr.bf16.mxu0 %v3927_v25  ;;  %2685 = vmatprep.mubr.bf16.mxu0 %v3304_v55  ;;  %v3987_v6 = vld [vmem:[%s5540_s1 + $0x104] ss:$8 sps:$4 sm:$0xff]   ;;  %v3985_v8 = vld [vmem:[%s5540_s1 + $0x100] ss:$8 sps:$4 sm:$0xff]   ;;  %v4017_v48 = vld [vmem:[%s5540_s1 + $0x154] ss:$8 sps:$4 sm:$0xff]  }
  0x1a   :  { %v3990_v7 = vld [vmem:[%s5540_s1 + $0x504] ss:$8 sps:$4 sm:$0xff]   ;;  %v3988_v9 = vld [vmem:[%s5540_s1 + $0x500] ss:$8 sps:$4 sm:$0xff]   ;;  %v4020_v49 = vld [vmem:[%s5540_s1 + $0x554] ss:$8 sps:$4 sm:$0xff]  }
  0x1b   :  { %2254 = vmatpush1.bf16.msra.mxu1 %v3929_v26  ;;  %v37_v10 = vld [vmem:[%s5541_s0 + $0x80] sm:$0xff]  ;;  %v4015_v52 = vld [vmem:[%s5540_s1 + $0x150] ss:$8 sps:$4 sm:$0xff]  }
  0x1c   :  { %2666 = vmatpush1.bf16.msra.mxu0 %v3930_v27  ;;  %2255 = vmatprep.subr.bf16.mxu1 %v3931_v28  ;;  %v45_v13 = vld [vmem:[%s5541_s0 + $0xc0] sm:$0xff]  ;;  %v4018_v53 = vld [vmem:[%s5540_s1 + $0x550] ss:$8 sps:$4 sm:$0xff]  }
  0x1d   :  { %2667 = vmatprep.subr.bf16.mxu0 %v3933_v29  ;;  %v41_v14 = vld [vmem:[%s5541_s0 + $0xa0] sm:$0xff]  ;;  %v3312_v18 = vcombine.high %v37_v10, %v45_v13  ;;  %v3311_v28 = vcombine.low %v37_v10, %v45_v13 }
  0x1e   :  { %v49_v15 = vld [vmem:[%s5541_s0 + $0xe0] sm:$0xff] }
  0x1f   :  { %2256 = vmatpush1.bf16.msra.mxu1 %v3935_v30  ;;  %v3320_v19 = vcombine.high %v41_v14, %v49_v15  ;;  %v3999_v22 = vld [vmem:[%s5540_s1 + $0x124] ss:$8 sps:$4 sm:$0xff]   ;;  %v3997_v24 = vld [vmem:[%s5540_s1 + $0x120] ss:$8 sps:$4 sm:$0xff]   ;;  %v3319_v29 = vcombine.low %v41_v14, %v49_v15 }
  0x20   :  { %2668 = vmatpush1.bf16.msra.mxu0 %v3936_v31  ;;  %2257 = vmatprep.subr.bf16.mxu1 %v3937_v32  ;;  %v4002_v23 = vld [vmem:[%s5540_s1 + $0x524] ss:$8 sps:$4 sm:$0xff]   ;;  %v4000_v25 = vld [vmem:[%s5540_s1 + $0x520] ss:$8 sps:$4 sm:$0xff]   ;;  %v4005_v32 = vld [vmem:[%s5540_s1 + $0x134] ss:$8 sps:$4 sm:$0xff]  }
  0x21   :  { %2669 = vmatprep.subr.bf16.mxu0 %v3939_v33  ;;  %v53_v26 = vld [vmem:[%s5541_s0 + $0x100] sm:$0xff]  ;;  %v4008_v33 = vld [vmem:[%s5540_s1 + $0x534] ss:$8 sps:$4 sm:$0xff]  }
  0x22   :  { %v61_v27 = vld [vmem:[%s5541_s0 + $0x140] sm:$0xff] }
  0x23   :  { %2258 = vmatpush1.bf16.msra.mxu1 %v3941_v34  ;;  %v57_v30 = vld [vmem:[%s5541_s0 + $0x120] sm:$0xff]  ;;  %v3328_v34 = vcombine.high %v53_v26, %v61_v27 }
  0x24   :  { %2670 = vmatpush1.bf16.msra.mxu0 %v3942_v35  ;;  %2259 = vmatprep.subr.bf16.mxu1 %v3943_v36  ;;  %v65_v31 = vld [vmem:[%s5541_s0 + $0x160] sm:$0xff]  ;;  %v4003_v36 = vld [vmem:[%s5540_s1 + $0x130] ss:$8 sps:$4 sm:$0xff]  }
  0x25   :  { %2671 = vmatprep.subr.bf16.mxu0 %v3945_v37  ;;  %v3336_v35 = vcombine.high %v57_v30, %v65_v31  ;;  %v4006_v37 = vld [vmem:[%s5540_s1 + $0x530] ss:$8 sps:$4 sm:$0xff]   ;;  %v4023_v54 = vld [vmem:[%s5540_s1 + $0x164] ss:$8 sps:$4 sm:$0xff]   ;;  %v4033_v14 = vld [vmem:[%s5540_s1 + $0x180] ss:$8 sps:$4 sm:$0xff]  }
  0x26   :  { %v4026_v55 = vld [vmem:[%s5540_s1 + $0x564] ss:$8 sps:$4 sm:$0xff]   ;;  %v4036_v15 = vld [vmem:[%s5540_s1 + $0x580] ss:$8 sps:$4 sm:$0xff]  }
  0x27   :  { %2260 = vmatpush1.bf16.msra.mxu1 %v3947_v38  ;;  %v4011_v38 = vld [vmem:[%s5540_s1 + $0x144] ss:$8 sps:$4 sm:$0xff]  }
  0x28   :  { %2672 = vmatpush1.bf16.msra.mxu0 %v3948_v39  ;;  %2261 = vmatprep.subr.bf16.mxu1 %v3949_v40  ;;  %v4014_v39 = vld [vmem:[%s5540_s1 + $0x544] ss:$8 sps:$4 sm:$0xff]   ;;  %v4009_v40 = vld [vmem:[%s5540_s1 + $0x140] ss:$8 sps:$4 sm:$0xff]  }
  0x29   :  { %2673 = vmatprep.subr.bf16.mxu0 %v3951_v41  ;;  %v69_v41 = vld [vmem:[%s5541_s0 + $0x180] sm:$0xff] }
  0x2a   :  { %v105_v10 = vld [vmem:[%s5541_s0 + $0x2a0] sm:$0xff] }
  0x2b   :  { %2262 = vmatpush1.bf16.msra.mxu1 %v3953_v42  ;;  %v77_v42 = vld [vmem:[%s5541_s0 + $0x1c0] sm:$0xff] }
  0x2c   :  { %2674 = vmatpush1.bf16.msra.mxu0 %v3954_v43  ;;  %2263 = vmatprep.subr.bf16.mxu1 %v3955_v44  ;;  %v3327_v43 = vcombine.low %v53_v26, %v61_v27  ;;  %v3335_v44 = vcombine.low %v57_v30, %v65_v31  ;;  %v113_v13 = vld [vmem:[%s5541_s0 + $0x2e0] sm:$0xff] }
  0x2d   :  { %2675 = vmatprep.subr.bf16.mxu0 %v3957_v45  ;;  %v73_v45 = vld [vmem:[%s5541_s0 + $0x1a0] sm:$0xff] }
  0x2e   :  { %v117_v26 = vld [vmem:[%s5541_s0 + $0x300] sm:$0xff] }
  0x2f   :  { %2264 = vmatpush1.bf16.msra.mxu1 %v3959_v46  ;;  %v81_v46 = vld [vmem:[%s5541_s0 + $0x1e0] sm:$0xff] }
  0x30   :  { %2676 = vmatpush1.bf16.msra.mxu0 %v3960_v47  ;;  %2265 = vmatprep.subr.bf16.mxu1 %v3961_v50  ;;  %v4012_v47 = vld [vmem:[%s5540_s1 + $0x540] ss:$8 sps:$4 sm:$0xff]   ;;  %v3344_v50 = vcombine.high %v69_v41, %v77_v42 }
  0x31   :  { %2677 = vmatprep.subr.bf16.mxu0 %v3963_v51  ;;  %v3352_v51 = vcombine.high %v73_v45, %v81_v46  ;;  %v125_v27 = vld [vmem:[%s5541_s0 + $0x340] sm:$0xff] }
  0x32   :  { %v121_v30 = vld [vmem:[%s5541_s0 + $0x320] sm:$0xff] }
  0x33   :  { %2266 = vmatpush1.bf16.msra.mxu1 %v3965_v56  ;;  %v85_v56 = vld [vmem:[%s5541_s0 + $0x200] sm:$0xff] }
  0x34   :  { %2678 = vmatpush1.bf16.msra.mxu0 %v3966_v57  ;;  %2267 = vmatprep.subr.bf16.mxu1 %v3967_v58  ;;  %v93_v57 = vld [vmem:[%s5541_s0 + $0x240] sm:$0xff]  ;;  %v3343_v58 = vcombine.low %v69_v41, %v77_v42  ;;  %v22_v41 = vld [vmem:[%s5541_s0 + $0x8] sm:$0xff] }
  0x35   :  { %2679 = vmatprep.subr.bf16.mxu0 %v3969_v59  ;;  %v3351_v59 = vcombine.low %v73_v45, %v81_v46  ;;  %v129_v31 = vld [vmem:[%s5541_s0 + $0x360] sm:$0xff]  ;;  %v30_v42 = vld [vmem:[%s5541_s0 + $0x48] sm:$0xff] }
  0x36   :  { %v26_v45 = vld [vmem:[%s5541_s0 + $0x28] sm:$0xff] }
  0x37   :  { %2268 = vmatpush1.bf16.msra.mxu1 %v3971_v60  ;;  %v89_v60 = vld [vmem:[%s5541_s0 + $0x220] sm:$0xff]  ;;  %v34_v46 = vld [vmem:[%s5541_s0 + $0x68] sm:$0xff] }
  0x38   :  { %2680 = vmatpush1.bf16.msra.mxu0 %v3972_v61  ;;  %2269 = vmatprep.subr.bf16.mxu1 %v3973_v62  ;;  %v97_v61 = vld [vmem:[%s5541_s0 + $0x260] sm:$0xff] }
  0x39   :  { %2681 = vmatprep.subr.bf16.mxu0 %v3975_v63  ;;  %v4021_v62 = vld [vmem:[%s5540_s1 + $0x160] ss:$8 sps:$4 sm:$0xff]  }
  0x3a   :  { %v4024_v63 = vld [vmem:[%s5540_s1 + $0x560] ss:$8 sps:$4 sm:$0xff]  }
  0x3b   :  { %2270 = vmatpush1.bf16.msra.mxu1 %v3977_v0  ;;  %v4029_v0 = vld [vmem:[%s5540_s1 + $0x174] ss:$8 sps:$4 sm:$0xff]  }
  0x3c   :  { %2682 = vmatpush1.bf16.msra.mxu0 %v3978_v1  ;;  %2271 = vmatprep.subr.bf16.mxu1 %v3979_v2  ;;  %v4032_v1 = vld [vmem:[%s5540_s1 + $0x574] ss:$8 sps:$4 sm:$0xff]   ;;  %v3360_v2 = vcombine.high %v85_v56, %v93_v57 }
  0x3d   :  { %2683 = vmatprep.subr.bf16.mxu0 %v3981_v3  ;;  %v3368_v3 = vcombine.high %v89_v60, %v97_v61 }
  0x3f   :  { %2272 = vmatpush1.bf16.msra.mxu1 %v3983_v4  ;;  %v4027_v4 = vld [vmem:[%s5540_s1 + $0x170] ss:$8 sps:$4 sm:$0xff]  }
  0x40   :  { %2684 = vmatpush1.bf16.msra.mxu0 %v3984_v5  ;;  %2344 = vmatprep.subr.bf16.mxu1 %v3987_v6  ;;  %v4030_v5 = vld [vmem:[%s5540_s1 + $0x570] ss:$8 sps:$4 sm:$0xff]   ;;  %v4035_v6 = vld [vmem:[%s5540_s1 + $0x184] ss:$8 sps:$4 sm:$0xff]  }
  0x41   :  { %2756 = vmatprep.subr.bf16.mxu0 %v3990_v7  ;;  %v4038_v7 = vld [vmem:[%s5540_s1 + $0x584] ss:$8 sps:$4 sm:$0xff]  }
  0x42   :  { %2274 = vmatmul.mubr.bf16.vlgmr.msra.gmra.mrb[0].mxu1 %v3295_v11  ;;  %v3359_v11 = vcombine.low %v85_v56, %v93_v57  ;;  %v4069_v56 = vld [vmem:[%s5540_s1 + $0x1e0] ss:$8 sps:$4 sm:$0xff]  }
  0x43   :  { %2686 = vmatmul.mubr.bf16.vlgmr.msra.gmra.mrb[0].mxu0 %v3303_v12  ;;  %2345 = vmatpush1.bf16.msra.mxu1 %v3985_v8  ;;  %v101_v8 = vld [vmem:[%s5541_s0 + $0x280] sm:$0xff]  ;;  %v3367_v12 = vcombine.low %v89_v60, %v97_v61  ;;  %v4075_v60 = vld [vmem:[%s5540_s1 + $0x1f0] ss:$8 sps:$4 sm:$0xff]  }
  0x44   :  { %2757 = vmatpush1.bf16.msra.mxu0 %v3988_v9  ;;  %2346 = vmatprep.subr.bf16.mxu1 %v3993_v16  ;;  %v109_v9 = vld [vmem:[%s5541_s0 + $0x2c0] sm:$0xff]  ;;  %v4041_v16 = vld [vmem:[%s5540_s1 + $0x194] ss:$8 sps:$4 sm:$0xff]   ;;  %v4078_v61 = vld [vmem:[%s5540_s1 + $0x5f0] ss:$8 sps:$4 sm:$0xff]  }
  0x45   :  { %2758 = vmatprep.subr.bf16.mxu0 %v3996_v17  ;;  %2283 = vmatprep.mubr.bf16.mxu1 %v3312_v18  ;;  %v4044_v17 = vld [vmem:[%s5540_s1 + $0x594] ss:$8 sps:$4 sm:$0xff]   ;;  %v3376_v18 = vcombine.high %v101_v8, %v109_v9  ;;  %v4072_v57 = vld [vmem:[%s5540_s1 + $0x5e0] ss:$8 sps:$4 sm:$0xff]  }
  0x46   :  { %2695 = vmatprep.mubr.bf16.mxu0 %v3320_v19  ;;  %v3384_v19 = vcombine.high %v105_v10, %v113_v13 }
  0x47   :  { %2347 = vmatpush1.bf16.msra.mxu1 %v3991_v20  ;;  %v4039_v20 = vld [vmem:[%s5540_s1 + $0x190] ss:$8 sps:$4 sm:$0xff]  }
  0x48   :  { %2759 = vmatpush1.bf16.msra.mxu0 %v3994_v21  ;;  %2348 = vmatprep.subr.bf16.mxu1 %v3999_v22  ;;  %v4042_v21 = vld [vmem:[%s5540_s1 + $0x590] ss:$8 sps:$4 sm:$0xff]   ;;  %v4047_v22 = vld [vmem:[%s5540_s1 + $0x1a4] ss:$8 sps:$4 sm:$0xff]  }
  0x49   :  { %2760 = vmatprep.subr.bf16.mxu0 %v4002_v23  ;;  %v4050_v23 = vld [vmem:[%s5540_s1 + $0x5a4] ss:$8 sps:$4 sm:$0xff]  }
  0x4a   :  { %2284 = vmatmul.mubr.bf16.gmra.mrb[4].mxu1 %v3311_v28  ;;  %v3375_v28 = vcombine.low %v101_v8, %v109_v9  ;;  %v4089_v8 = vld [vmem:[%s5540_s1 + $0x214] ss:$8 sps:$4 sm:$0xff]  }
  0x4b   :  { %2696 = vmatmul.mubr.bf16.gmra.mrb[4].mxu0 %v3319_v29  ;;  %2349 = vmatpush1.bf16.msra.mxu1 %v3997_v24  ;;  %v4045_v24 = vld [vmem:[%s5540_s1 + $0x1a0] ss:$8 sps:$4 sm:$0xff]   ;;  %v3383_v29 = vcombine.low %v105_v10, %v113_v13  ;;  %v4092_v9 = vld [vmem:[%s5540_s1 + $0x614] ss:$8 sps:$4 sm:$0xff]   ;;  %v4090_v13 = vld [vmem:[%s5540_s1 + $0x610] ss:$8 sps:$4 sm:$0xff]  }
  0x4c   :  { %2761 = vmatpush1.bf16.msra.mxu0 %v4000_v25  ;;  %2350 = vmatprep.subr.bf16.mxu1 %v4005_v32  ;;  %v4048_v25 = vld [vmem:[%s5540_s1 + $0x5a0] ss:$8 sps:$4 sm:$0xff]   ;;  %v4053_v32 = vld [vmem:[%s5540_s1 + $0x1b4] ss:$8 sps:$4 sm:$0xff]  }
  0x4d   :  { %2762 = vmatprep.subr.bf16.mxu0 %v4008_v33  ;;  %2293 = vmatprep.mubr.bf16.mxu1 %v3328_v34  ;;  %v4056_v33 = vld [vmem:[%s5540_s1 + $0x5b4] ss:$8 sps:$4 sm:$0xff]   ;;  %v3392_v34 = vcombine.high %v117_v26, %v125_v27 }
  0x4e   :  { %2705 = vmatprep.mubr.bf16.mxu0 %v3336_v35  ;;  %v3400_v35 = vcombine.high %v121_v30, %v129_v31 }
  0x4f   :  { %2351 = vmatpush1.bf16.msra.mxu1 %v4003_v36  ;;  %v4051_v36 = vld [vmem:[%s5540_s1 + $0x1b0] ss:$8 sps:$4 sm:$0xff]  }
  0x50   :  { %2763 = vmatpush1.bf16.msra.mxu0 %v4006_v37  ;;  %2352 = vmatprep.subr.bf16.mxu1 %v4011_v38  ;;  %v4054_v37 = vld [vmem:[%s5540_s1 + $0x5b0] ss:$8 sps:$4 sm:$0xff]   ;;  %v4059_v38 = vld [vmem:[%s5540_s1 + $0x1c4] ss:$8 sps:$4 sm:$0xff]  }
  0x51   :  { %2764 = vmatprep.subr.bf16.mxu0 %v4014_v39  ;;  %v4062_v39 = vld [vmem:[%s5540_s1 + $0x5c4] ss:$8 sps:$4 sm:$0xff]  }
  0x52   :  { %2294 = vmatmul.mubr.bf16.gmra.mrb[8].mxu1 %v3327_v43  ;;  %v3391_v43 = vcombine.low %v117_v26, %v125_v27 }
  0x53   :  { %2706 = vmatmul.mubr.bf16.gmra.mrb[8].mxu0 %v3335_v44  ;;  %2353 = vmatpush1.bf16.msra.mxu1 %v4009_v40  ;;  %v4057_v40 = vld [vmem:[%s5540_s1 + $0x1c0] ss:$8 sps:$4 sm:$0xff]   ;;  %v3399_v44 = vcombine.low %v121_v30, %v129_v31  ;;  %v4107_v30 = vld [vmem:[%s5540_s1 + $0x244] ss:$8 sps:$4 sm:$0xff]  }
  0x54   :  { %2765 = vmatpush1.bf16.msra.mxu0 %v4012_v47  ;;  %2354 = vmatprep.subr.bf16.mxu1 %v4017_v48  ;;  %v4060_v47 = vld [vmem:[%s5540_s1 + $0x5c0] ss:$8 sps:$4 sm:$0xff]   ;;  %v4065_v48 = vld [vmem:[%s5540_s1 + $0x1d4] ss:$8 sps:$4 sm:$0xff]   ;;  %v4110_v31 = vld [vmem:[%s5540_s1 + $0x644] ss:$8 sps:$4 sm:$0xff]  }
  0x55   :  { %2766 = vmatprep.subr.bf16.mxu0 %v4020_v49  ;;  %2303 = vmatprep.mubr.bf16.mxu1 %v3344_v50  ;;  %v4068_v49 = vld [vmem:[%s5540_s1 + $0x5d4] ss:$8 sps:$4 sm:$0xff]   ;;  %v3298_v50 = vcombine.high %v22_v41, %v30_v42 }
  0x56   :  { %2715 = vmatprep.mubr.bf16.mxu0 %v3352_v51  ;;  %v3306_v51 = vcombine.high %v26_v45, %v34_v46 }
  0x57   :  { %2355 = vmatpush1.bf16.msra.mxu1 %v4015_v52  ;;  %v4063_v52 = vld [vmem:[%s5540_s1 + $0x1d0] ss:$8 sps:$4 sm:$0xff]  }
  0x58   :  { %2767 = vmatpush1.bf16.msra.mxu0 %v4018_v53  ;;  %2356 = vmatprep.subr.bf16.mxu1 %v4023_v54  ;;  %v4066_v53 = vld [vmem:[%s5540_s1 + $0x5d0] ss:$8 sps:$4 sm:$0xff]   ;;  %v4071_v54 = vld [vmem:[%s5540_s1 + $0x1e4] ss:$8 sps:$4 sm:$0xff]  }
  0x59   :  { %2768 = vmatprep.subr.bf16.mxu0 %v4026_v55  ;;  %v4074_v55 = vld [vmem:[%s5540_s1 + $0x5e4] ss:$8 sps:$4 sm:$0xff]  }
  0x5a   :  { %2304 = vmatmul.mubr.bf16.gmra.mrb[12].mxu1 %v3343_v58  ;;  %v4077_v58 = vld [vmem:[%s5540_s1 + $0x1f4] ss:$8 sps:$4 sm:$0xff]  }
  0x5b   :  { %2716 = vmatmul.mubr.bf16.gmra.mrb[12].mxu0 %v3351_v59  ;;  %2357 = vmatpush1.bf16.msra.mxu1 %v4021_v62  ;;  %v4080_v59 = vld [vmem:[%s5540_s1 + $0x5f4] ss:$8 sps:$4 sm:$0xff]   ;;  %v4083_v62 = vld [vmem:[%s5540_s1 + $0x204] ss:$8 sps:$4 sm:$0xff]  }
  0x5c   :  { %2769 = vmatpush1.bf16.msra.mxu0 %v4024_v63  ;;  %2358 = vmatprep.subr.bf16.mxu1 %v4029_v0  ;;  %v4086_v63 = vld [vmem:[%s5540_s1 + $0x604] ss:$8 sps:$4 sm:$0xff]  }
  0x5d   :  { %2770 = vmatprep.subr.bf16.mxu0 %v4032_v1  ;;  %2313 = vmatprep.mubr.bf16.mxu1 %v3360_v2  ;;  %v38_v0 = vld [vmem:[%s5541_s0 + $0x88] sm:$0xff] }
  0x5e   :  { %2725 = vmatprep.mubr.bf16.mxu0 %v3368_v3  ;;  %v46_v1 = vld [vmem:[%s5541_s0 + $0xc8] sm:$0xff]  ;;  %v3297_v3 = vcombine.low %v22_v41, %v30_v42  ;;  %v4116_v41 = vld [vmem:[%s5540_s1 + $0x654] ss:$8 sps:$4 sm:$0xff]  }
  0x5f   :  { %2359 = vmatpush1.bf16.msra.mxu1 %v4027_v4  ;;  %v42_v2 = vld [vmem:[%s5541_s0 + $0xa8] sm:$0xff]  ;;  %v3305_v4 = vcombine.low %v26_v45, %v34_v46  ;;  %v3314_v10 = vcombine.high %v38_v0, %v46_v1  ;;  %v4114_v45 = vld [vmem:[%s5540_s1 + $0x650] ss:$8 sps:$4 sm:$0xff]  }
  0x60   :  { %2771 = vmatpush1.bf16.msra.mxu0 %v4030_v5  ;;  %2360 = vmatprep.subr.bf16.mxu1 %v4035_v6  ;;  %v50_v5 = vld [vmem:[%s5541_s0 + $0xe8] sm:$0xff] }
  0x61   :  { %2772 = vmatprep.subr.bf16.mxu0 %v4038_v7  ;;  %v4081_v6 = vld [vmem:[%s5540_s1 + $0x200] ss:$8 sps:$4 sm:$0xff]   ;;  %v4119_v46 = vld [vmem:[%s5540_s1 + $0x264] ss:$8 sps:$4 sm:$0xff]  }
  0x62   :  { %2314 = vmatmul.mubr.bf16.gmra.mrb[16].mxu1 %v3359_v11  ;;  %v4084_v7 = vld [vmem:[%s5540_s1 + $0x600] ss:$8 sps:$4 sm:$0xff]   ;;  %v3322_v11 = vcombine.high %v42_v2, %v50_v5 }
  0x63   :  { %2726 = vmatmul.mubr.bf16.gmra.mrb[16].mxu0 %v3367_v12  ;;  %2361 = vmatpush1.bf16.msra.mxu1 %v4033_v14  ;;  %v4087_v12 = vld [vmem:[%s5540_s1 + $0x210] ss:$8 sps:$4 sm:$0xff]   ;;  %v4095_v14 = vld [vmem:[%s5540_s1 + $0x224] ss:$8 sps:$4 sm:$0xff]  }
  0x64   :  { %2773 = vmatpush1.bf16.msra.mxu0 %v4036_v15  ;;  %2362 = vmatprep.subr.bf16.mxu1 %v4041_v16  ;;  %v4098_v15 = vld [vmem:[%s5540_s1 + $0x624] ss:$8 sps:$4 sm:$0xff]   ;;  %v4093_v16 = vld [vmem:[%s5540_s1 + $0x220] ss:$8 sps:$4 sm:$0xff]  }
  0x65   :  { %2774 = vmatprep.subr.bf16.mxu0 %v4044_v17  ;;  %2323 = vmatprep.mubr.bf16.mxu1 %v3376_v18  ;;  %v4096_v17 = vld [vmem:[%s5540_s1 + $0x620] ss:$8 sps:$4 sm:$0xff]  }
  0x66   :  { %2735 = vmatprep.mubr.bf16.mxu0 %v3384_v19  ;;  %v54_v18 = vld [vmem:[%s5541_s0 + $0x108] sm:$0xff]  ;;  %v3313_v19 = vcombine.low %v38_v0, %v46_v1 }
  0x67   :  { %2363 = vmatpush1.bf16.msra.mxu1 %v4039_v20  ;;  %v3321_v20 = vcombine.low %v42_v2, %v50_v5  ;;  %v4129_v0 = vld [vmem:[%s5540_s1 + $0x280] ss:$8 sps:$4 sm:$0xff]  }
  0x68   :  { %2775 = vmatpush1.bf16.msra.mxu0 %v4042_v21  ;;  %2364 = vmatprep.subr.bf16.mxu1 %v4047_v22  ;;  %v62_v21 = vld [vmem:[%s5541_s0 + $0x148] sm:$0xff] }
  0x69   :  { %2776 = vmatprep.subr.bf16.mxu0 %v4050_v23  ;;  %v58_v22 = vld [vmem:[%s5541_s0 + $0x128] sm:$0xff]  ;;  %v3330_v26 = vcombine.high %v54_v18, %v62_v21 }
  0x6a   :  { %2324 = vmatmul.mubr.bf16.gmra.mrb[20].mxu1 %v3375_v28  ;;  %v66_v23 = vld [vmem:[%s5541_s0 + $0x168] sm:$0xff]  ;;  %v4099_v28 = vld [vmem:[%s5540_s1 + $0x230] ss:$8 sps:$4 sm:$0xff]  }
  0x6b   :  { %2736 = vmatmul.mubr.bf16.gmra.mrb[20].mxu0 %v3383_v29  ;;  %2365 = vmatpush1.bf16.msra.mxu1 %v4045_v24  ;;  %v4101_v24 = vld [vmem:[%s5540_s1 + $0x234] ss:$8 sps:$4 sm:$0xff]   ;;  %v3338_v27 = vcombine.high %v58_v22, %v66_v23  ;;  %v4102_v29 = vld [vmem:[%s5540_s1 + $0x630] ss:$8 sps:$4 sm:$0xff]   ;;  %v4132_v1 = vld [vmem:[%s5540_s1 + $0x680] ss:$8 sps:$4 sm:$0xff]  }
  0x6c   :  { %2777 = vmatpush1.bf16.msra.mxu0 %v4048_v25  ;;  %2366 = vmatprep.subr.bf16.mxu1 %v4053_v32  ;;  %v4104_v25 = vld [vmem:[%s5540_s1 + $0x634] ss:$8 sps:$4 sm:$0xff]   ;;  %v4105_v32 = vld [vmem:[%s5540_s1 + $0x240] ss:$8 sps:$4 sm:$0xff]  }
  0x6d   :  { %2778 = vmatprep.subr.bf16.mxu0 %v4056_v33  ;;  %2333 = vmatprep.mubr.bf16.mxu1 %v3392_v34  ;;  %v4108_v33 = vld [vmem:[%s5540_s1 + $0x640] ss:$8 sps:$4 sm:$0xff]  }
  0x6e   :  { %2745 = vmatprep.mubr.bf16.mxu0 %v3400_v35  ;;  %v70_v34 = vld [vmem:[%s5541_s0 + $0x188] sm:$0xff] }
  0x6f   :  { %2367 = vmatpush1.bf16.msra.mxu1 %v4051_v36  ;;  %v78_v35 = vld [vmem:[%s5541_s0 + $0x1c8] sm:$0xff]  ;;  %v3329_v36 = vcombine.low %v54_v18, %v62_v21 }
  0x70   :  { %2779 = vmatpush1.bf16.msra.mxu0 %v4054_v37  ;;  %2368 = vmatprep.subr.bf16.mxu1 %v4059_v38  ;;  %v3337_v37 = vcombine.low %v58_v22, %v66_v23  ;;  %v74_v38 = vld [vmem:[%s5541_s0 + $0x1a8] sm:$0xff]  ;;  %v3346_v42 = vcombine.high %v70_v34, %v78_v35 }
  0x71   :  { %2780 = vmatprep.subr.bf16.mxu0 %v4062_v39  ;;  %v82_v39 = vld [vmem:[%s5541_s0 + $0x1e8] sm:$0xff] }
  0x72   :  { %2334 = vmatmul.mubr.bf16.gmra.mrb[24].mxu1 %v3391_v43  ;;  %v3354_v43 = vcombine.high %v74_v38, %v82_v39  ;;  %v102_v2 = vld [vmem:[%s5541_s0 + $0x288] sm:$0xff] }
  0x73   :  { %2746 = vmatmul.mubr.bf16.gmra.mrb[24].mxu0 %v3399_v44  ;;  %2369 = vmatpush1.bf16.msra.mxu1 %v4057_v40  ;;  %v4113_v40 = vld [vmem:[%s5540_s1 + $0x254] ss:$8 sps:$4 sm:$0xff]   ;;  %v4111_v44 = vld [vmem:[%s5540_s1 + $0x250] ss:$8 sps:$4 sm:$0xff]   ;;  %v110_v5 = vld [vmem:[%s5541_s0 + $0x2c8] sm:$0xff] }
  0x74   :  { %2781 = vmatpush1.bf16.msra.mxu0 %v4060_v47  ;;  %2370 = vmatprep.subr.bf16.mxu1 %v4065_v48  ;;  %v4122_v47 = vld [vmem:[%s5540_s1 + $0x664] ss:$8 sps:$4 sm:$0xff]   ;;  %v4117_v48 = vld [vmem:[%s5540_s1 + $0x260] ss:$8 sps:$4 sm:$0xff]  }
  0x75   :  { %2782 = vmatprep.subr.bf16.mxu0 %v4068_v49  ;;  %2376 = vmatprep.mubr.bf16.mxu1 %v3298_v50  ;;  %v4120_v49 = vld [vmem:[%s5540_s1 + $0x660] ss:$8 sps:$4 sm:$0xff]  }
  0x76   :  { %2788 = vmatprep.mubr.bf16.mxu0 %v3306_v51  ;;  %v86_v50 = vld [vmem:[%s5541_s0 + $0x208] sm:$0xff] }
  0x77   :  { %2371 = vmatpush1.bf16.msra.mxu1 %v4063_v52  ;;  %v94_v51 = vld [vmem:[%s5541_s0 + $0x248] sm:$0xff]  ;;  %v3345_v52 = vcombine.low %v70_v34, %v78_v35  ;;  %v23_v34 = vld [vmem:[%s5541_s0 + $0x10] sm:$0xff] }
  0x78   :  { %2783 = vmatpush1.bf16.msra.mxu0 %v4066_v53  ;;  %2372 = vmatprep.subr.bf16.mxu1 %v4071_v54  ;;  %v3353_v53 = vcombine.low %v74_v38, %v82_v39  ;;  %v90_v54 = vld [vmem:[%s5541_s0 + $0x228] sm:$0xff]  ;;  %v31_v35 = vld [vmem:[%s5541_s0 + $0x50] sm:$0xff] }
  0x79   :  { %2784 = vmatprep.subr.bf16.mxu0 %v4074_v55  ;;  %v98_v55 = vld [vmem:[%s5541_s0 + $0x268] sm:$0xff]  ;;  %v27_v38 = vld [vmem:[%s5541_s0 + $0x30] sm:$0xff] }
  0x7a   :  { %v118_v18 = vld [vmem:[%s5541_s0 + $0x308] sm:$0xff]  ;;  %v35_v39 = vld [vmem:[%s5541_s0 + $0x70] sm:$0xff] }
  0x7b   :  { %2373 = vmatpush1.bf16.msra.mxu1 %v4069_v56  ;;  %v4125_v56 = vld [vmem:[%s5540_s1 + $0x274] ss:$8 sps:$4 sm:$0xff]   ;;  %v122_v22 = vld [vmem:[%s5541_s0 + $0x328] sm:$0xff] }
  0x7c   :  { %2785 = vmatpush1.bf16.msra.mxu0 %v4072_v57  ;;  %2374 = vmatprep.subr.bf16.mxu1 %v4077_v58  ;;  %v4128_v57 = vld [vmem:[%s5540_s1 + $0x674] ss:$8 sps:$4 sm:$0xff]   ;;  %v3362_v58 = vcombine.high %v86_v50, %v94_v51  ;;  %v130_v23 = vld [vmem:[%s5541_s0 + $0x368] sm:$0xff] }
  0x7d   :  { %2786 = vmatprep.subr.bf16.mxu0 %v4080_v59  ;;  %v3370_v59 = vcombine.high %v90_v54, %v98_v55 }
  0x7f   :  { %2375 = vmatpush1.bf16.msra.mxu1 %v4075_v60  ;;  %v4123_v60 = vld [vmem:[%s5540_s1 + $0x270] ss:$8 sps:$4 sm:$0xff]  }
  0x80   :  { %2787 = vmatpush1.bf16.msra.mxu0 %v4078_v61  ;;  %2447 = vmatprep.subr.bf16.mxu1 %v4083_v62  ;;  %v4126_v61 = vld [vmem:[%s5540_s1 + $0x670] ss:$8 sps:$4 sm:$0xff]   ;;  %v4131_v62 = vld [vmem:[%s5540_s1 + $0x284] ss:$8 sps:$4 sm:$0xff]  }
  0x81   :  { %2859 = vmatprep.subr.bf16.mxu0 %v4086_v63  ;;  %v4134_v63 = vld [vmem:[%s5540_s1 + $0x684] ss:$8 sps:$4 sm:$0xff]  }
  0x82   :  { %2377 = vmatmul.mubr.bf16.vlgmr.msra.gmra.mrb[0].mxu1 %v3297_v3  ;;  %v3361_v3 = vcombine.low %v86_v50, %v94_v51  ;;  %v4173_v50 = vld [vmem:[%s5540_s1 + $0x2f4] ss:$8 sps:$4 sm:$0xff]  }
  0x83   :  { %2789 = vmatmul.mubr.bf16.vlgmr.msra.gmra.mrb[0].mxu0 %v3305_v4  ;;  %2448 = vmatpush1.bf16.msra.mxu1 %v4081_v6  ;;  %v3369_v4 = vcombine.low %v90_v54, %v98_v55  ;;  %v106_v6 = vld [vmem:[%s5541_s0 + $0x2a8] sm:$0xff]  ;;  %v4176_v51 = vld [vmem:[%s5540_s1 + $0x6f4] ss:$8 sps:$4 sm:$0xff]  }
  0x84   :  { %2860 = vmatpush1.bf16.msra.mxu0 %v4084_v7  ;;  %2449 = vmatprep.subr.bf16.mxu1 %v4089_v8  ;;  %v114_v7 = vld [vmem:[%s5541_s0 + $0x2e8] sm:$0xff]  ;;  %v4137_v8 = vld [vmem:[%s5540_s1 + $0x294] ss:$8 sps:$4 sm:$0xff]  }
  0x85   :  { %2861 = vmatprep.subr.bf16.mxu0 %v4092_v9  ;;  %2386 = vmatprep.mubr.bf16.mxu1 %v3314_v10  ;;  %v4140_v9 = vld [vmem:[%s5540_s1 + $0x694] ss:$8 sps:$4 sm:$0xff]   ;;  %v3378_v10 = vcombine.high %v102_v2, %v110_v5  ;;  %v3385_v21 = vcombine.low %v106_v6, %v114_v7  ;;  %v4179_v54 = vld [vmem:[%s5540_s1 + $0x304] ss:$8 sps:$4 sm:$0xff]  }
  0x86   :  { %2798 = vmatprep.mubr.bf16.mxu0 %v3322_v11  ;;  %v3386_v11 = vcombine.high %v106_v6, %v114_v7  ;;  %v4182_v55 = vld [vmem:[%s5540_s1 + $0x704] ss:$8 sps:$4 sm:$0xff]  }
  0x87   :  { %2450 = vmatpush1.bf16.msra.mxu1 %v4087_v12  ;;  %v4135_v12 = vld [vmem:[%s5540_s1 + $0x290] ss:$8 sps:$4 sm:$0xff]   ;;  %v4191_v6 = vld [vmem:[%s5540_s1 + $0x324] ss:$8 sps:$4 sm:$0xff]  }
  0x88   :  { %2862 = vmatpush1.bf16.msra.mxu0 %v4090_v13  ;;  %2451 = vmatprep.subr.bf16.mxu1 %v4095_v14  ;;  %v4138_v13 = vld [vmem:[%s5540_s1 + $0x690] ss:$8 sps:$4 sm:$0xff]   ;;  %v4143_v14 = vld [vmem:[%s5540_s1 + $0x2a4] ss:$8 sps:$4 sm:$0xff]  }
  0x89   :  { %2863 = vmatprep.subr.bf16.mxu0 %v4098_v15  ;;  %v4146_v15 = vld [vmem:[%s5540_s1 + $0x6a4] ss:$8 sps:$4 sm:$0xff]  }
  0x8a   :  { %2387 = vmatmul.mubr.bf16.gmra.mrb[4].mxu1 %v3313_v19  ;;  %v126_v19 = vld [vmem:[%s5541_s0 + $0x348] sm:$0xff] }
  0x8b   :  { %2799 = vmatmul.mubr.bf16.gmra.mrb[4].mxu0 %v3321_v20  ;;  %2452 = vmatpush1.bf16.msra.mxu1 %v4093_v16  ;;  %v4141_v16 = vld [vmem:[%s5540_s1 + $0x2a0] ss:$8 sps:$4 sm:$0xff]   ;;  %v3377_v20 = vcombine.low %v102_v2, %v110_v5  ;;  %v4186_v5 = vld [vmem:[%s5540_s1 + $0x710] ss:$8 sps:$4 sm:$0xff]   ;;  %v4194_v7 = vld [vmem:[%s5540_s1 + $0x724] ss:$8 sps:$4 sm:$0xff]  }
  0x8c   :  { %2864 = vmatpush1.bf16.msra.mxu0 %v4096_v17  ;;  %2453 = vmatprep.subr.bf16.mxu1 %v4101_v24  ;;  %v4144_v17 = vld [vmem:[%s5540_s1 + $0x6a0] ss:$8 sps:$4 sm:$0xff]   ;;  %v4149_v24 = vld [vmem:[%s5540_s1 + $0x2b4] ss:$8 sps:$4 sm:$0xff]  }
  0x8d   :  { %2865 = vmatprep.subr.bf16.mxu0 %v4104_v25  ;;  %2396 = vmatprep.mubr.bf16.mxu1 %v3330_v26  ;;  %v4152_v25 = vld [vmem:[%s5540_s1 + $0x6b4] ss:$8 sps:$4 sm:$0xff]   ;;  %v3394_v26 = vcombine.high %v118_v18, %v126_v19 }
  0x8e   :  { %2808 = vmatprep.mubr.bf16.mxu0 %v3338_v27  ;;  %v3402_v27 = vcombine.high %v122_v22, %v130_v23 }
  0x8f   :  { %2454 = vmatpush1.bf16.msra.mxu1 %v4099_v28  ;;  %v4147_v28 = vld [vmem:[%s5540_s1 + $0x2b0] ss:$8 sps:$4 sm:$0xff]  }
  0x90   :  { %2866 = vmatpush1.bf16.msra.mxu0 %v4102_v29  ;;  %2455 = vmatprep.subr.bf16.mxu1 %v4107_v30  ;;  %v4150_v29 = vld [vmem:[%s5540_s1 + $0x6b0] ss:$8 sps:$4 sm:$0xff]   ;;  %v4155_v30 = vld [vmem:[%s5540_s1 + $0x2c4] ss:$8 sps:$4 sm:$0xff]  }
  0x91   :  { %2867 = vmatprep.subr.bf16.mxu0 %v4110_v31  ;;  %v4158_v31 = vld [vmem:[%s5540_s1 + $0x6c4] ss:$8 sps:$4 sm:$0xff]  }
  0x92   :  { %2397 = vmatmul.mubr.bf16.gmra.mrb[8].mxu1 %v3329_v36  ;;  %v3393_v36 = vcombine.low %v118_v18, %v126_v19 }
  0x93   :  { %2809 = vmatmul.mubr.bf16.gmra.mrb[8].mxu0 %v3337_v37  ;;  %2456 = vmatpush1.bf16.msra.mxu1 %v4105_v32  ;;  %v4153_v32 = vld [vmem:[%s5540_s1 + $0x2c0] ss:$8 sps:$4 sm:$0xff]   ;;  %v3401_v37 = vcombine.low %v122_v22, %v130_v23  ;;  %v4203_v22 = vld [vmem:[%s5540_s1 + $0x344] ss:$8 sps:$4 sm:$0xff]  }
  0x94   :  { %2868 = vmatpush1.bf16.msra.mxu0 %v4108_v33  ;;  %2457 = vmatprep.subr.bf16.mxu1 %v4113_v40  ;;  %v4156_v33 = vld [vmem:[%s5540_s1 + $0x6c0] ss:$8 sps:$4 sm:$0xff]   ;;  %v4161_v40 = vld [vmem:[%s5540_s1 + $0x2d4] ss:$8 sps:$4 sm:$0xff]   ;;  %v4206_v23 = vld [vmem:[%s5540_s1 + $0x744] ss:$8 sps:$4 sm:$0xff]  }
  0x95   :  { %2869 = vmatprep.subr.bf16.mxu0 %v4116_v41  ;;  %2406 = vmatprep.mubr.bf16.mxu1 %v3346_v42  ;;  %v4164_v41 = vld [vmem:[%s5540_s1 + $0x6d4] ss:$8 sps:$4 sm:$0xff]   ;;  %v3300_v42 = vcombine.high %v23_v34, %v31_v35 }
  0x96   :  { %2818 = vmatprep.mubr.bf16.mxu0 %v3354_v43  ;;  %v3308_v43 = vcombine.high %v27_v38, %v35_v39 }
  0x97   :  { %2458 = vmatpush1.bf16.msra.mxu1 %v4111_v44  ;;  %v4159_v44 = vld [vmem:[%s5540_s1 + $0x2d0] ss:$8 sps:$4 sm:$0xff]  }
  0x98   :  { %2870 = vmatpush1.bf16.msra.mxu0 %v4114_v45  ;;  %2459 = vmatprep.subr.bf16.mxu1 %v4119_v46  ;;  %v4162_v45 = vld [vmem:[%s5540_s1 + $0x6d0] ss:$8 sps:$4 sm:$0xff]   ;;  %v4167_v46 = vld [vmem:[%s5540_s1 + $0x2e4] ss:$8 sps:$4 sm:$0xff]  }
  0x99   :  { %2871 = vmatprep.subr.bf16.mxu0 %v4122_v47  ;;  %v4170_v47 = vld [vmem:[%s5540_s1 + $0x6e4] ss:$8 sps:$4 sm:$0xff]  }
  0x9a   :  { %2407 = vmatmul.mubr.bf16.gmra.mrb[12].mxu1 %v3345_v52  ;;  %v4171_v52 = vld [vmem:[%s5540_s1 + $0x2f0] ss:$8 sps:$4 sm:$0xff]  }
  0x9b   :  { %2819 = vmatmul.mubr.bf16.gmra.mrb[12].mxu0 %v3353_v53  ;;  %2460 = vmatpush1.bf16.msra.mxu1 %v4117_v48  ;;  %v4165_v48 = vld [vmem:[%s5540_s1 + $0x2e0] ss:$8 sps:$4 sm:$0xff]   ;;  %v4174_v53 = vld [vmem:[%s5540_s1 + $0x6f0] ss:$8 sps:$4 sm:$0xff]  }
  0x9c   :  { %2872 = vmatpush1.bf16.msra.mxu0 %v4120_v49  ;;  %2461 = vmatprep.subr.bf16.mxu1 %v4125_v56  ;;  %v4168_v49 = vld [vmem:[%s5540_s1 + $0x6e0] ss:$8 sps:$4 sm:$0xff]   ;;  %v39_v56 = vld [vmem:[%s5541_s0 + $0x90] sm:$0xff] }
  0x9d   :  { %2873 = vmatprep.subr.bf16.mxu0 %v4128_v57  ;;  %2416 = vmatprep.mubr.bf16.mxu1 %v3362_v58  ;;  %v47_v57 = vld [vmem:[%s5541_s0 + $0xd0] sm:$0xff]  ;;  %v3299_v58 = vcombine.low %v23_v34, %v31_v35 }
  0x9e   :  { %2828 = vmatprep.mubr.bf16.mxu0 %v3370_v59  ;;  %v3307_v59 = vcombine.low %v27_v38, %v35_v39  ;;  %v3316_v2 = vcombine.high %v39_v56, %v47_v57  ;;  %v4215_v38 = vld [vmem:[%s5540_s1 + $0x364] ss:$8 sps:$4 sm:$0xff]  }
  0x9f   :  { %2462 = vmatpush1.bf16.msra.mxu1 %v4123_v60  ;;  %v43_v60 = vld [vmem:[%s5541_s0 + $0xb0] sm:$0xff]  ;;  %v4218_v39 = vld [vmem:[%s5540_s1 + $0x764] ss:$8 sps:$4 sm:$0xff]  }
  0xa0   :  { %2874 = vmatpush1.bf16.msra.mxu0 %v4126_v61  ;;  %2463 = vmatprep.subr.bf16.mxu1 %v4131_v62  ;;  %v51_v61 = vld [vmem:[%s5541_s0 + $0xf0] sm:$0xff]  ;;  %v4177_v62 = vld [vmem:[%s5540_s1 + $0x300] ss:$8 sps:$4 sm:$0xff]  }
  0xa1   :  { %2875 = vmatprep.subr.bf16.mxu0 %v4134_v63  ;;  %v4180_v63 = vld [vmem:[%s5540_s1 + $0x700] ss:$8 sps:$4 sm:$0xff]  }
  0xa2   :  { %2417 = vmatmul.mubr.bf16.gmra.mrb[16].mxu1 %v3361_v3  ;;  %v3324_v3 = vcombine.high %v43_v60, %v51_v61 }
  0xa3   :  { %2829 = vmatmul.mubr.bf16.gmra.mrb[16].mxu0 %v3369_v4  ;;  %2464 = vmatpush1.bf16.msra.mxu1 %v4129_v0  ;;  %v4185_v0 = vld [vmem:[%s5540_s1 + $0x314] ss:$8 sps:$4 sm:$0xff]   ;;  %v4183_v4 = vld [vmem:[%s5540_s1 + $0x310] ss:$8 sps:$4 sm:$0xff]  }
  0xa4   :  { %2876 = vmatpush1.bf16.msra.mxu0 %v4132_v1  ;;  %2465 = vmatprep.subr.bf16.mxu1 %v4137_v8  ;;  %v4188_v1 = vld [vmem:[%s5540_s1 + $0x714] ss:$8 sps:$4 sm:$0xff]  }
  0xa5   :  { %2877 = vmatprep.subr.bf16.mxu0 %v4140_v9  ;;  %2426 = vmatprep.mubr.bf16.mxu1 %v3378_v10  ;;  %v55_v8 = vld [vmem:[%s5541_s0 + $0x110] sm:$0xff]  ;;  %v3315_v9 = vcombine.low %v39_v56, %v47_v57  ;;  %v3323_v10 = vcombine.low %v43_v60, %v51_v61 }
  0xa6   :  { %2838 = vmatprep.mubr.bf16.mxu0 %v3386_v11  ;;  %v63_v11 = vld [vmem:[%s5541_s0 + $0x150] sm:$0xff] }
  0xa7   :  { %2466 = vmatpush1.bf16.msra.mxu1 %v4135_v12  ;;  %v59_v12 = vld [vmem:[%s5541_s0 + $0x130] sm:$0xff]  ;;  %v3332_v18 = vcombine.high %v55_v8, %v63_v11 }
  0xa8   :  { %2878 = vmatpush1.bf16.msra.mxu0 %v4138_v13  ;;  %2467 = vmatprep.subr.bf16.mxu1 %v4143_v14  ;;  %v67_v13 = vld [vmem:[%s5541_s0 + $0x170] sm:$0xff]  ;;  %v4189_v14 = vld [vmem:[%s5540_s1 + $0x320] ss:$8 sps:$4 sm:$0xff]  }
  0xa9   :  { %2879 = vmatprep.subr.bf16.mxu0 %v4146_v15  ;;  %v4192_v15 = vld [vmem:[%s5540_s1 + $0x720] ss:$8 sps:$4 sm:$0xff]   ;;  %v3340_v19 = vcombine.high %v59_v12, %v67_v13  ;;  %v103_v56 = vld [vmem:[%s5541_s0 + $0x290] sm:$0xff] }
  0xaa   :  { %2427 = vmatmul.mubr.bf16.gmra.mrb[20].mxu1 %v3377_v20  ;;  %v4195_v20 = vld [vmem:[%s5540_s1 + $0x330] ss:$8 sps:$4 sm:$0xff]  }
  0xab   :  { %2839 = vmatmul.mubr.bf16.gmra.mrb[20].mxu0 %v3385_v21  ;;  %2468 = vmatpush1.bf16.msra.mxu1 %v4141_v16  ;;  %v4197_v16 = vld [vmem:[%s5540_s1 + $0x334] ss:$8 sps:$4 sm:$0xff]   ;;  %v4198_v21 = vld [vmem:[%s5540_s1 + $0x730] ss:$8 sps:$4 sm:$0xff]  }
  0xac   :  { %2880 = vmatpush1.bf16.msra.mxu0 %v4144_v17  ;;  %2469 = vmatprep.subr.bf16.mxu1 %v4149_v24  ;;  %v4200_v17 = vld [vmem:[%s5540_s1 + $0x734] ss:$8 sps:$4 sm:$0xff]  }
  0xad   :  { %2881 = vmatprep.subr.bf16.mxu0 %v4152_v25  ;;  %2436 = vmatprep.mubr.bf16.mxu1 %v3394_v26  ;;  %v71_v24 = vld [vmem:[%s5541_s0 + $0x190] sm:$0xff]  ;;  %v3331_v25 = vcombine.low %v55_v8, %v63_v11  ;;  %v3339_v26 = vcombine.low %v59_v12, %v67_v13 }
  0xae   :  { %2848 = vmatprep.mubr.bf16.mxu0 %v3402_v27  ;;  %v79_v27 = vld [vmem:[%s5541_s0 + $0x1d0] sm:$0xff] }
  0xaf   :  { %2470 = vmatpush1.bf16.msra.mxu1 %v4147_v28  ;;  %v75_v28 = vld [vmem:[%s5541_s0 + $0x1b0] sm:$0xff]  ;;  %v3348_v34 = vcombine.high %v71_v24, %v79_v27 }
  0xb0   :  { %2882 = vmatpush1.bf16.msra.mxu0 %v4150_v29  ;;  %2471 = vmatprep.subr.bf16.mxu1 %v4155_v30  ;;  %v83_v29 = vld [vmem:[%s5541_s0 + $0x1f0] sm:$0xff]  ;;  %v4201_v30 = vld [vmem:[%s5540_s1 + $0x340] ss:$8 sps:$4 sm:$0xff]  }
  0xb1   :  { %2883 = vmatprep.subr.bf16.mxu0 %v4158_v31  ;;  %v4204_v31 = vld [vmem:[%s5540_s1 + $0x740] ss:$8 sps:$4 sm:$0xff]   ;;  %v3356_v35 = vcombine.high %v75_v28, %v83_v29  ;;  %v107_v60 = vld [vmem:[%s5541_s0 + $0x2b0] sm:$0xff] }
  0xb2   :  { %2437 = vmatmul.mubr.bf16.gmra.mrb[24].mxu1 %v3393_v36  ;;  %v4207_v36 = vld [vmem:[%s5540_s1 + $0x350] ss:$8 sps:$4 sm:$0xff]  }
  0xb3   :  { %2849 = vmatmul.mubr.bf16.gmra.mrb[24].mxu0 %v3401_v37  ;;  %2472 = vmatpush1.bf16.msra.mxu1 %v4153_v32  ;;  %v4209_v32 = vld [vmem:[%s5540_s1 + $0x354] ss:$8 sps:$4 sm:$0xff]   ;;  %v4210_v37 = vld [vmem:[%s5540_s1 + $0x750] ss:$8 sps:$4 sm:$0xff]  }
  0xb4   :  { %2884 = vmatpush1.bf16.msra.mxu0 %v4156_v33  ;;  %2473 = vmatprep.subr.bf16.mxu1 %v4161_v40  ;;  %v4212_v33 = vld [vmem:[%s5540_s1 + $0x754] ss:$8 sps:$4 sm:$0xff]  }
  0xb5   :  { %2885 = vmatprep.subr.bf16.mxu0 %v4164_v41  ;;  %2479 = vmatprep.mubr.bf16.mxu1 %v3300_v42  ;;  %v87_v40 = vld [vmem:[%s5541_s0 + $0x210] sm:$0xff]  ;;  %v3347_v41 = vcombine.low %v71_v24, %v79_v27  ;;  %v3355_v42 = vcombine.low %v75_v28, %v83_v29  ;;  %v24_v24 = vld [vmem:[%s5541_s0 + $0x18] sm:$0xff] }
  0xb6   :  { %2891 = vmatprep.mubr.bf16.mxu0 %v3308_v43  ;;  %v95_v43 = vld [vmem:[%s5541_s0 + $0x250] sm:$0xff]  ;;  %v32_v27 = vld [vmem:[%s5541_s0 + $0x58] sm:$0xff] }
  0xb7   :  { %2474 = vmatpush1.bf16.msra.mxu1 %v4159_v44  ;;  %v91_v44 = vld [vmem:[%s5541_s0 + $0x230] sm:$0xff]  ;;  %v3363_v57 = vcombine.low %v87_v40, %v95_v43  ;;  %v28_v28 = vld [vmem:[%s5541_s0 + $0x38] sm:$0xff] }
  0xb8   :  { %2886 = vmatpush1.bf16.msra.mxu0 %v4162_v45  ;;  %2475 = vmatprep.subr.bf16.mxu1 %v4167_v46  ;;  %v99_v45 = vld [vmem:[%s5541_s0 + $0x270] sm:$0xff]  ;;  %v4213_v46 = vld [vmem:[%s5540_s1 + $0x360] ss:$8 sps:$4 sm:$0xff]   ;;  %v36_v29 = vld [vmem:[%s5541_s0 + $0x78] sm:$0xff] }
  0xb9   :  { %2887 = vmatprep.subr.bf16.mxu0 %v4170_v47  ;;  %v4216_v47 = vld [vmem:[%s5540_s1 + $0x760] ss:$8 sps:$4 sm:$0xff]   ;;  %v115_v61 = vld [vmem:[%s5541_s0 + $0x2f0] sm:$0xff] }
  0xba   :  { %v119_v8 = vld [vmem:[%s5541_s0 + $0x310] sm:$0xff] }
  0xbb   :  { %2476 = vmatpush1.bf16.msra.mxu1 %v4165_v48  ;;  %v4221_v48 = vld [vmem:[%s5540_s1 + $0x374] ss:$8 sps:$4 sm:$0xff]  }
  0xbc   :  { %2888 = vmatpush1.bf16.msra.mxu0 %v4168_v49  ;;  %2477 = vmatprep.subr.bf16.mxu1 %v4173_v50  ;;  %v4224_v49 = vld [vmem:[%s5540_s1 + $0x774] ss:$8 sps:$4 sm:$0xff]   ;;  %v3364_v50 = vcombine.high %v87_v40, %v95_v43  ;;  %v4261_v40 = vld [vmem:[%s5540_s1 + $0x3e0] ss:$8 sps:$4 sm:$0xff]  }
  0xbd   :  { %2889 = vmatprep.subr.bf16.mxu0 %v4176_v51  ;;  %v3372_v51 = vcombine.high %v91_v44, %v99_v45  ;;  %v127_v11 = vld [vmem:[%s5541_s0 + $0x350] sm:$0xff] }
  0xbe   :  { %v123_v12 = vld [vmem:[%s5541_s0 + $0x330] sm:$0xff] }
  0xbf   :  { %2478 = vmatpush1.bf16.msra.mxu1 %v4171_v52  ;;  %v4219_v52 = vld [vmem:[%s5540_s1 + $0x370] ss:$8 sps:$4 sm:$0xff]   ;;  %v4272_v43 = vld [vmem:[%s5540_s1 + $0x7f4] ss:$8 sps:$4 sm:$0xff]  }
  0xc0   :  { %2890 = vmatpush1.bf16.msra.mxu0 %v4174_v53  ;;  %2550 = vmatprep.subr.bf16.mxu1 %v4179_v54  ;;  %v4222_v53 = vld [vmem:[%s5540_s1 + $0x770] ss:$8 sps:$4 sm:$0xff]   ;;  %v4227_v54 = vld [vmem:[%s5540_s1 + $0x384] ss:$8 sps:$4 sm:$0xff]  }
  0xc1   :  { %2962 = vmatprep.subr.bf16.mxu0 %v4182_v55  ;;  %v4230_v55 = vld [vmem:[%s5540_s1 + $0x784] ss:$8 sps:$4 sm:$0xff]   ;;  %v131_v13 = vld [vmem:[%s5541_s0 + $0x370] sm:$0xff] }
  0xc2   :  { %2480 = vmatmul.mubr.bf16.vlgmr.msra.gmra.mrb[0].mxu1 %v3299_v58  ;;  %v3371_v58 = vcombine.low %v91_v44, %v99_v45  ;;  %v4267_v44 = vld [vmem:[%s5540_s1 + $0x3f0] ss:$8 sps:$4 sm:$0xff]  }
  0xc3   :  { %2892 = vmatmul.mubr.bf16.vlgmr.msra.gmra.mrb[0].mxu0 %v3307_v59  ;;  %2551 = vmatpush1.bf16.msra.mxu1 %v4177_v62  ;;  %v111_v59 = vld [vmem:[%s5541_s0 + $0x2d0] sm:$0xff]  ;;  %v4225_v62 = vld [vmem:[%s5540_s1 + $0x380] ss:$8 sps:$4 sm:$0xff]  }
  0xc4   :  { %2963 = vmatpush1.bf16.msra.mxu0 %v4180_v63  ;;  %2552 = vmatprep.subr.bf16.mxu1 %v4185_v0  ;;  %v4228_v63 = vld [vmem:[%s5540_s1 + $0x780] ss:$8 sps:$4 sm:$0xff]   ;;  %v4233_v0 = vld [vmem:[%s5540_s1 + $0x394] ss:$8 sps:$4 sm:$0xff]   ;;  %v4270_v45 = vld [vmem:[%s5540_s1 + $0x7f0] ss:$8 sps:$4 sm:$0xff]  }
  0xc5   :  { %2964 = vmatprep.subr.bf16.mxu0 %v4188_v1  ;;  %2489 = vmatprep.mubr.bf16.mxu1 %v3316_v2  ;;  %v4236_v1 = vld [vmem:[%s5540_s1 + $0x794] ss:$8 sps:$4 sm:$0xff]   ;;  %v3380_v2 = vcombine.high %v103_v56, %v111_v59 }
  0xc6   :  { %2901 = vmatprep.mubr.bf16.mxu0 %v3324_v3  ;;  %v3388_v3 = vcombine.high %v107_v60, %v115_v61 }
  0xc7   :  { %2553 = vmatpush1.bf16.msra.mxu1 %v4183_v4  ;;  %v4231_v4 = vld [vmem:[%s5540_s1 + $0x390] ss:$8 sps:$4 sm:$0xff]  }
  0xc8   :  { %2965 = vmatpush1.bf16.msra.mxu0 %v4186_v5  ;;  %2554 = vmatprep.subr.bf16.mxu1 %v4191_v6  ;;  %v4234_v5 = vld [vmem:[%s5540_s1 + $0x790] ss:$8 sps:$4 sm:$0xff]   ;;  %v4239_v6 = vld [vmem:[%s5540_s1 + $0x3a4] ss:$8 sps:$4 sm:$0xff]  }
  0xc9   :  { %2966 = vmatprep.subr.bf16.mxu0 %v4194_v7  ;;  %v4242_v7 = vld [vmem:[%s5540_s1 + $0x7a4] ss:$8 sps:$4 sm:$0xff]  }
  0xca   :  { %2490 = vmatmul.mubr.bf16.gmra.mrb[4].mxu1 %v3315_v9  ;;  %v3379_v9 = vcombine.low %v103_v56, %v111_v59  ;;  %v60_v56 = vld [vmem:[%s5541_s0 + $0x138] sm:$0xff] }
  0xcb   :  { %2902 = vmatmul.mubr.bf16.gmra.mrb[4].mxu0 %v3323_v10  ;;  %2555 = vmatpush1.bf16.msra.mxu1 %v4189_v14  ;;  %v3387_v10 = vcombine.low %v107_v60, %v115_v61  ;;  %v4237_v14 = vld [vmem:[%s5540_s1 + $0x3a0] ss:$8 sps:$4 sm:$0xff]  }
  0xcc   :  { %2967 = vmatpush1.bf16.msra.mxu0 %v4192_v15  ;;  %2556 = vmatprep.subr.bf16.mxu1 %v4197_v16  ;;  %v4240_v15 = vld [vmem:[%s5540_s1 + $0x7a0] ss:$8 sps:$4 sm:$0xff]   ;;  %v4245_v16 = vld [vmem:[%s5540_s1 + $0x3b4] ss:$8 sps:$4 sm:$0xff]  }
  0xcd   :  { %2968 = vmatprep.subr.bf16.mxu0 %v4200_v17  ;;  %2499 = vmatprep.mubr.bf16.mxu1 %v3332_v18  ;;  %v4248_v17 = vld [vmem:[%s5540_s1 + $0x7b4] ss:$8 sps:$4 sm:$0xff]   ;;  %v3396_v18 = vcombine.high %v119_v8, %v127_v11 }
  0xce   :  { %2911 = vmatprep.mubr.bf16.mxu0 %v3340_v19  ;;  %v3404_v19 = vcombine.high %v123_v12, %v131_v13 }
  0xcf   :  { %2557 = vmatpush1.bf16.msra.mxu1 %v4195_v20  ;;  %v4243_v20 = vld [vmem:[%s5540_s1 + $0x3b0] ss:$8 sps:$4 sm:$0xff]  }
  0xd0   :  { %2969 = vmatpush1.bf16.msra.mxu0 %v4198_v21  ;;  %2558 = vmatprep.subr.bf16.mxu1 %v4203_v22  ;;  %v4246_v21 = vld [vmem:[%s5540_s1 + $0x7b0] ss:$8 sps:$4 sm:$0xff]   ;;  %v4251_v22 = vld [vmem:[%s5540_s1 + $0x3c4] ss:$8 sps:$4 sm:$0xff]  }
  0xd1   :  { %2970 = vmatprep.subr.bf16.mxu0 %v4206_v23  ;;  %v4254_v23 = vld [vmem:[%s5540_s1 + $0x7c4] ss:$8 sps:$4 sm:$0xff]  }
  0xd2   :  { %2500 = vmatmul.mubr.bf16.gmra.mrb[8].mxu1 %v3331_v25  ;;  %v3395_v25 = vcombine.low %v119_v8, %v127_v11  ;;  %v92_v8 = vld [vmem:[%s5541_s0 + $0x238] sm:$0xff] }
  0xd3   :  { %2912 = vmatmul.mubr.bf16.gmra.mrb[8].mxu0 %v3339_v26  ;;  %2559 = vmatpush1.bf16.msra.mxu1 %v4201_v30  ;;  %v3403_v26 = vcombine.low %v123_v12, %v131_v13  ;;  %v4249_v30 = vld [vmem:[%s5540_s1 + $0x3c0] ss:$8 sps:$4 sm:$0xff]  }
  0xd4   :  { %2971 = vmatpush1.bf16.msra.mxu0 %v4204_v31  ;;  %2560 = vmatprep.subr.bf16.mxu1 %v4209_v32  ;;  %v4252_v31 = vld [vmem:[%s5540_s1 + $0x7c0] ss:$8 sps:$4 sm:$0xff]   ;;  %v4257_v32 = vld [vmem:[%s5540_s1 + $0x3d4] ss:$8 sps:$4 sm:$0xff]  }
  0xd5   :  { %2972 = vmatprep.subr.bf16.mxu0 %v4212_v33  ;;  %2509 = vmatprep.mubr.bf16.mxu1 %v3348_v34  ;;  %v4260_v33 = vld [vmem:[%s5540_s1 + $0x7d4] ss:$8 sps:$4 sm:$0xff]   ;;  %v3302_v34 = vcombine.high %v24_v24, %v32_v27 }
  0xd6   :  { %2921 = vmatprep.mubr.bf16.mxu0 %v3356_v35  ;;  %v3310_v35 = vcombine.high %v28_v28, %v36_v29 }
  0xd7   :  { %2561 = vmatpush1.bf16.msra.mxu1 %v4207_v36  ;;  %v4255_v36 = vld [vmem:[%s5540_s1 + $0x3d0] ss:$8 sps:$4 sm:$0xff]  }
  0xd8   :  { %2973 = vmatpush1.bf16.msra.mxu0 %v4210_v37  ;;  %2562 = vmatprep.subr.bf16.mxu1 %v4215_v38  ;;  %v4258_v37 = vld [vmem:[%s5540_s1 + $0x7d0] ss:$8 sps:$4 sm:$0xff]   ;;  %v4263_v38 = vld [vmem:[%s5540_s1 + $0x3e4] ss:$8 sps:$4 sm:$0xff]  }
  0xd9   :  { %2974 = vmatprep.subr.bf16.mxu0 %v4218_v39  ;;  %v4266_v39 = vld [vmem:[%s5540_s1 + $0x7e4] ss:$8 sps:$4 sm:$0xff]  }
  0xda   :  { %2510 = vmatmul.mubr.bf16.gmra.mrb[12].mxu1 %v3347_v41  ;;  %v4264_v41 = vld [vmem:[%s5540_s1 + $0x7e0] ss:$8 sps:$4 sm:$0xff]  }
  0xdb   :  { %2922 = vmatmul.mubr.bf16.gmra.mrb[12].mxu0 %v3355_v42  ;;  %2563 = vmatpush1.bf16.msra.mxu1 %v4213_v46  ;;  %v4269_v42 = vld [vmem:[%s5540_s1 + $0x3f4] ss:$8 sps:$4 sm:$0xff]  }
  0xdc   :  { %2975 = vmatpush1.bf16.msra.mxu0 %v4216_v47  ;;  %2564 = vmatprep.subr.bf16.mxu1 %v4221_v48  ;;  %v40_v46 = vld [vmem:[%s5541_s0 + $0x98] sm:$0xff] }
  0xdd   :  { %2976 = vmatprep.subr.bf16.mxu0 %v4224_v49  ;;  %2519 = vmatprep.mubr.bf16.mxu1 %v3364_v50  ;;  %v48_v47 = vld [vmem:[%s5541_s0 + $0xd8] sm:$0xff]  ;;  %v3301_v50 = vcombine.low %v24_v24, %v32_v27 }
  0xde   :  { %2931 = vmatprep.mubr.bf16.mxu0 %v3372_v51  ;;  %v44_v48 = vld [vmem:[%s5541_s0 + $0xb8] sm:$0xff]  ;;  %v3309_v51 = vcombine.low %v28_v28, %v36_v29 }
  0xdf   :  { %2565 = vmatpush1.bf16.msra.mxu1 %v4219_v52  ;;  %v52_v49 = vld [vmem:[%s5541_s0 + $0xf8] sm:$0xff]  ;;  %v3318_v52 = vcombine.high %v40_v46, %v48_v47 }
  0xe0   :  { %2977 = vmatpush1.bf16.msra.mxu0 %v4222_v53  ;;  %2566 = vmatprep.subr.bf16.mxu1 %v4227_v54  ;;  %v3326_v53 = vcombine.high %v44_v48, %v52_v49  ;;  %v56_v54 = vld [vmem:[%s5541_s0 + $0x118] sm:$0xff]  ;;  %v3325_v59 = vcombine.low %v44_v48, %v52_v49 }
  0xe1   :  { %2978 = vmatprep.subr.bf16.mxu0 %v4230_v55  ;;  %v64_v55 = vld [vmem:[%s5541_s0 + $0x158] sm:$0xff] }
  0xe2   :  { %2520 = vmatmul.mubr.bf16.gmra.mrb[16].mxu1 %v3363_v57  ;;  %v68_v57 = vld [vmem:[%s5541_s0 + $0x178] sm:$0xff]  ;;  %v3334_v60 = vcombine.high %v56_v54, %v64_v55 }
  0xe3   :  { %2932 = vmatmul.mubr.bf16.gmra.mrb[16].mxu0 %v3371_v58  ;;  %2567 = vmatpush1.bf16.msra.mxu1 %v4225_v62  ;;  %v3317_v58 = vcombine.low %v40_v46, %v48_v47  ;;  %v3342_v61 = vcombine.high %v60_v56, %v68_v57  ;;  %v72_v62 = vld [vmem:[%s5541_s0 + $0x198] sm:$0xff] }
  0xe4   :  { %2979 = vmatpush1.bf16.msra.mxu0 %v4228_v63  ;;  %2568 = vmatprep.subr.bf16.mxu1 %v4233_v0  ;;  %v80_v63 = vld [vmem:[%s5541_s0 + $0x1d8] sm:$0xff] }
  0xe5   :  { %2980 = vmatprep.subr.bf16.mxu0 %v4236_v1  ;;  %2529 = vmatprep.mubr.bf16.mxu1 %v3380_v2  ;;  %v76_v0 = vld [vmem:[%s5541_s0 + $0x1b8] sm:$0xff]  ;;  %v3333_v2 = vcombine.low %v56_v54, %v64_v55 }
  0xe6   :  { %2941 = vmatprep.mubr.bf16.mxu0 %v3388_v3  ;;  %v84_v1 = vld [vmem:[%s5541_s0 + $0x1f8] sm:$0xff]  ;;  %v3341_v3 = vcombine.low %v60_v56, %v68_v57 }
  0xe7   :  { %2569 = vmatpush1.bf16.msra.mxu1 %v4231_v4  ;;  %v3350_v4 = vcombine.high %v72_v62, %v80_v63  ;;  %v3357_v11 = vcombine.low %v76_v0, %v84_v1  ;;  %v124_v24 = vld [vmem:[%s5541_s0 + $0x338] sm:$0xff] }
  0xe8   :  { %2981 = vmatpush1.bf16.msra.mxu0 %v4234_v5  ;;  %2570 = vmatprep.subr.bf16.mxu1 %v4239_v6  ;;  %v3358_v5 = vcombine.high %v76_v0, %v84_v1  ;;  %v88_v6 = vld [vmem:[%s5541_s0 + $0x218] sm:$0xff] }
  0xe9   :  { %2982 = vmatprep.subr.bf16.mxu0 %v4242_v7  ;;  %v96_v7 = vld [vmem:[%s5541_s0 + $0x258] sm:$0xff] }
  0xea   :  { %2530 = vmatmul.mubr.bf16.gmra.mrb[20].mxu1 %v3379_v9  ;;  %v100_v9 = vld [vmem:[%s5541_s0 + $0x278] sm:$0xff]  ;;  %v3366_v12 = vcombine.high %v88_v6, %v96_v7 }
  0xeb   :  { %2942 = vmatmul.mubr.bf16.gmra.mrb[20].mxu0 %v3387_v10  ;;  %2571 = vmatpush1.bf16.msra.mxu1 %v4237_v14  ;;  %v3349_v10 = vcombine.low %v72_v62, %v80_v63  ;;  %v3374_v13 = vcombine.high %v92_v8, %v100_v9  ;;  %v104_v14 = vld [vmem:[%s5541_s0 + $0x298] sm:$0xff] }
  0xec   :  { %2983 = vmatpush1.bf16.msra.mxu0 %v4240_v15  ;;  %2572 = vmatprep.subr.bf16.mxu1 %v4245_v16  ;;  %v112_v15 = vld [vmem:[%s5541_s0 + $0x2d8] sm:$0xff] }
  0xed   :  { %2984 = vmatprep.subr.bf16.mxu0 %v4248_v17  ;;  %2539 = vmatprep.mubr.bf16.mxu1 %v3396_v18  ;;  %v108_v16 = vld [vmem:[%s5541_s0 + $0x2b8] sm:$0xff]  ;;  %v3365_v18 = vcombine.low %v88_v6, %v96_v7 }
  0xee   :  { %2951 = vmatprep.mubr.bf16.mxu0 %v3404_v19  ;;  %v116_v17 = vld [vmem:[%s5541_s0 + $0x2f8] sm:$0xff]  ;;  %v3373_v19 = vcombine.low %v92_v8, %v100_v9 }
  0xef   :  { %2573 = vmatpush1.bf16.msra.mxu1 %v4243_v20  ;;  %v3382_v20 = vcombine.high %v104_v14, %v112_v15  ;;  %v3389_v27 = vcombine.low %v108_v16, %v116_v17 }
  0xf0   :  { %2985 = vmatpush1.bf16.msra.mxu0 %v4246_v21  ;;  %2574 = vmatprep.subr.bf16.mxu1 %v4251_v22  ;;  %v3390_v21 = vcombine.high %v108_v16, %v116_v17  ;;  %v120_v22 = vld [vmem:[%s5541_s0 + $0x318] sm:$0xff] }
  0xf1   :  { %2986 = vmatprep.subr.bf16.mxu0 %v4254_v23  ;;  %v128_v23 = vld [vmem:[%s5541_s0 + $0x358] sm:$0xff] }
  0xf2   :  { %2540 = vmatmul.mubr.bf16.gmra.mrb[24].mxu1 %v3395_v25  ;;  %v132_v25 = vld [vmem:[%s5541_s0 + $0x378] sm:$0xff]  ;;  %v3398_v28 = vcombine.high %v120_v22, %v128_v23 }
  0xf3   :  { %2952 = vmatmul.mubr.bf16.gmra.mrb[24].mxu0 %v3403_v26  ;;  %2575 = vmatpush1.bf16.msra.mxu1 %v4249_v30  ;;  %v3381_v26 = vcombine.low %v104_v14, %v112_v15  ;;  %v3406_v29 = vcombine.high %v124_v24, %v132_v25  ;;  %v3397_v30 = vcombine.low %v120_v22, %v128_v23 }
  0xf4   :  { %2987 = vmatpush1.bf16.msra.mxu0 %v4252_v31  ;;  %2576 = vmatprep.subr.bf16.mxu1 %v4257_v32  ;;  %v3405_v31 = vcombine.low %v124_v24, %v132_v25  ;;  %v4273_v32 = vmov 0.0  }
  0xf5   :  { %2988 = vmatprep.subr.bf16.mxu0 %v4260_v33  ;;  %2582 = vmatprep.mubr.bf16.mxu1 %v3302_v34  ;;  %20 = vst [vmem:[%s5542_s4] sm:$0xf] %v4273_v32  ;;  %v391_v33 = vlaneseq }
  0xf6   :  { %2994 = vmatprep.mubr.bf16.mxu0 %v3310_v35 }
  0xf7   :  { %2577 = vmatpush1.bf16.msra.mxu1 %v4255_v36  ;;  %v5407_v34 = vshrl.u32 %v391_v33, 7  ;;  %v389_v36 = vld [vmem:[%s5543_s2] sm:$0x3] }
  0xf8   :  { %2989 = vmatpush1.bf16.msra.mxu0 %v4258_v37  ;;  %2578 = vmatprep.subr.bf16.mxu1 %v4263_v38 }
  0xf9   :  { %2990 = vmatprep.subr.bf16.mxu0 %v4266_v39  ;;  %v393_v35 = vsub.s32 0, %v5407_v34  ;;  %v397_v37 = vsub.s32 1, %v5407_v34 }
  0xfb   :  { %2579 = vmatpush1.bf16.msra.mxu1 %v4261_v40  ;;  %v5414_v38 = vrot.slane %v389_v36, %v393_v35  ;;  %v5416_v39 = vrot.slane %v389_v36, %v397_v37 }
  0xfc   :  { %2991 = vmatpush1.bf16.msra.mxu0 %v4264_v41  ;;  %2580 = vmatprep.subr.bf16.mxu1 %v4269_v42 }
  0xfd   :  { %2992 = vmatprep.subr.bf16.mxu0 %v4272_v43 }
  0xff   :  { %2581 = vmatpush1.bf16.msra.mxu1 %v4267_v44 }
 0x100   :  { %2993 = vmatpush1.bf16.msra.mxu0 %v4270_v45 }
 0x102   :  { %2583 = vmatmul.mubr.bf16.vlgmr.msra.gmra.mrb[0].mxu1 %v3301_v50 }
 0x103   :  { %2995 = vmatmul.mubr.bf16.vlgmr.msra.gmra.mrb[0].mxu0 %v3309_v51  ;;  %2592 = vmatprep.mubr.bf16.mxu1 %v3318_v52 }
 0x104   :  { %3004 = vmatprep.mubr.bf16.mxu0 %v3326_v53 }
 0x10a   :  { %2593 = vmatmul.mubr.bf16.gmra.mrb[4].mxu1 %v3317_v58 }
 0x10b   :  { %3005 = vmatmul.mubr.bf16.gmra.mrb[4].mxu0 %v3325_v59  ;;  %2602 = vmatprep.mubr.bf16.mxu1 %v3334_v60 }
 0x10c   :  { %3014 = vmatprep.mubr.bf16.mxu0 %v3342_v61 }
 0x112   :  { %2603 = vmatmul.mubr.bf16.gmra.mrb[8].mxu1 %v3333_v2 }
 0x113   :  { %3015 = vmatmul.mubr.bf16.gmra.mrb[8].mxu0 %v3341_v3  ;;  %2612 = vmatprep.mubr.bf16.mxu1 %v3350_v4 }
 0x114   :  { %3024 = vmatprep.mubr.bf16.mxu0 %v3358_v5 }
 0x11a   :  { %2613 = vmatmul.mubr.bf16.gmra.mrb[12].mxu1 %v3349_v10 }
 0x11b   :  { %3025 = vmatmul.mubr.bf16.gmra.mrb[12].mxu0 %v3357_v11  ;;  %2622 = vmatprep.mubr.bf16.mxu1 %v3366_v12 }
 0x11c   :  { %3034 = vmatprep.mubr.bf16.mxu0 %v3374_v13 }
 0x122   :  { %2623 = vmatmul.mubr.bf16.gmra.mrb[16].mxu1 %v3365_v18 }
 0x123   :  { %3035 = vmatmul.mubr.bf16.gmra.mrb[16].mxu0 %v3373_v19  ;;  %2632 = vmatprep.mubr.bf16.mxu1 %v3382_v20 }
 0x124   :  { %3044 = vmatprep.mubr.bf16.mxu0 %v3390_v21 }
 0x12a   :  { %2633 = vmatmul.mubr.bf16.gmra.mrb[20].mxu1 %v3381_v26 }
 0x12b   :  { %3045 = vmatmul.mubr.bf16.gmra.mrb[20].mxu0 %v3389_v27  ;;  %2642 = vmatprep.mubr.bf16.mxu1 %v3398_v28 }
 0x12c   :  { %3054 = vmatprep.mubr.bf16.mxu0 %v3406_v29 }
 0x132   :  { %2643 = vmatmul.mubr.bf16.gmra.mrb[24].mxu1 %v3397_v30 }
 0x133   :  { %3055 = vmatmul.mubr.bf16.gmra.mrb[24].mxu0 %v3405_v31 }
 0x1d5   :  { %v2584_v40 = vpop.f32.mrb[0].mxu1 }
 0x1d6   :  { %v2996_v41 = vpop.f32.mrb[0].mxu0  ;;  %v3663_v42 = vadd.f32 %v2584_v40, %v5414_v38  ;;  %v2586_v43 = vpop.f32.mrb[1].mxu1 }
 0x1d7   :  { %v2998_v44 = vpop.f32.mrb[1].mxu0  ;;  %v3665_v45 = vadd.f32 %v2586_v43, %v5416_v39  ;;  %v2588_v46 = vpop.f32.mrb[2].mxu1 }
 0x1d8   :  { %v3000_v47 = vpop.f32.mrb[2].mxu0  ;;  %v3664_v48 = vadd.f32 %v3663_v42, %v2996_v41  ;;  %v3667_v49 = vadd.f32 %v2588_v46, %v5414_v38  ;;  %v2590_v50 = vpop.f32.mrb[3].mxu1 }
 0x1d9   :  { %v3002_v51 = vpop.f32.mrb[3].mxu0  ;;  %v3666_v52 = vadd.f32 %v3665_v45, %v2998_v44  ;;  %v3669_v53 = vadd.f32 %v2590_v50, %v5416_v39 }
 0x1da   :  { %3065 = vst [vmem:[%s5544_s3] sm:$0xff] %v3664_v48  ;;  %v3668_v54 = vadd.f32 %v3667_v49, %v3000_v47  ;;  %v3204_v56 = vmul.f32 %v3664_v48, %v3664_v48 }
 0x1db   :  { %3066 = vst [vmem:[%s5544_s3 + $0x8] sm:$0xff] %v3666_v52  ;;  %v3670_v55 = vadd.f32 %v3669_v53, %v3002_v51  ;;  %v3205_v59 = vmul.f32 %v3666_v52, %v3666_v52 }
 0x1dc   :  { %3067 = vst [vmem:[%s5544_s3 + $0x10] sm:$0xff] %v3668_v54  ;;  %v3166_v57 = vadd.f32 %v3668_v54, %v3664_v48  ;;  %v3206_v58 = vmul.f32 %v3668_v54, %v3668_v54 }
 0x1dd   :  { %3068 = vst [vmem:[%s5544_s3 + $0x18] sm:$0xff] %v3670_v55  ;;  %v3185_v60 = vadd.f32 %v3670_v55, %v3666_v52  ;;  %v3207_v61 = vmul.f32 %v3670_v55, %v3670_v55  ;;  %v2594_v62 = vpop.f32.mrb[4].mxu1 }
 0x1de   :  { %v3006_v63 = vpop.f32.mrb[4].mxu0  ;;  %v3232_v0 = vadd.f32 %v3206_v58, %v3204_v56  ;;  %v3671_v1 = vadd.f32 %v2594_v62, %v5414_v38  ;;  %v2596_v2 = vpop.f32.mrb[5].mxu1 }
 0x1df   :  { %v3008_v3 = vpop.f32.mrb[5].mxu0  ;;  %v3251_v4 = vadd.f32 %v3207_v61, %v3205_v59  ;;  %v3673_v5 = vadd.f32 %v2596_v2, %v5416_v39  ;;  %v2598_v6 = vpop.f32.mrb[6].mxu1 }
 0x1e0   :  { %v3010_v7 = vpop.f32.mrb[6].mxu0  ;;  %v3672_v8 = vadd.f32 %v3671_v1, %v3006_v63  ;;  %v3675_v9 = vadd.f32 %v2598_v6, %v5414_v38  ;;  %v2600_v10 = vpop.f32.mrb[7].mxu1 }
 0x1e1   :  { %v3012_v11 = vpop.f32.mrb[7].mxu0  ;;  %v3674_v12 = vadd.f32 %v3673_v5, %v3008_v3  ;;  %v3677_v13 = vadd.f32 %v2600_v10, %v5416_v39 }
 0x1e2   :  { %3069 = vst [vmem:[%s5544_s3 + $0x20] sm:$0xff] %v3672_v8  ;;  %v3167_v14 = vadd.f32 %v3672_v8, %v3166_v57  ;;  %v3208_v15 = vmul.f32 %v3672_v8, %v3672_v8  ;;  %v3676_v16 = vadd.f32 %v3675_v9, %v3010_v7 }
 0x1e3   :  { %3070 = vst [vmem:[%s5544_s3 + $0x28] sm:$0xff] %v3674_v12  ;;  %v3186_v17 = vadd.f32 %v3674_v12, %v3185_v60  ;;  %v3209_v18 = vmul.f32 %v3674_v12, %v3674_v12  ;;  %v3678_v19 = vadd.f32 %v3677_v13, %v3012_v11 }
 0x1e4   :  { %v3233_v20 = vadd.f32 %v3232_v0, %v3208_v15  ;;  %3071 = vst [vmem:[%s5544_s3 + $0x30] sm:$0xff] %v3676_v16  ;;  %v3168_v21 = vadd.f32 %v3676_v16, %v3167_v14  ;;  %v3210_v22 = vmul.f32 %v3676_v16, %v3676_v16 }
 0x1e5   :  { %v3252_v23 = vadd.f32 %v3251_v4, %v3209_v18  ;;  %3072 = vst [vmem:[%s5544_s3 + $0x38] sm:$0xff] %v3678_v19  ;;  %v3187_v24 = vadd.f32 %v3678_v19, %v3186_v17  ;;  %v3211_v25 = vmul.f32 %v3678_v19, %v3678_v19  ;;  %v2604_v26 = vpop.f32.mrb[8].mxu1 }
 0x1e6   :  { %v3016_v27 = vpop.f32.mrb[8].mxu0  ;;  %v3234_v28 = vadd.f32 %v3233_v20, %v3210_v22  ;;  %v3679_v29 = vadd.f32 %v2604_v26, %v5414_v38  ;;  %v2606_v30 = vpop.f32.mrb[9].mxu1 }
 0x1e7   :  { %v3018_v31 = vpop.f32.mrb[9].mxu0  ;;  %v3253_v32 = vadd.f32 %v3252_v23, %v3211_v25  ;;  %v3681_v33 = vadd.f32 %v2606_v30, %v5416_v39  ;;  %v2608_v35 = vpop.f32.mrb[10].mxu1 }
 0x1e8   :  { %v3020_v36 = vpop.f32.mrb[10].mxu0  ;;  %v3680_v37 = vadd.f32 %v3679_v29, %v3016_v27  ;;  %v3683_v40 = vadd.f32 %v2608_v35, %v5414_v38  ;;  %v2610_v41 = vpop.f32.mrb[11].mxu1 }
 0x1e9   :  { %v3022_v42 = vpop.f32.mrb[11].mxu0  ;;  %v3682_v43 = vadd.f32 %v3681_v33, %v3018_v31  ;;  %v3685_v44 = vadd.f32 %v2610_v41, %v5416_v39 }
 0x1ea   :  { %3073 = vst [vmem:[%s5544_s3 + $0x40] sm:$0xff] %v3680_v37  ;;  %v3169_v45 = vadd.f32 %v3680_v37, %v3168_v21  ;;  %v3212_v46 = vmul.f32 %v3680_v37, %v3680_v37  ;;  %v3684_v47 = vadd.f32 %v3683_v40, %v3020_v36 }
 0x1eb   :  { %3074 = vst [vmem:[%s5544_s3 + $0x48] sm:$0xff] %v3682_v43  ;;  %v3188_v48 = vadd.f32 %v3682_v43, %v3187_v24  ;;  %v3213_v49 = vmul.f32 %v3682_v43, %v3682_v43  ;;  %v3686_v50 = vadd.f32 %v3685_v44, %v3022_v42 }
 0x1ec   :  { %v3235_v51 = vadd.f32 %v3234_v28, %v3212_v46  ;;  %3075 = vst [vmem:[%s5544_s3 + $0x50] sm:$0xff] %v3684_v47  ;;  %v3170_v52 = vadd.f32 %v3684_v47, %v3169_v45  ;;  %v3214_v53 = vmul.f32 %v3684_v47, %v3684_v47 }
 0x1ed   :  { %v3254_v54 = vadd.f32 %v3253_v32, %v3213_v49  ;;  %3076 = vst [vmem:[%s5544_s3 + $0x58] sm:$0xff] %v3686_v50  ;;  %v3189_v55 = vadd.f32 %v3686_v50, %v3188_v48  ;;  %v3215_v56 = vmul.f32 %v3686_v50, %v3686_v50  ;;  %v2614_v57 = vpop.f32.mrb[12].mxu1 }
 0x1ee   :  { %v3026_v58 = vpop.f32.mrb[12].mxu0  ;;  %v3236_v59 = vadd.f32 %v3235_v51, %v3214_v53  ;;  %v3687_v60 = vadd.f32 %v2614_v57, %v5414_v38  ;;  %v2616_v61 = vpop.f32.mrb[13].mxu1 }
 0x1ef   :  { %v3028_v62 = vpop.f32.mrb[13].mxu0  ;;  %v3255_v63 = vadd.f32 %v3254_v54, %v3215_v56  ;;  %v3689_v0 = vadd.f32 %v2616_v61, %v5416_v39  ;;  %v2618_v1 = vpop.f32.mrb[14].mxu1 }
 0x1f0   :  { %v3030_v2 = vpop.f32.mrb[14].mxu0  ;;  %v3688_v3 = vadd.f32 %v3687_v60, %v3026_v58  ;;  %v3691_v4 = vadd.f32 %v2618_v1, %v5414_v38  ;;  %v2620_v5 = vpop.f32.mrb[15].mxu1 }
 0x1f1   :  { %v3032_v6 = vpop.f32.mrb[15].mxu0  ;;  %v3690_v7 = vadd.f32 %v3689_v0, %v3028_v62  ;;  %v3693_v8 = vadd.f32 %v2620_v5, %v5416_v39 }
 0x1f2   :  { %3077 = vst [vmem:[%s5544_s3 + $0x60] sm:$0xff] %v3688_v3  ;;  %v3171_v9 = vadd.f32 %v3688_v3, %v3170_v52  ;;  %v3216_v10 = vmul.f32 %v3688_v3, %v3688_v3  ;;  %v3692_v11 = vadd.f32 %v3691_v4, %v3030_v2 }
 0x1f3   :  { %3078 = vst [vmem:[%s5544_s3 + $0x68] sm:$0xff] %v3690_v7  ;;  %v3190_v12 = vadd.f32 %v3690_v7, %v3189_v55  ;;  %v3217_v13 = vmul.f32 %v3690_v7, %v3690_v7  ;;  %v3694_v14 = vadd.f32 %v3693_v8, %v3032_v6 }
 0x1f4   :  { %v3237_v15 = vadd.f32 %v3236_v59, %v3216_v10  ;;  %3079 = vst [vmem:[%s5544_s3 + $0x70] sm:$0xff] %v3692_v11  ;;  %v3172_v16 = vadd.f32 %v3692_v11, %v3171_v9  ;;  %v3218_v17 = vmul.f32 %v3692_v11, %v3692_v11  ;;  %v3107_v10 = vadd.s32 96, %v5407_v34 }
 0x1f5   :  { %v3256_v18 = vadd.f32 %v3255_v63, %v3217_v13  ;;  %3080 = vst [vmem:[%s5544_s3 + $0x78] sm:$0xff] %v3694_v14  ;;  %v3191_v19 = vadd.f32 %v3694_v14, %v3190_v12  ;;  %v3219_v20 = vmul.f32 %v3694_v14, %v3694_v14  ;;  %v2624_v21 = vpop.f32.mrb[16].mxu1 }
 0x1f6   :  { %v3036_v22 = vpop.f32.mrb[16].mxu0  ;;  %v3238_v23 = vadd.f32 %v3237_v15, %v3218_v17  ;;  %v3695_v24 = vadd.f32 %v2624_v21, %v5414_v38  ;;  %v2626_v25 = vpop.f32.mrb[17].mxu1  ;;  %vm3136_vm0 = vcmp.lt.s32.totalorder %v3107_v10, 98 }
 0x1f7   :  { %v3038_v26 = vpop.f32.mrb[17].mxu0  ;;  %v3257_v27 = vadd.f32 %v3256_v18, %v3219_v20  ;;  %v3697_v28 = vadd.f32 %v2626_v25, %v5416_v39  ;;  %v2628_v29 = vpop.f32.mrb[18].mxu1 }
 0x1f8   :  { %v3040_v30 = vpop.f32.mrb[18].mxu0  ;;  %v3696_v31 = vadd.f32 %v3695_v24, %v3036_v22  ;;  %v3699_v32 = vadd.f32 %v2628_v29, %v5414_v38  ;;  %v2630_v33 = vpop.f32.mrb[19].mxu1 }
 0x1f9   :  { %v3042_v35 = vpop.f32.mrb[19].mxu0  ;;  %v3698_v36 = vadd.f32 %v3697_v28, %v3038_v26  ;;  %v3701_v37 = vadd.f32 %v2630_v33, %v5416_v39 }
 0x1fa   :  { %3081 = vst [vmem:[%s5544_s3 + $0x80] sm:$0xff] %v3696_v31  ;;  %v3173_v40 = vadd.f32 %v3696_v31, %v3172_v16  ;;  %v3220_v41 = vmul.f32 %v3696_v31, %v3696_v31  ;;  %v3700_v42 = vadd.f32 %v3699_v32, %v3040_v30 }
 0x1fb   :  { %3082 = vst [vmem:[%s5544_s3 + $0x88] sm:$0xff] %v3698_v36  ;;  %v3192_v43 = vadd.f32 %v3698_v36, %v3191_v19  ;;  %v3221_v44 = vmul.f32 %v3698_v36, %v3698_v36  ;;  %v3702_v45 = vadd.f32 %v3701_v37, %v3042_v35 }
 0x1fc   :  { %v3239_v46 = vadd.f32 %v3238_v23, %v3220_v41  ;;  %3083 = vst [vmem:[%s5544_s3 + $0x90] sm:$0xff] %v3700_v42  ;;  %v3174_v47 = vadd.f32 %v3700_v42, %v3173_v40  ;;  %v3222_v48 = vmul.f32 %v3700_v42, %v3700_v42 }
 0x1fd   :  { %v3258_v49 = vadd.f32 %v3257_v27, %v3221_v44  ;;  %3084 = vst [vmem:[%s5544_s3 + $0x98] sm:$0xff] %v3702_v45  ;;  %v3193_v50 = vadd.f32 %v3702_v45, %v3192_v43  ;;  %v3223_v51 = vmul.f32 %v3702_v45, %v3702_v45  ;;  %v2634_v52 = vpop.f32.mrb[20].mxu1 }
 0x1fe   :  { %v3046_v53 = vpop.f32.mrb[20].mxu0  ;;  %v3240_v54 = vadd.f32 %v3239_v46, %v3222_v48  ;;  %v3703_v55 = vadd.f32 %v2634_v52, %v5414_v38  ;;  %v2636_v56 = vpop.f32.mrb[21].mxu1 }
 0x1ff   :  { %v3048_v57 = vpop.f32.mrb[21].mxu0  ;;  %v3259_v58 = vadd.f32 %v3258_v49, %v3223_v51  ;;  %v3705_v59 = vadd.f32 %v2636_v56, %v5416_v39  ;;  %v2638_v60 = vpop.f32.mrb[22].mxu1  ;;  %v4274_v56 = vmov 1983009808  }
 0x200   :  { %v3050_v61 = vpop.f32.mrb[22].mxu0  ;;  %v3704_v62 = vadd.f32 %v3703_v55, %v3046_v53  ;;  %v3707_v63 = vadd.f32 %v2638_v60, %v5414_v38  ;;  %v2640_v0 = vpop.f32.mrb[23].mxu1 }
 0x201   :  { %v3052_v1 = vpop.f32.mrb[23].mxu0  ;;  %v3706_v2 = vadd.f32 %v3705_v59, %v3048_v57  ;;  %v3709_v3 = vadd.f32 %v2640_v0, %v5416_v39  ;;  %v3278_v57 = vunpack.c.l.s4 %v4274_v56 }
 0x202   :  { %3085 = vst [vmem:[%s5544_s3 + $0xa0] sm:$0xff] %v3704_v62  ;;  %v3175_v4 = vadd.f32 %v3704_v62, %v3174_v47  ;;  %v3224_v5 = vmul.f32 %v3704_v62, %v3704_v62  ;;  %v3708_v6 = vadd.f32 %v3707_v63, %v3050_v61 }
 0x203   :  { %3086 = vst [vmem:[%s5544_s3 + $0xa8] sm:$0xff] %v3706_v2  ;;  %v3194_v7 = vadd.f32 %v3706_v2, %v3193_v50  ;;  %v3225_v8 = vmul.f32 %v3706_v2, %v3706_v2  ;;  %v3710_v9 = vadd.f32 %v3709_v3, %v3052_v1  ;;  %v3279_v1 = vunpack.c.0.s8 %v3278_v57 }
 0x204   :  { %v3241_v11 = vadd.f32 %v3240_v54, %v3224_v5  ;;  %3087 = vst [vmem:[%s5544_s3 + $0xb0] sm:$0xff] %v3708_v6  ;;  %v3176_v12 = vadd.f32 %v3708_v6, %v3175_v4  ;;  %v3226_v13 = vmul.f32 %v3708_v6, %v3708_v6 }
 0x205   :  { %v3260_v14 = vadd.f32 %v3259_v58, %v3225_v8  ;;  %3088 = vst [vmem:[%s5544_s3 + $0xb8] sm:$0xff] %v3710_v9  ;;  %v3195_v15 = vadd.f32 %v3710_v9, %v3194_v7  ;;  %v3227_v16 = vmul.f32 %v3710_v9, %v3710_v9  ;;  %v2644_v17 = vpop.f32.mrb[24].mxu1  ;;  %v3282_v8 = vsub.s32 %v3279_v1, %v5407_v34 }
 0x206   :  { %v3056_v18 = vpop.f32.mrb[24].mxu0  ;;  %v3242_v19 = vadd.f32 %v3241_v11, %v3226_v13  ;;  %v3711_v20 = vadd.f32 %v2644_v17, %v5414_v38  ;;  %v2646_v21 = vpop.f32.mrb[25].mxu1  ;;  %v3270_v11 = vld [vmem:[%s5542_s4] sm:$0xf] }
 0x207   :  { %v3058_v22 = vpop.f32.mrb[25].mxu0  ;;  %v3261_v23 = vadd.f32 %v3260_v14, %v3227_v16  ;;  %v3713_v24 = vadd.f32 %v2646_v21, %v5416_v39  ;;  %v2648_v25 = vpop.f32.mrb[26].mxu1 }
 0x208   :  { %v3060_v26 = vpop.f32.mrb[26].mxu0  ;;  %v3712_v27 = vadd.f32 %v3711_v20, %v3056_v18  ;;  %v3715_v28 = vadd.f32 %v2648_v25, %v5414_v38  ;;  %v2650_v29 = vpop.f32.mrb[27].mxu1 }
 0x209   :  { %v3062_v30 = vpop.f32.mrb[27].mxu0  ;;  %v3714_v31 = vadd.f32 %v3713_v24, %v3058_v22  ;;  %v3717_v32 = vadd.f32 %v2650_v29, %v5416_v39 }
 0x20a   :  { %3089 = vst [vmem:[%s5544_s3 + $0xc0] sm:$0xff] %v3712_v27  ;;  %v3162_v33 = vsel %vm3136_vm0, %v3712_v27, 0.0  ;;  %v3716_v35 = vadd.f32 %v3715_v28, %v3060_v26 }
 0x20b   :  { %v3177_v36 = vadd.f32 %v3176_v12, %v3162_v33  ;;  %v3228_v37 = vmul.f32 %v3162_v33, %v3162_v33  ;;  %3090 = vst [vmem:[%s5544_s3 + $0xc8] sm:$0xff] %v3714_v31  ;;  %v3163_v38 = vsel %vm3136_vm0, %v3714_v31, 0.0  ;;  %v3718_v40 = vadd.f32 %v3717_v32, %v3062_v30 }
 0x20c   :  { %v3196_v41 = vadd.f32 %v3195_v15, %v3163_v38  ;;  %v3229_v42 = vmul.f32 %v3163_v38, %v3163_v38  ;;  %3091 = vst [vmem:[%s5544_s3 + $0xd0] sm:$0xff] %v3716_v35 }
 0x20d   :  { %v3179_v39 = vrot.slane %v3177_v36, 4  ;;  %v3243_v43 = vadd.f32 %v3242_v19, %v3228_v37  ;;  %3092 = vst [vmem:[%s5544_s3 + $0xd8] sm:$0xff] %v3718_v40 }
 0x20e   :  { %v3198_v44 = vrot.slane %v3196_v41, 4  ;;  %v3262_v45 = vadd.f32 %v3261_v23, %v3229_v42 }
 0x20f   :  { %v3180_v46 = vadd.f32 %v3179_v39, %v3177_v36  ;;  %v3245_v47 = vrot.slane %v3243_v43, 4 }
 0x210   :  { %v3199_v48 = vadd.f32 %v3198_v44, %v3196_v41  ;;  %v3264_v49 = vrot.slane %v3262_v45, 4 }
 0x211   :  { %v3181_v50 = vrot.slane %v3180_v46, 2  ;;  %v3246_v51 = vadd.f32 %v3245_v47, %v3243_v43 }
 0x212   :  { %v3200_v52 = vrot.slane %v3199_v48, 2  ;;  %v3265_v53 = vadd.f32 %v3264_v49, %v3262_v45 }
 0x213   :  { %v3182_v54 = vadd.f32 %v3181_v50, %v3180_v46  ;;  %v3247_v55 = vrot.slane %v3246_v51, 2 }
 0x214   :  { %v3201_v58 = vadd.f32 %v3200_v52, %v3199_v48  ;;  %v3266_v59 = vrot.slane %v3265_v53, 2 }
 0x215   :  { %v3183_v60 = vrot.slane %v3182_v54, 1  ;;  %v3248_v61 = vadd.f32 %v3247_v55, %v3246_v51 }
 0x216   :  { %v3202_v62 = vrot.slane %v3201_v58, 1  ;;  %v3267_v63 = vadd.f32 %v3266_v59, %v3265_v53 }
 0x217   :  { %v3249_v0 = vrot.slane %v3248_v61, 1  ;;  %v3184_v3 = vadd.f32 %v3183_v60, %v3182_v54 }
 0x218   :  { %v3268_v2 = vrot.slane %v3267_v63, 1  ;;  %v3203_v5 = vadd.f32 %v3202_v62, %v3201_v58 }
 0x219   :  { %v3250_v4 = vadd.f32 %v3249_v0, %v3248_v61 }
 0x21a   :  { %v3269_v6 = vadd.f32 %v3268_v2, %v3267_v63 }
 0x21b   :  { %v3272_v7 = vsel %vm3271_vm1, %v3184_v3, %v3250_v4 }
 0x21c   :  { %v3273_v9 = vsel %vm3271_vm1, %v3203_v5, %v3269_v6 }
 0x21d   :  { %v3276_v10 = vcombine.low %v3272_v7, %v3273_v9 }
 0x21f   :  { %v3283_v12 = vrot.slane %v3276_v10, %v3282_v8 }
 0x221   :  { %v3285_v13 = vadd.f32 %v3283_v12, %v3270_v11 }
 0x223   :  { %3286 = vst [vmem:[%s5542_s4] sm:$0xf] %v3285_v13 }

// kernel: discriminator_forward.9
= control target key start
LH: loop header
LB: loop body
LE: loop exit
PB: predicated region body
PF: predicated region fallthrough
CT: control target
= control target key end

     0   :  { %vm8905_vm0 = vcmask 7168   ;;  %s14585_s1 = inlined_call_operand.vmem [shape: bf16[12544,1], index: 1, kind: input, shape index: {}]   ;;  %s14586_s0 = inlined_call_operand.vmem [shape: bf16[16,12544], index: 0, kind: input, shape index: {}]   ;;  %s14587_s2 = inlined_call_operand.<no memory space> [shape: f32[1,1], index: 2, kind: input, shape index: {}]   ;;  %s14588_s3 = inlined_call_operand.vmem [shape: f32[16,1], index: 3, kind: output, shape index: {}]  }
   0x1   :  { %v10875_v0 = vld [vmem:[%s14585_s1 + $0x40] sm:$0xff]   ;;  %v10879_v4 = vld [vmem:[%s14585_s1 + $0x48] sm:$0xff]   ;;  %v10883_v8 = vld [vmem:[%s14585_s1 + $0x50] sm:$0xff]  }
   0x2   :  { %v10876_v1 = vld [vmem:[%s14585_s1] sm:$0xff]   ;;  %9797 = vmatprep.subr.bf16.mxu0 %v10875_v0  ;;  %v10880_v5 = vld [vmem:[%s14585_s1 + $0x8] sm:$0xff]   ;;  %v10884_v9 = vld [vmem:[%s14585_s1 + $0x10] sm:$0xff]  }
   0x3   :  { %v10877_v2 = vld [vmem:[%s14585_s1 + $0xc0] sm:$0xff]   ;;  %9798 = vmatpush3.bf16.msra.mxu0 %v10876_v1  ;;  %v10881_v6 = vld [vmem:[%s14585_s1 + $0xc8] sm:$0xff]   ;;  %v10885_v10 = vld [vmem:[%s14585_s1 + $0xd0] sm:$0xff]  }
   0x4   :  { %v10878_v3 = vld [vmem:[%s14585_s1 + $0x80] sm:$0xff]   ;;  %9819 = vmatprep.subr.bf16.mxu1 %v10877_v2  ;;  %9799 = vmatprep.subr.bf16.mxu0 %v10879_v4  ;;  %v10882_v7 = vld [vmem:[%s14585_s1 + $0x88] sm:$0xff]   ;;  %v10886_v11 = vld [vmem:[%s14585_s1 + $0x90] sm:$0xff]  }
   0x5   :  { %9820 = vmatpush3.bf16.msra.mxu1 %v10878_v3  ;;  %v10887_v12 = vld [vmem:[%s14585_s1 + $0x58] sm:$0xff]   ;;  %v10891_v16 = vld [vmem:[%s14585_s1 + $0x60] sm:$0xff]   ;;  %v10895_v20 = vld [vmem:[%s14585_s1 + $0x68] sm:$0xff]  }
   0x6   :  { %9821 = vmatprep.subr.bf16.mxu1 %v10881_v6  ;;  %v10888_v13 = vld [vmem:[%s14585_s1 + $0x18] sm:$0xff]   ;;  %v10892_v17 = vld [vmem:[%s14585_s1 + $0x20] sm:$0xff]   ;;  %v10896_v21 = vld [vmem:[%s14585_s1 + $0x28] sm:$0xff]  }
   0x7   :  { %9800 = vmatpush3.bf16.msra.mxu0 %v10880_v5  ;;  %v10889_v14 = vld [vmem:[%s14585_s1 + $0xd8] sm:$0xff]   ;;  %v10893_v18 = vld [vmem:[%s14585_s1 + $0xe0] sm:$0xff]   ;;  %v10897_v22 = vld [vmem:[%s14585_s1 + $0xe8] sm:$0xff]  }
   0x8   :  { %9801 = vmatprep.subr.bf16.mxu0 %v10883_v8  ;;  %v10890_v15 = vld [vmem:[%s14585_s1 + $0x98] sm:$0xff]   ;;  %v10894_v19 = vld [vmem:[%s14585_s1 + $0xa0] sm:$0xff]   ;;  %v10898_v23 = vld [vmem:[%s14585_s1 + $0xa8] sm:$0xff]  }
   0x9   :  { %9822 = vmatpush3.bf16.msra.mxu1 %v10882_v7  ;;  %v10899_v24 = vld [vmem:[%s14585_s1 + $0x70] sm:$0xff]   ;;  %v10903_v28 = vld [vmem:[%s14585_s1 + $0x78] sm:$0xff]   ;;  %v10906_v31 = vld [vmem:[%s14586_s0] ss:$392 sps:$4 sm:$0xff]  }
   0xa   :  { %9823 = vmatprep.subr.bf16.mxu1 %v10885_v10  ;;  %v10900_v25 = vld [vmem:[%s14585_s1 + $0x30] sm:$0xff]   ;;  %v10904_v29 = vld [vmem:[%s14585_s1 + $0x38] sm:$0xff]   ;;  %v10908_v32 = vld [vmem:[%s14586_s0 + $0x4] ss:$392 sps:$4 sm:$0xff]  }
   0xb   :  { %9802 = vmatpush3.bf16.msra.mxu0 %v10884_v9  ;;  %v10901_v26 = vld [vmem:[%s14585_s1 + $0xf0] sm:$0xff]   ;;  %v10905_v30 = vld [vmem:[%s14585_s1 + $0xf8] sm:$0xff]   ;;  %6916 = vmatprep.mubr.bf16.mxu0 %v10908_v32  ;;  %v10910_v34 = vld [vmem:[%s14585_s1 + $0x140] sm:$0xff]  }
   0xc   :  { %9803 = vmatprep.subr.bf16.mxu0 %v10887_v12  ;;  %v10902_v27 = vld [vmem:[%s14585_s1 + $0xb0] sm:$0xff]   ;;  %v10909_v33 = vld [vmem:[%s14585_s1 + $0xb8] sm:$0xff]   ;;  %v10914_v37 = vld [vmem:[%s14585_s1 + $0x100] sm:$0xff]  }
   0xd   :  { %9824 = vmatpush3.bf16.msra.mxu1 %v10886_v11  ;;  %v10911_v35 = vld [vmem:[%s14586_s0 + $0x8] ss:$392 sps:$4 sm:$0xff]   ;;  %v10913_v36 = vld [vmem:[%s14586_s0 + $0xc] ss:$392 sps:$4 sm:$0xff]   ;;  %v10915_v38 = vld [vmem:[%s14585_s1 + $0x1c0] sm:$0xff]  }
   0xe   :  { %9825 = vmatprep.subr.bf16.mxu1 %v10889_v14  ;;  %6957 = vmatprep.mubr.bf16.mxu1 %v10913_v36  ;;  %v10916_v39 = vld [vmem:[%s14585_s1 + $0x180] sm:$0xff]   ;;  %v10917_v40 = vld [vmem:[%s14585_s1 + $0x148] sm:$0xff]   ;;  %v10921_v44 = vld [vmem:[%s14585_s1 + $0x150] sm:$0xff]  }
   0xf   :  { %9804 = vmatpush3.bf16.msra.mxu0 %v10888_v13  ;;  %v10918_v41 = vld [vmem:[%s14585_s1 + $0x108] sm:$0xff]   ;;  %v10922_v45 = vld [vmem:[%s14585_s1 + $0x110] sm:$0xff]   ;;  %v10925_v48 = vld [vmem:[%s14585_s1 + $0x158] sm:$0xff]  }
  0x10   :  { %9805 = vmatprep.subr.bf16.mxu0 %v10891_v16  ;;  %v10919_v42 = vld [vmem:[%s14585_s1 + $0x1c8] sm:$0xff]   ;;  %v10923_v46 = vld [vmem:[%s14585_s1 + $0x1d0] sm:$0xff]   ;;  %v10926_v49 = vld [vmem:[%s14585_s1 + $0x118] sm:$0xff]  }
  0x11   :  { %9826 = vmatpush3.bf16.msra.mxu1 %v10890_v15  ;;  %v10920_v43 = vld [vmem:[%s14585_s1 + $0x188] sm:$0xff]   ;;  %v10924_v47 = vld [vmem:[%s14585_s1 + $0x190] sm:$0xff]   ;;  %v10927_v50 = vld [vmem:[%s14585_s1 + $0x1d8] sm:$0xff]  }
  0x12   :  { %9827 = vmatprep.subr.bf16.mxu1 %v10893_v18  ;;  %v10928_v51 = vld [vmem:[%s14585_s1 + $0x198] sm:$0xff]   ;;  %v10929_v52 = vld [vmem:[%s14585_s1 + $0x160] sm:$0xff]   ;;  %v10933_v56 = vld [vmem:[%s14585_s1 + $0x168] sm:$0xff]  }
  0x13   :  { %9806 = vmatpush3.bf16.msra.mxu0 %v10892_v17  ;;  %v10930_v53 = vld [vmem:[%s14585_s1 + $0x120] sm:$0xff]   ;;  %v10934_v57 = vld [vmem:[%s14585_s1 + $0x128] sm:$0xff]   ;;  %v10937_v60 = vld [vmem:[%s14585_s1 + $0x170] sm:$0xff]  }
  0x14   :  { %9807 = vmatprep.subr.bf16.mxu0 %v10895_v20  ;;  %v10931_v54 = vld [vmem:[%s14585_s1 + $0x1e0] sm:$0xff]   ;;  %v10935_v58 = vld [vmem:[%s14585_s1 + $0x1e8] sm:$0xff]   ;;  %v10938_v61 = vld [vmem:[%s14585_s1 + $0x130] sm:$0xff]  }
  0x15   :  { %9828 = vmatpush3.bf16.msra.mxu1 %v10894_v19  ;;  %v10932_v55 = vld [vmem:[%s14585_s1 + $0x1a0] sm:$0xff]   ;;  %v10936_v59 = vld [vmem:[%s14585_s1 + $0x1a8] sm:$0xff]   ;;  %v10939_v62 = vld [vmem:[%s14585_s1 + $0x1f0] sm:$0xff]  }
  0x16   :  { %9829 = vmatprep.subr.bf16.mxu1 %v10897_v22  ;;  %v10940_v63 = vld [vmem:[%s14585_s1 + $0x1b0] sm:$0xff]   ;;  %v10941_v0 = vld [vmem:[%s14585_s1 + $0x178] sm:$0xff]   ;;  %v10948_v6 = vld [vmem:[%s14585_s1 + $0x240] sm:$0xff]  }
  0x17   :  { %9808 = vmatpush3.bf16.msra.mxu0 %v10896_v21  ;;  %v10942_v1 = vld [vmem:[%s14585_s1 + $0x138] sm:$0xff]   ;;  %v10952_v9 = vld [vmem:[%s14585_s1 + $0x200] sm:$0xff]   ;;  %v10955_v12 = vld [vmem:[%s14585_s1 + $0x248] sm:$0xff]  }
  0x18   :  { %9809 = vmatprep.subr.bf16.mxu0 %v10899_v24  ;;  %v10943_v2 = vld [vmem:[%s14585_s1 + $0x1f8] sm:$0xff]   ;;  %v10953_v10 = vld [vmem:[%s14585_s1 + $0x2c0] sm:$0xff]   ;;  %v10956_v13 = vld [vmem:[%s14585_s1 + $0x208] sm:$0xff]  }
  0x19   :  { %9830 = vmatpush3.bf16.msra.mxu1 %v10898_v23  ;;  %v10944_v3 = vld [vmem:[%s14586_s0 + $0x10] ss:$392 sps:$4 sm:$0xff]   ;;  %v10946_v4 = vld [vmem:[%s14586_s0 + $0x14] ss:$392 sps:$4 sm:$0xff]   ;;  %v10954_v11 = vld [vmem:[%s14585_s1 + $0x280] sm:$0xff]  }
  0x1a   :  { %9831 = vmatprep.subr.bf16.mxu1 %v10901_v26  ;;  %v10947_v5 = vld [vmem:[%s14585_s1 + $0x1b8] sm:$0xff]   ;;  %v10957_v14 = vld [vmem:[%s14585_s1 + $0x2c8] sm:$0xff]   ;;  %v10959_v16 = vld [vmem:[%s14585_s1 + $0x250] sm:$0xff]  }
  0x1b   :  { %9810 = vmatpush3.bf16.msra.mxu0 %v10900_v25  ;;  %v10949_v7 = vld [vmem:[%s14586_s0 + $0x18] ss:$392 sps:$4 sm:$0xff]   ;;  %v10951_v8 = vld [vmem:[%s14586_s0 + $0x1c] ss:$392 sps:$4 sm:$0xff]   ;;  %v10958_v15 = vld [vmem:[%s14585_s1 + $0x288] sm:$0xff]  }
  0x1c   :  { %9811 = vmatprep.subr.bf16.mxu0 %v10903_v28  ;;  %v10960_v17 = vld [vmem:[%s14585_s1 + $0x210] sm:$0xff]   ;;  %v10963_v20 = vld [vmem:[%s14585_s1 + $0x258] sm:$0xff]   ;;  %v10967_v24 = vld [vmem:[%s14585_s1 + $0x260] sm:$0xff]  }
  0x1d   :  { %9832 = vmatpush3.bf16.msra.mxu1 %v10902_v27  ;;  %v10961_v18 = vld [vmem:[%s14585_s1 + $0x2d0] sm:$0xff]   ;;  %v10964_v21 = vld [vmem:[%s14585_s1 + $0x218] sm:$0xff]   ;;  %v10968_v25 = vld [vmem:[%s14585_s1 + $0x220] sm:$0xff]  }
  0x1e   :  { %9833 = vmatprep.subr.bf16.mxu1 %v10905_v30  ;;  %v10962_v19 = vld [vmem:[%s14585_s1 + $0x290] sm:$0xff]   ;;  %v10965_v22 = vld [vmem:[%s14585_s1 + $0x2d8] sm:$0xff]   ;;  %v10969_v26 = vld [vmem:[%s14585_s1 + $0x2e0] sm:$0xff]  }
  0x1f   :  { %9812 = vmatpush3.bf16.msra.mxu0 %v10904_v29  ;;  %v10966_v23 = vld [vmem:[%s14585_s1 + $0x298] sm:$0xff]   ;;  %v10970_v27 = vld [vmem:[%s14585_s1 + $0x2a0] sm:$0xff]   ;;  %v10971_v28 = vld [vmem:[%s14585_s1 + $0x268] sm:$0xff]  }
  0x20   :  { %9841 = vmatprep.subr.bf16.mxu0 %v10910_v34  ;;  %v10972_v29 = vld [vmem:[%s14585_s1 + $0x228] sm:$0xff]   ;;  %v10975_v32 = vld [vmem:[%s14585_s1 + $0x270] sm:$0xff]   ;;  %v10979_v36 = vld [vmem:[%s14585_s1 + $0x278] sm:$0xff]  }
  0x21   :  { %9834 = vmatpush3.bf16.msra.mxu1 %v10909_v33  ;;  %v10973_v30 = vld [vmem:[%s14585_s1 + $0x2e8] sm:$0xff]   ;;  %v10976_v33 = vld [vmem:[%s14585_s1 + $0x230] sm:$0xff]  }
  0x22   :  { %6917 = vmatmul.mubr.bf16.vlgmr.msra.gmra.mrb[0].mxu0 %v10906_v31  ;;  %9863 = vmatprep.subr.bf16.mxu1 %v10915_v38  ;;  %v10974_v31 = vld [vmem:[%s14585_s1 + $0x2a8] sm:$0xff]   ;;  %v10977_v34 = vld [vmem:[%s14585_s1 + $0x2f0] sm:$0xff]   ;;  %v10981_v38 = vld [vmem:[%s14585_s1 + $0x2f8] sm:$0xff]  }
  0x23   :  { %9842 = vmatpush3.bf16.msra.mxu0 %v10914_v37  ;;  %6998 = vmatprep.mubr.bf16.mxu0 %v10946_v4  ;;  %v10980_v37 = vld [vmem:[%s14585_s1 + $0x238] sm:$0xff]   ;;  %v11013_v4 = vld [vmem:[%s14585_s1 + $0x370] sm:$0xff]  }
  0x24   :  { %6958 = vmatmul.mubr.bf16.vlgmr.msra.gmra.mrb[0].mxu1 %v10911_v35  ;;  %9843 = vmatprep.subr.bf16.mxu0 %v10917_v40  ;;  %v10978_v35 = vld [vmem:[%s14585_s1 + $0x2b0] sm:$0xff]   ;;  %v10984_v40 = vld [vmem:[%s14586_s0 + $0x24] ss:$392 sps:$4 sm:$0xff]  }
  0x25   :  { %9864 = vmatpush3.bf16.msra.mxu1 %v10916_v39  ;;  %7039 = vmatprep.mubr.bf16.mxu1 %v10951_v8  ;;  %v10982_v39 = vld [vmem:[%s14586_s0 + $0x20] ss:$392 sps:$4 sm:$0xff]   ;;  %v8_v8 = vstv %s14587_s2 }
  0x26   :  { %9865 = vmatprep.subr.bf16.mxu1 %v10919_v42  ;;  %v10986_v42 = vld [vmem:[%s14585_s1 + $0x340] sm:$0xff]   ;;  %9 = vst [vmem:[#allocation2] sm:$0x1] %v8_v8 }
  0x27   :  { %9844 = vmatpush3.bf16.msra.mxu0 %v10918_v41  ;;  %v10985_v41 = vld [vmem:[%s14585_s1 + $0x2b8] sm:$0xff]   ;;  %v11084_v8 = vld [vmem:[%s14585_s1 + $0x5a0] sm:$0xff]  }
  0x28   :  { %9845 = vmatprep.subr.bf16.mxu0 %v10921_v44  ;;  %v10989_v44 = vld [vmem:[%s14586_s0 + $0x2c] ss:$392 sps:$4 sm:$0xff]  }
  0x29   :  { %9866 = vmatpush3.bf16.msra.mxu1 %v10920_v43  ;;  %v10987_v43 = vld [vmem:[%s14586_s0 + $0x28] ss:$392 sps:$4 sm:$0xff]  }
  0x2a   :  { %9867 = vmatprep.subr.bf16.mxu1 %v10923_v46  ;;  %v10991_v46 = vld [vmem:[%s14585_s1 + $0x3c0] sm:$0xff]  }
  0x2b   :  { %9846 = vmatpush3.bf16.msra.mxu0 %v10922_v45  ;;  %v10990_v45 = vld [vmem:[%s14585_s1 + $0x300] sm:$0xff]  }
  0x2c   :  { %9847 = vmatprep.subr.bf16.mxu0 %v10925_v48  ;;  %v10993_v48 = vld [vmem:[%s14585_s1 + $0x348] sm:$0xff]  }
  0x2d   :  { %9868 = vmatpush3.bf16.msra.mxu1 %v10924_v47  ;;  %v10992_v47 = vld [vmem:[%s14585_s1 + $0x380] sm:$0xff]  }
  0x2e   :  { %9869 = vmatprep.subr.bf16.mxu1 %v10927_v50  ;;  %v10995_v50 = vld [vmem:[%s14585_s1 + $0x3c8] sm:$0xff]  }
  0x2f   :  { %9848 = vmatpush3.bf16.msra.mxu0 %v10926_v49  ;;  %v10994_v49 = vld [vmem:[%s14585_s1 + $0x308] sm:$0xff]  }
  0x30   :  { %9849 = vmatprep.subr.bf16.mxu0 %v10929_v52  ;;  %v10997_v52 = vld [vmem:[%s14585_s1 + $0x350] sm:$0xff]  }
  0x31   :  { %9870 = vmatpush3.bf16.msra.mxu1 %v10928_v51  ;;  %v10996_v51 = vld [vmem:[%s14585_s1 + $0x388] sm:$0xff]  }
  0x32   :  { %9871 = vmatprep.subr.bf16.mxu1 %v10931_v54  ;;  %v10999_v54 = vld [vmem:[%s14585_s1 + $0x3d0] sm:$0xff]  }
  0x33   :  { %9850 = vmatpush3.bf16.msra.mxu0 %v10930_v53  ;;  %v10998_v53 = vld [vmem:[%s14585_s1 + $0x310] sm:$0xff]  }
  0x34   :  { %9851 = vmatprep.subr.bf16.mxu0 %v10933_v56  ;;  %v11001_v56 = vld [vmem:[%s14585_s1 + $0x358] sm:$0xff]  }
  0x35   :  { %9872 = vmatpush3.bf16.msra.mxu1 %v10932_v55  ;;  %v11000_v55 = vld [vmem:[%s14585_s1 + $0x390] sm:$0xff]  }
  0x36   :  { %9873 = vmatprep.subr.bf16.mxu1 %v10935_v58  ;;  %v11003_v58 = vld [vmem:[%s14585_s1 + $0x3d8] sm:$0xff]  }
  0x37   :  { %9852 = vmatpush3.bf16.msra.mxu0 %v10934_v57  ;;  %v11002_v57 = vld [vmem:[%s14585_s1 + $0x318] sm:$0xff]  }
  0x38   :  { %9853 = vmatprep.subr.bf16.mxu0 %v10937_v60  ;;  %v11005_v60 = vld [vmem:[%s14585_s1 + $0x360] sm:$0xff]  }
  0x39   :  { %9874 = vmatpush3.bf16.msra.mxu1 %v10936_v59  ;;  %v11004_v59 = vld [vmem:[%s14585_s1 + $0x398] sm:$0xff]  }
  0x3a   :  { %9875 = vmatprep.subr.bf16.mxu1 %v10939_v62  ;;  %v11007_v62 = vld [vmem:[%s14585_s1 + $0x3e0] sm:$0xff]  }
  0x3b   :  { %9854 = vmatpush3.bf16.msra.mxu0 %v10938_v61  ;;  %v11006_v61 = vld [vmem:[%s14585_s1 + $0x320] sm:$0xff]  }
  0x3c   :  { %9855 = vmatprep.subr.bf16.mxu0 %v10941_v0  ;;  %v11009_v0 = vld [vmem:[%s14585_s1 + $0x368] sm:$0xff]  }
  0x3d   :  { %9876 = vmatpush3.bf16.msra.mxu1 %v10940_v63  ;;  %v11008_v63 = vld [vmem:[%s14585_s1 + $0x3a0] sm:$0xff]  }
  0x3e   :  { %9877 = vmatprep.subr.bf16.mxu1 %v10943_v2  ;;  %v11011_v2 = vld [vmem:[%s14585_s1 + $0x3e8] sm:$0xff]  }
  0x3f   :  { %9856 = vmatpush3.bf16.msra.mxu0 %v10942_v1  ;;  %v11010_v1 = vld [vmem:[%s14585_s1 + $0x328] sm:$0xff]  }
  0x40   :  { %9885 = vmatprep.subr.bf16.mxu0 %v10948_v6  ;;  %v11015_v6 = vld [vmem:[%s14585_s1 + $0x3f0] sm:$0xff]  }
  0x41   :  { %9878 = vmatpush3.bf16.msra.mxu1 %v10947_v5  ;;  %v11014_v5 = vld [vmem:[%s14585_s1 + $0x330] sm:$0xff]  }
  0x42   :  { %6999 = vmatmul.mubr.bf16.vlgmr.msra.gmra.mrb[4].mxu0 %v10944_v3  ;;  %9907 = vmatprep.subr.bf16.mxu1 %v10953_v10  ;;  %v11012_v3 = vld [vmem:[%s14585_s1 + $0x3a8] sm:$0xff]   ;;  %v11018_v10 = vld [vmem:[%s14585_s1 + $0x338] sm:$0xff]  }
  0x43   :  { %9886 = vmatpush3.bf16.msra.mxu0 %v10952_v9  ;;  %7080 = vmatprep.mubr.bf16.mxu0 %v10984_v40  ;;  %v11017_v9 = vld [vmem:[%s14585_s1 + $0x378] sm:$0xff]   ;;  %v11050_v40 = vld [vmem:[%s14585_s1 + $0x4a8] sm:$0xff]  }
  0x44   :  { %7040 = vmatmul.mubr.bf16.vlgmr.msra.gmra.mrb[4].mxu1 %v10949_v7  ;;  %9887 = vmatprep.subr.bf16.mxu0 %v10955_v12  ;;  %v11016_v7 = vld [vmem:[%s14585_s1 + $0x3b0] sm:$0xff]  }
  0x45   :  { %9908 = vmatpush3.bf16.msra.mxu1 %v10954_v11  ;;  %7121 = vmatprep.mubr.bf16.mxu1 %v10989_v44  ;;  %v11019_v11 = vld [vmem:[%s14585_s1 + $0x3f8] sm:$0xff]   ;;  %v11054_v44 = vld [vmem:[%s14585_s1 + $0x4b0] sm:$0xff]  }
  0x46   :  { %9909 = vmatprep.subr.bf16.mxu1 %v10957_v14  ;;  %v11020_v12 = vld [vmem:[%s14586_s0 + $0x30] ss:$392 sps:$4 sm:$0xff]  }
  0x47   :  { %9888 = vmatpush3.bf16.msra.mxu0 %v10956_v13  ;;  %v11022_v13 = vld [vmem:[%s14586_s0 + $0x34] ss:$392 sps:$4 sm:$0xff]  }
  0x48   :  { %9889 = vmatprep.subr.bf16.mxu0 %v10959_v16  ;;  %v11023_v14 = vld [vmem:[%s14585_s1 + $0x3b8] sm:$0xff]  }
  0x49   :  { %9910 = vmatpush3.bf16.msra.mxu1 %v10958_v15  ;;  %v11024_v15 = vld [vmem:[%s14585_s1 + $0x440] sm:$0xff]  }
  0x4a   :  { %9911 = vmatprep.subr.bf16.mxu1 %v10961_v18  ;;  %v11025_v16 = vld [vmem:[%s14586_s0 + $0x38] ss:$392 sps:$4 sm:$0xff]  }
  0x4b   :  { %9890 = vmatpush3.bf16.msra.mxu0 %v10960_v17  ;;  %v11027_v17 = vld [vmem:[%s14586_s0 + $0x3c] ss:$392 sps:$4 sm:$0xff]  }
  0x4c   :  { %9891 = vmatprep.subr.bf16.mxu0 %v10963_v20  ;;  %v11028_v18 = vld [vmem:[%s14585_s1 + $0x400] sm:$0xff]  }
  0x4d   :  { %9912 = vmatpush3.bf16.msra.mxu1 %v10962_v19  ;;  %v11029_v19 = vld [vmem:[%s14585_s1 + $0x4c0] sm:$0xff]  }
  0x4e   :  { %9913 = vmatprep.subr.bf16.mxu1 %v10965_v22  ;;  %v11030_v20 = vld [vmem:[%s14585_s1 + $0x480] sm:$0xff]   ;;  %v11032_v22 = vld [vmem:[%s14585_s1 + $0x408] sm:$0xff]  }
  0x4f   :  { %9892 = vmatpush3.bf16.msra.mxu0 %v10964_v21  ;;  %v11031_v21 = vld [vmem:[%s14585_s1 + $0x448] sm:$0xff]  }
  0x50   :  { %9893 = vmatprep.subr.bf16.mxu0 %v10967_v24  ;;  %v11034_v24 = vld [vmem:[%s14585_s1 + $0x488] sm:$0xff]  }
  0x51   :  { %9914 = vmatpush3.bf16.msra.mxu1 %v10966_v23  ;;  %v11033_v23 = vld [vmem:[%s14585_s1 + $0x4c8] sm:$0xff]  }
  0x52   :  { %9915 = vmatprep.subr.bf16.mxu1 %v10969_v26  ;;  %v11036_v26 = vld [vmem:[%s14585_s1 + $0x410] sm:$0xff]  }
  0x53   :  { %9894 = vmatpush3.bf16.msra.mxu0 %v10968_v25  ;;  %v11035_v25 = vld [vmem:[%s14585_s1 + $0x450] sm:$0xff]  }
  0x54   :  { %9895 = vmatprep.subr.bf16.mxu0 %v10971_v28  ;;  %v11038_v28 = vld [vmem:[%s14585_s1 + $0x490] sm:$0xff]  }
  0x55   :  { %9916 = vmatpush3.bf16.msra.mxu1 %v10970_v27  ;;  %v11037_v27 = vld [vmem:[%s14585_s1 + $0x4d0] sm:$0xff]  }
  0x56   :  { %9917 = vmatprep.subr.bf16.mxu1 %v10973_v30  ;;  %v11040_v30 = vld [vmem:[%s14585_s1 + $0x418] sm:$0xff]  }
  0x57   :  { %9896 = vmatpush3.bf16.msra.mxu0 %v10972_v29  ;;  %v11039_v29 = vld [vmem:[%s14585_s1 + $0x458] sm:$0xff]  }
  0x58   :  { %9897 = vmatprep.subr.bf16.mxu0 %v10975_v32  ;;  %v11042_v32 = vld [vmem:[%s14585_s1 + $0x498] sm:$0xff]  }
  0x59   :  { %9918 = vmatpush3.bf16.msra.mxu1 %v10974_v31  ;;  %v11041_v31 = vld [vmem:[%s14585_s1 + $0x4d8] sm:$0xff]  }
  0x5a   :  { %9919 = vmatprep.subr.bf16.mxu1 %v10977_v34  ;;  %v11044_v34 = vld [vmem:[%s14585_s1 + $0x420] sm:$0xff]  }
  0x5b   :  { %9898 = vmatpush3.bf16.msra.mxu0 %v10976_v33  ;;  %v11043_v33 = vld [vmem:[%s14585_s1 + $0x460] sm:$0xff]  }
  0x5c   :  { %9899 = vmatprep.subr.bf16.mxu0 %v10979_v36  ;;  %v11046_v36 = vld [vmem:[%s14585_s1 + $0x4a0] sm:$0xff]  }
  0x5d   :  { %9920 = vmatpush3.bf16.msra.mxu1 %v10978_v35  ;;  %v11045_v35 = vld [vmem:[%s14585_s1 + $0x4e0] sm:$0xff]  }
  0x5e   :  { %9921 = vmatprep.subr.bf16.mxu1 %v10981_v38  ;;  %v11048_v38 = vld [vmem:[%s14585_s1 + $0x428] sm:$0xff]  }
  0x5f   :  { %9900 = vmatpush3.bf16.msra.mxu0 %v10980_v37  ;;  %v11047_v37 = vld [vmem:[%s14585_s1 + $0x468] sm:$0xff]  }
  0x60   :  { %9929 = vmatprep.subr.bf16.mxu0 %v10986_v42  ;;  %v11052_v42 = vld [vmem:[%s14585_s1 + $0x430] sm:$0xff]  }
  0x61   :  { %9922 = vmatpush3.bf16.msra.mxu1 %v10985_v41  ;;  %v11051_v41 = vld [vmem:[%s14585_s1 + $0x470] sm:$0xff]  }
  0x62   :  { %7081 = vmatmul.mubr.bf16.vlgmr.msra.gmra.mrb[8].mxu0 %v10982_v39  ;;  %9951 = vmatprep.subr.bf16.mxu1 %v10991_v46  ;;  %v11049_v39 = vld [vmem:[%s14585_s1 + $0x4e8] sm:$0xff]   ;;  %v11056_v46 = vld [vmem:[%s14585_s1 + $0x438] sm:$0xff]  }
  0x63   :  { %9930 = vmatpush3.bf16.msra.mxu0 %v10990_v45  ;;  %7162 = vmatprep.mubr.bf16.mxu0 %v11022_v13  ;;  %v11055_v45 = vld [vmem:[%s14585_s1 + $0x478] sm:$0xff]   ;;  %v11089_v13 = vld [vmem:[%s14585_s1 + $0x570] sm:$0xff]  }
  0x64   :  { %7122 = vmatmul.mubr.bf16.vlgmr.msra.gmra.mrb[8].mxu1 %v10987_v43  ;;  %9931 = vmatprep.subr.bf16.mxu0 %v10993_v48  ;;  %v11053_v43 = vld [vmem:[%s14585_s1 + $0x4f0] sm:$0xff]   ;;  %v11058_v48 = vld [vmem:[%s14586_s0 + $0x40] ss:$392 sps:$4 sm:$0xff]  }
  0x65   :  { %9952 = vmatpush3.bf16.msra.mxu1 %v10992_v47  ;;  %7203 = vmatprep.mubr.bf16.mxu1 %v11027_v17  ;;  %v11057_v47 = vld [vmem:[%s14585_s1 + $0x4f8] sm:$0xff]  }
  0x66   :  { %9953 = vmatprep.subr.bf16.mxu1 %v10995_v50  ;;  %v11061_v50 = vld [vmem:[%s14585_s1 + $0x4b8] sm:$0xff]  }
  0x67   :  { %9932 = vmatpush3.bf16.msra.mxu0 %v10994_v49  ;;  %v11060_v49 = vld [vmem:[%s14586_s0 + $0x44] ss:$392 sps:$4 sm:$0xff]   ;;  %v11093_v17 = vld [vmem:[%s14585_s1 + $0x578] sm:$0xff]  }
  0x68   :  { %9933 = vmatprep.subr.bf16.mxu0 %v10997_v52  ;;  %v11063_v52 = vld [vmem:[%s14586_s0 + $0x48] ss:$392 sps:$4 sm:$0xff]  }
  0x69   :  { %9954 = vmatpush3.bf16.msra.mxu1 %v10996_v51  ;;  %v11062_v51 = vld [vmem:[%s14585_s1 + $0x540] sm:$0xff]  }
  0x6a   :  { %9955 = vmatprep.subr.bf16.mxu1 %v10999_v54  ;;  %v11066_v54 = vld [vmem:[%s14585_s1 + $0x500] sm:$0xff]  }
  0x6b   :  { %9934 = vmatpush3.bf16.msra.mxu0 %v10998_v53  ;;  %v11065_v53 = vld [vmem:[%s14586_s0 + $0x4c] ss:$392 sps:$4 sm:$0xff]  }
  0x6c   :  { %9935 = vmatprep.subr.bf16.mxu0 %v11001_v56  ;;  %v11068_v56 = vld [vmem:[%s14585_s1 + $0x580] sm:$0xff]  }
  0x6d   :  { %9956 = vmatpush3.bf16.msra.mxu1 %v11000_v55  ;;  %v11067_v55 = vld [vmem:[%s14585_s1 + $0x5c0] sm:$0xff]  }
  0x6e   :  { %9957 = vmatprep.subr.bf16.mxu1 %v11003_v58  ;;  %v11070_v58 = vld [vmem:[%s14585_s1 + $0x508] sm:$0xff]  }
  0x6f   :  { %9936 = vmatpush3.bf16.msra.mxu0 %v11002_v57  ;;  %v11069_v57 = vld [vmem:[%s14585_s1 + $0x548] sm:$0xff]  }
  0x70   :  { %9937 = vmatprep.subr.bf16.mxu0 %v11005_v60  ;;  %v11072_v60 = vld [vmem:[%s14585_s1 + $0x588] sm:$0xff]  }
  0x71   :  { %9958 = vmatpush3.bf16.msra.mxu1 %v11004_v59  ;;  %v11071_v59 = vld [vmem:[%s14585_s1 + $0x5c8] sm:$0xff]  }
  0x72   :  { %9959 = vmatprep.subr.bf16.mxu1 %v11007_v62  ;;  %v11074_v62 = vld [vmem:[%s14585_s1 + $0x510] sm:$0xff]  }
  0x73   :  { %9938 = vmatpush3.bf16.msra.mxu0 %v11006_v61  ;;  %v11073_v61 = vld [vmem:[%s14585_s1 + $0x550] sm:$0xff]  }
  0x74   :  { %9939 = vmatprep.subr.bf16.mxu0 %v11009_v0  ;;  %v11076_v0 = vld [vmem:[%s14585_s1 + $0x590] sm:$0xff]  }
  0x75   :  { %9960 = vmatpush3.bf16.msra.mxu1 %v11008_v63  ;;  %v11075_v63 = vld [vmem:[%s14585_s1 + $0x5d0] sm:$0xff]  }
  0x76   :  { %9961 = vmatprep.subr.bf16.mxu1 %v11011_v2  ;;  %v11078_v2 = vld [vmem:[%s14585_s1 + $0x518] sm:$0xff]  }
  0x77   :  { %9940 = vmatpush3.bf16.msra.mxu0 %v11010_v1  ;;  %v11077_v1 = vld [vmem:[%s14585_s1 + $0x558] sm:$0xff]  }
  0x78   :  { %9941 = vmatprep.subr.bf16.mxu0 %v11013_v4  ;;  %v11080_v4 = vld [vmem:[%s14585_s1 + $0x598] sm:$0xff]  }
  0x79   :  { %9962 = vmatpush3.bf16.msra.mxu1 %v11012_v3  ;;  %v11079_v3 = vld [vmem:[%s14585_s1 + $0x5d8] sm:$0xff]  }
  0x7a   :  { %9963 = vmatprep.subr.bf16.mxu1 %v11015_v6  ;;  %v11082_v6 = vld [vmem:[%s14585_s1 + $0x520] sm:$0xff]  }
  0x7b   :  { %9942 = vmatpush3.bf16.msra.mxu0 %v11014_v5  ;;  %v11081_v5 = vld [vmem:[%s14585_s1 + $0x560] sm:$0xff]  }
  0x7c   :  { %9943 = vmatprep.subr.bf16.mxu0 %v11017_v9  ;;  %v11085_v9 = vld [vmem:[%s14585_s1 + $0x568] sm:$0xff]  }
  0x7d   :  { %9964 = vmatpush3.bf16.msra.mxu1 %v11016_v7  ;;  %v11083_v7 = vld [vmem:[%s14585_s1 + $0x5e0] sm:$0xff]  }
  0x7e   :  { %9965 = vmatprep.subr.bf16.mxu1 %v11019_v11  ;;  %v11087_v11 = vld [vmem:[%s14585_s1 + $0x5e8] sm:$0xff]  }
  0x7f   :  { %9944 = vmatpush3.bf16.msra.mxu0 %v11018_v10  ;;  %v11086_v10 = vld [vmem:[%s14585_s1 + $0x528] sm:$0xff]  }
  0x80   :  { %9973 = vmatprep.subr.bf16.mxu0 %v11024_v15  ;;  %v11091_v15 = vld [vmem:[%s14585_s1 + $0x5f0] sm:$0xff]  }
  0x81   :  { %9966 = vmatpush3.bf16.msra.mxu1 %v11023_v14  ;;  %v11090_v14 = vld [vmem:[%s14585_s1 + $0x530] sm:$0xff]  }
  0x82   :  { %7163 = vmatmul.mubr.bf16.vlgmr.msra.gmra.mrb[12].mxu0 %v11020_v12  ;;  %9995 = vmatprep.subr.bf16.mxu1 %v11029_v19  ;;  %v11088_v12 = vld [vmem:[%s14585_s1 + $0x5a8] sm:$0xff]   ;;  %v11095_v19 = vld [vmem:[%s14585_s1 + $0x5f8] sm:$0xff]  }
  0x83   :  { %9974 = vmatpush3.bf16.msra.mxu0 %v11028_v18  ;;  %7244 = vmatprep.mubr.bf16.mxu0 %v11060_v49  ;;  %v11094_v18 = vld [vmem:[%s14585_s1 + $0x538] sm:$0xff]   ;;  %v11127_v49 = vld [vmem:[%s14585_s1 + $0x670] sm:$0xff]  }
  0x84   :  { %7204 = vmatmul.mubr.bf16.vlgmr.msra.gmra.mrb[12].mxu1 %v11025_v16  ;;  %9975 = vmatprep.subr.bf16.mxu0 %v11031_v21  ;;  %v11092_v16 = vld [vmem:[%s14585_s1 + $0x5b0] sm:$0xff]  }
  0x85   :  { %9996 = vmatpush3.bf16.msra.mxu1 %v11030_v20  ;;  %7285 = vmatprep.mubr.bf16.mxu1 %v11065_v53  ;;  %v11096_v20 = vld [vmem:[%s14586_s0 + $0x50] ss:$392 sps:$4 sm:$0xff]   ;;  %v11098_v21 = vld [vmem:[%s14586_s0 + $0x54] ss:$392 sps:$4 sm:$0xff]  }
  0x86   :  { %9997 = vmatprep.subr.bf16.mxu1 %v11033_v23  ;;  %v11100_v23 = vld [vmem:[%s14585_s1 + $0x640] sm:$0xff]   ;;  %v11131_v53 = vld [vmem:[%s14585_s1 + $0x678] sm:$0xff]  }
  0x87   :  { %9976 = vmatpush3.bf16.msra.mxu0 %v11032_v22  ;;  %v11099_v22 = vld [vmem:[%s14585_s1 + $0x5b8] sm:$0xff]  }
  0x88   :  { %9977 = vmatprep.subr.bf16.mxu0 %v11035_v25  ;;  %v11103_v25 = vld [vmem:[%s14586_s0 + $0x5c] ss:$392 sps:$4 sm:$0xff]  }
  0x89   :  { %9998 = vmatpush3.bf16.msra.mxu1 %v11034_v24  ;;  %v11101_v24 = vld [vmem:[%s14586_s0 + $0x58] ss:$392 sps:$4 sm:$0xff]  }
  0x8a   :  { %9999 = vmatprep.subr.bf16.mxu1 %v11037_v27  ;;  %v11105_v27 = vld [vmem:[%s14585_s1 + $0x6c0] sm:$0xff]  }
  0x8b   :  { %9978 = vmatpush3.bf16.msra.mxu0 %v11036_v26  ;;  %v11104_v26 = vld [vmem:[%s14585_s1 + $0x600] sm:$0xff]  }
  0x8c   :  { %9979 = vmatprep.subr.bf16.mxu0 %v11039_v29  ;;  %v11107_v29 = vld [vmem:[%s14585_s1 + $0x648] sm:$0xff]  }
  0x8d   :  { %10000 = vmatpush3.bf16.msra.mxu1 %v11038_v28  ;;  %v11106_v28 = vld [vmem:[%s14585_s1 + $0x680] sm:$0xff]  }
  0x8e   :  { %10001 = vmatprep.subr.bf16.mxu1 %v11041_v31  ;;  %v11109_v31 = vld [vmem:[%s14585_s1 + $0x6c8] sm:$0xff]  }
  0x8f   :  { %9980 = vmatpush3.bf16.msra.mxu0 %v11040_v30  ;;  %v11108_v30 = vld [vmem:[%s14585_s1 + $0x608] sm:$0xff]  }
  0x90   :  { %9981 = vmatprep.subr.bf16.mxu0 %v11043_v33  ;;  %v11111_v33 = vld [vmem:[%s14585_s1 + $0x650] sm:$0xff]  }
  0x91   :  { %10002 = vmatpush3.bf16.msra.mxu1 %v11042_v32  ;;  %v11110_v32 = vld [vmem:[%s14585_s1 + $0x688] sm:$0xff]  }
  0x92   :  { %10003 = vmatprep.subr.bf16.mxu1 %v11045_v35  ;;  %v11113_v35 = vld [vmem:[%s14585_s1 + $0x6d0] sm:$0xff]  }
  0x93   :  { %9982 = vmatpush3.bf16.msra.mxu0 %v11044_v34  ;;  %v11112_v34 = vld [vmem:[%s14585_s1 + $0x610] sm:$0xff]  }
  0x94   :  { %9983 = vmatprep.subr.bf16.mxu0 %v11047_v37  ;;  %v11115_v37 = vld [vmem:[%s14585_s1 + $0x658] sm:$0xff]  }
  0x95   :  { %10004 = vmatpush3.bf16.msra.mxu1 %v11046_v36  ;;  %v11114_v36 = vld [vmem:[%s14585_s1 + $0x690] sm:$0xff]  }
  0x96   :  { %10005 = vmatprep.subr.bf16.mxu1 %v11049_v39  ;;  %v11117_v39 = vld [vmem:[%s14585_s1 + $0x6d8] sm:$0xff]  }
  0x97   :  { %9984 = vmatpush3.bf16.msra.mxu0 %v11048_v38  ;;  %v11116_v38 = vld [vmem:[%s14585_s1 + $0x618] sm:$0xff]  }
  0x98   :  { %9985 = vmatprep.subr.bf16.mxu0 %v11051_v41  ;;  %v11119_v41 = vld [vmem:[%s14585_s1 + $0x660] sm:$0xff]  }
  0x99   :  { %10006 = vmatpush3.bf16.msra.mxu1 %v11050_v40  ;;  %v11118_v40 = vld [vmem:[%s14585_s1 + $0x698] sm:$0xff]  }
  0x9a   :  { %10007 = vmatprep.subr.bf16.mxu1 %v11053_v43  ;;  %v11121_v43 = vld [vmem:[%s14585_s1 + $0x6e0] sm:$0xff]  }
  0x9b   :  { %9986 = vmatpush3.bf16.msra.mxu0 %v11052_v42  ;;  %v11120_v42 = vld [vmem:[%s14585_s1 + $0x620] sm:$0xff]  }
  0x9c   :  { %9987 = vmatprep.subr.bf16.mxu0 %v11055_v45  ;;  %v11123_v45 = vld [vmem:[%s14585_s1 + $0x668] sm:$0xff]  }
  0x9d   :  { %10008 = vmatpush3.bf16.msra.mxu1 %v11054_v44  ;;  %v11122_v44 = vld [vmem:[%s14585_s1 + $0x6a0] sm:$0xff]  }
  0x9e   :  { %10009 = vmatprep.subr.bf16.mxu1 %v11057_v47  ;;  %v11125_v47 = vld [vmem:[%s14585_s1 + $0x6e8] sm:$0xff]  }
  0x9f   :  { %9988 = vmatpush3.bf16.msra.mxu0 %v11056_v46  ;;  %v11124_v46 = vld [vmem:[%s14585_s1 + $0x628] sm:$0xff]  }
  0xa0   :  { %10017 = vmatprep.subr.bf16.mxu0 %v11062_v51  ;;  %v11129_v51 = vld [vmem:[%s14585_s1 + $0x6f0] sm:$0xff]  }
  0xa1   :  { %10010 = vmatpush3.bf16.msra.mxu1 %v11061_v50  ;;  %v11128_v50 = vld [vmem:[%s14585_s1 + $0x630] sm:$0xff]  }
  0xa2   :  { %7245 = vmatmul.mubr.bf16.vlgmr.msra.gmra.mrb[16].mxu0 %v11058_v48  ;;  %10039 = vmatprep.subr.bf16.mxu1 %v11067_v55  ;;  %v11126_v48 = vld [vmem:[%s14585_s1 + $0x6a8] sm:$0xff]   ;;  %v11133_v55 = vld [vmem:[%s14585_s1 + $0x6f8] sm:$0xff]  }
  0xa3   :  { %10018 = vmatpush3.bf16.msra.mxu0 %v11066_v54  ;;  %7326 = vmatprep.mubr.bf16.mxu0 %v11098_v21  ;;  %v11132_v54 = vld [vmem:[%s14585_s1 + $0x638] sm:$0xff]  }
  0xa4   :  { %7286 = vmatmul.mubr.bf16.vlgmr.msra.gmra.mrb[16].mxu1 %v11063_v52  ;;  %10019 = vmatprep.subr.bf16.mxu0 %v11069_v57  ;;  %v11130_v52 = vld [vmem:[%s14585_s1 + $0x6b0] sm:$0xff]   ;;  %v11136_v57 = vld [vmem:[%s14586_s0 + $0x64] ss:$392 sps:$4 sm:$0xff]   ;;  %v11153_v21 = vld [vmem:[%s14585_s1 + $0x758] sm:$0xff]  }
  0xa5   :  { %10040 = vmatpush3.bf16.msra.mxu1 %v11068_v56  ;;  %7367 = vmatprep.mubr.bf16.mxu1 %v11103_v25  ;;  %v11134_v56 = vld [vmem:[%s14586_s0 + $0x60] ss:$392 sps:$4 sm:$0xff]  }
  0xa6   :  { %10041 = vmatprep.subr.bf16.mxu1 %v11071_v59  ;;  %v11138_v59 = vld [vmem:[%s14585_s1 + $0x740] sm:$0xff]  }
  0xa7   :  { %10020 = vmatpush3.bf16.msra.mxu0 %v11070_v58  ;;  %v11137_v58 = vld [vmem:[%s14585_s1 + $0x6b8] sm:$0xff]   ;;  %v11157_v25 = vld [vmem:[%s14585_s1 + $0x760] sm:$0xff]  }
  0xa8   :  { %10021 = vmatprep.subr.bf16.mxu0 %v11073_v61  ;;  %v11141_v61 = vld [vmem:[%s14586_s0 + $0x6c] ss:$392 sps:$4 sm:$0xff]  }
  0xa9   :  { %10042 = vmatpush3.bf16.msra.mxu1 %v11072_v60  ;;  %v11139_v60 = vld [vmem:[%s14586_s0 + $0x68] ss:$392 sps:$4 sm:$0xff]  }
  0xaa   :  { %10043 = vmatprep.subr.bf16.mxu1 %v11075_v63  ;;  %v11143_v63 = vld [vmem:[%s14585_s1 + $0x7c0] sm:$0xff]  }
  0xab   :  { %10022 = vmatpush3.bf16.msra.mxu0 %v11074_v62  ;;  %v11142_v62 = vld [vmem:[%s14585_s1 + $0x700] sm:$0xff]  }
  0xac   :  { %10023 = vmatprep.subr.bf16.mxu0 %v11077_v1 }
  0xad   :  { %10044 = vmatpush3.bf16.msra.mxu1 %v11076_v0  ;;  %v11144_v0 = vld [vmem:[%s14585_s1 + $0x780] sm:$0xff]  }
  0xae   :  { %10045 = vmatprep.subr.bf16.mxu1 %v11079_v3 }
  0xaf   :  { %10024 = vmatpush3.bf16.msra.mxu0 %v11078_v2  ;;  %v11145_v2 = vld [vmem:[%s14585_s1 + $0x748] sm:$0xff]  }
  0xb0   :  { %10025 = vmatprep.subr.bf16.mxu0 %v11081_v5 }
  0xb1   :  { %10046 = vmatpush3.bf16.msra.mxu1 %v11080_v4  ;;  %v11146_v4 = vld [vmem:[%s14585_s1 + $0x708] sm:$0xff]  }
  0xb2   :  { %10047 = vmatprep.subr.bf16.mxu1 %v11083_v7  ;;  %v11147_v7 = vld [vmem:[%s14585_s1 + $0x7c8] sm:$0xff]  }
  0xb3   :  { %10026 = vmatpush3.bf16.msra.mxu0 %v11082_v6 }
  0xb4   :  { %10027 = vmatprep.subr.bf16.mxu0 %v11085_v9  ;;  %v11148_v9 = vld [vmem:[%s14585_s1 + $0x788] sm:$0xff]  }
  0xb5   :  { %10048 = vmatpush3.bf16.msra.mxu1 %v11084_v8 }
  0xb6   :  { %10049 = vmatprep.subr.bf16.mxu1 %v11087_v11  ;;  %v11149_v11 = vld [vmem:[%s14585_s1 + $0x750] sm:$0xff]  }
  0xb7   :  { %10028 = vmatpush3.bf16.msra.mxu0 %v11086_v10 }
  0xb8   :  { %10029 = vmatprep.subr.bf16.mxu0 %v11089_v13 }
  0xb9   :  { %10050 = vmatpush3.bf16.msra.mxu1 %v11088_v12 }
  0xba   :  { %10051 = vmatprep.subr.bf16.mxu1 %v11091_v15 }
  0xbb   :  { %10030 = vmatpush3.bf16.msra.mxu0 %v11090_v14  ;;  %v11150_v14 = vld [vmem:[%s14585_s1 + $0x710] sm:$0xff]  }
  0xbc   :  { %10031 = vmatprep.subr.bf16.mxu0 %v11093_v17  ;;  %v11151_v17 = vld [vmem:[%s14585_s1 + $0x7d0] sm:$0xff]  }
  0xbd   :  { %10052 = vmatpush3.bf16.msra.mxu1 %v11092_v16 }
  0xbe   :  { %10053 = vmatprep.subr.bf16.mxu1 %v11095_v19  ;;  %v11152_v19 = vld [vmem:[%s14585_s1 + $0x790] sm:$0xff]  }
  0xbf   :  { %10032 = vmatpush3.bf16.msra.mxu0 %v11094_v18 }
  0xc0   :  { %10061 = vmatprep.subr.bf16.mxu0 %v11100_v23  ;;  %v11155_v23 = vld [vmem:[%s14585_s1 + $0x7d8] sm:$0xff]  }
  0xc1   :  { %10054 = vmatpush3.bf16.msra.mxu1 %v11099_v22  ;;  %v11154_v22 = vld [vmem:[%s14585_s1 + $0x718] sm:$0xff]  }
  0xc2   :  { %7327 = vmatmul.mubr.bf16.vlgmr.msra.gmra.mrb[20].mxu0 %v11096_v20  ;;  %10083 = vmatprep.subr.bf16.mxu1 %v11105_v27  ;;  %v11159_v27 = vld [vmem:[%s14585_s1 + $0x7e0] sm:$0xff]  }
  0xc3   :  { %10062 = vmatpush3.bf16.msra.mxu0 %v11104_v26  ;;  %7408 = vmatprep.mubr.bf16.mxu0 %v11136_v57  ;;  %v11158_v26 = vld [vmem:[%s14585_s1 + $0x720] sm:$0xff]  }
  0xc4   :  { %7368 = vmatmul.mubr.bf16.vlgmr.msra.gmra.mrb[20].mxu1 %v11101_v24  ;;  %10063 = vmatprep.subr.bf16.mxu0 %v11107_v29  ;;  %v11156_v24 = vld [vmem:[%s14585_s1 + $0x798] sm:$0xff]   ;;  %v8912_v29 = vld [vmem:[#allocation2] ss:$0 sm:$0xff] }
  0xc5   :  { %10084 = vmatpush3.bf16.msra.mxu1 %v11106_v28  ;;  %7449 = vmatprep.mubr.bf16.mxu1 %v11141_v61  ;;  %v11160_v28 = vld [vmem:[%s14585_s1 + $0x7a0] sm:$0xff]   ;;  %v11185_v61 = vld [vmem:[%s14585_s1 + $0x8c8] sm:$0xff]  }
  0xc6   :  { %10085 = vmatprep.subr.bf16.mxu1 %v11109_v31  ;;  %v11161_v31 = vld [vmem:[%s14585_s1 + $0x768] sm:$0xff]  }
  0xc7   :  { %10064 = vmatpush3.bf16.msra.mxu0 %v11108_v30 }
  0xc8   :  { %10065 = vmatprep.subr.bf16.mxu0 %v11111_v33  ;;  %v11162_v33 = vld [vmem:[%s14585_s1 + $0x728] sm:$0xff]  }
  0xc9   :  { %10086 = vmatpush3.bf16.msra.mxu1 %v11110_v32 }
  0xca   :  { %10087 = vmatprep.subr.bf16.mxu1 %v11113_v35  ;;  %v11163_v35 = vld [vmem:[%s14585_s1 + $0x7e8] sm:$0xff]  }
  0xcb   :  { %10066 = vmatpush3.bf16.msra.mxu0 %v11112_v34 }
  0xcc   :  { %10067 = vmatprep.subr.bf16.mxu0 %v11115_v37  ;;  %v11164_v37 = vld [vmem:[%s14585_s1 + $0x7a8] sm:$0xff]  }
  0xcd   :  { %10088 = vmatpush3.bf16.msra.mxu1 %v11114_v36 }
  0xce   :  { %10089 = vmatprep.subr.bf16.mxu1 %v11117_v39  ;;  %v11166_v39 = vld [vmem:[%s14585_s1 + $0x730] sm:$0xff]  }
  0xcf   :  { %10068 = vmatpush3.bf16.msra.mxu0 %v11116_v38  ;;  %v11165_v38 = vld [vmem:[%s14585_s1 + $0x770] sm:$0xff]  }
  0xd0   :  { %10069 = vmatprep.subr.bf16.mxu0 %v11119_v41  ;;  %v11168_v41 = vld [vmem:[%s14585_s1 + $0x7b0] sm:$0xff]  }
  0xd1   :  { %10090 = vmatpush3.bf16.msra.mxu1 %v11118_v40  ;;  %v11167_v40 = vld [vmem:[%s14585_s1 + $0x7f0] sm:$0xff]  }
  0xd2   :  { %10091 = vmatprep.subr.bf16.mxu1 %v11121_v43  ;;  %v11170_v43 = vld [vmem:[%s14585_s1 + $0x738] sm:$0xff]  }
  0xd3   :  { %10070 = vmatpush3.bf16.msra.mxu0 %v11120_v42  ;;  %v11169_v42 = vld [vmem:[%s14585_s1 + $0x778] sm:$0xff]  }
  0xd4   :  { %10071 = vmatprep.subr.bf16.mxu0 %v11123_v45  ;;  %v11172_v45 = vld [vmem:[%s14586_s0 + $0x70] ss:$392 sps:$4 sm:$0xff]  }
  0xd5   :  { %10092 = vmatpush3.bf16.msra.mxu1 %v11122_v44  ;;  %v11171_v44 = vld [vmem:[%s14585_s1 + $0x7f8] sm:$0xff]  }
  0xd6   :  { %10093 = vmatprep.subr.bf16.mxu1 %v11125_v47  ;;  %v11175_v47 = vld [vmem:[%s14585_s1 + $0x7b8] sm:$0xff]  }
  0xd7   :  { %10072 = vmatpush3.bf16.msra.mxu0 %v11124_v46  ;;  %v11174_v46 = vld [vmem:[%s14586_s0 + $0x74] ss:$392 sps:$4 sm:$0xff]  }
  0xd8   :  { %10073 = vmatprep.subr.bf16.mxu0 %v11127_v49  ;;  %v11177_v49 = vld [vmem:[%s14586_s0 + $0x78] ss:$392 sps:$4 sm:$0xff]  }
  0xd9   :  { %10094 = vmatpush3.bf16.msra.mxu1 %v11126_v48  ;;  %v11176_v48 = vld [vmem:[%s14585_s1 + $0x840] sm:$0xff]  }
  0xda   :  { %10095 = vmatprep.subr.bf16.mxu1 %v11129_v51  ;;  %v11180_v51 = vld [vmem:[%s14585_s1 + $0x800] sm:$0xff]  }
  0xdb   :  { %10074 = vmatpush3.bf16.msra.mxu0 %v11128_v50  ;;  %v11179_v50 = vld [vmem:[%s14586_s0 + $0x7c] ss:$392 sps:$4 sm:$0xff]  }
  0xdc   :  { %10075 = vmatprep.subr.bf16.mxu0 %v11131_v53 }
  0xdd   :  { %10096 = vmatpush3.bf16.msra.mxu1 %v11130_v52  ;;  %v11181_v52 = vld [vmem:[%s14585_s1 + $0x8c0] sm:$0xff]  }
  0xde   :  { %10097 = vmatprep.subr.bf16.mxu1 %v11133_v55 }
  0xdf   :  { %10076 = vmatpush3.bf16.msra.mxu0 %v11132_v54  ;;  %v11182_v54 = vld [vmem:[%s14585_s1 + $0x880] sm:$0xff]  }
  0xe0   :  { %10105 = vmatprep.subr.bf16.mxu0 %v11138_v59  ;;  %v11184_v59 = vld [vmem:[%s14585_s1 + $0x808] sm:$0xff]  }
  0xe1   :  { %10098 = vmatpush3.bf16.msra.mxu1 %v11137_v58 }
  0xe2   :  { %7409 = vmatmul.mubr.bf16.vlgmr.msra.gmra.mrb[24].mxu0 %v11134_v56  ;;  %10127 = vmatprep.subr.bf16.mxu1 %v11143_v63  ;;  %v11183_v56 = vld [vmem:[%s14585_s1 + $0x848] sm:$0xff]  }
  0xe3   :  { %10106 = vmatpush3.bf16.msra.mxu0 %v11142_v62  ;;  %7490 = vmatprep.mubr.bf16.mxu0 %v11174_v46 }
  0xe4   :  { %7450 = vmatmul.mubr.bf16.vlgmr.msra.gmra.mrb[24].mxu1 %v11139_v60  ;;  %10107 = vmatprep.subr.bf16.mxu0 %v11145_v2 }
  0xe5   :  { %10128 = vmatpush3.bf16.msra.mxu1 %v11144_v0  ;;  %7531 = vmatprep.mubr.bf16.mxu1 %v11179_v50 }
  0xe6   :  { %10129 = vmatprep.subr.bf16.mxu1 %v11147_v7  ;;  %v11188_v7 = vld [vmem:[%s14585_s1 + $0x810] sm:$0xff]  }
  0xe7   :  { %10108 = vmatpush3.bf16.msra.mxu0 %v11146_v4 }
  0xe8   :  { %10109 = vmatprep.subr.bf16.mxu0 %v11149_v11 }
  0xe9   :  { %10130 = vmatpush3.bf16.msra.mxu1 %v11148_v9  ;;  %v11189_v9 = vld [vmem:[%s14585_s1 + $0x8d0] sm:$0xff]  }
  0xea   :  { %10131 = vmatprep.subr.bf16.mxu1 %v11151_v17  ;;  %v11194_v17 = vld [vmem:[%s14585_s1 + $0x898] sm:$0xff]  }
  0xeb   :  { %10110 = vmatpush3.bf16.msra.mxu0 %v11150_v14 }
  0xec   :  { %10111 = vmatprep.subr.bf16.mxu0 %v11153_v21  ;;  %v11198_v21 = vld [vmem:[%s14585_s1 + $0x8a0] sm:$0xff]  }
  0xed   :  { %10132 = vmatpush3.bf16.msra.mxu1 %v11152_v19  ;;  %v11196_v19 = vld [vmem:[%s14585_s1 + $0x820] sm:$0xff]  }
  0xee   :  { %10133 = vmatprep.subr.bf16.mxu1 %v11155_v23  ;;  %v11200_v23 = vld [vmem:[%s14585_s1 + $0x828] sm:$0xff]  }
  0xef   :  { %10112 = vmatpush3.bf16.msra.mxu0 %v11154_v22  ;;  %v11199_v22 = vld [vmem:[%s14585_s1 + $0x868] sm:$0xff]  }
  0xf0   :  { %10113 = vmatprep.subr.bf16.mxu0 %v11157_v25  ;;  %v11202_v25 = vld [vmem:[%s14585_s1 + $0x8a8] sm:$0xff]  }
  0xf1   :  { %10134 = vmatpush3.bf16.msra.mxu1 %v11156_v24  ;;  %v11201_v24 = vld [vmem:[%s14585_s1 + $0x8e8] sm:$0xff]  }
  0xf2   :  { %10135 = vmatprep.subr.bf16.mxu1 %v11159_v27  ;;  %v11204_v27 = vld [vmem:[%s14585_s1 + $0x830] sm:$0xff]  }
  0xf3   :  { %10114 = vmatpush3.bf16.msra.mxu0 %v11158_v26  ;;  %v11203_v26 = vld [vmem:[%s14585_s1 + $0x870] sm:$0xff]  }
  0xf4   :  { %10115 = vmatprep.subr.bf16.mxu0 %v11161_v31  ;;  %v11208_v31 = vld [vmem:[%s14585_s1 + $0x838] sm:$0xff]  }
  0xf5   :  { %v9813_v1 = vpop.f32.mrb[0].mxu0  ;;  %10136 = vmatpush3.bf16.msra.mxu1 %v11160_v28  ;;  %v11205_v28 = vld [vmem:[%s14585_s1 + $0x8f0] sm:$0xff]  }
  0xf6   :  { %v9814_v3 = vpop.f32.mrb[1].mxu0  ;;  %10137 = vmatprep.subr.bf16.mxu1 %v11163_v35  ;;  %v11213_v35 = vld [vmem:[%s14585_s1 + $0x8b8] sm:$0xff]  }
  0xf7   :  { %v9815_v5 = vadd.f32 %v9814_v3, %v9813_v1  ;;  %v9816_v6 = vpop.f32.mrb[2].mxu0  ;;  %v9835_v8 = vpop.f32.mrb[0].mxu1  ;;  %10116 = vmatpush3.bf16.msra.mxu0 %v11162_v33  ;;  %v11186_v1 = vld [vmem:[%s14585_s1 + $0x888] sm:$0xff]   ;;  %v11187_v3 = vld [vmem:[%s14585_s1 + $0x850] sm:$0xff]  }
  0xf8   :  { %v9817_v10 = vpop.f32.mrb[3].mxu0  ;;  %v9836_v13 = vpop.f32.mrb[1].mxu1  ;;  %10117 = vmatprep.subr.bf16.mxu0 %v11165_v38  ;;  %v11210_v33 = vld [vmem:[%s14586_s0 + $0x80] ss:$392 sps:$4 sm:$0xff]   ;;  %v11217_v38 = vld [vmem:[%s14586_s0 + $0x8c] ss:$392 sps:$4 sm:$0xff]  }
  0xf9   :  { %v9818_v12 = vadd.f32 %v9817_v10, %v9816_v6  ;;  %v9837_v15 = vadd.f32 %v9836_v13, %v9835_v8  ;;  %v9838_v16 = vpop.f32.mrb[2].mxu1  ;;  %v6919_v30 = vadd.f32 %v9815_v5, %v8912_v29  ;;  %10138 = vmatpush3.bf16.msra.mxu1 %v11164_v37  ;;  %v11191_v13 = vld [vmem:[%s14585_s1 + $0x858] sm:$0xff]   ;;  %v11215_v37 = vld [vmem:[%s14586_s0 + $0x88] ss:$392 sps:$4 sm:$0xff]  }
  0xfa   :  { %v9839_v18 = vpop.f32.mrb[3].mxu1  ;;  %10139 = vmatprep.subr.bf16.mxu1 %v11167_v40  ;;  %v11219_v40 = vld [vmem:[%s14585_s1 + $0x9c0] sm:$0xff]  }
  0xfb   :  { %v9840_v20 = vadd.f32 %v9839_v18, %v9838_v16  ;;  %v6922_v32 = vadd.f32 %v9818_v12, %v8912_v29  ;;  %v6960_v34 = vadd.f32 %v9837_v15, %v6919_v30  ;;  %10118 = vmatpush3.bf16.msra.mxu0 %v11166_v39  ;;  %v11190_v12 = vld [vmem:[%s14585_s1 + $0x890] sm:$0xff]   ;;  %v11192_v15 = vld [vmem:[%s14585_s1 + $0x818] sm:$0xff]   ;;  %v11195_v18 = vld [vmem:[%s14585_s1 + $0x860] sm:$0xff]  }
  0xfc   :  { %10119 = vmatprep.subr.bf16.mxu0 %v11169_v42  ;;  %v11193_v16 = vld [vmem:[%s14585_s1 + $0x8d8] sm:$0xff]   ;;  %v11206_v29 = vld [vmem:[%s14585_s1 + $0x8b0] sm:$0xff]   ;;  %v11218_v39 = vld [vmem:[%s14585_s1 + $0x900] sm:$0xff]  }
  0xfd   :  { %v6963_v36 = vadd.f32 %v9840_v20, %v6922_v32  ;;  %10140 = vmatpush3.bf16.msra.mxu1 %v11168_v41  ;;  %v11197_v20 = vld [vmem:[%s14585_s1 + $0x8e0] sm:$0xff]   ;;  %v11207_v30 = vld [vmem:[%s14585_s1 + $0x878] sm:$0xff]  }
  0xfe   :  { %10141 = vmatprep.subr.bf16.mxu1 %v11171_v44  ;;  %v11209_v32 = vld [vmem:[%s14585_s1 + $0x8f8] sm:$0xff]   ;;  %v11220_v42 = vld [vmem:[%s14585_s1 + $0x980] sm:$0xff]   ;;  %v11221_v44 = vld [vmem:[%s14585_s1 + $0x948] sm:$0xff]  }
  0xff   :  { %10120 = vmatpush3.bf16.msra.mxu0 %v11170_v43 }
 0x100   :  { %10149 = vmatprep.subr.bf16.mxu0 %v11176_v48 }
 0x101   :  { %10142 = vmatpush3.bf16.msra.mxu1 %v11175_v47  ;;  %v11222_v47 = vld [vmem:[%s14585_s1 + $0x908] sm:$0xff]  }
 0x102   :  { %7491 = vmatmul.mubr.bf16.vlgmr.msra.gmra.mrb[28].mxu0 %v11172_v45  ;;  %10171 = vmatprep.subr.bf16.mxu1 %v11181_v52  ;;  %v11224_v52 = vld [vmem:[%s14585_s1 + $0x988] sm:$0xff]  }
 0x103   :  { %10150 = vmatpush3.bf16.msra.mxu0 %v11180_v51 }
 0x104   :  { %7532 = vmatmul.mubr.bf16.vlgmr.msra.gmra.mrb[28].mxu1 %v11177_v49  ;;  %10151 = vmatprep.subr.bf16.mxu0 %v11183_v56  ;;  %v11223_v49 = vld [vmem:[%s14585_s1 + $0x9c8] sm:$0xff]  }
 0x105   :  { %10172 = vmatpush3.bf16.msra.mxu1 %v11182_v54  ;;  %7613 = vmatprep.mubr.bf16.mxu1 %v11217_v38  ;;  %v11262_v38 = vld [vmem:[%s14585_s1 + $0xa88] sm:$0xff]  }
 0x106   :  { %10173 = vmatprep.subr.bf16.mxu1 %v11185_v61  ;;  %v11227_v61 = vld [vmem:[%s14585_s1 + $0x9d0] sm:$0xff]  }
 0x107   :  { %10152 = vmatpush3.bf16.msra.mxu0 %v11184_v59 }
 0x108   :  { %10153 = vmatprep.subr.bf16.mxu0 %v11187_v3  ;;  %v11230_v3 = vld [vmem:[%s14585_s1 + $0x918] sm:$0xff]  }
 0x109   :  { %10174 = vmatpush3.bf16.msra.mxu1 %v11186_v1  ;;  %v11229_v1 = vld [vmem:[%s14585_s1 + $0x958] sm:$0xff]  }
 0x10a   :  { %10175 = vmatprep.subr.bf16.mxu1 %v11189_v9  ;;  %v11236_v9 = vld [vmem:[%s14585_s1 + $0x9a0] sm:$0xff]  }
 0x10b   :  { %10154 = vmatpush3.bf16.msra.mxu0 %v11188_v7  ;;  %v11234_v7 = vld [vmem:[%s14585_s1 + $0x920] sm:$0xff]  }
 0x10c   :  { %10155 = vmatprep.subr.bf16.mxu0 %v11191_v13  ;;  %v11240_v13 = vld [vmem:[%s14585_s1 + $0x9a8] sm:$0xff]  }
 0x10d   :  { %10176 = vmatpush3.bf16.msra.mxu1 %v11190_v12  ;;  %v11239_v12 = vld [vmem:[%s14585_s1 + $0x9e8] sm:$0xff]  }
 0x10e   :  { %10177 = vmatprep.subr.bf16.mxu1 %v11193_v16  ;;  %v11243_v16 = vld [vmem:[%s14585_s1 + $0x9f0] sm:$0xff]  }
 0x10f   :  { %10156 = vmatpush3.bf16.msra.mxu0 %v11192_v15  ;;  %v11242_v15 = vld [vmem:[%s14585_s1 + $0x930] sm:$0xff]  }
 0x110   :  { %10157 = vmatprep.subr.bf16.mxu0 %v11195_v18  ;;  %v11245_v18 = vld [vmem:[%s14585_s1 + $0x978] sm:$0xff]  }
 0x111   :  { %10178 = vmatpush3.bf16.msra.mxu1 %v11194_v17  ;;  %v11244_v17 = vld [vmem:[%s14585_s1 + $0x9b0] sm:$0xff]  }
 0x112   :  { %10179 = vmatprep.subr.bf16.mxu1 %v11197_v20  ;;  %v11247_v20 = vld [vmem:[%s14585_s1 + $0x9f8] sm:$0xff]  }
 0x113   :  { %10158 = vmatpush3.bf16.msra.mxu0 %v11196_v19  ;;  %v11246_v19 = vld [vmem:[%s14585_s1 + $0x938] sm:$0xff]  }
 0x114   :  { %10159 = vmatprep.subr.bf16.mxu0 %v11199_v22  ;;  %v11250_v22 = vld [vmem:[%s14586_s0 + $0x94] ss:$392 sps:$4 sm:$0xff]  }
 0x115   :  { %v9857_v53 = vpop.f32.mrb[4].mxu0  ;;  %10180 = vmatpush3.bf16.msra.mxu1 %v11198_v21  ;;  %v11248_v21 = vld [vmem:[%s14586_s0 + $0x90] ss:$392 sps:$4 sm:$0xff]  }
 0x116   :  { %v9858_v55 = vpop.f32.mrb[5].mxu0  ;;  %10181 = vmatprep.subr.bf16.mxu1 %v11201_v24  ;;  %v11252_v24 = vld [vmem:[%s14585_s1 + $0xa40] sm:$0xff]  }
 0x117   :  { %v9859_v57 = vadd.f32 %v9858_v55, %v9857_v53  ;;  %v9860_v58 = vpop.f32.mrb[6].mxu0  ;;  %v9879_v63 = vpop.f32.mrb[4].mxu1  ;;  %10160 = vmatpush3.bf16.msra.mxu0 %v11200_v23  ;;  %v11225_v55 = vld [vmem:[%s14585_s1 + $0x950] sm:$0xff]   ;;  %v11251_v23 = vld [vmem:[%s14585_s1 + $0x9b8] sm:$0xff]  }
 0x118   :  { %v9861_v60 = vpop.f32.mrb[7].mxu0  ;;  %v9880_v2 = vpop.f32.mrb[5].mxu1  ;;  %10161 = vmatprep.subr.bf16.mxu0 %v11203_v26  ;;  %v11255_v26 = vld [vmem:[%s14586_s0 + $0x9c] ss:$392 sps:$4 sm:$0xff]  }
 0x119   :  { %v7001_v62 = vadd.f32 %v9859_v57, %v6960_v34  ;;  %v9862_v0 = vadd.f32 %v9861_v60, %v9860_v58  ;;  %v9881_v5 = vadd.f32 %v9880_v2, %v9879_v63  ;;  %v9882_v6 = vpop.f32.mrb[6].mxu1  ;;  %10182 = vmatpush3.bf16.msra.mxu1 %v11202_v25  ;;  %v11212_v34 = vld [vmem:[%s14586_s0 + $0x84] ss:$392 sps:$4 sm:$0xff]   ;;  %v11226_v58 = vld [vmem:[%s14585_s1 + $0x910] sm:$0xff]   ;;  %v11253_v25 = vld [vmem:[%s14586_s0 + $0x98] ss:$392 sps:$4 sm:$0xff]  }
 0x11a   :  { %v9883_v8 = vpop.f32.mrb[7].mxu1  ;;  %10183 = vmatprep.subr.bf16.mxu1 %v11205_v28  ;;  %7572 = vmatprep.mubr.bf16.mxu0 %v11212_v34  ;;  %v11257_v28 = vld [vmem:[%s14585_s1 + $0xac0] sm:$0xff]  }
 0x11b   :  { %v7004_v4 = vadd.f32 %v9862_v0, %v6963_v36  ;;  %v12734_v10 = vadd.f32 %v9881_v5, %v7001_v62  ;;  %v9884_v11 = vadd.f32 %v9883_v8, %v9882_v6  ;;  %10162 = vmatpush3.bf16.msra.mxu0 %v11204_v27  ;;  %v11214_v36 = vld [vmem:[%s14585_s1 + $0x940] sm:$0xff]   ;;  %v11228_v0 = vld [vmem:[%s14585_s1 + $0x990] sm:$0xff]   ;;  %v11232_v5 = vld [vmem:[%s14585_s1 + $0x998] sm:$0xff]  }
 0x11c   :  { %10163 = vmatprep.subr.bf16.mxu0 %v11207_v30  ;;  %v11233_v6 = vld [vmem:[%s14585_s1 + $0x960] sm:$0xff]  }
 0x11d   :  { %v12742_v14 = vadd.f32 %v9884_v11, %v7004_v4  ;;  %10184 = vmatpush3.bf16.msra.mxu1 %v11206_v29  ;;  %v11231_v4 = vld [vmem:[%s14585_s1 + $0x9d8] sm:$0xff]   ;;  %v11235_v8 = vld [vmem:[%s14585_s1 + $0x9e0] sm:$0xff]   ;;  %v11238_v11 = vld [vmem:[%s14585_s1 + $0x928] sm:$0xff]  }
 0x11e   :  { %10185 = vmatprep.subr.bf16.mxu1 %v11209_v32  ;;  %v11256_v27 = vld [vmem:[%s14585_s1 + $0xa00] sm:$0xff]  }
 0x11f   :  { %10164 = vmatpush3.bf16.msra.mxu0 %v11208_v31  ;;  %v11258_v29 = vld [vmem:[%s14585_s1 + $0xa80] sm:$0xff]   ;;  %v11259_v31 = vld [vmem:[%s14585_s1 + $0xa48] sm:$0xff]  }
 0x120   :  { %10193 = vmatprep.subr.bf16.mxu0 %v11214_v36  ;;  %v11261_v36 = vld [vmem:[%s14585_s1 + $0xac8] sm:$0xff]  }
 0x121   :  { %10186 = vmatpush3.bf16.msra.mxu1 %v11213_v35 }
 0x122   :  { %7573 = vmatmul.mubr.bf16.vlgmr.msra.gmra.mrb[32].mxu0 %v11210_v33  ;;  %10215 = vmatprep.subr.bf16.mxu1 %v11219_v40  ;;  %v11260_v33 = vld [vmem:[%s14585_s1 + $0xa08] sm:$0xff]  }
 0x123   :  { %10194 = vmatpush3.bf16.msra.mxu0 %v11218_v39  ;;  %7654 = vmatprep.mubr.bf16.mxu0 %v11250_v22 }
 0x124   :  { %7614 = vmatmul.mubr.bf16.vlgmr.msra.gmra.mrb[32].mxu1 %v11215_v37  ;;  %10195 = vmatprep.subr.bf16.mxu0 %v11221_v44  ;;  %v11264_v44 = vld [vmem:[%s14585_s1 + $0xa10] sm:$0xff]  }
 0x125   :  { %10216 = vmatpush3.bf16.msra.mxu1 %v11220_v42  ;;  %7695 = vmatprep.mubr.bf16.mxu1 %v11255_v26 }
 0x126   :  { %10217 = vmatprep.subr.bf16.mxu1 %v11223_v49 }
 0x127   :  { %10196 = vmatpush3.bf16.msra.mxu0 %v11222_v47  ;;  %v11265_v47 = vld [vmem:[%s14585_s1 + $0xad0] sm:$0xff]  }
 0x128   :  { %10197 = vmatprep.subr.bf16.mxu0 %v11225_v55 }
 0x129   :  { %10218 = vmatpush3.bf16.msra.mxu1 %v11224_v52 }
 0x12a   :  { %10219 = vmatprep.subr.bf16.mxu1 %v11227_v61  ;;  %v11274_v61 = vld [vmem:[%s14585_s1 + $0xaa0] sm:$0xff]  }
 0x12b   :  { %10198 = vmatpush3.bf16.msra.mxu0 %v11226_v58  ;;  %v11271_v58 = vld [vmem:[%s14585_s1 + $0xa60] sm:$0xff]  }
 0x12c   :  { %10199 = vmatprep.subr.bf16.mxu0 %v11229_v1  ;;  %v11278_v1 = vld [vmem:[%s14585_s1 + $0xaa8] sm:$0xff]  }
 0x12d   :  { %10220 = vmatpush3.bf16.msra.mxu1 %v11228_v0  ;;  %v11277_v0 = vld [vmem:[%s14585_s1 + $0xae8] sm:$0xff]  }
 0x12e   :  { %10221 = vmatprep.subr.bf16.mxu1 %v11231_v4  ;;  %v11281_v4 = vld [vmem:[%s14585_s1 + $0xaf0] sm:$0xff]  }
 0x12f   :  { %10200 = vmatpush3.bf16.msra.mxu0 %v11230_v3  ;;  %v11280_v3 = vld [vmem:[%s14585_s1 + $0xa30] sm:$0xff]  }
 0x130   :  { %10201 = vmatprep.subr.bf16.mxu0 %v11233_v6  ;;  %v11283_v6 = vld [vmem:[%s14585_s1 + $0xa78] sm:$0xff]  }
 0x131   :  { %10222 = vmatpush3.bf16.msra.mxu1 %v11232_v5  ;;  %v11282_v5 = vld [vmem:[%s14585_s1 + $0xab0] sm:$0xff]  }
 0x132   :  { %10223 = vmatprep.subr.bf16.mxu1 %v11235_v8  ;;  %v11285_v8 = vld [vmem:[%s14585_s1 + $0xaf8] sm:$0xff]  }
 0x133   :  { %10202 = vmatpush3.bf16.msra.mxu0 %v11234_v7  ;;  %v11284_v7 = vld [vmem:[%s14585_s1 + $0xa38] sm:$0xff]  }
 0x135   :  { %v9901_v41 = vpop.f32.mrb[8].mxu0  ;;  %10224 = vmatpush3.bf16.msra.mxu1 %v11236_v9  ;;  %v11286_v9 = vld [vmem:[%s14586_s0 + $0xa0] ss:$392 sps:$4 sm:$0xff]  }
 0x136   :  { %v9902_v43 = vpop.f32.mrb[9].mxu0  ;;  %10225 = vmatprep.subr.bf16.mxu1 %v11239_v12  ;;  %v11290_v12 = vld [vmem:[%s14585_s1 + $0xb40] sm:$0xff]  }
 0x137   :  { %v9903_v45 = vadd.f32 %v9902_v43, %v9901_v41  ;;  %v9904_v46 = vpop.f32.mrb[10].mxu0  ;;  %v9923_v48 = vpop.f32.mrb[8].mxu1  ;;  %v11263_v41 = vld [vmem:[%s14585_s1 + $0xa50] sm:$0xff]  }
 0x138   :  { %v9905_v51 = vpop.f32.mrb[11].mxu0  ;;  %v9924_v54 = vpop.f32.mrb[9].mxu1 }
 0x139   :  { %v7083_v50 = vadd.f32 %v9903_v45, %v12734_v10  ;;  %v9906_v53 = vadd.f32 %v9905_v51, %v9904_v46  ;;  %v9925_v56 = vadd.f32 %v9924_v54, %v9923_v48  ;;  %v9926_v57 = vpop.f32.mrb[10].mxu1  ;;  %v11237_v10 = vld [vmem:[%s14585_s1 + $0x968] sm:$0xff]   ;;  %10226 = vmatpush3.bf16.msra.mxu1 %v11240_v13  ;;  %v11268_v54 = vld [vmem:[%s14585_s1 + $0xa18] sm:$0xff]  }
 0x13a   :  { %v9927_v60 = vpop.f32.mrb[11].mxu1  ;;  %10203 = vmatprep.subr.bf16.mxu0 %v11237_v10  ;;  %10227 = vmatprep.subr.bf16.mxu1 %v11243_v16  ;;  %v11288_v10 = vld [vmem:[%s14586_s0 + $0xa4] ss:$392 sps:$4 sm:$0xff]   ;;  %v11291_v13 = vld [vmem:[%s14586_s0 + $0xa8] ss:$392 sps:$4 sm:$0xff]  }
 0x13b   :  { %v7086_v59 = vadd.f32 %v9906_v53, %v12742_v14  ;;  %v12848_v62 = vadd.f32 %v9925_v56, %v7083_v50  ;;  %v9928_v63 = vadd.f32 %v9927_v60, %v9926_v57  ;;  %10204 = vmatpush3.bf16.msra.mxu0 %v11238_v11  ;;  %v11241_v14 = vld [vmem:[%s14585_s1 + $0x970] sm:$0xff]   ;;  %v11267_v53 = vld [vmem:[%s14585_s1 + $0xa58] sm:$0xff]   ;;  %v11273_v60 = vld [vmem:[%s14585_s1 + $0xae0] sm:$0xff]  }
 0x13c   :  { %10205 = vmatprep.subr.bf16.mxu0 %v11241_v14  ;;  %v11266_v50 = vld [vmem:[%s14585_s1 + $0xa90] sm:$0xff]   ;;  %v11269_v56 = vld [vmem:[%s14585_s1 + $0xad8] sm:$0xff]   ;;  %v11295_v16 = vld [vmem:[%s14585_s1 + $0xbc0] sm:$0xff]  }
 0x13d   :  { %v12856_v2 = vadd.f32 %v9928_v63, %v7086_v59  ;;  %10228 = vmatpush3.bf16.msra.mxu1 %v11244_v17  ;;  %v11270_v57 = vld [vmem:[%s14585_s1 + $0xa98] sm:$0xff]   ;;  %v11272_v59 = vld [vmem:[%s14585_s1 + $0xa20] sm:$0xff]   ;;  %v11276_v63 = vld [vmem:[%s14585_s1 + $0xa28] sm:$0xff]  }
 0x13e   :  { %10229 = vmatprep.subr.bf16.mxu1 %v11247_v20  ;;  %v11289_v11 = vld [vmem:[%s14585_s1 + $0xab8] sm:$0xff]   ;;  %v11293_v14 = vld [vmem:[%s14586_s0 + $0xac] ss:$392 sps:$4 sm:$0xff]  }
 0x13f   :  { %10206 = vmatpush3.bf16.msra.mxu0 %v11242_v15  ;;  %v11294_v15 = vld [vmem:[%s14585_s1 + $0xb00] sm:$0xff]   ;;  %v11297_v20 = vld [vmem:[%s14585_s1 + $0xb48] sm:$0xff]  }
 0x140   :  { %10207 = vmatprep.subr.bf16.mxu0 %v11245_v18  ;;  %v11296_v18 = vld [vmem:[%s14585_s1 + $0xb80] sm:$0xff]  }
 0x141   :  { %10230 = vmatpush3.bf16.msra.mxu1 %v11251_v23  ;;  %v11298_v23 = vld [vmem:[%s14585_s1 + $0xb08] sm:$0xff]  }
 0x142   :  { %10259 = vmatprep.subr.bf16.mxu1 %v11257_v28 }
 0x143   :  { %10208 = vmatpush3.bf16.msra.mxu0 %v11246_v19 }
 0x144   :  { %10237 = vmatprep.subr.bf16.mxu0 %v11252_v24  ;;  %7696 = vmatmul.mubr.bf16.vlgmr.msra.gmra.mrb[36].mxu1 %v11253_v25  ;;  %v11299_v25 = vld [vmem:[%s14585_s1 + $0xbc8] sm:$0xff]  }
 0x145   :  { %10260 = vmatpush3.bf16.msra.mxu1 %v11258_v29  ;;  %7777 = vmatprep.mubr.bf16.mxu1 %v11293_v14  ;;  %v11300_v29 = vld [vmem:[%s14585_s1 + $0xb88] sm:$0xff]  }
 0x146   :  { %7655 = vmatmul.mubr.bf16.vlgmr.msra.gmra.mrb[36].mxu0 %v11248_v21  ;;  %10261 = vmatprep.subr.bf16.mxu1 %v11261_v36 }
 0x147   :  { %10238 = vmatpush3.bf16.msra.mxu0 %v11256_v27  ;;  %7736 = vmatprep.mubr.bf16.mxu0 %v11288_v10 }
 0x148   :  { %10239 = vmatprep.subr.bf16.mxu0 %v11259_v31  ;;  %v11301_v31 = vld [vmem:[%s14585_s1 + $0xb50] sm:$0xff]  }
 0x149   :  { %10262 = vmatpush3.bf16.msra.mxu1 %v11262_v38 }
 0x14a   :  { %10263 = vmatprep.subr.bf16.mxu1 %v11265_v47  ;;  %v11310_v47 = vld [vmem:[%s14585_s1 + $0xb20] sm:$0xff]  }
 0x14b   :  { %10240 = vmatpush3.bf16.msra.mxu0 %v11260_v33 }
 0x14c   :  { %10241 = vmatprep.subr.bf16.mxu0 %v11263_v41  ;;  %v11305_v41 = vld [vmem:[%s14585_s1 + $0xb58] sm:$0xff]  }
 0x14d   :  { %10264 = vmatpush3.bf16.msra.mxu1 %v11266_v50  ;;  %v11313_v50 = vld [vmem:[%s14585_s1 + $0xb68] sm:$0xff]  }
 0x14e   :  { %10265 = vmatprep.subr.bf16.mxu1 %v11269_v56  ;;  %v11319_v56 = vld [vmem:[%s14585_s1 + $0xbf0] sm:$0xff]  }
 0x14f   :  { %10242 = vmatpush3.bf16.msra.mxu0 %v11264_v44  ;;  %v11307_v44 = vld [vmem:[%s14585_s1 + $0xbd8] sm:$0xff]  }
 0x150   :  { %10243 = vmatprep.subr.bf16.mxu0 %v11267_v53  ;;  %v11316_v53 = vld [vmem:[%s14585_s1 + $0xba8] sm:$0xff]  }
 0x151   :  { %10266 = vmatpush3.bf16.msra.mxu1 %v11270_v57  ;;  %v11320_v57 = vld [vmem:[%s14585_s1 + $0xbb0] sm:$0xff]  }
 0x152   :  { %10267 = vmatprep.subr.bf16.mxu1 %v11273_v60  ;;  %v11323_v60 = vld [vmem:[%s14585_s1 + $0xbf8] sm:$0xff]  }
 0x153   :  { %10244 = vmatpush3.bf16.msra.mxu0 %v11268_v54  ;;  %v11317_v54 = vld [vmem:[%s14585_s1 + $0xb70] sm:$0xff]  }
 0x154   :  { %10245 = vmatprep.subr.bf16.mxu0 %v11271_v58  ;;  %v11321_v58 = vld [vmem:[%s14585_s1 + $0xb78] sm:$0xff]  }
 0x155   :  { %v9945_v30 = vpop.f32.mrb[12].mxu0  ;;  %10268 = vmatpush3.bf16.msra.mxu1 %v11274_v61  ;;  %v11324_v61 = vld [vmem:[%s14586_s0 + $0xb0] ss:$392 sps:$4 sm:$0xff]  }
 0x156   :  { %v9946_v32 = vpop.f32.mrb[13].mxu0  ;;  %10269 = vmatprep.subr.bf16.mxu1 %v11277_v0  ;;  %v11328_v0 = vld [vmem:[%s14585_s1 + $0xc40] sm:$0xff]  }
 0x157   :  { %v9947_v34 = vadd.f32 %v9946_v32, %v9945_v30  ;;  %v9948_v35 = vpop.f32.mrb[14].mxu0  ;;  %v9967_v37 = vpop.f32.mrb[12].mxu1  ;;  %10246 = vmatpush3.bf16.msra.mxu0 %v11272_v59  ;;  %v11322_v59 = vld [vmem:[%s14585_s1 + $0xb38] sm:$0xff]  }
 0x158   :  { %v9949_v40 = vpop.f32.mrb[15].mxu0  ;;  %v9968_v43 = vpop.f32.mrb[13].mxu1 }
 0x159   :  { %v7165_v39 = vadd.f32 %v9947_v34, %v12848_v62  ;;  %v9950_v42 = vadd.f32 %v9949_v40, %v9948_v35  ;;  %v9969_v45 = vadd.f32 %v9968_v43, %v9967_v37  ;;  %v9970_v46 = vpop.f32.mrb[14].mxu1  ;;  %v11275_v62 = vld [vmem:[%s14585_s1 + $0xa68] sm:$0xff]   ;;  %10270 = vmatpush3.bf16.msra.mxu1 %v11278_v1  ;;  %v11302_v35 = vld [vmem:[%s14585_s1 + $0xb10] sm:$0xff]   ;;  %v11306_v43 = vld [vmem:[%s14585_s1 + $0xb18] sm:$0xff]  }
 0x15a   :  { %v9971_v49 = vpop.f32.mrb[15].mxu1  ;;  %10247 = vmatprep.subr.bf16.mxu0 %v11275_v62  ;;  %10271 = vmatprep.subr.bf16.mxu1 %v11281_v4  ;;  %v11303_v37 = vld [vmem:[%s14585_s1 + $0xbd0] sm:$0xff]   ;;  %v11329_v1 = vld [vmem:[%s14586_s0 + $0xb8] ss:$392 sps:$4 sm:$0xff]  }
 0x15b   :  { %v7168_v48 = vadd.f32 %v9950_v42, %v12856_v2  ;;  %v12965_v51 = vadd.f32 %v9969_v45, %v7165_v39  ;;  %v9972_v52 = vadd.f32 %v9971_v49, %v9970_v46  ;;  %10248 = vmatpush3.bf16.msra.mxu0 %v11276_v63  ;;  %v11279_v2 = vld [vmem:[%s14585_s1 + $0xa70] sm:$0xff]   ;;  %v11308_v45 = vld [vmem:[%s14585_s1 + $0xb98] sm:$0xff]   ;;  %v11309_v46 = vld [vmem:[%s14585_s1 + $0xb60] sm:$0xff]  }
 0x15c   :  { %10249 = vmatprep.subr.bf16.mxu0 %v11279_v2  ;;  %v11304_v40 = vld [vmem:[%s14585_s1 + $0xb90] sm:$0xff]   ;;  %v11312_v49 = vld [vmem:[%s14585_s1 + $0xba0] sm:$0xff]   ;;  %v11327_v63 = vld [vmem:[%s14585_s1 + $0xbb8] sm:$0xff]  }
 0x15d   :  { %v12973_v55 = vadd.f32 %v9972_v52, %v7168_v48  ;;  %10272 = vmatpush3.bf16.msra.mxu1 %v11282_v5  ;;  %v11311_v48 = vld [vmem:[%s14585_s1 + $0xbe0] sm:$0xff]   ;;  %v11315_v52 = vld [vmem:[%s14585_s1 + $0xbe8] sm:$0xff]   ;;  %v11326_v62 = vld [vmem:[%s14586_s0 + $0xb4] ss:$392 sps:$4 sm:$0xff]  }
 0x15e   :  { %10273 = vmatprep.subr.bf16.mxu1 %v11285_v8  ;;  %v11331_v2 = vld [vmem:[%s14586_s0 + $0xbc] ss:$392 sps:$4 sm:$0xff]   ;;  %v11335_v8 = vld [vmem:[%s14585_s1 + $0xc48] sm:$0xff]  }
 0x15f   :  { %10250 = vmatpush3.bf16.msra.mxu0 %v11280_v3  ;;  %v11332_v3 = vld [vmem:[%s14585_s1 + $0xc00] sm:$0xff]  }
 0x160   :  { %10251 = vmatprep.subr.bf16.mxu0 %v11283_v6  ;;  %v11333_v4 = vld [vmem:[%s14585_s1 + $0xcc0] sm:$0xff]  }
 0x161   :  { %10274 = vmatpush3.bf16.msra.mxu1 %v11289_v11  ;;  %v11334_v6 = vld [vmem:[%s14585_s1 + $0xc80] sm:$0xff]   ;;  %v11336_v11 = vld [vmem:[%s14585_s1 + $0xc08] sm:$0xff]  }
 0x162   :  { %10303 = vmatprep.subr.bf16.mxu1 %v11295_v16  ;;  %v11338_v16 = vld [vmem:[%s14585_s1 + $0xc88] sm:$0xff]  }
 0x163   :  { %10252 = vmatpush3.bf16.msra.mxu0 %v11284_v7 }
 0x164   :  { %10281 = vmatprep.subr.bf16.mxu0 %v11290_v12  ;;  %7778 = vmatmul.mubr.bf16.vlgmr.msra.gmra.mrb[40].mxu1 %v11291_v13  ;;  %v11337_v13 = vld [vmem:[%s14585_s1 + $0xcc8] sm:$0xff]  }
 0x165   :  { %10304 = vmatpush3.bf16.msra.mxu1 %v11296_v18  ;;  %7859 = vmatprep.mubr.bf16.mxu1 %v11331_v2  ;;  %v11376_v2 = vld [vmem:[%s14585_s1 + $0xd88] sm:$0xff]  }
 0x166   :  { %7737 = vmatmul.mubr.bf16.vlgmr.msra.gmra.mrb[40].mxu0 %v11286_v9  ;;  %10305 = vmatprep.subr.bf16.mxu1 %v11299_v25  ;;  %v11341_v25 = vld [vmem:[%s14585_s1 + $0xcd0] sm:$0xff]  }
 0x167   :  { %10282 = vmatpush3.bf16.msra.mxu0 %v11294_v15  ;;  %7818 = vmatprep.mubr.bf16.mxu0 %v11326_v62 }
 0x168   :  { %10283 = vmatprep.subr.bf16.mxu0 %v11297_v20 }
 0x169   :  { %10306 = vmatpush3.bf16.msra.mxu1 %v11300_v29  ;;  %v11343_v29 = vld [vmem:[%s14585_s1 + $0xc58] sm:$0xff]  }
 0x16a   :  { %10307 = vmatprep.subr.bf16.mxu1 %v11303_v37  ;;  %v11350_v37 = vld [vmem:[%s14585_s1 + $0xca0] sm:$0xff]  }
 0x16b   :  { %10284 = vmatpush3.bf16.msra.mxu0 %v11298_v23 }
 0x16c   :  { %10285 = vmatprep.subr.bf16.mxu0 %v11301_v31  ;;  %v11344_v31 = vld [vmem:[%s14585_s1 + $0xc18] sm:$0xff]  }
 0x16d   :  { %10308 = vmatpush3.bf16.msra.mxu1 %v11304_v40  ;;  %v11353_v40 = vld [vmem:[%s14585_s1 + $0xce8] sm:$0xff]  }
 0x16e   :  { %10309 = vmatprep.subr.bf16.mxu1 %v11307_v44  ;;  %v11357_v44 = vld [vmem:[%s14585_s1 + $0xcf0] sm:$0xff]  }
 0x16f   :  { %10286 = vmatpush3.bf16.msra.mxu0 %v11302_v35  ;;  %v11348_v35 = vld [vmem:[%s14585_s1 + $0xc20] sm:$0xff]  }
 0x170   :  { %10287 = vmatprep.subr.bf16.mxu0 %v11305_v41  ;;  %v11354_v41 = vld [vmem:[%s14585_s1 + $0xca8] sm:$0xff]  }
 0x171   :  { %10310 = vmatpush3.bf16.msra.mxu1 %v11308_v45  ;;  %v11358_v45 = vld [vmem:[%s14585_s1 + $0xcb0] sm:$0xff]  }
 0x172   :  { %10311 = vmatprep.subr.bf16.mxu1 %v11311_v48  ;;  %v11361_v48 = vld [vmem:[%s14585_s1 + $0xcf8] sm:$0xff]  }
 0x173   :  { %10288 = vmatpush3.bf16.msra.mxu0 %v11306_v43  ;;  %v11356_v43 = vld [vmem:[%s14585_s1 + $0xc30] sm:$0xff]  }
 0x174   :  { %10289 = vmatprep.subr.bf16.mxu0 %v11309_v46  ;;  %v11359_v46 = vld [vmem:[%s14585_s1 + $0xc78] sm:$0xff]  }
 0x175   :  { %v9989_v17 = vpop.f32.mrb[16].mxu0  ;;  %10312 = vmatpush3.bf16.msra.mxu1 %v11312_v49  ;;  %v11362_v49 = vld [vmem:[%s14586_s0 + $0xc0] ss:$392 sps:$4 sm:$0xff]  }
 0x176   :  { %v9990_v19 = vpop.f32.mrb[17].mxu0  ;;  %10313 = vmatprep.subr.bf16.mxu1 %v11315_v52  ;;  %v11366_v52 = vld [vmem:[%s14585_s1 + $0xd40] sm:$0xff]  }
 0x177   :  { %v9991_v21 = vadd.f32 %v9990_v19, %v9989_v17  ;;  %v9992_v22 = vpop.f32.mrb[18].mxu0  ;;  %v10011_v27 = vpop.f32.mrb[16].mxu1  ;;  %10290 = vmatpush3.bf16.msra.mxu0 %v11310_v47  ;;  %v11339_v19 = vld [vmem:[%s14585_s1 + $0xc50] sm:$0xff]   ;;  %v11360_v47 = vld [vmem:[%s14585_s1 + $0xc38] sm:$0xff]  }
 0x178   :  { %v9993_v24 = vpop.f32.mrb[19].mxu0  ;;  %v10012_v30 = vpop.f32.mrb[17].mxu1  ;;  %10291 = vmatprep.subr.bf16.mxu0 %v11313_v50  ;;  %v11364_v50 = vld [vmem:[%s14586_s0 + $0xc4] ss:$392 sps:$4 sm:$0xff]  }
 0x179   :  { %v7247_v26 = vadd.f32 %v9991_v21, %v12965_v51  ;;  %v9994_v28 = vadd.f32 %v9993_v24, %v9992_v22  ;;  %v10013_v33 = vadd.f32 %v10012_v30, %v10011_v27  ;;  %v10014_v34 = vpop.f32.mrb[18].mxu1  ;;  %v11314_v51 = vld [vmem:[%s14585_s1 + $0xb28] sm:$0xff]   ;;  %10314 = vmatpush3.bf16.msra.mxu1 %v11316_v53  ;;  %v11340_v22 = vld [vmem:[%s14585_s1 + $0xc10] sm:$0xff]  }
 0x17a   :  { %v10015_v36 = vpop.f32.mrb[19].mxu1  ;;  %10315 = vmatprep.subr.bf16.mxu1 %v11319_v56  ;;  %v11367_v53 = vld [vmem:[%s14586_s0 + $0xc8] ss:$392 sps:$4 sm:$0xff]   ;;  %v11371_v56 = vld [vmem:[%s14585_s1 + $0xdc0] sm:$0xff]  }
 0x17b   :  { %v7250_v32 = vadd.f32 %v9994_v28, %v12973_v55  ;;  %v13076_v38 = vadd.f32 %v10013_v33, %v7247_v26  ;;  %v10016_v39 = vadd.f32 %v10015_v36, %v10014_v34  ;;  %10292 = vmatpush3.bf16.msra.mxu0 %v11314_v51  ;;  %v11318_v55 = vld [vmem:[%s14585_s1 + $0xb30] sm:$0xff]   ;;  %v11346_v33 = vld [vmem:[%s14585_s1 + $0xc98] sm:$0xff]   ;;  %v11347_v34 = vld [vmem:[%s14585_s1 + $0xc60] sm:$0xff]  }
 0x17c   :  { %10293 = vmatprep.subr.bf16.mxu0 %v11317_v54  ;;  %v11342_v28 = vld [vmem:[%s14585_s1 + $0xc90] sm:$0xff]   ;;  %v11349_v36 = vld [vmem:[%s14585_s1 + $0xce0] sm:$0xff]   ;;  %v11365_v51 = vld [vmem:[%s14585_s1 + $0xcb8] sm:$0xff]  }
 0x17d   :  { %v13084_v42 = vadd.f32 %v10016_v39, %v7250_v32  ;;  %10316 = vmatpush3.bf16.msra.mxu1 %v11320_v57  ;;  %v11345_v32 = vld [vmem:[%s14585_s1 + $0xcd8] sm:$0xff]   ;;  %v11352_v39 = vld [vmem:[%s14585_s1 + $0xc28] sm:$0xff]   ;;  %v11372_v57 = vld [vmem:[%s14585_s1 + $0xd80] sm:$0xff]  }
 0x17e   :  { %10317 = vmatprep.subr.bf16.mxu1 %v11323_v60  ;;  %v11369_v54 = vld [vmem:[%s14586_s0 + $0xcc] ss:$392 sps:$4 sm:$0xff]  }
 0x17f   :  { %10294 = vmatpush3.bf16.msra.mxu0 %v11318_v55  ;;  %v11370_v55 = vld [vmem:[%s14585_s1 + $0xd00] sm:$0xff]  }
 0x180   :  { %10295 = vmatprep.subr.bf16.mxu0 %v11321_v58 }
 0x181   :  { %10318 = vmatpush3.bf16.msra.mxu1 %v11327_v63 }
 0x182   :  { %10347 = vmatprep.subr.bf16.mxu1 %v11333_v4 }
 0x183   :  { %10296 = vmatpush3.bf16.msra.mxu0 %v11322_v59  ;;  %v11373_v59 = vld [vmem:[%s14585_s1 + $0xd48] sm:$0xff]  }
 0x184   :  { %10325 = vmatprep.subr.bf16.mxu0 %v11328_v0  ;;  %7860 = vmatmul.mubr.bf16.vlgmr.msra.gmra.mrb[44].mxu1 %v11329_v1  ;;  %v11375_v0 = vld [vmem:[%s14585_s1 + $0xdc8] sm:$0xff]  }
 0x185   :  { %10348 = vmatpush3.bf16.msra.mxu1 %v11334_v6  ;;  %7941 = vmatprep.mubr.bf16.mxu1 %v11369_v54  ;;  %v11414_v54 = vld [vmem:[%s14585_s1 + $0xe88] sm:$0xff]  }
 0x186   :  { %7819 = vmatmul.mubr.bf16.vlgmr.msra.gmra.mrb[44].mxu0 %v11324_v61  ;;  %10349 = vmatprep.subr.bf16.mxu1 %v11337_v13  ;;  %v11374_v61 = vld [vmem:[%s14585_s1 + $0xd08] sm:$0xff]  }
 0x187   :  { %10326 = vmatpush3.bf16.msra.mxu0 %v11332_v3  ;;  %7900 = vmatprep.mubr.bf16.mxu0 %v11364_v50 }
 0x188   :  { %10327 = vmatprep.subr.bf16.mxu0 %v11335_v8  ;;  %v11378_v8 = vld [vmem:[%s14585_s1 + $0xd10] sm:$0xff]  }
 0x189   :  { %10350 = vmatpush3.bf16.msra.mxu1 %v11338_v16 }
 0x18a   :  { %10351 = vmatprep.subr.bf16.mxu1 %v11341_v25  ;;  %v11388_v25 = vld [vmem:[%s14585_s1 + $0xda0] sm:$0xff]  }
 0x18b   :  { %10328 = vmatpush3.bf16.msra.mxu0 %v11336_v11  ;;  %v11379_v11 = vld [vmem:[%s14585_s1 + $0xdd0] sm:$0xff]  }
 0x18c   :  { %10329 = vmatprep.subr.bf16.mxu0 %v11339_v19 }
 0x18d   :  { %10352 = vmatpush3.bf16.msra.mxu1 %v11342_v28  ;;  %v11391_v28 = vld [vmem:[%s14585_s1 + $0xde8] sm:$0xff]  }
 0x18e   :  { %10353 = vmatprep.subr.bf16.mxu1 %v11345_v32  ;;  %v11395_v32 = vld [vmem:[%s14585_s1 + $0xdf0] sm:$0xff]  }
 0x18f   :  { %10330 = vmatpush3.bf16.msra.mxu0 %v11340_v22  ;;  %v11385_v22 = vld [vmem:[%s14585_s1 + $0xd60] sm:$0xff]  }
 0x190   :  { %10331 = vmatprep.subr.bf16.mxu0 %v11343_v29  ;;  %v11392_v29 = vld [vmem:[%s14585_s1 + $0xda8] sm:$0xff]  }
 0x191   :  { %10354 = vmatpush3.bf16.msra.mxu1 %v11346_v33  ;;  %v11396_v33 = vld [vmem:[%s14585_s1 + $0xdb0] sm:$0xff]  }
 0x192   :  { %10355 = vmatprep.subr.bf16.mxu1 %v11349_v36  ;;  %v11399_v36 = vld [vmem:[%s14585_s1 + $0xdf8] sm:$0xff]  }
 0x193   :  { %10332 = vmatpush3.bf16.msra.mxu0 %v11344_v31  ;;  %v11394_v31 = vld [vmem:[%s14585_s1 + $0xd30] sm:$0xff]  }
 0x194   :  { %10333 = vmatprep.subr.bf16.mxu0 %v11347_v34  ;;  %v11397_v34 = vld [vmem:[%s14585_s1 + $0xd78] sm:$0xff]  }
 0x195   :  { %v10033_v5 = vpop.f32.mrb[20].mxu0  ;;  %10356 = vmatpush3.bf16.msra.mxu1 %v11350_v37  ;;  %v11400_v37 = vld [vmem:[%s14586_s0 + $0xd0] ss:$392 sps:$4 sm:$0xff]  }
 0x196   :  { %v10034_v7 = vpop.f32.mrb[21].mxu0  ;;  %10357 = vmatprep.subr.bf16.mxu1 %v11353_v40  ;;  %v11404_v40 = vld [vmem:[%s14585_s1 + $0xe40] sm:$0xff]  }
 0x197   :  { %v10035_v9 = vadd.f32 %v10034_v7, %v10033_v5  ;;  %v10036_v10 = vpop.f32.mrb[22].mxu0  ;;  %v10055_v12 = vpop.f32.mrb[20].mxu1  ;;  %10334 = vmatpush3.bf16.msra.mxu0 %v11348_v35  ;;  %v11377_v5 = vld [vmem:[%s14585_s1 + $0xd50] sm:$0xff]   ;;  %v11398_v35 = vld [vmem:[%s14585_s1 + $0xd38] sm:$0xff]  }
 0x198   :  { %v10037_v15 = vpop.f32.mrb[23].mxu0  ;;  %v10056_v18 = vpop.f32.mrb[21].mxu1 }
 0x199   :  { %v7329_v14 = vadd.f32 %v10035_v9, %v13076_v38  ;;  %v10038_v17 = vadd.f32 %v10037_v15, %v10036_v10  ;;  %v10057_v20 = vadd.f32 %v10056_v18, %v10055_v12  ;;  %v10058_v21 = vpop.f32.mrb[22].mxu1  ;;  %v11351_v38 = vld [vmem:[%s14585_s1 + $0xc68] sm:$0xff]   ;;  %10358 = vmatpush3.bf16.msra.mxu1 %v11354_v41  ;;  %v11382_v18 = vld [vmem:[%s14585_s1 + $0xd18] sm:$0xff]  }
 0x19a   :  { %v10059_v24 = vpop.f32.mrb[23].mxu1  ;;  %10335 = vmatprep.subr.bf16.mxu0 %v11351_v38  ;;  %10359 = vmatprep.subr.bf16.mxu1 %v11357_v44  ;;  %v11402_v38 = vld [vmem:[%s14586_s0 + $0xd4] ss:$392 sps:$4 sm:$0xff]   ;;  %v11405_v41 = vld [vmem:[%s14586_s0 + $0xd8] ss:$392 sps:$4 sm:$0xff]  }
 0x19b   :  { %v7332_v23 = vadd.f32 %v10038_v17, %v13084_v42  ;;  %v13190_v26 = vadd.f32 %v10057_v20, %v7329_v14  ;;  %v10060_v27 = vadd.f32 %v10059_v24, %v10058_v21  ;;  %10336 = vmatpush3.bf16.msra.mxu0 %v11352_v39  ;;  %v11355_v42 = vld [vmem:[%s14585_s1 + $0xc70] sm:$0xff]   ;;  %v11381_v17 = vld [vmem:[%s14585_s1 + $0xd58] sm:$0xff]   ;;  %v11387_v24 = vld [vmem:[%s14585_s1 + $0xde0] sm:$0xff]  }
 0x19c   :  { %10337 = vmatprep.subr.bf16.mxu0 %v11355_v42  ;;  %v11380_v14 = vld [vmem:[%s14585_s1 + $0xd90] sm:$0xff]   ;;  %v11383_v20 = vld [vmem:[%s14585_s1 + $0xdd8] sm:$0xff]   ;;  %v11409_v44 = vld [vmem:[%s14585_s1 + $0xec0] sm:$0xff]  }
 0x19d   :  { %v13198_v30 = vadd.f32 %v10060_v27, %v7332_v23  ;;  %10360 = vmatpush3.bf16.msra.mxu1 %v11358_v45  ;;  %v11384_v21 = vld [vmem:[%s14585_s1 + $0xd98] sm:$0xff]   ;;  %v11386_v23 = vld [vmem:[%s14585_s1 + $0xd20] sm:$0xff]   ;;  %v11390_v27 = vld [vmem:[%s14585_s1 + $0xd28] sm:$0xff]  }
 0x19e   :  { %10361 = vmatprep.subr.bf16.mxu1 %v11361_v48  ;;  %v11403_v39 = vld [vmem:[%s14585_s1 + $0xdb8] sm:$0xff]   ;;  %v11410_v45 = vld [vmem:[%s14585_s1 + $0xe80] sm:$0xff]  }
 0x19f   :  { %10338 = vmatpush3.bf16.msra.mxu0 %v11356_v43  ;;  %v11407_v42 = vld [vmem:[%s14586_s0 + $0xdc] ss:$392 sps:$4 sm:$0xff]  }
 0x1a0   :  { %10339 = vmatprep.subr.bf16.mxu0 %v11359_v46  ;;  %v11408_v43 = vld [vmem:[%s14585_s1 + $0xe00] sm:$0xff]  }
 0x1a1   :  { %10362 = vmatpush3.bf16.msra.mxu1 %v11365_v51 }
 0x1a2   :  { %10391 = vmatprep.subr.bf16.mxu1 %v11371_v56 }
 0x1a3   :  { %10340 = vmatpush3.bf16.msra.mxu0 %v11360_v47  ;;  %v11411_v47 = vld [vmem:[%s14585_s1 + $0xe48] sm:$0xff]  }
 0x1a4   :  { %10369 = vmatprep.subr.bf16.mxu0 %v11366_v52  ;;  %7942 = vmatmul.mubr.bf16.vlgmr.msra.gmra.mrb[48].mxu1 %v11367_v53  ;;  %v11413_v52 = vld [vmem:[%s14585_s1 + $0xec8] sm:$0xff]  }
 0x1a5   :  { %10392 = vmatpush3.bf16.msra.mxu1 %v11372_v57  ;;  %8023 = vmatprep.mubr.bf16.mxu1 %v11407_v42  ;;  %v11415_v57 = vld [vmem:[%s14585_s1 + $0xe50] sm:$0xff]  }
 0x1a6   :  { %7901 = vmatmul.mubr.bf16.vlgmr.msra.gmra.mrb[48].mxu0 %v11362_v49  ;;  %10393 = vmatprep.subr.bf16.mxu1 %v11375_v0  ;;  %v11412_v49 = vld [vmem:[%s14585_s1 + $0xe08] sm:$0xff]  }
 0x1a7   :  { %10370 = vmatpush3.bf16.msra.mxu0 %v11370_v55  ;;  %7982 = vmatprep.mubr.bf16.mxu0 %v11402_v38 }
 0x1a8   :  { %10371 = vmatprep.subr.bf16.mxu0 %v11373_v59 }
 0x1a9   :  { %10394 = vmatpush3.bf16.msra.mxu1 %v11376_v2  ;;  %v11418_v2 = vld [vmem:[%s14585_s1 + $0xe90] sm:$0xff]  }
 0x1aa   :  { %10395 = vmatprep.subr.bf16.mxu1 %v11379_v11  ;;  %v11424_v11 = vld [vmem:[%s14585_s1 + $0xe20] sm:$0xff]  }
 0x1ab   :  { %10372 = vmatpush3.bf16.msra.mxu0 %v11374_v61 }
 0x1ac   :  { %10373 = vmatprep.subr.bf16.mxu0 %v11377_v5  ;;  %v11419_v5 = vld [vmem:[%s14585_s1 + $0xe58] sm:$0xff]  }
 0x1ad   :  { %10396 = vmatpush3.bf16.msra.mxu1 %v11380_v14  ;;  %v11427_v14 = vld [vmem:[%s14585_s1 + $0xe68] sm:$0xff]  }
 0x1ae   :  { %10397 = vmatprep.subr.bf16.mxu1 %v11383_v20  ;;  %v11433_v20 = vld [vmem:[%s14585_s1 + $0xef0] sm:$0xff]  }
 0x1af   :  { %10374 = vmatpush3.bf16.msra.mxu0 %v11378_v8  ;;  %v11421_v8 = vld [vmem:[%s14585_s1 + $0xed8] sm:$0xff]  }
 0x1b0   :  { %10375 = vmatprep.subr.bf16.mxu0 %v11381_v17  ;;  %v11430_v17 = vld [vmem:[%s14585_s1 + $0xea8] sm:$0xff]  }
 0x1b1   :  { %10398 = vmatpush3.bf16.msra.mxu1 %v11384_v21  ;;  %v11434_v21 = vld [vmem:[%s14585_s1 + $0xeb0] sm:$0xff]  }
 0x1b2   :  { %10399 = vmatprep.subr.bf16.mxu1 %v11387_v24  ;;  %v11437_v24 = vld [vmem:[%s14585_s1 + $0xef8] sm:$0xff]  }
 0x1b3   :  { %10376 = vmatpush3.bf16.msra.mxu0 %v11382_v18  ;;  %v11431_v18 = vld [vmem:[%s14585_s1 + $0xe70] sm:$0xff]  }
 0x1b4   :  { %10377 = vmatprep.subr.bf16.mxu0 %v11385_v22  ;;  %v11435_v22 = vld [vmem:[%s14585_s1 + $0xe78] sm:$0xff]  }
 0x1b5   :  { %v10077_v58 = vpop.f32.mrb[24].mxu0  ;;  %10400 = vmatpush3.bf16.msra.mxu1 %v11388_v25  ;;  %v11438_v25 = vld [vmem:[%s14586_s0 + $0xe0] ss:$392 sps:$4 sm:$0xff]  }
 0x1b6   :  { %v10078_v60 = vpop.f32.mrb[25].mxu0  ;;  %10401 = vmatprep.subr.bf16.mxu1 %v11391_v28  ;;  %v11442_v28 = vld [vmem:[%s14585_s1 + $0xf40] sm:$0xff]  }
 0x1b7   :  { %v10079_v62 = vadd.f32 %v10078_v60, %v10077_v58  ;;  %v10080_v63 = vpop.f32.mrb[26].mxu0  ;;  %v10099_v1 = vpop.f32.mrb[24].mxu1  ;;  %10378 = vmatpush3.bf16.msra.mxu0 %v11386_v23  ;;  %v11416_v60 = vld [vmem:[%s14585_s1 + $0xe10] sm:$0xff]   ;;  %v11436_v23 = vld [vmem:[%s14585_s1 + $0xe38] sm:$0xff]  }
 0x1b8   :  { %v10081_v4 = vpop.f32.mrb[27].mxu0  ;;  %v10100_v7 = vpop.f32.mrb[25].mxu1 }
 0x1b9   :  { %v7411_v3 = vadd.f32 %v10079_v62, %v13190_v26  ;;  %v10082_v6 = vadd.f32 %v10081_v4, %v10080_v63  ;;  %v10101_v9 = vadd.f32 %v10100_v7, %v10099_v1  ;;  %v10102_v10 = vpop.f32.mrb[26].mxu1  ;;  %v11389_v26 = vld [vmem:[%s14585_s1 + $0xd68] sm:$0xff]   ;;  %10402 = vmatpush3.bf16.msra.mxu1 %v11392_v29  ;;  %v11417_v63 = vld [vmem:[%s14585_s1 + $0xed0] sm:$0xff]  }
 0x1ba   :  { %v10103_v13 = vpop.f32.mrb[27].mxu1  ;;  %10379 = vmatprep.subr.bf16.mxu0 %v11389_v26  ;;  %10403 = vmatprep.subr.bf16.mxu1 %v11395_v32  ;;  %v11440_v26 = vld [vmem:[%s14586_s0 + $0xe4] ss:$392 sps:$4 sm:$0xff]   ;;  %v11443_v29 = vld [vmem:[%s14586_s0 + $0xe8] ss:$392 sps:$4 sm:$0xff]  }
 0x1bb   :  { %v7414_v12 = vadd.f32 %v10082_v6, %v13198_v30  ;;  %v13307_v15 = vadd.f32 %v10101_v9, %v7411_v3  ;;  %v10104_v16 = vadd.f32 %v10103_v13, %v10102_v10  ;;  %10380 = vmatpush3.bf16.msra.mxu0 %v11390_v27  ;;  %v11393_v30 = vld [vmem:[%s14585_s1 + $0xd70] sm:$0xff]   ;;  %v11420_v6 = vld [vmem:[%s14585_s1 + $0xe18] sm:$0xff]   ;;  %v11423_v10 = vld [vmem:[%s14585_s1 + $0xe60] sm:$0xff]  }
 0x1bc   :  { %10381 = vmatprep.subr.bf16.mxu0 %v11393_v30  ;;  %v11422_v9 = vld [vmem:[%s14585_s1 + $0xe98] sm:$0xff]   ;;  %v11426_v13 = vld [vmem:[%s14585_s1 + $0xea0] sm:$0xff]   ;;  %v11445_v30 = vld [vmem:[%s14586_s0 + $0xec] ss:$392 sps:$4 sm:$0xff]  }
 0x1bd   :  { %v13315_v19 = vadd.f32 %v10104_v16, %v7414_v12  ;;  %10404 = vmatpush3.bf16.msra.mxu1 %v11396_v33  ;;  %v11425_v12 = vld [vmem:[%s14585_s1 + $0xee0] sm:$0xff]   ;;  %v11429_v16 = vld [vmem:[%s14585_s1 + $0xee8] sm:$0xff]   ;;  %v11441_v27 = vld [vmem:[%s14585_s1 + $0xeb8] sm:$0xff]  }
 0x1be   :  { %10405 = vmatprep.subr.bf16.mxu1 %v11399_v36  ;;  %v11447_v32 = vld [vmem:[%s14585_s1 + $0xfc0] sm:$0xff]   ;;  %v11449_v36 = vld [vmem:[%s14585_s1 + $0xf48] sm:$0xff]  }
 0x1bf   :  { %10382 = vmatpush3.bf16.msra.mxu0 %v11394_v31  ;;  %v11446_v31 = vld [vmem:[%s14585_s1 + $0xf00] sm:$0xff]  }
 0x1c0   :  { %10383 = vmatprep.subr.bf16.mxu0 %v11397_v34  ;;  %v11448_v34 = vld [vmem:[%s14585_s1 + $0xf80] sm:$0xff]  }
 0x1c1   :  { %10406 = vmatpush3.bf16.msra.mxu1 %v11403_v39  ;;  %v11450_v39 = vld [vmem:[%s14585_s1 + $0xf08] sm:$0xff]  }
 0x1c2   :  { %10435 = vmatprep.subr.bf16.mxu1 %v11409_v44 }
 0x1c3   :  { %10384 = vmatpush3.bf16.msra.mxu0 %v11398_v35 }
 0x1c4   :  { %10413 = vmatprep.subr.bf16.mxu0 %v11404_v40  ;;  %8024 = vmatmul.mubr.bf16.vlgmr.msra.gmra.mrb[52].mxu1 %v11405_v41  ;;  %v11451_v41 = vld [vmem:[%s14585_s1 + $0xfc8] sm:$0xff]  }
 0x1c5   :  { %10436 = vmatpush3.bf16.msra.mxu1 %v11410_v45  ;;  %8105 = vmatprep.mubr.bf16.mxu1 %v11445_v30  ;;  %v11452_v45 = vld [vmem:[%s14585_s1 + $0xf88] sm:$0xff]  }
 0x1c6   :  { %7983 = vmatmul.mubr.bf16.vlgmr.msra.gmra.mrb[52].mxu0 %v11400_v37  ;;  %10437 = vmatprep.subr.bf16.mxu1 %v11413_v52  ;;  %v11490_v30 = vld [vmem:[%s14585_s1 + $0x1088] sm:$0xff]  }
 0x1c7   :  { %10414 = vmatpush3.bf16.msra.mxu0 %v11408_v43  ;;  %8064 = vmatprep.mubr.bf16.mxu0 %v11440_v26 }
 0x1c8   :  { %10415 = vmatprep.subr.bf16.mxu0 %v11411_v47  ;;  %v11453_v47 = vld [vmem:[%s14585_s1 + $0xf50] sm:$0xff]  }
 0x1c9   :  { %10438 = vmatpush3.bf16.msra.mxu1 %v11414_v54 }
 0x1ca   :  { %10439 = vmatprep.subr.bf16.mxu1 %v11417_v63  ;;  %v11462_v63 = vld [vmem:[%s14585_s1 + $0xf20] sm:$0xff]  }
 0x1cb   :  { %10416 = vmatpush3.bf16.msra.mxu0 %v11412_v49 }
 0x1cc   :  { %10417 = vmatprep.subr.bf16.mxu0 %v11415_v57  ;;  %v11457_v57 = vld [vmem:[%s14585_s1 + $0xf58] sm:$0xff]  }
 0x1cd   :  { %10440 = vmatpush3.bf16.msra.mxu1 %v11418_v2  ;;  %v11465_v2 = vld [vmem:[%s14585_s1 + $0xf68] sm:$0xff]  }
 0x1ce   :  { %10441 = vmatprep.subr.bf16.mxu1 %v11421_v8  ;;  %v11471_v8 = vld [vmem:[%s14585_s1 + $0xff0] sm:$0xff]  }
 0x1cf   :  { %10418 = vmatpush3.bf16.msra.mxu0 %v11416_v60  ;;  %v11459_v60 = vld [vmem:[%s14585_s1 + $0xfd8] sm:$0xff]  }
 0x1d0   :  { %10419 = vmatprep.subr.bf16.mxu0 %v11419_v5  ;;  %v11468_v5 = vld [vmem:[%s14585_s1 + $0xfa8] sm:$0xff]  }
 0x1d1   :  { %10442 = vmatpush3.bf16.msra.mxu1 %v11422_v9  ;;  %v11472_v9 = vld [vmem:[%s14585_s1 + $0xfb0] sm:$0xff]  }
 0x1d2   :  { %10443 = vmatprep.subr.bf16.mxu1 %v11425_v12  ;;  %v11475_v12 = vld [vmem:[%s14585_s1 + $0xff8] sm:$0xff]  }
 0x1d3   :  { %10420 = vmatpush3.bf16.msra.mxu0 %v11420_v6  ;;  %v11469_v6 = vld [vmem:[%s14585_s1 + $0xf70] sm:$0xff]  }
 0x1d4   :  { %10421 = vmatprep.subr.bf16.mxu0 %v11423_v10  ;;  %v11473_v10 = vld [vmem:[%s14585_s1 + $0xf78] sm:$0xff]  }
 0x1d5   :  { %v10121_v46 = vpop.f32.mrb[28].mxu0  ;;  %10444 = vmatpush3.bf16.msra.mxu1 %v11426_v13  ;;  %v11476_v13 = vld [vmem:[%s14586_s0 + $0xf0] ss:$392 sps:$4 sm:$0xff]  }
 0x1d6   :  { %v10122_v48 = vpop.f32.mrb[29].mxu0  ;;  %10445 = vmatprep.subr.bf16.mxu1 %v11429_v16  ;;  %v11480_v16 = vld [vmem:[%s14585_s1 + $0x1040] sm:$0xff]  }
 0x1d7   :  { %v10123_v50 = vadd.f32 %v10122_v48, %v10121_v46  ;;  %v10124_v51 = vpop.f32.mrb[30].mxu0  ;;  %v10143_v53 = vpop.f32.mrb[28].mxu1  ;;  %10422 = vmatpush3.bf16.msra.mxu0 %v11424_v11  ;;  %v11474_v11 = vld [vmem:[%s14585_s1 + $0xf38] sm:$0xff]  }
 0x1d8   :  { %v10125_v56 = vpop.f32.mrb[31].mxu0  ;;  %v10144_v59 = vpop.f32.mrb[29].mxu1  ;;  %10423 = vmatprep.subr.bf16.mxu0 %v11427_v14  ;;  %v11478_v14 = vld [vmem:[%s14586_s0 + $0xf4] ss:$392 sps:$4 sm:$0xff]  }
 0x1d9   :  { %v7493_v55 = vadd.f32 %v10123_v50, %v13307_v15  ;;  %v10126_v58 = vadd.f32 %v10125_v56, %v10124_v51  ;;  %v10145_v61 = vadd.f32 %v10144_v59, %v10143_v53  ;;  %v10146_v62 = vpop.f32.mrb[30].mxu1  ;;  %v11428_v15 = vld [vmem:[%s14585_s1 + $0xe28] sm:$0xff]   ;;  %10446 = vmatpush3.bf16.msra.mxu1 %v11430_v17  ;;  %v11454_v51 = vld [vmem:[%s14585_s1 + $0xf10] sm:$0xff]   ;;  %v11458_v59 = vld [vmem:[%s14585_s1 + $0xf18] sm:$0xff]  }
 0x1da   :  { %v10147_v1 = vpop.f32.mrb[31].mxu1  ;;  %10447 = vmatprep.subr.bf16.mxu1 %v11433_v20  ;;  %v11455_v53 = vld [vmem:[%s14585_s1 + $0xfd0] sm:$0xff]   ;;  %v11481_v17 = vld [vmem:[%s14586_s0 + $0xf8] ss:$392 sps:$4 sm:$0xff]  }
 0x1db   :  { %v7496_v0 = vadd.f32 %v10126_v58, %v13315_v19  ;;  %v13421_v3 = vadd.f32 %v10145_v61, %v7493_v55  ;;  %v10148_v4 = vadd.f32 %v10147_v1, %v10146_v62  ;;  %10424 = vmatpush3.bf16.msra.mxu0 %v11428_v15  ;;  %v11432_v19 = vld [vmem:[%s14585_s1 + $0xe30] sm:$0xff]   ;;  %v11460_v61 = vld [vmem:[%s14585_s1 + $0xf98] sm:$0xff]   ;;  %v11461_v62 = vld [vmem:[%s14585_s1 + $0xf60] sm:$0xff]  }
 0x1dc   :  { %10425 = vmatprep.subr.bf16.mxu0 %v11431_v18  ;;  %v11456_v56 = vld [vmem:[%s14585_s1 + $0xf90] sm:$0xff]   ;;  %v11464_v1 = vld [vmem:[%s14585_s1 + $0xfa0] sm:$0xff]   ;;  %v11479_v15 = vld [vmem:[%s14585_s1 + $0xfb8] sm:$0xff]  }
 0x1dd   :  { %v13429_v7 = vadd.f32 %v10148_v4, %v7496_v0  ;;  %10448 = vmatpush3.bf16.msra.mxu1 %v11434_v21  ;;  %v11463_v0 = vld [vmem:[%s14585_s1 + $0xfe0] sm:$0xff]   ;;  %v11467_v4 = vld [vmem:[%s14585_s1 + $0xfe8] sm:$0xff]  }
 0x1de   :  { %10449 = vmatprep.subr.bf16.mxu1 %v11437_v24  ;;  %v11483_v18 = vld [vmem:[%s14586_s0 + $0xfc] ss:$392 sps:$4 sm:$0xff]  }
 0x1df   :  { %10426 = vmatpush3.bf16.msra.mxu0 %v11432_v19  ;;  %v11484_v19 = vld [vmem:[%s14585_s1 + $0x1000] sm:$0xff]  }
 0x1e0   :  { %10427 = vmatprep.subr.bf16.mxu0 %v11435_v22  ;;  %v11485_v20 = vld [vmem:[%s14585_s1 + $0x10c0] sm:$0xff]  }
 0x1e1   :  { %10450 = vmatpush3.bf16.msra.mxu1 %v11441_v27  ;;  %v11486_v21 = vld [vmem:[%s14585_s1 + $0x1080] sm:$0xff]  }
 0x1e2   :  { %10479 = vmatprep.subr.bf16.mxu1 %v11447_v32 }
 0x1e3   :  { %10428 = vmatpush3.bf16.msra.mxu0 %v11436_v23  ;;  %v11487_v23 = vld [vmem:[%s14585_s1 + $0x1048] sm:$0xff]  }
 0x1e4   :  { %10457 = vmatprep.subr.bf16.mxu0 %v11442_v28  ;;  %8106 = vmatmul.mubr.bf16.vlgmr.msra.gmra.mrb[56].mxu1 %v11443_v29  ;;  %v11489_v28 = vld [vmem:[%s14585_s1 + $0x10c8] sm:$0xff]  }
 0x1e5   :  { %10480 = vmatpush3.bf16.msra.mxu1 %v11448_v34  ;;  %8187 = vmatprep.mubr.bf16.mxu1 %v11483_v18  ;;  %v11528_v18 = vld [vmem:[%s14585_s1 + $0x1188] sm:$0xff]  }
 0x1e6   :  { %8065 = vmatmul.mubr.bf16.vlgmr.msra.gmra.mrb[56].mxu0 %v11438_v25  ;;  %10481 = vmatprep.subr.bf16.mxu1 %v11451_v41  ;;  %v11488_v25 = vld [vmem:[%s14585_s1 + $0x1008] sm:$0xff]  }
 0x1e7   :  { %10458 = vmatpush3.bf16.msra.mxu0 %v11446_v31  ;;  %8146 = vmatprep.mubr.bf16.mxu0 %v11478_v14 }
 0x1e8   :  { %10459 = vmatprep.subr.bf16.mxu0 %v11449_v36  ;;  %v11492_v36 = vld [vmem:[%s14585_s1 + $0x1010] sm:$0xff]  }
 0x1e9   :  { %10482 = vmatpush3.bf16.msra.mxu1 %v11452_v45  ;;  %v11495_v45 = vld [vmem:[%s14585_s1 + $0x1058] sm:$0xff]  }
 0x1ea   :  { %10483 = vmatprep.subr.bf16.mxu1 %v11455_v53  ;;  %v11502_v53 = vld [vmem:[%s14585_s1 + $0x10a0] sm:$0xff]  }
 0x1eb   :  { %10460 = vmatpush3.bf16.msra.mxu0 %v11450_v39  ;;  %v11493_v39 = vld [vmem:[%s14585_s1 + $0x10d0] sm:$0xff]  }
 0x1ec   :  { %10461 = vmatprep.subr.bf16.mxu0 %v11453_v47 }
 0x1ed   :  { %10484 = vmatpush3.bf16.msra.mxu1 %v11456_v56  ;;  %v11505_v56 = vld [vmem:[%s14585_s1 + $0x10e8] sm:$0xff]  }
 0x1ee   :  { %10485 = vmatprep.subr.bf16.mxu1 %v11459_v60  ;;  %v11509_v60 = vld [vmem:[%s14585_s1 + $0x10f0] sm:$0xff]  }
 0x1ef   :  { %10462 = vmatpush3.bf16.msra.mxu0 %v11454_v51  ;;  %v11500_v51 = vld [vmem:[%s14585_s1 + $0x1020] sm:$0xff]  }
 0x1f0   :  { %10463 = vmatprep.subr.bf16.mxu0 %v11457_v57  ;;  %v11506_v57 = vld [vmem:[%s14585_s1 + $0x10a8] sm:$0xff]  }
 0x1f1   :  { %10486 = vmatpush3.bf16.msra.mxu1 %v11460_v61  ;;  %v11510_v61 = vld [vmem:[%s14585_s1 + $0x10b0] sm:$0xff]  }
 0x1f2   :  { %10487 = vmatprep.subr.bf16.mxu1 %v11463_v0  ;;  %v11513_v0 = vld [vmem:[%s14585_s1 + $0x10f8] sm:$0xff]  }
 0x1f3   :  { %10464 = vmatpush3.bf16.msra.mxu0 %v11458_v59  ;;  %v11508_v59 = vld [vmem:[%s14585_s1 + $0x1030] sm:$0xff]  }
 0x1f4   :  { %10465 = vmatprep.subr.bf16.mxu0 %v11461_v62  ;;  %v11511_v62 = vld [vmem:[%s14585_s1 + $0x1078] sm:$0xff]  }
 0x1f5   :  { %v10165_v33 = vpop.f32.mrb[32].mxu0  ;;  %10488 = vmatpush3.bf16.msra.mxu1 %v11464_v1  ;;  %v11514_v1 = vld [vmem:[%s14586_s0 + $0x100] ss:$392 sps:$4 sm:$0xff]  }
 0x1f6   :  { %v10166_v35 = vpop.f32.mrb[33].mxu0  ;;  %10489 = vmatprep.subr.bf16.mxu1 %v11467_v4  ;;  %v11518_v4 = vld [vmem:[%s14585_s1 + $0x1140] sm:$0xff]  }
 0x1f7   :  { %v10167_v37 = vadd.f32 %v10166_v35, %v10165_v33  ;;  %v10168_v38 = vpop.f32.mrb[34].mxu0  ;;  %v10187_v43 = vpop.f32.mrb[32].mxu1  ;;  %10466 = vmatpush3.bf16.msra.mxu0 %v11462_v63  ;;  %v11491_v33 = vld [vmem:[%s14585_s1 + $0x1050] sm:$0xff]   ;;  %v11512_v63 = vld [vmem:[%s14585_s1 + $0x1038] sm:$0xff]  }
 0x1f8   :  { %v10169_v40 = vpop.f32.mrb[35].mxu0  ;;  %v10188_v46 = vpop.f32.mrb[33].mxu1  ;;  %10467 = vmatprep.subr.bf16.mxu0 %v11465_v2  ;;  %v11516_v2 = vld [vmem:[%s14586_s0 + $0x104] ss:$392 sps:$4 sm:$0xff]  }
 0x1f9   :  { %v7575_v42 = vadd.f32 %v10167_v37, %v13421_v3  ;;  %v10170_v44 = vadd.f32 %v10169_v40, %v10168_v38  ;;  %v10189_v49 = vadd.f32 %v10188_v46, %v10187_v43  ;;  %v10190_v50 = vpop.f32.mrb[34].mxu1  ;;  %v11466_v3 = vld [vmem:[%s14585_s1 + $0xf28] sm:$0xff]   ;;  %10490 = vmatpush3.bf16.msra.mxu1 %v11468_v5  ;;  %v11496_v46 = vld [vmem:[%s14585_s1 + $0x1018] sm:$0xff]  }
 0x1fa   :  { %v10191_v52 = vpop.f32.mrb[35].mxu1  ;;  %10491 = vmatprep.subr.bf16.mxu1 %v11471_v8  ;;  %v11519_v5 = vld [vmem:[%s14586_s0 + $0x108] ss:$392 sps:$4 sm:$0xff]   ;;  %v11523_v8 = vld [vmem:[%s14585_s1 + $0x11c0] sm:$0xff]  }
 0x1fb   :  { %v7578_v48 = vadd.f32 %v10170_v44, %v13429_v7  ;;  %v13532_v54 = vadd.f32 %v10189_v49, %v7575_v42  ;;  %v10192_v55 = vadd.f32 %v10191_v52, %v10190_v50  ;;  %10468 = vmatpush3.bf16.msra.mxu0 %v11466_v3  ;;  %v11470_v7 = vld [vmem:[%s14585_s1 + $0xf30] sm:$0xff]   ;;  %v11498_v49 = vld [vmem:[%s14585_s1 + $0x1098] sm:$0xff]   ;;  %v11499_v50 = vld [vmem:[%s14585_s1 + $0x1060] sm:$0xff]  }
 0x1fc   :  { %10469 = vmatprep.subr.bf16.mxu0 %v11469_v6  ;;  %v11494_v42 = vld [vmem:[%s14585_s1 + $0x1090] sm:$0xff]   ;;  %v11501_v52 = vld [vmem:[%s14585_s1 + $0x10e0] sm:$0xff]   ;;  %v11517_v3 = vld [vmem:[%s14585_s1 + $0x10b8] sm:$0xff]  }
 0x1fd   :  { %v13540_v58 = vadd.f32 %v10192_v55, %v7578_v48  ;;  %10492 = vmatpush3.bf16.msra.mxu1 %v11472_v9  ;;  %v11497_v48 = vld [vmem:[%s14585_s1 + $0x10d8] sm:$0xff]   ;;  %v11504_v55 = vld [vmem:[%s14585_s1 + $0x1028] sm:$0xff]   ;;  %v11524_v9 = vld [vmem:[%s14585_s1 + $0x1180] sm:$0xff]  }
 0x1fe   :  { %10493 = vmatprep.subr.bf16.mxu1 %v11475_v12  ;;  %v11521_v6 = vld [vmem:[%s14586_s0 + $0x10c] ss:$392 sps:$4 sm:$0xff]  }
 0x1ff   :  { %10470 = vmatpush3.bf16.msra.mxu0 %v11470_v7  ;;  %v11522_v7 = vld [vmem:[%s14585_s1 + $0x1100] sm:$0xff]  }
 0x200   :  { %10471 = vmatprep.subr.bf16.mxu0 %v11473_v10 }
 0x201   :  { %10494 = vmatpush3.bf16.msra.mxu1 %v11479_v15 }
 0x202   :  { %10523 = vmatprep.subr.bf16.mxu1 %v11485_v20 }
 0x203   :  { %10472 = vmatpush3.bf16.msra.mxu0 %v11474_v11  ;;  %v11525_v11 = vld [vmem:[%s14585_s1 + $0x1148] sm:$0xff]  }
 0x204   :  { %10501 = vmatprep.subr.bf16.mxu0 %v11480_v16  ;;  %8188 = vmatmul.mubr.bf16.vlgmr.msra.gmra.mrb[60].mxu1 %v11481_v17  ;;  %v11527_v16 = vld [vmem:[%s14585_s1 + $0x11c8] sm:$0xff]  }
 0x205   :  { %10524 = vmatpush3.bf16.msra.mxu1 %v11486_v21  ;;  %8269 = vmatprep.mubr.bf16.mxu1 %v11521_v6  ;;  %v11529_v21 = vld [vmem:[%s14585_s1 + $0x1150] sm:$0xff]  }
 0x206   :  { %8147 = vmatmul.mubr.bf16.vlgmr.msra.gmra.mrb[60].mxu0 %v11476_v13  ;;  %10525 = vmatprep.subr.bf16.mxu1 %v11489_v28  ;;  %v11526_v13 = vld [vmem:[%s14585_s1 + $0x1108] sm:$0xff]  }
 0x207   :  { %10502 = vmatpush3.bf16.msra.mxu0 %v11484_v19  ;;  %8228 = vmatprep.mubr.bf16.mxu0 %v11516_v2 }
 0x208   :  { %10503 = vmatprep.subr.bf16.mxu0 %v11487_v23 }
 0x209   :  { %10526 = vmatpush3.bf16.msra.mxu1 %v11490_v30  ;;  %v11532_v30 = vld [vmem:[%s14585_s1 + $0x1190] sm:$0xff]  }
 0x20a   :  { %10527 = vmatprep.subr.bf16.mxu1 %v11493_v39  ;;  %v11538_v39 = vld [vmem:[%s14585_s1 + $0x1120] sm:$0xff]  }
 0x20b   :  { %10504 = vmatpush3.bf16.msra.mxu0 %v11488_v25 }
 0x20c   :  { %10505 = vmatprep.subr.bf16.mxu0 %v11491_v33  ;;  %v11533_v33 = vld [vmem:[%s14585_s1 + $0x1158] sm:$0xff]  }
 0x20d   :  { %10528 = vmatpush3.bf16.msra.mxu1 %v11494_v42  ;;  %v11541_v42 = vld [vmem:[%s14585_s1 + $0x1168] sm:$0xff]  }
 0x20e   :  { %10529 = vmatprep.subr.bf16.mxu1 %v11497_v48  ;;  %v11547_v48 = vld [vmem:[%s14585_s1 + $0x11f0] sm:$0xff]  }
 0x20f   :  { %10506 = vmatpush3.bf16.msra.mxu0 %v11492_v36  ;;  %v11535_v36 = vld [vmem:[%s14585_s1 + $0x11d8] sm:$0xff]  }
 0x210   :  { %10507 = vmatprep.subr.bf16.mxu0 %v11495_v45  ;;  %v11544_v45 = vld [vmem:[%s14585_s1 + $0x11a8] sm:$0xff]  }
 0x211   :  { %10530 = vmatpush3.bf16.msra.mxu1 %v11498_v49  ;;  %v11548_v49 = vld [vmem:[%s14585_s1 + $0x11b0] sm:$0xff]  }
 0x212   :  { %10531 = vmatprep.subr.bf16.mxu1 %v11501_v52  ;;  %v11551_v52 = vld [vmem:[%s14585_s1 + $0x11f8] sm:$0xff]  }
 0x213   :  { %10508 = vmatpush3.bf16.msra.mxu0 %v11496_v46  ;;  %v11545_v46 = vld [vmem:[%s14585_s1 + $0x1170] sm:$0xff]  }
 0x214   :  { %10509 = vmatprep.subr.bf16.mxu0 %v11499_v50  ;;  %v11549_v50 = vld [vmem:[%s14585_s1 + $0x1178] sm:$0xff]  }
 0x215   :  { %10532 = vmatpush3.bf16.msra.mxu1 %v11502_v53  ;;  %v11552_v53 = vld [vmem:[%s14586_s0 + $0x110] ss:$392 sps:$4 sm:$0xff]  }
 0x216   :  { %10533 = vmatprep.subr.bf16.mxu1 %v11505_v56  ;;  %v11556_v56 = vld [vmem:[%s14585_s1 + $0x1240] sm:$0xff]  }
 0x217   :  { %v10231_v29 = vpop.f32.mrb[36].mxu1  ;;  %10510 = vmatpush3.bf16.msra.mxu0 %v11500_v51  ;;  %v11550_v51 = vld [vmem:[%s14585_s1 + $0x1138] sm:$0xff]  }
 0x218   :  { %v10232_v35 = vpop.f32.mrb[37].mxu1 }
 0x219   :  { %v10209_v22 = vpop.f32.mrb[36].mxu0  ;;  %v10233_v37 = vadd.f32 %v10232_v35, %v10231_v29  ;;  %v10234_v38 = vpop.f32.mrb[38].mxu1  ;;  %10534 = vmatpush3.bf16.msra.mxu1 %v11506_v57  ;;  %v11557_v57 = vld [vmem:[%s14586_s0 + $0x118] ss:$392 sps:$4 sm:$0xff]  }
 0x21a   :  { %v10210_v24 = vpop.f32.mrb[37].mxu0  ;;  %v10235_v41 = vpop.f32.mrb[39].mxu1  ;;  %10535 = vmatprep.subr.bf16.mxu1 %v11509_v60  ;;  %v11561_v60 = vld [vmem:[%s14585_s1 + $0x12c0] sm:$0xff]  }
 0x21b   :  { %v10211_v26 = vadd.f32 %v10210_v24, %v10209_v22  ;;  %v10212_v27 = vpop.f32.mrb[38].mxu0  ;;  %v10236_v44 = vadd.f32 %v10235_v41, %v10234_v38  ;;  %v11530_v24 = vld [vmem:[%s14585_s1 + $0x1110] sm:$0xff]   ;;  %v11537_v38 = vld [vmem:[%s14585_s1 + $0x1160] sm:$0xff]  }
 0x21c   :  { %v10213_v32 = vpop.f32.mrb[39].mxu0  ;;  %v11540_v41 = vld [vmem:[%s14585_s1 + $0x11a0] sm:$0xff]  }
 0x21d   :  { %v7657_v31 = vadd.f32 %v10211_v26, %v13532_v54  ;;  %v10214_v34 = vadd.f32 %v10213_v32, %v10212_v27  ;;  %v11503_v54 = vld [vmem:[%s14585_s1 + $0x1068] sm:$0xff]   ;;  %10536 = vmatpush3.bf16.msra.mxu1 %v11510_v61  ;;  %v11531_v27 = vld [vmem:[%s14585_s1 + $0x11d0] sm:$0xff]  }
 0x21e   :  { %10511 = vmatprep.subr.bf16.mxu0 %v11503_v54  ;;  %10537 = vmatprep.subr.bf16.mxu1 %v11513_v0  ;;  %v11554_v54 = vld [vmem:[%s14586_s0 + $0x114] ss:$392 sps:$4 sm:$0xff]   ;;  %v11563_v0 = vld [vmem:[%s14585_s1 + $0x1248] sm:$0xff]  }
 0x21f   :  { %v7660_v40 = vadd.f32 %v10214_v34, %v13540_v58  ;;  %v13649_v43 = vadd.f32 %v10233_v37, %v7657_v31  ;;  %10512 = vmatpush3.bf16.msra.mxu0 %v11504_v55  ;;  %v11507_v58 = vld [vmem:[%s14585_s1 + $0x1070] sm:$0xff]   ;;  %v11534_v34 = vld [vmem:[%s14585_s1 + $0x1118] sm:$0xff]  }
 0x220   :  { %10513 = vmatprep.subr.bf16.mxu0 %v11507_v58  ;;  %v11536_v37 = vld [vmem:[%s14585_s1 + $0x1198] sm:$0xff]  }
 0x221   :  { %v13657_v47 = vadd.f32 %v10236_v44, %v7660_v40  ;;  %10538 = vmatpush3.bf16.msra.mxu1 %v11517_v3  ;;  %v11539_v40 = vld [vmem:[%s14585_s1 + $0x11e0] sm:$0xff]   ;;  %v11543_v44 = vld [vmem:[%s14585_s1 + $0x11e8] sm:$0xff]   ;;  %v11555_v55 = vld [vmem:[%s14585_s1 + $0x11b8] sm:$0xff]  }
 0x222   :  { %10567 = vmatprep.subr.bf16.mxu1 %v11523_v8  ;;  %v11559_v58 = vld [vmem:[%s14586_s0 + $0x11c] ss:$392 sps:$4 sm:$0xff]   ;;  %v11564_v3 = vld [vmem:[%s14585_s1 + $0x1208] sm:$0xff]  }
 0x223   :  { %10514 = vmatpush3.bf16.msra.mxu0 %v11508_v59  ;;  %v11560_v59 = vld [vmem:[%s14585_s1 + $0x1200] sm:$0xff]  }
 0x224   :  { %10515 = vmatprep.subr.bf16.mxu0 %v11511_v62  ;;  %8270 = vmatmul.mubr.bf16.vlgmr.msra.gmra.mrb[64].mxu1 %v11519_v5  ;;  %v11562_v62 = vld [vmem:[%s14585_s1 + $0x1280] sm:$0xff]   ;;  %v11565_v5 = vld [vmem:[%s14585_s1 + $0x12c8] sm:$0xff]  }
 0x225   :  { %10568 = vmatpush3.bf16.msra.mxu1 %v11524_v9  ;;  %8351 = vmatprep.mubr.bf16.mxu1 %v11559_v58  ;;  %v11566_v9 = vld [vmem:[%s14585_s1 + $0x1288] sm:$0xff]  }
 0x226   :  { %10569 = vmatprep.subr.bf16.mxu1 %v11527_v16  ;;  %v11604_v58 = vld [vmem:[%s14585_s1 + $0x1388] sm:$0xff]  }
 0x227   :  { %10516 = vmatpush3.bf16.msra.mxu0 %v11512_v63 }
 0x228   :  { %10545 = vmatprep.subr.bf16.mxu0 %v11518_v4 }
 0x229   :  { %10570 = vmatpush3.bf16.msra.mxu1 %v11528_v18 }
 0x22a   :  { %8229 = vmatmul.mubr.bf16.vlgmr.msra.gmra.mrb[64].mxu0 %v11514_v1  ;;  %10571 = vmatprep.subr.bf16.mxu1 %v11531_v27  ;;  %v11576_v27 = vld [vmem:[%s14585_s1 + $0x1220] sm:$0xff]  }
 0x22b   :  { %10546 = vmatpush3.bf16.msra.mxu0 %v11522_v7  ;;  %8310 = vmatprep.mubr.bf16.mxu0 %v11554_v54 }
 0x22c   :  { %10547 = vmatprep.subr.bf16.mxu0 %v11525_v11  ;;  %v11567_v11 = vld [vmem:[%s14585_s1 + $0x1250] sm:$0xff]  }
 0x22d   :  { %10572 = vmatpush3.bf16.msra.mxu1 %v11532_v30  ;;  %v11579_v30 = vld [vmem:[%s14585_s1 + $0x1268] sm:$0xff]  }
 0x22e   :  { %10573 = vmatprep.subr.bf16.mxu1 %v11535_v36  ;;  %v11585_v36 = vld [vmem:[%s14585_s1 + $0x12f0] sm:$0xff]  }
 0x22f   :  { %10548 = vmatpush3.bf16.msra.mxu0 %v11526_v13 }
 0x230   :  { %10549 = vmatprep.subr.bf16.mxu0 %v11529_v21  ;;  %v11571_v21 = vld [vmem:[%s14585_s1 + $0x1258] sm:$0xff]  }
 0x231   :  { %10574 = vmatpush3.bf16.msra.mxu1 %v11536_v37  ;;  %v11586_v37 = vld [vmem:[%s14585_s1 + $0x12b0] sm:$0xff]  }
 0x232   :  { %10575 = vmatprep.subr.bf16.mxu1 %v11539_v40  ;;  %v11589_v40 = vld [vmem:[%s14585_s1 + $0x12f8] sm:$0xff]  }
 0x233   :  { %10550 = vmatpush3.bf16.msra.mxu0 %v11530_v24  ;;  %v11573_v24 = vld [vmem:[%s14585_s1 + $0x12d8] sm:$0xff]  }
 0x234   :  { %10551 = vmatprep.subr.bf16.mxu0 %v11533_v33  ;;  %v11582_v33 = vld [vmem:[%s14585_s1 + $0x12a8] sm:$0xff]  }
 0x235   :  { %10576 = vmatpush3.bf16.msra.mxu1 %v11540_v41  ;;  %v11590_v41 = vld [vmem:[%s14586_s0 + $0x120] ss:$392 sps:$4 sm:$0xff]  }
 0x236   :  { %10577 = vmatprep.subr.bf16.mxu1 %v11543_v44  ;;  %v11594_v44 = vld [vmem:[%s14585_s1 + $0x1340] sm:$0xff]  }
 0x237   :  { %v10275_v17 = vpop.f32.mrb[40].mxu1  ;;  %10552 = vmatpush3.bf16.msra.mxu0 %v11534_v34  ;;  %v11583_v34 = vld [vmem:[%s14585_s1 + $0x1270] sm:$0xff]  }
 0x238   :  { %v10276_v23 = vpop.f32.mrb[41].mxu1  ;;  %10553 = vmatprep.subr.bf16.mxu0 %v11537_v38  ;;  %v11587_v38 = vld [vmem:[%s14585_s1 + $0x1278] sm:$0xff]  }
 0x239   :  { %v10253_v10 = vpop.f32.mrb[40].mxu0  ;;  %v10277_v25 = vadd.f32 %v10276_v23, %v10275_v17  ;;  %v10278_v26 = vpop.f32.mrb[42].mxu1  ;;  %10578 = vmatpush3.bf16.msra.mxu1 %v11544_v45  ;;  %v11569_v17 = vld [vmem:[%s14585_s1 + $0x12d0] sm:$0xff]   ;;  %v11572_v23 = vld [vmem:[%s14585_s1 + $0x1218] sm:$0xff]  }
 0x23a   :  { %v10254_v12 = vpop.f32.mrb[41].mxu0  ;;  %v10279_v29 = vpop.f32.mrb[43].mxu1  ;;  %10579 = vmatprep.subr.bf16.mxu1 %v11547_v48  ;;  %v11595_v45 = vld [vmem:[%s14586_s0 + $0x128] ss:$392 sps:$4 sm:$0xff]   ;;  %v11599_v48 = vld [vmem:[%s14585_s1 + $0x13c0] sm:$0xff]  }
 0x23b   :  { %v10255_v14 = vadd.f32 %v10254_v12, %v10253_v10  ;;  %v10256_v15 = vpop.f32.mrb[42].mxu0  ;;  %v10280_v32 = vadd.f32 %v10279_v29, %v10278_v26  ;;  %10554 = vmatpush3.bf16.msra.mxu0 %v11538_v39  ;;  %v11575_v26 = vld [vmem:[%s14585_s1 + $0x1260] sm:$0xff]   ;;  %v11588_v39 = vld [vmem:[%s14585_s1 + $0x1238] sm:$0xff]  }
 0x23c   :  { %v10257_v20 = vpop.f32.mrb[43].mxu0  ;;  %10555 = vmatprep.subr.bf16.mxu0 %v11541_v42  ;;  %v11578_v29 = vld [vmem:[%s14585_s1 + $0x12a0] sm:$0xff]  }
 0x23d   :  { %v7739_v19 = vadd.f32 %v10255_v14, %v13649_v43  ;;  %v10258_v22 = vadd.f32 %v10257_v20, %v10256_v15  ;;  %v11542_v43 = vld [vmem:[%s14585_s1 + $0x1128] sm:$0xff]   ;;  %10580 = vmatpush3.bf16.msra.mxu1 %v11548_v49  ;;  %v11568_v15 = vld [vmem:[%s14585_s1 + $0x1210] sm:$0xff]   ;;  %v11600_v49 = vld [vmem:[%s14585_s1 + $0x1380] sm:$0xff]  }
 0x23e   :  { %10581 = vmatprep.subr.bf16.mxu1 %v11551_v52  ;;  %v11570_v20 = vld [vmem:[%s14585_s1 + $0x1290] sm:$0xff]   ;;  %v11592_v42 = vld [vmem:[%s14586_s0 + $0x124] ss:$392 sps:$4 sm:$0xff]  }
 0x23f   :  { %v7742_v28 = vadd.f32 %v10258_v22, %v13657_v47  ;;  %v13763_v31 = vadd.f32 %v10277_v25, %v7739_v19  ;;  %10556 = vmatpush3.bf16.msra.mxu0 %v11542_v43  ;;  %v11546_v47 = vld [vmem:[%s14585_s1 + $0x1130] sm:$0xff]   ;;  %v11574_v25 = vld [vmem:[%s14585_s1 + $0x1298] sm:$0xff]  }
 0x240   :  { %10557 = vmatprep.subr.bf16.mxu0 %v11545_v46  ;;  %v11593_v43 = vld [vmem:[%s14585_s1 + $0x12b8] sm:$0xff]   ;;  %v11597_v46 = vld [vmem:[%s14586_s0 + $0x12c] ss:$392 sps:$4 sm:$0xff]  }
 0x241   :  { %v13771_v35 = vadd.f32 %v10280_v32, %v7742_v28  ;;  %10582 = vmatpush3.bf16.msra.mxu1 %v11555_v55  ;;  %v11577_v28 = vld [vmem:[%s14585_s1 + $0x12e0] sm:$0xff]   ;;  %v11581_v32 = vld [vmem:[%s14585_s1 + $0x12e8] sm:$0xff]  }
 0x242   :  { %10611 = vmatprep.subr.bf16.mxu1 %v11561_v60 }
 0x243   :  { %10558 = vmatpush3.bf16.msra.mxu0 %v11546_v47  ;;  %v11598_v47 = vld [vmem:[%s14585_s1 + $0x1300] sm:$0xff]  }
 0x244   :  { %10559 = vmatprep.subr.bf16.mxu0 %v11549_v50  ;;  %8352 = vmatmul.mubr.bf16.vlgmr.msra.gmra.mrb[68].mxu1 %v11557_v57 }
 0x245   :  { %10612 = vmatpush3.bf16.msra.mxu1 %v11562_v62  ;;  %8433 = vmatprep.mubr.bf16.mxu1 %v11597_v46  ;;  %v11642_v46 = vld [vmem:[%s14585_s1 + $0x1488] sm:$0xff]  }
 0x246   :  { %10613 = vmatprep.subr.bf16.mxu1 %v11565_v5 }
 0x247   :  { %10560 = vmatpush3.bf16.msra.mxu0 %v11550_v51  ;;  %v11601_v51 = vld [vmem:[%s14585_s1 + $0x1348] sm:$0xff]  }
 0x248   :  { %10589 = vmatprep.subr.bf16.mxu0 %v11556_v56  ;;  %v11603_v56 = vld [vmem:[%s14585_s1 + $0x13c8] sm:$0xff]  }
 0x249   :  { %10614 = vmatpush3.bf16.msra.mxu1 %v11566_v9  ;;  %v11609_v9 = vld [vmem:[%s14585_s1 + $0x1358] sm:$0xff]  }
 0x24a   :  { %8311 = vmatmul.mubr.bf16.vlgmr.msra.gmra.mrb[68].mxu0 %v11552_v53  ;;  %10615 = vmatprep.subr.bf16.mxu1 %v11569_v17  ;;  %v11602_v53 = vld [vmem:[%s14585_s1 + $0x1308] sm:$0xff]   ;;  %v11616_v17 = vld [vmem:[%s14585_s1 + $0x13a0] sm:$0xff]  }
 0x24b   :  { %10590 = vmatpush3.bf16.msra.mxu0 %v11560_v59  ;;  %8392 = vmatprep.mubr.bf16.mxu0 %v11592_v42 }
 0x24c   :  { %10591 = vmatprep.subr.bf16.mxu0 %v11563_v0  ;;  %v11606_v0 = vld [vmem:[%s14585_s1 + $0x1310] sm:$0xff]  }
 0x24d   :  { %10616 = vmatpush3.bf16.msra.mxu1 %v11570_v20  ;;  %v11619_v20 = vld [vmem:[%s14585_s1 + $0x13e8] sm:$0xff]  }
 0x24e   :  { %10617 = vmatprep.subr.bf16.mxu1 %v11573_v24  ;;  %v11623_v24 = vld [vmem:[%s14585_s1 + $0x13f0] sm:$0xff]  }
 0x24f   :  { %10592 = vmatpush3.bf16.msra.mxu0 %v11564_v3  ;;  %v11607_v3 = vld [vmem:[%s14585_s1 + $0x13d0] sm:$0xff]  }
 0x250   :  { %10593 = vmatprep.subr.bf16.mxu0 %v11567_v11 }
 0x251   :  { %10618 = vmatpush3.bf16.msra.mxu1 %v11574_v25  ;;  %v11624_v25 = vld [vmem:[%s14585_s1 + $0x13b0] sm:$0xff]  }
 0x252   :  { %10619 = vmatprep.subr.bf16.mxu1 %v11577_v28  ;;  %v11627_v28 = vld [vmem:[%s14585_s1 + $0x13f8] sm:$0xff]  }
 0x253   :  { %10594 = vmatpush3.bf16.msra.mxu0 %v11568_v15  ;;  %v11614_v15 = vld [vmem:[%s14585_s1 + $0x1320] sm:$0xff]  }
 0x254   :  { %10595 = vmatprep.subr.bf16.mxu0 %v11571_v21  ;;  %v11620_v21 = vld [vmem:[%s14585_s1 + $0x13a8] sm:$0xff]  }
 0x255   :  { %10620 = vmatpush3.bf16.msra.mxu1 %v11578_v29  ;;  %v11628_v29 = vld [vmem:[%s14586_s0 + $0x130] ss:$392 sps:$4 sm:$0xff]  }
 0x256   :  { %10621 = vmatprep.subr.bf16.mxu1 %v11581_v32  ;;  %v11632_v32 = vld [vmem:[%s14585_s1 + $0x1440] sm:$0xff]  }
 0x257   :  { %v10319_v7 = vpop.f32.mrb[44].mxu1  ;;  %10596 = vmatpush3.bf16.msra.mxu0 %v11572_v23  ;;  %v11622_v23 = vld [vmem:[%s14585_s1 + $0x1330] sm:$0xff]  }
 0x258   :  { %v10320_v10 = vpop.f32.mrb[45].mxu1  ;;  %10597 = vmatprep.subr.bf16.mxu0 %v11575_v26  ;;  %v11625_v26 = vld [vmem:[%s14585_s1 + $0x1378] sm:$0xff]  }
 0x259   :  { %v10297_v61 = vpop.f32.mrb[44].mxu0  ;;  %v10321_v13 = vadd.f32 %v10320_v10, %v10319_v7  ;;  %v10322_v14 = vpop.f32.mrb[46].mxu1  ;;  %10622 = vmatpush3.bf16.msra.mxu1 %v11582_v33  ;;  %v11610_v10 = vld [vmem:[%s14585_s1 + $0x1318] sm:$0xff]  }
 0x25a   :  { %v10298_v63 = vpop.f32.mrb[45].mxu0  ;;  %v10323_v16 = vpop.f32.mrb[47].mxu1  ;;  %10623 = vmatprep.subr.bf16.mxu1 %v11585_v36  ;;  %v11633_v33 = vld [vmem:[%s14586_s0 + $0x138] ss:$392 sps:$4 sm:$0xff]  }
 0x25b   :  { %v10299_v1 = vadd.f32 %v10298_v63, %v10297_v61  ;;  %v10300_v2 = vpop.f32.mrb[46].mxu0  ;;  %v10324_v19 = vadd.f32 %v10323_v16, %v10322_v14  ;;  %10598 = vmatpush3.bf16.msra.mxu0 %v11576_v27  ;;  %v11605_v61 = vld [vmem:[%s14585_s1 + $0x1350] sm:$0xff]   ;;  %v11613_v14 = vld [vmem:[%s14585_s1 + $0x1360] sm:$0xff]   ;;  %v11626_v27 = vld [vmem:[%s14585_s1 + $0x1338] sm:$0xff]  }
 0x25c   :  { %v10301_v4 = vpop.f32.mrb[47].mxu0  ;;  %10599 = vmatprep.subr.bf16.mxu0 %v11579_v30  ;;  %v11615_v16 = vld [vmem:[%s14585_s1 + $0x13e0] sm:$0xff]   ;;  %v11630_v30 = vld [vmem:[%s14586_s0 + $0x134] ss:$392 sps:$4 sm:$0xff]  }
 0x25d   :  { %v7821_v6 = vadd.f32 %v10299_v1, %v13763_v31  ;;  %v10302_v8 = vadd.f32 %v10301_v4, %v10300_v2  ;;  %v11580_v31 = vld [vmem:[%s14585_s1 + $0x1228] sm:$0xff]   ;;  %10624 = vmatpush3.bf16.msra.mxu1 %v11586_v37  ;;  %v11637_v36 = vld [vmem:[%s14585_s1 + $0x14c0] sm:$0xff]  }
 0x25e   :  { %10625 = vmatprep.subr.bf16.mxu1 %v11589_v40  ;;  %v11638_v37 = vld [vmem:[%s14585_s1 + $0x1480] sm:$0xff]  }
 0x25f   :  { %v7824_v12 = vadd.f32 %v10302_v8, %v13771_v35  ;;  %v13874_v18 = vadd.f32 %v10321_v13, %v7821_v6  ;;  %10600 = vmatpush3.bf16.msra.mxu0 %v11580_v31  ;;  %v11584_v35 = vld [vmem:[%s14585_s1 + $0x1230] sm:$0xff]   ;;  %v11612_v13 = vld [vmem:[%s14585_s1 + $0x1398] sm:$0xff]  }
 0x260   :  { %10601 = vmatprep.subr.bf16.mxu0 %v11583_v34  ;;  %v11608_v6 = vld [vmem:[%s14585_s1 + $0x1390] sm:$0xff]   ;;  %v11631_v31 = vld [vmem:[%s14585_s1 + $0x13b8] sm:$0xff]  }
 0x261   :  { %v13882_v22 = vadd.f32 %v10324_v19, %v7824_v12  ;;  %10626 = vmatpush3.bf16.msra.mxu1 %v11593_v43  ;;  %v11611_v12 = vld [vmem:[%s14585_s1 + $0x13d8] sm:$0xff]   ;;  %v11618_v19 = vld [vmem:[%s14585_s1 + $0x1328] sm:$0xff]  }
 0x262   :  { %10655 = vmatprep.subr.bf16.mxu1 %v11599_v48  ;;  %v11635_v34 = vld [vmem:[%s14586_s0 + $0x13c] ss:$392 sps:$4 sm:$0xff]  }
 0x263   :  { %10602 = vmatpush3.bf16.msra.mxu0 %v11584_v35  ;;  %v11636_v35 = vld [vmem:[%s14585_s1 + $0x1400] sm:$0xff]  }
 0x264   :  { %10603 = vmatprep.subr.bf16.mxu0 %v11587_v38  ;;  %8434 = vmatmul.mubr.bf16.vlgmr.msra.gmra.mrb[72].mxu1 %v11595_v45 }
 0x265   :  { %10656 = vmatpush3.bf16.msra.mxu1 %v11600_v49  ;;  %8515 = vmatprep.mubr.bf16.mxu1 %v11635_v34  ;;  %v11643_v49 = vld [vmem:[%s14585_s1 + $0x1450] sm:$0xff]  }
 0x266   :  { %10657 = vmatprep.subr.bf16.mxu1 %v11603_v56 }
 0x267   :  { %10604 = vmatpush3.bf16.msra.mxu0 %v11588_v39  ;;  %v11639_v39 = vld [vmem:[%s14585_s1 + $0x1448] sm:$0xff]  }
 0x268   :  { %10633 = vmatprep.subr.bf16.mxu0 %v11594_v44  ;;  %v11641_v44 = vld [vmem:[%s14585_s1 + $0x14c8] sm:$0xff]  }
 0x269   :  { %10658 = vmatpush3.bf16.msra.mxu1 %v11604_v58  ;;  %v11646_v58 = vld [vmem:[%s14585_s1 + $0x1490] sm:$0xff]  }
 0x26a   :  { %8393 = vmatmul.mubr.bf16.vlgmr.msra.gmra.mrb[72].mxu0 %v11590_v41  ;;  %10659 = vmatprep.subr.bf16.mxu1 %v11607_v3  ;;  %v11640_v41 = vld [vmem:[%s14585_s1 + $0x1408] sm:$0xff]   ;;  %v11652_v3 = vld [vmem:[%s14585_s1 + $0x1420] sm:$0xff]  }
 0x26b   :  { %10634 = vmatpush3.bf16.msra.mxu0 %v11598_v47  ;;  %8474 = vmatprep.mubr.bf16.mxu0 %v11630_v30 }
 0x26c   :  { %10635 = vmatprep.subr.bf16.mxu0 %v11601_v51 }
 0x26d   :  { %10660 = vmatpush3.bf16.msra.mxu1 %v11608_v6  ;;  %v11655_v6 = vld [vmem:[%s14585_s1 + $0x1468] sm:$0xff]  }
 0x26e   :  { %10661 = vmatprep.subr.bf16.mxu1 %v11611_v12  ;;  %v11661_v12 = vld [vmem:[%s14585_s1 + $0x14f0] sm:$0xff]  }
 0x26f   :  { %10636 = vmatpush3.bf16.msra.mxu0 %v11602_v53 }
 0x270   :  { %10637 = vmatprep.subr.bf16.mxu0 %v11605_v61  ;;  %v11647_v61 = vld [vmem:[%s14585_s1 + $0x1458] sm:$0xff]  }
 0x271   :  { %10662 = vmatpush3.bf16.msra.mxu1 %v11612_v13  ;;  %v11662_v13 = vld [vmem:[%s14585_s1 + $0x14b0] sm:$0xff]  }
 0x272   :  { %10663 = vmatprep.subr.bf16.mxu1 %v11615_v16  ;;  %v11665_v16 = vld [vmem:[%s14585_s1 + $0x14f8] sm:$0xff]  }
 0x273   :  { %10638 = vmatpush3.bf16.msra.mxu0 %v11606_v0  ;;  %v11649_v0 = vld [vmem:[%s14585_s1 + $0x14d8] sm:$0xff]  }
 0x274   :  { %10639 = vmatprep.subr.bf16.mxu0 %v11609_v9  ;;  %v11658_v9 = vld [vmem:[%s14585_s1 + $0x14a8] sm:$0xff]  }
 0x275   :  { %10664 = vmatpush3.bf16.msra.mxu1 %v11616_v17  ;;  %v11666_v17 = vld [vmem:[%s14586_s0 + $0x140] ss:$392 sps:$4 sm:$0xff]  }
 0x276   :  { %10665 = vmatprep.subr.bf16.mxu1 %v11619_v20  ;;  %v11670_v20 = vld [vmem:[%s14585_s1 + $0x1540] sm:$0xff]  }
 0x277   :  { %v10363_v57 = vpop.f32.mrb[48].mxu1  ;;  %10640 = vmatpush3.bf16.msra.mxu0 %v11610_v10  ;;  %v11659_v10 = vld [vmem:[%s14585_s1 + $0x1470] sm:$0xff]  }
 0x278   :  { %v10364_v63 = vpop.f32.mrb[49].mxu1  ;;  %10641 = vmatprep.subr.bf16.mxu0 %v11613_v14  ;;  %v11663_v14 = vld [vmem:[%s14585_s1 + $0x1478] sm:$0xff]  }
 0x279   :  { %v10341_v50 = vpop.f32.mrb[48].mxu0  ;;  %v10365_v1 = vadd.f32 %v10364_v63, %v10363_v57  ;;  %v10366_v2 = vpop.f32.mrb[50].mxu1  ;;  %10666 = vmatpush3.bf16.msra.mxu1 %v11620_v21  ;;  %v11671_v21 = vld [vmem:[%s14586_s0 + $0x148] ss:$392 sps:$4 sm:$0xff]  }
 0x27a   :  { %v10342_v52 = vpop.f32.mrb[49].mxu0  ;;  %v10367_v5 = vpop.f32.mrb[51].mxu1  ;;  %10667 = vmatprep.subr.bf16.mxu1 %v11623_v24  ;;  %v11675_v24 = vld [vmem:[%s14585_s1 + $0x15c0] sm:$0xff]  }
 0x27b   :  { %v10343_v54 = vadd.f32 %v10342_v52, %v10341_v50  ;;  %v10344_v55 = vpop.f32.mrb[50].mxu0  ;;  %v10368_v8 = vadd.f32 %v10367_v5, %v10366_v2  ;;  %10642 = vmatpush3.bf16.msra.mxu0 %v11614_v15  ;;  %v11644_v52 = vld [vmem:[%s14585_s1 + $0x1410] sm:$0xff]   ;;  %v11651_v2 = vld [vmem:[%s14585_s1 + $0x1460] sm:$0xff]   ;;  %v11664_v15 = vld [vmem:[%s14585_s1 + $0x1438] sm:$0xff]  }
 0x27c   :  { %v10345_v60 = vpop.f32.mrb[51].mxu0  ;;  %v11654_v5 = vld [vmem:[%s14585_s1 + $0x14a0] sm:$0xff]  }
 0x27d   :  { %v7903_v59 = vadd.f32 %v10343_v54, %v13874_v18  ;;  %v10346_v62 = vadd.f32 %v10345_v60, %v10344_v55  ;;  %v11617_v18 = vld [vmem:[%s14585_s1 + $0x1368] sm:$0xff]   ;;  %10668 = vmatpush3.bf16.msra.mxu1 %v11624_v25  ;;  %v11645_v55 = vld [vmem:[%s14585_s1 + $0x14d0] sm:$0xff]  }
 0x27e   :  { %10643 = vmatprep.subr.bf16.mxu0 %v11617_v18  ;;  %10669 = vmatprep.subr.bf16.mxu1 %v11627_v28  ;;  %v11668_v18 = vld [vmem:[%s14586_s0 + $0x144] ss:$392 sps:$4 sm:$0xff]  }
 0x27f   :  { %v7906_v4 = vadd.f32 %v10346_v62, %v13882_v22  ;;  %v13991_v7 = vadd.f32 %v10365_v1, %v7903_v59  ;;  %10644 = vmatpush3.bf16.msra.mxu0 %v11618_v19  ;;  %v11621_v22 = vld [vmem:[%s14585_s1 + $0x1370] sm:$0xff]   ;;  %v11648_v62 = vld [vmem:[%s14585_s1 + $0x1418] sm:$0xff]   ;;  %v11677_v28 = vld [vmem:[%s14585_s1 + $0x1548] sm:$0xff]  }
 0x280   :  { %10645 = vmatprep.subr.bf16.mxu0 %v11621_v22  ;;  %v11650_v1 = vld [vmem:[%s14585_s1 + $0x1498] sm:$0xff]   ;;  %v11673_v22 = vld [vmem:[%s14586_s0 + $0x14c] ss:$392 sps:$4 sm:$0xff]  }
 0x281   :  { %v13999_v11 = vadd.f32 %v10368_v8, %v7906_v4  ;;  %10670 = vmatpush3.bf16.msra.mxu1 %v11631_v31  ;;  %v11653_v4 = vld [vmem:[%s14585_s1 + $0x14e0] sm:$0xff]   ;;  %v11657_v8 = vld [vmem:[%s14585_s1 + $0x14e8] sm:$0xff]   ;;  %v11669_v19 = vld [vmem:[%s14585_s1 + $0x14b8] sm:$0xff]  }
 0x282   :  { %10699 = vmatprep.subr.bf16.mxu1 %v11637_v36  ;;  %v11678_v31 = vld [vmem:[%s14585_s1 + $0x1508] sm:$0xff]  }
 0x283   :  { %10646 = vmatpush3.bf16.msra.mxu0 %v11622_v23  ;;  %v11674_v23 = vld [vmem:[%s14585_s1 + $0x1500] sm:$0xff]  }
 0x284   :  { %10647 = vmatprep.subr.bf16.mxu0 %v11625_v26  ;;  %8516 = vmatmul.mubr.bf16.vlgmr.msra.gmra.mrb[76].mxu1 %v11633_v33  ;;  %v11676_v26 = vld [vmem:[%s14585_s1 + $0x1580] sm:$0xff]   ;;  %v11679_v33 = vld [vmem:[%s14585_s1 + $0x15c8] sm:$0xff]  }
 0x285   :  { %10700 = vmatpush3.bf16.msra.mxu1 %v11638_v37  ;;  %8597 = vmatprep.mubr.bf16.mxu1 %v11673_v22  ;;  %v11680_v37 = vld [vmem:[%s14585_s1 + $0x1588] sm:$0xff]  }
 0x286   :  { %10701 = vmatprep.subr.bf16.mxu1 %v11641_v44  ;;  %v11718_v22 = vld [vmem:[%s14585_s1 + $0x1688] sm:$0xff]  }
 0x287   :  { %10648 = vmatpush3.bf16.msra.mxu0 %v11626_v27 }
 0x288   :  { %10677 = vmatprep.subr.bf16.mxu0 %v11632_v32 }
 0x289   :  { %10702 = vmatpush3.bf16.msra.mxu1 %v11642_v46 }
 0x28a   :  { %8475 = vmatmul.mubr.bf16.vlgmr.msra.gmra.mrb[76].mxu0 %v11628_v29  ;;  %10703 = vmatprep.subr.bf16.mxu1 %v11645_v55  ;;  %v11690_v55 = vld [vmem:[%s14585_s1 + $0x1520] sm:$0xff]  }
 0x28b   :  { %10678 = vmatpush3.bf16.msra.mxu0 %v11636_v35  ;;  %8556 = vmatprep.mubr.bf16.mxu0 %v11668_v18 }
 0x28c   :  { %10679 = vmatprep.subr.bf16.mxu0 %v11639_v39  ;;  %v11681_v39 = vld [vmem:[%s14585_s1 + $0x1550] sm:$0xff]  }
 0x28d   :  { %10704 = vmatpush3.bf16.msra.mxu1 %v11646_v58  ;;  %v11693_v58 = vld [vmem:[%s14585_s1 + $0x1568] sm:$0xff]  }
 0x28e   :  { %10705 = vmatprep.subr.bf16.mxu1 %v11649_v0  ;;  %v11699_v0 = vld [vmem:[%s14585_s1 + $0x15f0] sm:$0xff]  }
 0x28f   :  { %10680 = vmatpush3.bf16.msra.mxu0 %v11640_v41 }
 0x290   :  { %10681 = vmatprep.subr.bf16.mxu0 %v11643_v49  ;;  %v11685_v49 = vld [vmem:[%s14585_s1 + $0x1558] sm:$0xff]  }
 0x291   :  { %10706 = vmatpush3.bf16.msra.mxu1 %v11650_v1  ;;  %v11700_v1 = vld [vmem:[%s14585_s1 + $0x15b0] sm:$0xff]  }
 0x292   :  { %10707 = vmatprep.subr.bf16.mxu1 %v11653_v4  ;;  %v11703_v4 = vld [vmem:[%s14585_s1 + $0x15f8] sm:$0xff]  }
 0x293   :  { %10682 = vmatpush3.bf16.msra.mxu0 %v11644_v52  ;;  %v11687_v52 = vld [vmem:[%s14585_s1 + $0x15d8] sm:$0xff]  }
 0x294   :  { %10683 = vmatprep.subr.bf16.mxu0 %v11647_v61  ;;  %v11696_v61 = vld [vmem:[%s14585_s1 + $0x15a8] sm:$0xff]  }
 0x295   :  { %10708 = vmatpush3.bf16.msra.mxu1 %v11654_v5  ;;  %v11704_v5 = vld [vmem:[%s14586_s0 + $0x150] ss:$392 sps:$4 sm:$0xff]  }
 0x296   :  { %10709 = vmatprep.subr.bf16.mxu1 %v11657_v8  ;;  %v11708_v8 = vld [vmem:[%s14585_s1 + $0x1640] sm:$0xff]  }
 0x297   :  { %v10407_v45 = vpop.f32.mrb[52].mxu1  ;;  %10684 = vmatpush3.bf16.msra.mxu0 %v11648_v62  ;;  %v11697_v62 = vld [vmem:[%s14585_s1 + $0x1570] sm:$0xff]  }
 0x298   :  { %v10408_v51 = vpop.f32.mrb[53].mxu1  ;;  %10685 = vmatprep.subr.bf16.mxu0 %v11651_v2  ;;  %v11701_v2 = vld [vmem:[%s14585_s1 + $0x1578] sm:$0xff]  }
 0x299   :  { %v10385_v38 = vpop.f32.mrb[52].mxu0  ;;  %v10409_v53 = vadd.f32 %v10408_v51, %v10407_v45  ;;  %v10410_v54 = vpop.f32.mrb[54].mxu1  ;;  %10710 = vmatpush3.bf16.msra.mxu1 %v11658_v9  ;;  %v11683_v45 = vld [vmem:[%s14585_s1 + $0x15d0] sm:$0xff]   ;;  %v11686_v51 = vld [vmem:[%s14585_s1 + $0x1518] sm:$0xff]  }
 0x29a   :  { %v10386_v40 = vpop.f32.mrb[53].mxu0  ;;  %v10411_v57 = vpop.f32.mrb[55].mxu1  ;;  %10711 = vmatprep.subr.bf16.mxu1 %v11661_v12  ;;  %v11709_v9 = vld [vmem:[%s14586_s0 + $0x158] ss:$392 sps:$4 sm:$0xff]  }
 0x29b   :  { %v10387_v42 = vadd.f32 %v10386_v40, %v10385_v38  ;;  %v10388_v43 = vpop.f32.mrb[54].mxu0  ;;  %v10412_v60 = vadd.f32 %v10411_v57, %v10410_v54  ;;  %10686 = vmatpush3.bf16.msra.mxu0 %v11652_v3  ;;  %v11689_v54 = vld [vmem:[%s14585_s1 + $0x1560] sm:$0xff]   ;;  %v11702_v3 = vld [vmem:[%s14585_s1 + $0x1538] sm:$0xff]  }
 0x29c   :  { %v10389_v48 = vpop.f32.mrb[55].mxu0  ;;  %10687 = vmatprep.subr.bf16.mxu0 %v11655_v6  ;;  %v11692_v57 = vld [vmem:[%s14585_s1 + $0x15a0] sm:$0xff]   ;;  %v11706_v6 = vld [vmem:[%s14586_s0 + $0x154] ss:$392 sps:$4 sm:$0xff]  }
 0x29d   :  { %v7985_v47 = vadd.f32 %v10387_v42, %v13991_v7  ;;  %v10390_v50 = vadd.f32 %v10389_v48, %v10388_v43  ;;  %v11656_v7 = vld [vmem:[%s14585_s1 + $0x1428] sm:$0xff]   ;;  %10712 = vmatpush3.bf16.msra.mxu1 %v11662_v13  ;;  %v11682_v43 = vld [vmem:[%s14585_s1 + $0x1510] sm:$0xff]   ;;  %v11713_v12 = vld [vmem:[%s14585_s1 + $0x16c0] sm:$0xff]  }
 0x29e   :  { %10713 = vmatprep.subr.bf16.mxu1 %v11665_v16  ;;  %v11684_v48 = vld [vmem:[%s14585_s1 + $0x1590] sm:$0xff]   ;;  %v11714_v13 = vld [vmem:[%s14585_s1 + $0x1680] sm:$0xff]  }
 0x29f   :  { %v7988_v56 = vadd.f32 %v10390_v50, %v13999_v11  ;;  %v14105_v59 = vadd.f32 %v10409_v53, %v7985_v47  ;;  %10688 = vmatpush3.bf16.msra.mxu0 %v11656_v7  ;;  %v11660_v11 = vld [vmem:[%s14585_s1 + $0x1430] sm:$0xff]   ;;  %v11688_v53 = vld [vmem:[%s14585_s1 + $0x1598] sm:$0xff]  }
 0x2a0   :  { %10689 = vmatprep.subr.bf16.mxu0 %v11659_v10  ;;  %v11707_v7 = vld [vmem:[%s14585_s1 + $0x15b8] sm:$0xff]  }
 0x2a1   :  { %v14113_v63 = vadd.f32 %v10412_v60, %v7988_v56  ;;  %10714 = vmatpush3.bf16.msra.mxu1 %v11669_v19  ;;  %v11691_v56 = vld [vmem:[%s14585_s1 + $0x15e0] sm:$0xff]   ;;  %v11695_v60 = vld [vmem:[%s14585_s1 + $0x15e8] sm:$0xff]  }
 0x2a2   :  { %10743 = vmatprep.subr.bf16.mxu1 %v11675_v24  ;;  %v11711_v10 = vld [vmem:[%s14586_s0 + $0x15c] ss:$392 sps:$4 sm:$0xff]  }
 0x2a3   :  { %10690 = vmatpush3.bf16.msra.mxu0 %v11660_v11  ;;  %v11712_v11 = vld [vmem:[%s14585_s1 + $0x1600] sm:$0xff]  }
 0x2a4   :  { %10691 = vmatprep.subr.bf16.mxu0 %v11663_v14  ;;  %8598 = vmatmul.mubr.bf16.vlgmr.msra.gmra.mrb[80].mxu1 %v11671_v21 }
 0x2a5   :  { %10744 = vmatpush3.bf16.msra.mxu1 %v11676_v26  ;;  %8679 = vmatprep.mubr.bf16.mxu1 %v11711_v10  ;;  %v11756_v10 = vld [vmem:[%s14585_s1 + $0x1788] sm:$0xff]  }
 0x2a6   :  { %10745 = vmatprep.subr.bf16.mxu1 %v11679_v33 }
 0x2a7   :  { %10692 = vmatpush3.bf16.msra.mxu0 %v11664_v15  ;;  %v11715_v15 = vld [vmem:[%s14585_s1 + $0x1648] sm:$0xff]  }
 0x2a8   :  { %10721 = vmatprep.subr.bf16.mxu0 %v11670_v20  ;;  %v11717_v20 = vld [vmem:[%s14585_s1 + $0x16c8] sm:$0xff]  }
 0x2a9   :  { %10746 = vmatpush3.bf16.msra.mxu1 %v11680_v37  ;;  %v11723_v37 = vld [vmem:[%s14585_s1 + $0x1658] sm:$0xff]  }
 0x2aa   :  { %8557 = vmatmul.mubr.bf16.vlgmr.msra.gmra.mrb[80].mxu0 %v11666_v17  ;;  %10747 = vmatprep.subr.bf16.mxu1 %v11683_v45  ;;  %v11716_v17 = vld [vmem:[%s14585_s1 + $0x1608] sm:$0xff]   ;;  %v11730_v45 = vld [vmem:[%s14585_s1 + $0x16a0] sm:$0xff]  }
 0x2ab   :  { %10722 = vmatpush3.bf16.msra.mxu0 %v11674_v23  ;;  %8638 = vmatprep.mubr.bf16.mxu0 %v11706_v6 }
 0x2ac   :  { %10723 = vmatprep.subr.bf16.mxu0 %v11677_v28  ;;  %v11720_v28 = vld [vmem:[%s14585_s1 + $0x1610] sm:$0xff]  }
 0x2ad   :  { %10748 = vmatpush3.bf16.msra.mxu1 %v11684_v48  ;;  %v11733_v48 = vld [vmem:[%s14585_s1 + $0x16e8] sm:$0xff]  }
 0x2ae   :  { %10749 = vmatprep.subr.bf16.mxu1 %v11687_v52  ;;  %v11737_v52 = vld [vmem:[%s14585_s1 + $0x16f0] sm:$0xff]  }
 0x2af   :  { %10724 = vmatpush3.bf16.msra.mxu0 %v11678_v31  ;;  %v11721_v31 = vld [vmem:[%s14585_s1 + $0x16d0] sm:$0xff]  }
 0x2b0   :  { %10725 = vmatprep.subr.bf16.mxu0 %v11681_v39 }
 0x2b1   :  { %10750 = vmatpush3.bf16.msra.mxu1 %v11688_v53  ;;  %v11738_v53 = vld [vmem:[%s14585_s1 + $0x16b0] sm:$0xff]  }
 0x2b2   :  { %10751 = vmatprep.subr.bf16.mxu1 %v11691_v56  ;;  %v11741_v56 = vld [vmem:[%s14585_s1 + $0x16f8] sm:$0xff]  }
 0x2b3   :  { %10726 = vmatpush3.bf16.msra.mxu0 %v11682_v43  ;;  %v11728_v43 = vld [vmem:[%s14585_s1 + $0x1620] sm:$0xff]  }
 0x2b4   :  { %10727 = vmatprep.subr.bf16.mxu0 %v11685_v49  ;;  %v11734_v49 = vld [vmem:[%s14585_s1 + $0x16a8] sm:$0xff]  }
 0x2b5   :  { %10752 = vmatpush3.bf16.msra.mxu1 %v11692_v57  ;;  %v11742_v57 = vld [vmem:[%s14586_s0 + $0x160] ss:$392 sps:$4 sm:$0xff]  }
 0x2b6   :  { %10753 = vmatprep.subr.bf16.mxu1 %v11695_v60  ;;  %v11746_v60 = vld [vmem:[%s14585_s1 + $0x1740] sm:$0xff]  }
 0x2b7   :  { %v10451_v35 = vpop.f32.mrb[56].mxu1  ;;  %10728 = vmatpush3.bf16.msra.mxu0 %v11686_v51  ;;  %v11736_v51 = vld [vmem:[%s14585_s1 + $0x1630] sm:$0xff]  }
 0x2b8   :  { %v10452_v38 = vpop.f32.mrb[57].mxu1  ;;  %10729 = vmatprep.subr.bf16.mxu0 %v11689_v54  ;;  %v11739_v54 = vld [vmem:[%s14585_s1 + $0x1678] sm:$0xff]  }
 0x2b9   :  { %v10429_v25 = vpop.f32.mrb[56].mxu0  ;;  %v10453_v41 = vadd.f32 %v10452_v38, %v10451_v35  ;;  %v10454_v42 = vpop.f32.mrb[58].mxu1  ;;  %10754 = vmatpush3.bf16.msra.mxu1 %v11696_v61  ;;  %v11724_v38 = vld [vmem:[%s14585_s1 + $0x1618] sm:$0xff]   ;;  %v11747_v61 = vld [vmem:[%s14586_s0 + $0x168] ss:$392 sps:$4 sm:$0xff]  }
 0x2ba   :  { %v10430_v27 = vpop.f32.mrb[57].mxu0  ;;  %v10455_v44 = vpop.f32.mrb[59].mxu1  ;;  %10755 = vmatprep.subr.bf16.mxu1 %v11699_v0  ;;  %v11751_v0 = vld [vmem:[%s14585_s1 + $0x17c0] sm:$0xff]  }
 0x2bb   :  { %v10431_v29 = vadd.f32 %v10430_v27, %v10429_v25  ;;  %v10432_v30 = vpop.f32.mrb[58].mxu0  ;;  %v10456_v47 = vadd.f32 %v10455_v44, %v10454_v42  ;;  %10730 = vmatpush3.bf16.msra.mxu0 %v11690_v55  ;;  %v11719_v25 = vld [vmem:[%s14585_s1 + $0x1650] sm:$0xff]   ;;  %v11727_v42 = vld [vmem:[%s14585_s1 + $0x1660] sm:$0xff]   ;;  %v11740_v55 = vld [vmem:[%s14585_s1 + $0x1638] sm:$0xff]  }
 0x2bc   :  { %v10433_v32 = vpop.f32.mrb[59].mxu0  ;;  %10731 = vmatprep.subr.bf16.mxu0 %v11693_v58  ;;  %v11729_v44 = vld [vmem:[%s14585_s1 + $0x16e0] sm:$0xff]  }
 0x2bd   :  { %v8067_v34 = vadd.f32 %v10431_v29, %v14105_v59  ;;  %v10434_v36 = vadd.f32 %v10433_v32, %v10432_v30  ;;  %v11694_v59 = vld [vmem:[%s14585_s1 + $0x1528] sm:$0xff]   ;;  %10756 = vmatpush3.bf16.msra.mxu1 %v11700_v1  ;;  %v11752_v1 = vld [vmem:[%s14585_s1 + $0x1780] sm:$0xff]  }
 0x2be   :  { %10757 = vmatprep.subr.bf16.mxu1 %v11703_v4  ;;  %v11744_v58 = vld [vmem:[%s14586_s0 + $0x164] ss:$392 sps:$4 sm:$0xff]  }
 0x2bf   :  { %v8070_v40 = vadd.f32 %v10434_v36, %v14113_v63  ;;  %v14216_v46 = vadd.f32 %v10453_v41, %v8067_v34  ;;  %10732 = vmatpush3.bf16.msra.mxu0 %v11694_v59  ;;  %v11698_v63 = vld [vmem:[%s14585_s1 + $0x1530] sm:$0xff]   ;;  %v11726_v41 = vld [vmem:[%s14585_s1 + $0x1698] sm:$0xff]  }
 0x2c0   :  { %10733 = vmatprep.subr.bf16.mxu0 %v11697_v62  ;;  %v11722_v34 = vld [vmem:[%s14585_s1 + $0x1690] sm:$0xff]   ;;  %v11745_v59 = vld [vmem:[%s14585_s1 + $0x16b8] sm:$0xff]  }
 0x2c1   :  { %v14224_v50 = vadd.f32 %v10456_v47, %v8070_v40  ;;  %10758 = vmatpush3.bf16.msra.mxu1 %v11707_v7  ;;  %v11725_v40 = vld [vmem:[%s14585_s1 + $0x16d8] sm:$0xff]   ;;  %v11732_v47 = vld [vmem:[%s14585_s1 + $0x1628] sm:$0xff]  }
 0x2c2   :  { %10787 = vmatprep.subr.bf16.mxu1 %v11713_v12  ;;  %v11749_v62 = vld [vmem:[%s14586_s0 + $0x16c] ss:$392 sps:$4 sm:$0xff]  }
 0x2c3   :  { %10734 = vmatpush3.bf16.msra.mxu0 %v11698_v63  ;;  %v11750_v63 = vld [vmem:[%s14585_s1 + $0x1700] sm:$0xff]  }
 0x2c4   :  { %10735 = vmatprep.subr.bf16.mxu0 %v11701_v2  ;;  %8680 = vmatmul.mubr.bf16.vlgmr.msra.gmra.mrb[84].mxu1 %v11709_v9 }
 0x2c5   :  { %10788 = vmatpush3.bf16.msra.mxu1 %v11714_v13  ;;  %8761 = vmatprep.mubr.bf16.mxu1 %v11749_v62  ;;  %v11757_v13 = vld [vmem:[%s14585_s1 + $0x1750] sm:$0xff]  }
 0x2c6   :  { %10789 = vmatprep.subr.bf16.mxu1 %v11717_v20 }
 0x2c7   :  { %10736 = vmatpush3.bf16.msra.mxu0 %v11702_v3  ;;  %v11753_v3 = vld [vmem:[%s14585_s1 + $0x1748] sm:$0xff]  }
 0x2c8   :  { %10765 = vmatprep.subr.bf16.mxu0 %v11708_v8  ;;  %v11755_v8 = vld [vmem:[%s14585_s1 + $0x17c8] sm:$0xff]  }
 0x2c9   :  { %10790 = vmatpush3.bf16.msra.mxu1 %v11718_v22  ;;  %v11760_v22 = vld [vmem:[%s14585_s1 + $0x1790] sm:$0xff]  }
 0x2ca   :  { %8639 = vmatmul.mubr.bf16.vlgmr.msra.gmra.mrb[84].mxu0 %v11704_v5  ;;  %10791 = vmatprep.subr.bf16.mxu1 %v11721_v31  ;;  %v11754_v5 = vld [vmem:[%s14585_s1 + $0x1708] sm:$0xff]   ;;  %v11766_v31 = vld [vmem:[%s14585_s1 + $0x1720] sm:$0xff]  }
 0x2cb   :  { %10766 = vmatpush3.bf16.msra.mxu0 %v11712_v11  ;;  %8720 = vmatprep.mubr.bf16.mxu0 %v11744_v58 }
 0x2cc   :  { %10767 = vmatprep.subr.bf16.mxu0 %v11715_v15 }
 0x2cd   :  { %10792 = vmatpush3.bf16.msra.mxu1 %v11722_v34  ;;  %v11769_v34 = vld [vmem:[%s14585_s1 + $0x1768] sm:$0xff]  }
 0x2ce   :  { %10793 = vmatprep.subr.bf16.mxu1 %v11725_v40  ;;  %v11775_v40 = vld [vmem:[%s14585_s1 + $0x17f0] sm:$0xff]  }
 0x2cf   :  { %10768 = vmatpush3.bf16.msra.mxu0 %v11716_v17 }
 0x2d0   :  { %10769 = vmatprep.subr.bf16.mxu0 %v11719_v25  ;;  %v11761_v25 = vld [vmem:[%s14585_s1 + $0x1758] sm:$0xff]  }
 0x2d1   :  { %10794 = vmatpush3.bf16.msra.mxu1 %v11726_v41  ;;  %v11776_v41 = vld [vmem:[%s14585_s1 + $0x17b0] sm:$0xff]  }
 0x2d2   :  { %10795 = vmatprep.subr.bf16.mxu1 %v11729_v44  ;;  %v11779_v44 = vld [vmem:[%s14585_s1 + $0x17f8] sm:$0xff]  }
 0x2d3   :  { %10770 = vmatpush3.bf16.msra.mxu0 %v11720_v28  ;;  %v11763_v28 = vld [vmem:[%s14585_s1 + $0x17d8] sm:$0xff]  }
 0x2d4   :  { %10771 = vmatprep.subr.bf16.mxu0 %v11723_v37  ;;  %v11772_v37 = vld [vmem:[%s14585_s1 + $0x17a8] sm:$0xff]  }
 0x2d5   :  { %10796 = vmatpush3.bf16.msra.mxu1 %v11730_v45  ;;  %v11780_v45 = vld [vmem:[%s14586_s0 + $0x170] ss:$392 sps:$4 sm:$0xff]  }
 0x2d6   :  { %10797 = vmatprep.subr.bf16.mxu1 %v11733_v48  ;;  %v11784_v48 = vld [vmem:[%s14585_s1 + $0x1840] sm:$0xff]  }
 0x2d7   :  { %v10495_v21 = vpop.f32.mrb[60].mxu1  ;;  %10772 = vmatpush3.bf16.msra.mxu0 %v11724_v38  ;;  %v11773_v38 = vld [vmem:[%s14585_s1 + $0x1770] sm:$0xff]  }
 0x2d8   :  { %v10496_v27 = vpop.f32.mrb[61].mxu1  ;;  %10773 = vmatprep.subr.bf16.mxu0 %v11727_v42  ;;  %v11777_v42 = vld [vmem:[%s14585_s1 + $0x1778] sm:$0xff]  }
 0x2d9   :  { %v10473_v14 = vpop.f32.mrb[60].mxu0  ;;  %v10497_v29 = vadd.f32 %v10496_v27, %v10495_v21  ;;  %v10498_v30 = vpop.f32.mrb[62].mxu1  ;;  %10798 = vmatpush3.bf16.msra.mxu1 %v11734_v49  ;;  %v11785_v49 = vld [vmem:[%s14586_s0 + $0x178] ss:$392 sps:$4 sm:$0xff]  }
 0x2da   :  { %v10474_v16 = vpop.f32.mrb[61].mxu0  ;;  %v10499_v33 = vpop.f32.mrb[63].mxu1  ;;  %10799 = vmatprep.subr.bf16.mxu1 %v11737_v52  ;;  %v11789_v52 = vld [vmem:[%s14585_s1 + $0x1848] sm:$0xff]  }
 0x2db   :  { %v10475_v18 = vadd.f32 %v10474_v16, %v10473_v14  ;;  %v10476_v19 = vpop.f32.mrb[62].mxu0  ;;  %v10500_v36 = vadd.f32 %v10499_v33, %v10498_v30  ;;  %10774 = vmatpush3.bf16.msra.mxu0 %v11728_v43  ;;  %v11758_v16 = vld [vmem:[%s14585_s1 + $0x1710] sm:$0xff]   ;;  %v11765_v30 = vld [vmem:[%s14585_s1 + $0x1760] sm:$0xff]   ;;  %v11778_v43 = vld [vmem:[%s14585_s1 + $0x1738] sm:$0xff]  }
 0x2dc   :  { %v10477_v24 = vpop.f32.mrb[63].mxu0  ;;  %v11768_v33 = vld [vmem:[%s14585_s1 + $0x17a0] sm:$0xff]  }
 0x2dd   :  { %v8149_v23 = vadd.f32 %v10475_v18, %v14216_v46  ;;  %v10478_v26 = vadd.f32 %v10477_v24, %v10476_v19  ;;  %v11731_v46 = vld [vmem:[%s14585_s1 + $0x1668] sm:$0xff]   ;;  %10800 = vmatpush3.bf16.msra.mxu1 %v11738_v53  ;;  %v11759_v19 = vld [vmem:[%s14585_s1 + $0x17d0] sm:$0xff]  }
 0x2de   :  { %10775 = vmatprep.subr.bf16.mxu0 %v11731_v46  ;;  %10801 = vmatprep.subr.bf16.mxu1 %v11741_v56  ;;  %v11782_v46 = vld [vmem:[%s14586_s0 + $0x174] ss:$392 sps:$4 sm:$0xff]  }
 0x2df   :  { %v8152_v32 = vadd.f32 %v10478_v26, %v14224_v50  ;;  %v14333_v35 = vadd.f32 %v10497_v29, %v8149_v23  ;;  %10776 = vmatpush3.bf16.msra.mxu0 %v11732_v47  ;;  %v11735_v50 = vld [vmem:[%s14585_s1 + $0x1670] sm:$0xff]   ;;  %v11762_v26 = vld [vmem:[%s14585_s1 + $0x1718] sm:$0xff]  }
 0x2e0   :  { %10777 = vmatprep.subr.bf16.mxu0 %v11735_v50  ;;  %v11764_v29 = vld [vmem:[%s14585_s1 + $0x1798] sm:$0xff]   ;;  %v11791_v56 = vld [vmem:[%s14585_s1 + $0x1850] sm:$0xff]  }
 0x2e1   :  { %v14341_v39 = vadd.f32 %v10500_v36, %v8152_v32  ;;  %10802 = vmatpush3.bf16.msra.mxu1 %v11745_v59  ;;  %v11767_v32 = vld [vmem:[%s14585_s1 + $0x17e0] sm:$0xff]   ;;  %v11771_v36 = vld [vmem:[%s14585_s1 + $0x17e8] sm:$0xff]   ;;  %v11783_v47 = vld [vmem:[%s14585_s1 + $0x17b8] sm:$0xff]  }
 0x2e2   :  { %10831 = vmatprep.subr.bf16.mxu1 %v11751_v0  ;;  %v11787_v50 = vld [vmem:[%s14586_s0 + $0x17c] ss:$392 sps:$4 sm:$0xff]  }
 0x2e3   :  { %10778 = vmatpush3.bf16.msra.mxu0 %v11736_v51  ;;  %v11788_v51 = vld [vmem:[%s14585_s1 + $0x1800] sm:$0xff]  }
 0x2e4   :  { %10779 = vmatprep.subr.bf16.mxu0 %v11739_v54  ;;  %8762 = vmatmul.mubr.bf16.vlgmr.msra.gmra.mrb[88].mxu1 %v11747_v61  ;;  %v11790_v54 = vld [vmem:[%s14585_s1 + $0x1808] sm:$0xff]  }
 0x2e5   :  { %10832 = vmatpush3.bf16.msra.mxu1 %v11752_v1  ;;  %8843 = vmatprep.mubr.bf16.mxu1 %v11787_v50  ;;  %v11793_v1 = vld [vmem:[%s14585_s1 + $0x1858] sm:$0xff]  }
 0x2e6   :  { %10833 = vmatprep.subr.bf16.mxu1 %v11755_v8  ;;  %v11794_v8 = vld [vmem:[%s14585_s1 + $0x1818] sm:$0xff]  }
 0x2e7   :  { %10780 = vmatpush3.bf16.msra.mxu0 %v11740_v55 }
 0x2e8   :  { %10809 = vmatprep.subr.bf16.mxu0 %v11746_v60 }
 0x2e9   :  { %10834 = vmatpush3.bf16.msra.mxu1 %v11756_v10 }
 0x2ea   :  { %8721 = vmatmul.mubr.bf16.vlgmr.msra.gmra.mrb[88].mxu0 %v11742_v57  ;;  %10835 = vmatprep.subr.bf16.mxu1 %v11759_v19  ;;  %v11803_v19 = vld [vmem:[%s14586_s0 + $0x180] ss:$392 sps:$4 sm:$0xff]  }
 0x2eb   :  { %10810 = vmatpush3.bf16.msra.mxu0 %v11750_v63  ;;  %8802 = vmatprep.mubr.bf16.mxu0 %v11782_v46  ;;  %v11792_v63 = vld [vmem:[%s14585_s1 + $0x1810] sm:$0xff]  }
 0x2ec   :  { %10811 = vmatprep.subr.bf16.mxu0 %v11753_v3 }
 0x2ed   :  { %10836 = vmatpush3.bf16.msra.mxu1 %v11760_v22 }
 0x2ee   :  { %10837 = vmatprep.subr.bf16.mxu1 %v11763_v28 }
 0x2ef   :  { %10812 = vmatpush3.bf16.msra.mxu0 %v11754_v5 }
 0x2f0   :  { %10813 = vmatprep.subr.bf16.mxu0 %v11757_v13  ;;  %v11805_v13 = vld [vmem:[%s14586_s0 + $0x184] ss:$392 sps:$4 sm:$0xff]  }
 0x2f1   :  { %10838 = vmatpush3.bf16.msra.mxu1 %v11764_v29 }
 0x2f2   :  { %10839 = vmatprep.subr.bf16.mxu1 %v11767_v32 }
 0x2f3   :  { %10814 = vmatpush3.bf16.msra.mxu0 %v11758_v16  ;;  %v11800_v16 = vld [vmem:[%s14585_s1 + $0x1830] sm:$0xff]  }
 0x2f4   :  { %10815 = vmatprep.subr.bf16.mxu0 %v11761_v25 }
 0x2f5   :  { %10840 = vmatpush3.bf16.msra.mxu1 %v11768_v33 }
 0x2f6   :  { %10841 = vmatprep.subr.bf16.mxu1 %v11771_v36 }
 0x2f7   :  { %v10539_v9 = vpop.f32.mrb[64].mxu1  ;;  %10816 = vmatpush3.bf16.msra.mxu0 %v11762_v26 }
 0x2f8   :  { %v10540_v15 = vpop.f32.mrb[65].mxu1  ;;  %10817 = vmatprep.subr.bf16.mxu0 %v11765_v30 }
 0x2f9   :  { %v10541_v17 = vadd.f32 %v10540_v15, %v10539_v9  ;;  %v10542_v18 = vpop.f32.mrb[66].mxu1  ;;  %10842 = vmatpush3.bf16.msra.mxu1 %v11772_v37  ;;  %v11795_v9 = vld [vmem:[%s14585_s1 + $0x1860] sm:$0xff]   ;;  %v11799_v15 = vld [vmem:[%s14585_s1 + $0x1870] sm:$0xff]  }
 0x2fa   :  { %v10543_v21 = vpop.f32.mrb[67].mxu1  ;;  %10843 = vmatprep.subr.bf16.mxu1 %v11775_v40 }
 0x2fb   :  { %v10544_v24 = vadd.f32 %v10543_v21, %v10542_v18  ;;  %10818 = vmatpush3.bf16.msra.mxu0 %v11766_v31  ;;  %v11802_v18 = vld [vmem:[%s14585_s1 + $0x1838] sm:$0xff]  }
 0x2fc   :  { %10819 = vmatprep.subr.bf16.mxu0 %v11769_v34 }
 0x2fd   :  { %v10517_v2 = vpop.f32.mrb[64].mxu0  ;;  %10844 = vmatpush3.bf16.msra.mxu1 %v11776_v41 }
 0x2fe   :  { %v10518_v4 = vpop.f32.mrb[65].mxu0  ;;  %10845 = vmatprep.subr.bf16.mxu1 %v11779_v44 }
 0x2ff   :  { %v10519_v6 = vadd.f32 %v10518_v4, %v10517_v2  ;;  %v10520_v7 = vpop.f32.mrb[66].mxu0 }
 0x300   :  { %v10521_v12 = vpop.f32.mrb[67].mxu0 }
 0x301   :  { %v8231_v11 = vadd.f32 %v10519_v6, %v14333_v35  ;;  %v10522_v14 = vadd.f32 %v10521_v12, %v10520_v7  ;;  %v11770_v35 = vld [vmem:[%s14585_s1 + $0x1728] sm:$0xff]   ;;  %10846 = vmatpush3.bf16.msra.mxu1 %v11783_v47 }
 0x302   :  { %10820 = vmatpush3.bf16.msra.mxu0 %v11770_v35  ;;  %v11797_v12 = vld [vmem:[%s14585_s1 + $0x1868] sm:$0xff]  }
 0x303   :  { %v8234_v20 = vadd.f32 %v10522_v14, %v14341_v39  ;;  %v14447_v23 = vadd.f32 %v10541_v17, %v8231_v11  ;;  %v11774_v39 = vld [vmem:[%s14585_s1 + $0x1730] sm:$0xff]   ;;  %10821 = vmatprep.subr.bf16.mxu0 %v11773_v38  ;;  %v11796_v11 = vld [vmem:[%s14585_s1 + $0x1820] sm:$0xff]   ;;  %v11798_v14 = vld [vmem:[%s14585_s1 + $0x1828] sm:$0xff]  }
 0x304   :  { %8844 = vmatmul.mubr.bf16.vlgmr.msra.gmra.mrb[92].mxu1 %v11785_v49  ;;  %v11801_v17 = vld [vmem:[%s14585_s1 + $0x1878] sm:$0xff]  }
 0x305   :  { %v14455_v27 = vadd.f32 %v10544_v24, %v8234_v20 }
 0x306   :  { %10822 = vmatpush3.bf16.msra.mxu0 %v11774_v39 }
 0x307   :  { %10823 = vmatprep.subr.bf16.mxu0 %v11777_v42 }
 0x30a   :  { %10824 = vmatpush3.bf16.msra.mxu0 %v11778_v43 }
 0x30b   :  { %10853 = vmatprep.subr.bf16.mxu0 %v11784_v48 }
 0x30d   :  { %8803 = vmatmul.mubr.bf16.vlgmr.msra.gmra.mrb[92].mxu0 %v11780_v45 }
 0x30e   :  { %10854 = vmatpush3.bf16.msra.mxu0 %v11788_v51  ;;  %8884 = vmatprep.mubr.bf16.mxu0 %v11805_v13 }
 0x30f   :  { %10855 = vmatprep.subr.bf16.mxu0 %v11789_v52 }
 0x312   :  { %10856 = vmatpush3.bf16.msra.mxu0 %v11790_v54 }
 0x313   :  { %10857 = vmatprep.subr.bf16.mxu0 %v11791_v56 }
 0x316   :  { %10858 = vmatpush3.bf16.msra.mxu0 %v11792_v63 }
 0x317   :  { %v10583_v61 = vpop.f32.mrb[68].mxu1  ;;  %10859 = vmatprep.subr.bf16.mxu0 %v11793_v1 }
 0x318   :  { %v10584_v0 = vpop.f32.mrb[69].mxu1 }
 0x319   :  { %v10585_v3 = vadd.f32 %v10584_v0, %v10583_v61  ;;  %v10586_v4 = vpop.f32.mrb[70].mxu1 }
 0x31a   :  { %v10587_v5 = vpop.f32.mrb[71].mxu1  ;;  %10860 = vmatpush3.bf16.msra.mxu0 %v11794_v8 }
 0x31b   :  { %v10588_v7 = vadd.f32 %v10587_v5, %v10586_v4  ;;  %10861 = vmatprep.subr.bf16.mxu0 %v11795_v9 }
 0x31d   :  { %v10561_v53 = vpop.f32.mrb[68].mxu0 }
 0x31e   :  { %v10562_v55 = vpop.f32.mrb[69].mxu0  ;;  %10862 = vmatpush3.bf16.msra.mxu0 %v11796_v11 }
 0x31f   :  { %v10563_v57 = vadd.f32 %v10562_v55, %v10561_v53  ;;  %v10564_v58 = vpop.f32.mrb[70].mxu0  ;;  %10863 = vmatprep.subr.bf16.mxu0 %v11797_v12 }
 0x320   :  { %v10565_v59 = vpop.f32.mrb[71].mxu0 }
 0x321   :  { %v8313_v60 = vadd.f32 %v10563_v57, %v14447_v23  ;;  %v10566_v62 = vadd.f32 %v10565_v59, %v10564_v58 }
 0x322   :  { %10864 = vmatpush3.bf16.msra.mxu0 %v11798_v14 }
 0x323   :  { %v8316_v2 = vadd.f32 %v10566_v62, %v14455_v27  ;;  %v8354_v6 = vadd.f32 %v10585_v3, %v8313_v60  ;;  %10865 = vmatprep.subr.bf16.mxu0 %v11799_v15 }
 0x325   :  { %v8357_v10 = vadd.f32 %v10588_v7, %v8316_v2 }
 0x326   :  { %10866 = vmatpush3.bf16.msra.mxu0 %v11800_v16 }
 0x327   :  { %10867 = vmatprep.subr.bf16.mxu0 %v11801_v17 }
 0x32a   :  { %10868 = vmatpush3.bf16.msra.mxu0 %v11802_v18 }
 0x32d   :  { %8885 = vmatmul.mubr.bf16.vlgmr.msra.gmra.mrb[96].mxu0 %v11803_v19 }
 0x337   :  { %v10627_v24 = vpop.f32.mrb[72].mxu1 }
 0x338   :  { %v10628_v28 = vpop.f32.mrb[73].mxu1 }
 0x339   :  { %v10629_v29 = vadd.f32 %v10628_v28, %v10627_v24  ;;  %v10630_v30 = vpop.f32.mrb[74].mxu1 }
 0x33a   :  { %v10631_v32 = vpop.f32.mrb[75].mxu1 }
 0x33b   :  { %v10632_v34 = vadd.f32 %v10631_v32, %v10630_v30 }
 0x33d   :  { %v10605_v20 = vpop.f32.mrb[72].mxu0 }
 0x33e   :  { %v10606_v21 = vpop.f32.mrb[73].mxu0 }
 0x33f   :  { %v10607_v22 = vadd.f32 %v10606_v21, %v10605_v20  ;;  %v10608_v23 = vpop.f32.mrb[74].mxu0 }
 0x340   :  { %v10609_v25 = vpop.f32.mrb[75].mxu0 }
 0x341   :  { %v8395_v26 = vadd.f32 %v10607_v22, %v8354_v6  ;;  %v10610_v27 = vadd.f32 %v10609_v25, %v10608_v23 }
 0x343   :  { %v8398_v31 = vadd.f32 %v10610_v27, %v8357_v10  ;;  %v8436_v33 = vadd.f32 %v10629_v29, %v8395_v26 }
 0x345   :  { %v8439_v35 = vadd.f32 %v10632_v34, %v8398_v31 }
 0x357   :  { %v10671_v40 = vpop.f32.mrb[76].mxu1 }
 0x358   :  { %v10672_v44 = vpop.f32.mrb[77].mxu1 }
 0x359   :  { %v10673_v45 = vadd.f32 %v10672_v44, %v10671_v40  ;;  %v10674_v46 = vpop.f32.mrb[78].mxu1 }
 0x35a   :  { %v10675_v48 = vpop.f32.mrb[79].mxu1 }
 0x35b   :  { %v10676_v50 = vadd.f32 %v10675_v48, %v10674_v46 }
 0x35d   :  { %v10649_v36 = vpop.f32.mrb[76].mxu0 }
 0x35e   :  { %v10650_v37 = vpop.f32.mrb[77].mxu0 }
 0x35f   :  { %v10651_v38 = vadd.f32 %v10650_v37, %v10649_v36  ;;  %v10652_v39 = vpop.f32.mrb[78].mxu0 }
 0x360   :  { %v10653_v41 = vpop.f32.mrb[79].mxu0 }
 0x361   :  { %v8477_v42 = vadd.f32 %v10651_v38, %v8436_v33  ;;  %v10654_v43 = vadd.f32 %v10653_v41, %v10652_v39 }
 0x363   :  { %v8480_v47 = vadd.f32 %v10654_v43, %v8439_v35  ;;  %v8518_v49 = vadd.f32 %v10673_v45, %v8477_v42 }
 0x365   :  { %v8521_v51 = vadd.f32 %v10676_v50, %v8480_v47 }
 0x377   :  { %v10715_v58 = vpop.f32.mrb[80].mxu1 }
 0x378   :  { %v10716_v60 = vpop.f32.mrb[81].mxu1 }
 0x379   :  { %v10717_v62 = vadd.f32 %v10716_v60, %v10715_v58  ;;  %v10718_v63 = vpop.f32.mrb[82].mxu1 }
 0x37a   :  { %v10719_v0 = vpop.f32.mrb[83].mxu1 }
 0x37b   :  { %v10720_v2 = vadd.f32 %v10719_v0, %v10718_v63 }
 0x37d   :  { %v10693_v52 = vpop.f32.mrb[80].mxu0 }
 0x37e   :  { %v10694_v53 = vpop.f32.mrb[81].mxu0 }
 0x37f   :  { %v10695_v54 = vadd.f32 %v10694_v53, %v10693_v52  ;;  %v10696_v55 = vpop.f32.mrb[82].mxu0 }
 0x380   :  { %v10697_v56 = vpop.f32.mrb[83].mxu0 }
 0x381   :  { %v8559_v57 = vadd.f32 %v10695_v54, %v8518_v49  ;;  %v10698_v59 = vadd.f32 %v10697_v56, %v10696_v55 }
 0x383   :  { %v8562_v61 = vadd.f32 %v10698_v59, %v8521_v51  ;;  %v8600_v1 = vadd.f32 %v10717_v62, %v8559_v57 }
 0x385   :  { %v8603_v3 = vadd.f32 %v10720_v2, %v8562_v61 }
 0x397   :  { %v10759_v8 = vpop.f32.mrb[84].mxu1 }
 0x398   :  { %v10760_v12 = vpop.f32.mrb[85].mxu1 }
 0x399   :  { %v10761_v13 = vadd.f32 %v10760_v12, %v10759_v8  ;;  %v10762_v14 = vpop.f32.mrb[86].mxu1 }
 0x39a   :  { %v10763_v16 = vpop.f32.mrb[87].mxu1 }
 0x39b   :  { %v10764_v18 = vadd.f32 %v10763_v16, %v10762_v14 }
 0x39d   :  { %v10737_v4 = vpop.f32.mrb[84].mxu0 }
 0x39e   :  { %v10738_v5 = vpop.f32.mrb[85].mxu0 }
 0x39f   :  { %v10739_v6 = vadd.f32 %v10738_v5, %v10737_v4  ;;  %v10740_v7 = vpop.f32.mrb[86].mxu0 }
 0x3a0   :  { %v10741_v9 = vpop.f32.mrb[87].mxu0 }
 0x3a1   :  { %v8641_v10 = vadd.f32 %v10739_v6, %v8600_v1  ;;  %v10742_v11 = vadd.f32 %v10741_v9, %v10740_v7 }
 0x3a3   :  { %v8644_v15 = vadd.f32 %v10742_v11, %v8603_v3  ;;  %v8682_v17 = vadd.f32 %v10761_v13, %v8641_v10 }
 0x3a5   :  { %v8685_v19 = vadd.f32 %v10764_v18, %v8644_v15 }
 0x3b7   :  { %v10803_v24 = vpop.f32.mrb[88].mxu1 }
 0x3b8   :  { %v10804_v28 = vpop.f32.mrb[89].mxu1 }
 0x3b9   :  { %v10805_v29 = vadd.f32 %v10804_v28, %v10803_v24  ;;  %v10806_v30 = vpop.f32.mrb[90].mxu1 }
 0x3ba   :  { %v10807_v32 = vpop.f32.mrb[91].mxu1 }
 0x3bb   :  { %v10808_v34 = vadd.f32 %v10807_v32, %v10806_v30 }
 0x3bd   :  { %v10781_v20 = vpop.f32.mrb[88].mxu0 }
 0x3be   :  { %v10782_v21 = vpop.f32.mrb[89].mxu0 }
 0x3bf   :  { %v10783_v22 = vadd.f32 %v10782_v21, %v10781_v20  ;;  %v10784_v23 = vpop.f32.mrb[90].mxu0 }
 0x3c0   :  { %v10785_v25 = vpop.f32.mrb[91].mxu0 }
 0x3c1   :  { %v8723_v26 = vadd.f32 %v10783_v22, %v8682_v17  ;;  %v10786_v27 = vadd.f32 %v10785_v25, %v10784_v23 }
 0x3c3   :  { %v8726_v31 = vadd.f32 %v10786_v27, %v8685_v19  ;;  %v8764_v33 = vadd.f32 %v10805_v29, %v8723_v26 }
 0x3c5   :  { %v8767_v35 = vadd.f32 %v10808_v34, %v8726_v31 }
 0x3d7   :  { %v10847_v42 = vpop.f32.mrb[92].mxu1 }
 0x3d8   :  { %v10848_v44 = vpop.f32.mrb[93].mxu1 }
 0x3d9   :  { %v10849_v46 = vadd.f32 %v10848_v44, %v10847_v42  ;;  %v10850_v47 = vpop.f32.mrb[94].mxu1 }
 0x3da   :  { %v10851_v48 = vpop.f32.mrb[95].mxu1 }
 0x3db   :  { %v10852_v50 = vadd.f32 %v10851_v48, %v10850_v47 }
 0x3e0   :  { %v10825_v36 = vpop.f32.mrb[92].mxu0 }
 0x3e1   :  { %v10826_v37 = vpop.f32.mrb[93].mxu0 }
 0x3e2   :  { %v10827_v38 = vadd.f32 %v10826_v37, %v10825_v36  ;;  %v10828_v39 = vpop.f32.mrb[94].mxu0 }
 0x3e3   :  { %v10829_v40 = vpop.f32.mrb[95].mxu0 }
 0x3e4   :  { %v8805_v41 = vadd.f32 %v10827_v38, %v8764_v33  ;;  %v10830_v43 = vadd.f32 %v10829_v40, %v10828_v39 }
 0x3e6   :  { %v8808_v45 = vadd.f32 %v10830_v43, %v8767_v35  ;;  %v8846_v49 = vadd.f32 %v10849_v46, %v8805_v41 }
 0x3e8   :  { %v8849_v51 = vadd.f32 %v10852_v50, %v8808_v45 }
 0x400   :  { %v10869_v52 = vpop.f32.mrb[96].mxu0 }
 0x401   :  { %v10870_v53 = vpop.f32.mrb[97].mxu0 }
 0x402   :  { %v10871_v54 = vadd.f32 %v10870_v53, %v10869_v52  ;;  %v10872_v55 = vpop.f32.mrb[98].mxu0 }
 0x403   :  { %v10873_v56 = vpop.f32.mrb[99].mxu0 }
 0x404   :  { %v8887_v57 = vadd.f32 %v10871_v54, %v8846_v49  ;;  %v10874_v58 = vadd.f32 %v10873_v56, %v10872_v55 }
 0x406   :  { %v9795_v59 = vmul.f32 -1.442695, %v8887_v57  ;;  %v8890_v60 = vadd.f32 %v10874_v58, %v8849_v51 }
 0x408   :  { %11806 = vpow2.f32 %v9795_v59  ;;  %v9796_v61 = vmul.f32 -1.442695, %v8890_v60 }
 0x40a   :  { %11808 = vpow2.f32 %v9796_v61 }
 0x412   :  { %v11807_v62 = vpop.eup %11806 }
 0x413   :  { %v8899_v63 = vadd.f32 1.0, %v11807_v62 }
 0x414   :  { %v11809_v0 = vpop.eup %11808 }
 0x415   :  { %11810 = vrcp.f32 %v8899_v63  ;;  %v8900_v1 = vadd.f32 1.0, %v11809_v0 }
 0x417   :  { %11812 = vrcp.f32 %v8900_v1 }
 0x41f   :  { %v11811_v2 = vpop.eup %11810 }
 0x420   :  { %8906 = vst.msk [vmem:[%s14588_s3] sm:$0xff] %vm8905_vm0, %v11811_v2 }
 0x421   :  { %v11813_v3 = vpop.eup %11812 }
 0x422   :  { %8907 = vst.msk [vmem:[%s14588_s3 + $0x8] sm:$0xff] %vm8905_vm0, %v11813_v3 }

</bundles_post_ra>
